<compile_context>
chip_gen: v7x
topology: tpu7x:2x2x1
jax: 0.10.0
libtpu: 0.0.40
codegen_flags: <defaults>
</compile_context>

<pallas_src>
import functools

import jax
import jax.numpy as jnp
from jax.experimental import pallas as pl
from jax.experimental.pallas import tpu as pltpu


def _mi_kernel(x_ref, y_ref, out_ref, counts_ref, *, num_bins, n_valid, chunk):
    step = pl.program_id(0)

    @pl.when(step == 0)
    def _():
        counts_ref[...] = jnp.zeros_like(counts_ref)

    nb = num_bins
    scale = jnp.float32(nb - 1)

    x = x_ref[...]                      # (1, chunk) f32
    y = y_ref[...]                      # (1, chunk) f32

    # In-kernel tail mask: global element index >= n_valid -> never matches a bin.
    col = jax.lax.broadcasted_iota(jnp.int32, (1, chunk), 1)
    valid = (step * chunk + col) < n_valid

    # (x * (nb-1)).clamp(0, nb-1).long()  -> clamp then truncate (== floor, non-neg)
    ix = jnp.clip(x * scale, 0.0, scale).astype(jnp.int32)
    iy = jnp.clip(y * scale, 0.0, scale).astype(jnp.int32)
    ix = jnp.where(valid, ix, -1)       # padded / tail elements hit no bin

    bins = jax.lax.broadcasted_iota(jnp.int32, (nb, chunk), 0)   # (nb, chunk)
    oxt = (bins == ix).astype(jnp.bfloat16)                      # one-hot^T of bin_x
    oyt = (bins == iy).astype(jnp.bfloat16)                      # one-hot^T of bin_y

    # counts[i, j] += sum_c oxt[i, c] * oyt[j, c]   (MXU, f32 accumulation, exact)
    counts_ref[...] += jax.lax.dot_general(
        oxt, oyt, (((1,), (1,)), ((), ())),
        preferred_element_type=jnp.float32)

    @pl.when(step == pl.num_programs(0) - 1)
    def _():
        counts = counts_ref[...]
        # PyTorch `hist[bx, by] += 1` is non-accumulating: touched cells == 1.
        occ = (counts > 0.0).astype(jnp.float32)
        total = jnp.sum(occ)
        hist = occ / total                               # normalized joint "histogram"
        p_x = jnp.sum(hist, axis=1, keepdims=True)       # (nb, 1)
        p_y = jnp.sum(hist, axis=0, keepdims=True)       # (1, nb)
        denom = p_x * p_y + jnp.float32(1e-10)
        ratio = jnp.where(occ > 0.0, hist / denom, 1.0)  # avoid log(0) at empty cells
        mi = jnp.sum(hist * jnp.log(ratio))
        loss = 1.0 - jnp.tanh(mi)
        out_ref[...] = loss[None, None]


def mutual_information_loss(I_complementary, I_target, num_bins=256, chunk=4096):
    """Pallas TPU implementation of MutualInformationLoss.forward."""
    x = jnp.ravel(I_complementary).astype(jnp.float32)
    y = jnp.ravel(I_target).astype(jnp.float32)
    n = int(x.shape[0])

    # Lane-aligned chunk; never larger than needed, so wrapper padding (an HBM
    # copy) is bounded by a single chunk and is skipped entirely when n divides.
    chunk = max(128, min(chunk, ((n + 127) // 128) * 128))
    n_chunks = pl.cdiv(n, chunk)
    n_pad = n_chunks * chunk
    if n_pad != n:
        x = jnp.pad(x, (0, n_pad - n))
        y = jnp.pad(y, (0, n_pad - n))

    x2 = x.reshape(1, n_pad)
    y2 = y.reshape(1, n_pad)

    chunk_spec = pl.BlockSpec((1, chunk), lambda i: (0, i))
    out = pl.pallas_call(
        functools.partial(_mi_kernel, num_bins=num_bins, n_valid=n, chunk=chunk),
        out_shape=jax.ShapeDtypeStruct((1, 1), jnp.float32),
        grid_spec=pltpu.PrefetchScalarGridSpec(
            num_scalar_prefetch=0,
            grid=(n_chunks,),
            in_specs=[chunk_spec, chunk_spec],
            out_specs=pl.BlockSpec((1, 1), lambda i: (0, 0)),
            scratch_shapes=[pltpu.VMEM((num_bins, num_bins), jnp.float32)],
        ),
        compiler_params=pltpu.CompilerParams(
            dimension_semantics=("arbitrary",),      # grid accumulates into scratch
            vmem_limit_bytes=32 * 1024 * 1024,       # safe on v5e/v6e/v7x
        ),
    )(x2, y2)
    return out[0, 0]


if __name__ == "__main__":
    key = jax.random.PRNGKey(0)
    kx, ky = jax.random.split(key)
    # Image-like inputs with intensities in [0, 1), as the binning assumes.
    x = jax.random.uniform(kx, (2, 4, 16, 16), dtype=jnp.float32)
    y = jax.random.uniform(ky, (2, 4, 16, 16), dtype=jnp.float32)

    loss = mutual_information_loss(x, y, num_bins=256)
    jax.block_until_ready(loss)
    assert loss.shape == () and bool(jnp.isfinite(loss))
    print("KERNEL_OK")
</pallas_src>

<mosaic_0001>
module attributes {stable_mosaic.version = 11 : i64} {
  func.func @_mi_kernel(%arg0: i32, %arg1: memref<1x2048xf32, #tpu.memory_space<vmem>>, %arg2: memref<1x2048xf32, #tpu.memory_space<vmem>>, %arg3: memref<1x1xf32, #tpu.memory_space<vmem>>, %arg4: memref<256x256xf32, #tpu.memory_space<vmem>>) attributes {dimension_semantics = [#tpu.dimension_semantics<arbitrary>], iteration_bounds = array<i64: 1>, scalar_prefetch = 0 : i64, scratch_operands = 1 : i64, tpu.core_type = #tpu.core_type<tc>, window_params = [{transform_indices = @transform_0, window_bounds = array<i64: 1, 2048>}, {transform_indices = @transform_1, window_bounds = array<i64: 1, 2048>}, {pipeline_mode = #tpu.pipeline_mode<synchronous>, transform_indices = @transform_2, window_bounds = array<i64: 1, 1>}]} {
    %c0_i32 = arith.constant 0 : i32
    %0 = arith.cmpi eq, %arg0, %c0_i32 : i32
    %1 = arith.extui %0 : i1 to i32
    %c0_i32_0 = arith.constant 0 : i32
    %2 = arith.cmpi ne, %1, %c0_i32_0 : i32
    scf.if %2 {
      %cst_17 = arith.constant 0.000000e+00 : f32
      %45 = vector.broadcast %cst_17 : f32 to vector<256x256xf32>
      %c0_18 = arith.constant 0 : index
      %c0_19 = arith.constant 0 : index
      %46 = vector.load %arg4[%c0_18, %c0_19] : memref<256x256xf32, #tpu.memory_space<vmem>>, vector<256x256xf32>
      tpu.vector_store %arg4[%c0_18, %c0_19], %45 {strides = array<i32>} : memref<256x256xf32, #tpu.memory_space<vmem>>, vector<256x256xf32>,
    } else {
    }
    %c0 = arith.constant 0 : index
    %c0_1 = arith.constant 0 : index
    %3 = vector.load %arg1[%c0, %c0_1] : memref<1x2048xf32, #tpu.memory_space<vmem>>, vector<1x2048xf32>
    %c0_2 = arith.constant 0 : index
    %c0_3 = arith.constant 0 : index
    %4 = vector.load %arg2[%c0_2, %c0_3] : memref<1x2048xf32, #tpu.memory_space<vmem>>, vector<1x2048xf32>
    %5 = tpu.iota {dimensions = array<i32: 1>} : vector<1x2048xi32>
    %c2048_i32 = arith.constant 2048 : i32
    %6 = arith.muli %arg0, %c2048_i32 : i32
    %7 = vector.broadcast %6 : i32 to vector<1x2048xi32>
    %8 = arith.addi %7, %5 : vector<1x2048xi32>
    %c2048_i32_4 = arith.constant 2048 : i32
    %9 = vector.broadcast %c2048_i32_4 : i32 to vector<1x2048xi32>
    %10 = arith.cmpi slt, %8, %9 : vector<1x2048xi32>
    %cst = arith.constant 2.550000e+02 : f32
    %11 = vector.broadcast %cst : f32 to vector<1x2048xf32>
    %12 = arith.mulf %3, %11 : vector<1x2048xf32>
    %cst_5 = arith.constant 0.000000e+00 : f32
    %cst_6 = arith.constant 2.550000e+02 : f32
    %13 = vector.broadcast %cst_5 : f32 to vector<1x2048xf32>
    %14 = arith.maximumf %13, %12 : vector<1x2048xf32>
    %15 = vector.broadcast %cst_6 : f32 to vector<1x2048xf32>
    %16 = arith.minimumf %15, %14 : vector<1x2048xf32>
    %17 = arith.fptosi %16 : vector<1x2048xf32> to vector<1x2048xi32>
    %cst_7 = arith.constant 2.550000e+02 : f32
    %18 = vector.broadcast %cst_7 : f32 to vector<1x2048xf32>
    %19 = arith.mulf %4, %18 : vector<1x2048xf32>
    %cst_8 = arith.constant 0.000000e+00 : f32
    %cst_9 = arith.constant 2.550000e+02 : f32
    %20 = vector.broadcast %cst_8 : f32 to vector<1x2048xf32>
    %21 = arith.maximumf %20, %19 : vector<1x2048xf32>
    %22 = vector.broadcast %cst_9 : f32 to vector<1x2048xf32>
    %23 = arith.minimumf %22, %21 : vector<1x2048xf32>
    %24 = arith.fptosi %23 : vector<1x2048xf32> to vector<1x2048xi32>
    %c-1_i32 = arith.constant -1 : i32
    %25 = vector.broadcast %c-1_i32 : i32 to vector<1x2048xi32>
    %26 = arith.select %10, %17, %25 : vector<1x2048xi1>, vector<1x2048xi32>
    %27 = tpu.iota {dimensions = array<i32: 0>} : vector<256x2048xi32>
    %28 = vector.broadcast %26 : vector<1x2048xi32> to vector<256x2048xi32>
    %29 = arith.cmpi eq, %27, %28 : vector<256x2048xi32>
    %30 = arith.extui %29 : vector<256x2048xi1> to vector<256x2048xi32>
    %31 = arith.sitofp %30 : vector<256x2048xi32> to vector<256x2048xf32>
    %32 = arith.truncf %31 : vector<256x2048xf32> to vector<256x2048xbf16>
    %33 = vector.broadcast %24 : vector<1x2048xi32> to vector<256x2048xi32>
    %34 = arith.cmpi eq, %27, %33 : vector<256x2048xi32>
    %35 = arith.extui %34 : vector<256x2048xi1> to vector<256x2048xi32>
    %36 = arith.sitofp %35 : vector<256x2048xi32> to vector<256x2048xf32>
    %37 = arith.truncf %36 : vector<256x2048xf32> to vector<256x2048xbf16>
    %c0_10 = arith.constant 0 : index
    %c0_11 = arith.constant 0 : index
    %38 = vector.load %arg4[%c0_10, %c0_11] : memref<256x256xf32, #tpu.memory_space<vmem>>, vector<256x256xf32>
    %cst_12 = arith.constant dense<0.000000e+00> : vector<256x256xf32>
    %39 = tpu.matmul %32, %37, %cst_12 {dimension_numbers = #tpu.dot_dimension_numbers<[1], [1], [0], [0], [0, 0, 1, 0], [], []>} : vector<256x2048xbf16>, vector<256x2048xbf16>, vector<256x256xf32> -> vector<256x256xf32>
    %40 = arith.addf %38, %39 : vector<256x256xf32>
    %c0_13 = arith.constant 0 : index
    %c0_14 = arith.constant 0 : index
    %41 = vector.load %arg4[%c0_13, %c0_14] : memref<256x256xf32, #tpu.memory_space<vmem>>, vector<256x256xf32>
    tpu.vector_store %arg4[%c0_13, %c0_14], %40 {strides = array<i32>} : memref<256x256xf32, #tpu.memory_space<vmem>>, vector<256x256xf32>,
    %c0_i32_15 = arith.constant 0 : i32
    %42 = arith.cmpi eq, %arg0, %c0_i32_15 : i32
    %43 = arith.extui %42 : i1 to i32
    %c0_i32_16 = arith.constant 0 : i32
    %44 = arith.cmpi ne, %43, %c0_i32_16 : i32
    scf.if %44 {
      %c0_17 = arith.constant 0 : index
      %c0_18 = arith.constant 0 : index
      %45 = vector.load %arg4[%c0_17, %c0_18] : memref<256x256xf32, #tpu.memory_space<vmem>>, vector<256x256xf32>
      %cst_19 = arith.constant 0.000000e+00 : f32
      %46 = vector.broadcast %cst_19 : f32 to vector<256x256xf32>
      %47 = arith.cmpf ogt, %45, %46 : vector<256x256xf32>
      %48 = arith.extui %47 : vector<256x256xi1> to vector<256x256xi32>
      %49 = arith.sitofp %48 : vector<256x256xi32> to vector<256x256xf32>
      %50 = vector.shape_cast %49 : vector<256x256xf32> to vector<1x256x256xf32>
      %cst_20 = arith.constant dense<0.000000e+00> : vector<1xf32>
      %51 = vector.multi_reduction <add>, %50, %cst_20 [1, 2] : vector<1x256x256xf32> to vector<1xf32>
      %52 = vector.shape_cast %51 : vector<1xf32> to vector<1x1x1xf32>
      %53 = vector.extract %52[0, 0, 0] : f32 from vector<1x1x1xf32>
      %54 = vector.broadcast %53 : f32 to vector<256x256xf32>
      %55 = arith.divf %49, %54 : vector<256x256xf32>
      %cst_21 = arith.constant dense<0.000000e+00> : vector<256xf32>
      %56 = vector.multi_reduction <add>, %55, %cst_21 [1] : vector<256x256xf32> to vector<256xf32>
      %57 = vector.shape_cast %56 : vector<256xf32> to vector<256x1xf32>
      %cst_22 = arith.constant dense<0.000000e+00> : vector<256xf32>
      %58 = vector.multi_reduction <add>, %55, %cst_22 [0] : vector<256x256xf32> to vector<256xf32>
      %59 = vector.shape_cast %58 : vector<256xf32> to vector<1x256xf32>
      %60 = vector.broadcast %57 : vector<256x1xf32> to vector<256x256xf32>
      %61 = vector.broadcast %59 : vector<1x256xf32> to vector<256x256xf32>
      %62 = arith.mulf %60, %61 : vector<256x256xf32>
      %cst_23 = arith.constant 1.000000e-10 : f32
      %63 = vector.broadcast %cst_23 : f32 to vector<256x256xf32>
      %64 = arith.addf %62, %63 : vector<256x256xf32>
      %cst_24 = arith.constant 0.000000e+00 : f32
      %65 = vector.broadcast %cst_24 : f32 to vector<256x256xf32>
      %66 = arith.cmpf ogt, %49, %65 : vector<256x256xf32>
      %67 = arith.divf %55, %64 : vector<256x256xf32>
      %cst_25 = arith.constant 1.000000e+00 : f32
      %68 = vector.broadcast %cst_25 : f32 to vector<256x256xf32>
      %69 = arith.select %66, %67, %68 : vector<256x256xi1>, vector<256x256xf32>
      %70 = math.log %69 : vector<256x256xf32>
      %71 = arith.mulf %55, %70 : vector<256x256xf32>
      %72 = vector.shape_cast %71 : vector<256x256xf32> to vector<1x256x256xf32>
      %cst_26 = arith.constant dense<0.000000e+00> : vector<1xf32>
      %73 = vector.multi_reduction <add>, %72, %cst_26 [1, 2] : vector<1x256x256xf32> to vector<1xf32>
      %74 = vector.shape_cast %73 : vector<1xf32> to vector<1x1x1xf32>
      %75 = vector.extract %74[0, 0, 0] : f32 from vector<1x1x1xf32>
      %76 = math.tanh %75 : f32
      %cst_27 = arith.constant 1.000000e+00 : f32
      %77 = arith.subf %cst_27, %76 : f32
      %78 = vector.broadcast %77 : f32 to vector<1x1xf32>
      %c0_28 = arith.constant 0 : index
      %c0_29 = arith.constant 0 : index
      %79 = vector.load %arg3[%c0_28, %c0_29] : memref<1x1xf32, #tpu.memory_space<vmem>>, vector<1x1xf32>
      tpu.vector_store %arg3[%c0_28, %c0_29], %78 {strides = array<i32>} : memref<1x1xf32, #tpu.memory_space<vmem>>, vector<1x1xf32>,
    } else {
    }
    return
  }
  func.func @transform_0(%arg0: i32) -> (i32, i32) {
    %c0_i32 = arith.constant 0 : i32
    %c0_i32_0 = arith.constant 0 : i32
    return %c0_i32, %arg0 : i32, i32
  }
  func.func @transform_1(%arg0: i32) -> (i32, i32) {
    %c0_i32 = arith.constant 0 : i32
    %c0_i32_0 = arith.constant 0 : i32
    return %c0_i32, %arg0 : i32, i32
  }
  func.func @transform_2(%arg0: i32) -> (i32, i32) {
    %c0_i32 = arith.constant 0 : i32
    %c0_i32_0 = arith.constant 0 : i32
    %c0_i32_1 = arith.constant 0 : i32
    return %c0_i32, %c0_i32_0 : i32, i32
  }
}

</mosaic_0001>

<bundles_post_ra>
// kernel: tpu_custom_call.1
= control target key start
LH: loop header
LB: loop body
LE: loop exit
PB: predicated region body
PF: predicated region fallthrough
CT: control target
= control target key end

     0   :  { %7 = vsyncpa [#allocation4], 0  ;;  %s15546_s0 = inlined_call_operand.hbm [shape: f32[1,2048], index: 0, kind: input, shape index: {}]   ;;  %s15547_s1 = inlined_call_operand.hbm [shape: f32[1,2048], index: 1, kind: input, shape index: {}]   ;;  %s15548_s2 = inlined_call_operand.hbm [shape: f32[1,1], index: 2, kind: output, shape index: {}]  }
   0x1   :  { %8 = vsyncpa [#allocation7], 0 }
   0x2   :  { %9 = vsyncpa [#allocation5], 0  ;;  %s9885_s9 = smov [#allocation3]   ;;  %s9886_s11 = smov [#allocation6]  }
   0x3   :  { %s16_s10 = sshll.u32 %s9885_s9, 4  ;;  %s26_s12 = sshll.u32 %s9886_s11, 4  ;;  %s17_s10 = int_to_ptr.vmem [resolvable:$true] %s16_s10  ;;  %s27_s12 = int_to_ptr.vmem [resolvable:$true] %s26_s12 }
   0x4   :  { %s9813_s15 = scalar_lea.hbm %s15546_s0, 256 }
   0x5   :  { %p9814_p0 = scmp.ne.s32.totalorder %s15546_s0, %s9813_s15  ;;  %p9817_p1 = scmp.lt.u32.totalorder %s9813_s15, %s15546_s0 }
   0x7   :  { %p9819_p2 = pnand %p9817_p1, %p9814_p0 }
   0x9   :  { %9822 = shalt.err (!%p9819_p2)
}
   0xa   :  { %s9823_s20 = scalar_lea.vmem %s17_s10, 256  ;;  %p9828_p4 = scmp.lt.s32.totalorder %s17_s10, %s17_s10 }
   0xb   :  { %p9824_p3 = scmp.ne.s32.totalorder %s17_s10, %s9823_s20  ;;  %p9829_p5 = scmp.lt.s32.totalorder %s9823_s20, %s9823_s20 }
   0xd   :  { %p9830_p6 = por %p9829_p5, %p9828_p4 }
   0xf   :  { %p9831_p7 = pnand %p9830_p6, %p9824_p3 }
  0x11   :  { %9834 = shalt.err (!%p9831_p7)
}
  0x12   :  { %19 = dma.hbm_to_vmem [thread:$0]  %s15546_s0, 256, %s17_s10, [#allocation4]  }
  0x13   :  { %s9835_s25 = scalar_lea.hbm %s15547_s1, 256 }
  0x14   :  { %p9836_p8 = scmp.ne.s32.totalorder %s15547_s1, %s9835_s25  ;;  %p9839_p9 = scmp.lt.u32.totalorder %s9835_s25, %s15547_s1 }
  0x16   :  { %p9841_p10 = pnand %p9839_p9, %p9836_p8 }
  0x18   :  { %9844 = shalt.err (!%p9841_p10)
}
  0x19   :  { %s9845_s30 = scalar_lea.vmem %s27_s12, 256  ;;  %p9850_p12 = scmp.lt.s32.totalorder %s27_s12, %s27_s12 }
  0x1a   :  { %p9846_p11 = scmp.ne.s32.totalorder %s27_s12, %s9845_s30  ;;  %p9851_p13 = scmp.lt.s32.totalorder %s9845_s30, %s9845_s30 }
  0x1c   :  { %p9852_p0 = por %p9851_p13, %p9850_p12 }
  0x1e   :  { %p9853_p1 = pnand %p9852_p0, %p9846_p11 }
  0x20   :  { %9856 = shalt.err (!%p9853_p1)
}
  0x21   :  { %29 = dma.hbm_to_vmem [thread:$0]  %s15547_s1, 256, %s27_s12, [#allocation7]  }
  0x22   :  { %9879 = dma.done.wait [#allocation4], 256  }
  0x23   :  { %9880 = vsyncadd [#allocation4], 4294967040 }
  0x24   :  { %9881 = dma.done.wait [#allocation7], 256  }
  0x25   :  { %9882 = vsyncadd [#allocation7], 4294967040  ;;  %v104_v0 = vld [vmem:[#allocation3] sm:$0xff]  ;;  %v105_v1 = vld [vmem:[#allocation3 + $0x8] sm:$0xff]  ;;  %v175_v3 = vlaneseq  ;;  %s9889_s5 = smov [#allocation8]  }
  0x26   :  { %v106_v2 = vld [vmem:[#allocation6] sm:$0xff]  ;;  %v107_v4 = vld [vmem:[#allocation6 + $0x8] sm:$0xff]  ;;  %v159_v5 = vmul.f32 255.0, %v104_v0  ;;  %v160_v6 = vmul.f32 255.0, %v105_v1  ;;  %s6964_s6 = sshll.u32 %s9889_s5, 4  ;;  %s6965_s6 = int_to_ptr.vmem [resolvable:$true] %s6964_s6 }
  0x27   :  { %v167_v7 = vmul.f32 255.0, %v106_v2  ;;  %v168_v8 = vmul.f32 255.0, %v107_v4  ;;  %v9929_v13 = vshrl.u32 %v175_v3, 7  ;;  %s9857_s9 = scalar_lea.vmem %s6965_s6, 16  ;;  %s9861_s10 = scalar_lea.vmem %s6965_s6, 32 }
  0x28   :  { %v161_v9 = vmax.f32 %v159_v5, 0.0  ;;  %v162_v10 = vmax.f32 %v160_v6, 0.0  ;;  %p9858_p2 = scmp.ne.s32.totalorder %s6965_s6, %s9857_s9  ;;  %p9862_p3 = scmp.lt.s32.totalorder %s6965_s6, %s6965_s6 }
  0x29   :  { %v169_v11 = vmax.f32 %v167_v7, 0.0  ;;  %v170_v12 = vmax.f32 %v168_v8, 0.0  ;;  %v9932_v21 = vsub.s32 0, %v9929_v13  ;;  %v9935_v22 = vsub.s32 1, %v9929_v13  ;;  %p9863_p4 = scmp.lt.s32.totalorder %s9861_s10, %s9857_s9 }
  0x2a   :  { %v163_v14 = vmin.f32 %v161_v9, 255.0  ;;  %v164_v15 = vmin.f32 %v162_v10, 255.0  ;;  %v9938_v23 = vsub.s32 2, %v9929_v13  ;;  %v9943_v26 = vsub.s32 3, %v9929_v13 }
  0x2b   :  { %v171_v16 = vmin.f32 %v169_v11, 255.0  ;;  %v172_v17 = vmin.f32 %v170_v12, 255.0  ;;  %v9946_v27 = vsub.s32 4, %v9929_v13  ;;  %v9949_v29 = vsub.s32 5, %v9929_v13  ;;  %p9864_p5 = por %p9863_p4, %p9862_p3 }
  0x2c   :  { %v9534_v18 = vtrunc.f32 %v163_v14  ;;  %v9536_v19 = vtrunc.f32 %v164_v15  ;;  %v9952_v30 = vsub.s32 6, %v9929_v13  ;;  %v9955_v31 = vsub.s32 7, %v9929_v13 }
  0x2d   :  { %v9538_v20 = vtrunc.f32 %v171_v16  ;;  %v9540_v28 = vtrunc.f32 %v172_v17  ;;  %v10033_v1 = vadd.s32 8, %v9929_v13  ;;  %v10048_v5 = vadd.s32 16, %v9929_v13  ;;  %p9865_p6 = pnand %p9864_p5, %p9858_p2 }
  0x2e   :  { %v9940_v24 = vcvt.f32.s32 %v9534_v18  ;;  %v9537_v25 = vcvt.f32.s32 %v9536_v19  ;;  %v10051_v6 = vadd.s32 24, %v9929_v13  ;;  %v15549_v7 = vmov 1.0|1.0  }
  0x2f   :  { %v9957_v32 = vcvt.f32.s32 %v9538_v20  ;;  %v9981_v48 = vcvt.f32.s32 %v9540_v28  ;;  %v10080_v8 = vadd.s32 32, %v9929_v13  ;;  %v10083_v9 = vadd.s32 40, %v9929_v13 }
  0x30   :  { %v178_v33 = vrot.slane %v9940_v24, %v9932_v21  ;;  %v186_v34 = vrot.slane %v9940_v24, %v9938_v23  ;;  %v190_v35 = vrot.slane %v9940_v24, %v9943_v26  ;;  %v194_v36 = vrot.slane %v9940_v24, %v9946_v27 }
  0x31   :  { %v198_v37 = vrot.slane %v9940_v24, %v9949_v29  ;;  %v202_v38 = vrot.slane %v9940_v24, %v9952_v30  ;;  %v206_v39 = vrot.slane %v9940_v24, %v9955_v31  ;;  %v210_v40 = vrot.slane %v9537_v25, %v9932_v21 }
  0x32   :  { %v214_v41 = vrot.slane %v9537_v25, %v9935_v22  ;;  %v218_v42 = vrot.slane %v9537_v25, %v9938_v23  ;;  %v222_v43 = vrot.slane %v9537_v25, %v9943_v26  ;;  %v226_v44 = vrot.slane %v9537_v25, %v9946_v27 }
  0x33   :  { %v230_v45 = vrot.slane %v9537_v25, %v9949_v29  ;;  %v234_v46 = vrot.slane %v9537_v25, %v9952_v30  ;;  %v238_v47 = vrot.slane %v9537_v25, %v9955_v31  ;;  %v9984_v49 = vrot.slane %v178_v33, %v9932_v21 }
  0x34   :  { %v9987_v50 = vrot.slane %v186_v34, %v9932_v21  ;;  %v9990_v51 = vrot.slane %v190_v35, %v9932_v21  ;;  %v9993_v52 = vrot.slane %v194_v36, %v9932_v21  ;;  %v9996_v53 = vrot.slane %v198_v37, %v9932_v21 }
  0x35   :  { %v9999_v54 = vrot.slane %v202_v38, %v9932_v21  ;;  %v10002_v55 = vrot.slane %v206_v39, %v9932_v21  ;;  %v10005_v56 = vrot.slane %v210_v40, %v9932_v21  ;;  %v10008_v57 = vrot.slane %v214_v41, %v9932_v21 }
  0x36   :  { %v10011_v58 = vrot.slane %v218_v42, %v9932_v21  ;;  %v10014_v59 = vrot.slane %v222_v43, %v9932_v21  ;;  %v10017_v60 = vrot.slane %v226_v44, %v9932_v21  ;;  %v10020_v61 = vrot.slane %v230_v45, %v9932_v21 }
  0x37   :  { %v10023_v62 = vrot.slane %v234_v46, %v9932_v21  ;;  %v10026_v63 = vrot.slane %v238_v47, %v9932_v21  ;;  %v10030_v0 = vrot.slane %v9957_v32, %v9935_v22  ;;  %v10037_v2 = vrot.slane %v9957_v32, %v9932_v21 }
  0x38   :  { %v10041_v3 = vrot.slane %v9981_v48, %v9932_v21  ;;  %v10045_v4 = vrot.slane %v9981_v48, %v9935_v22  ;;  %v10106_v10 = vadd.s32 48, %v9929_v13  ;;  %v10109_v11 = vadd.s32 56, %v9929_v13 }
  0x39   :  { %15734 = vst [vmem:[#allocation12_spill] sm:$0xff] %v10023_v62  ;;  %vm2209_vm0 = vcmp.eq.s32.totalorder %v9929_v13, %v10030_v0  ;;  %vm2225_vm1 = vcmp.eq.s32.totalorder %v10033_v1, %v10030_v0  ;;  %vm2208_vm5 = vcmp.eq.s32.totalorder %v9929_v13, %v10037_v2  ;;  %vm2224_vm6 = vcmp.eq.s32.totalorder %v10033_v1, %v10037_v2 }
  0x3a   :  { %vm2217_vm2 = vcmp.eq.s32.totalorder %v9929_v13, %v10045_v4  ;;  %vm2233_vm3 = vcmp.eq.s32.totalorder %v10033_v1, %v10045_v4  ;;  %vm7998_vm4 = vmpackc.low %vm2225_vm1, %vm2209_vm0  ;;  %vm2216_vm7 = vcmp.eq.s32.totalorder %v9929_v13, %v10041_v3  ;;  %vm2232_vm8 = vcmp.eq.s32.totalorder %v10033_v1, %v10041_v3 }
  0x3b   :  { %7999 = vmatprep.subr.msk.bf16.mxu1 %vm7998_vm4, %v15549_v7  ;;  %vm8510_vm9 = vmpackc.low %vm2233_vm3, %vm2217_vm2  ;;  %vm2241_vm10 = vcmp.eq.s32.totalorder %v10048_v5, %v10030_v0  ;;  %vm2257_vm11 = vcmp.eq.s32.totalorder %v10051_v6, %v10030_v0  ;;  %vm2249_vm13 = vcmp.eq.s32.totalorder %v10048_v5, %v10045_v4  ;;  %vm2265_vm14 = vcmp.eq.s32.totalorder %v10051_v6, %v10045_v4 }
  0x3c   :  { %8511 = vmatprep.subr.msk.bf16.mxu0 %vm8510_vm9, %v15549_v7  ;;  %vm8000_vm12 = vmpackc.low %vm2224_vm6, %vm2208_vm5  ;;  %vm2240_vm1 = vcmp.eq.s32.totalorder %v10048_v5, %v10037_v2  ;;  %vm2256_vm2 = vcmp.eq.s32.totalorder %v10051_v6, %v10037_v2  ;;  %vm2248_vm4 = vcmp.eq.s32.totalorder %v10048_v5, %v10041_v3  ;;  %vm2264_vm5 = vcmp.eq.s32.totalorder %v10051_v6, %v10041_v3 }
  0x3d   :  { %8001 = vmatpush1.bf16.xpose.msk.msra.mxu1 %vm8000_vm12, %v15549_v7  ;;  %vm8512_vm15 = vmpackc.low %vm2232_vm8, %vm2216_vm7  ;;  %vm2273_vm6 = vcmp.eq.s32.totalorder %v10080_v8, %v10030_v0  ;;  %vm2289_vm7 = vcmp.eq.s32.totalorder %v10083_v9, %v10030_v0  ;;  %vm2281_vm9 = vcmp.eq.s32.totalorder %v10080_v8, %v10045_v4  ;;  %v10132_v12 = vadd.s32 64, %v9929_v13 }
  0x3e   :  { %8513 = vmatpush1.bf16.xpose.msk.msra.mxu0 %vm8512_vm15, %v15549_v7  ;;  %vm8002_vm0 = vmpackc.low %vm2257_vm11, %vm2241_vm10  ;;  %vm2297_vm10 = vcmp.eq.s32.totalorder %v10083_v9, %v10045_v4  ;;  %vm2288_vm15 = vcmp.eq.s32.totalorder %v10083_v9, %v10037_v2  ;;  %v10135_v14 = vadd.s32 72, %v9929_v13  ;;  %v10158_v15 = vadd.s32 80, %v9929_v13 }
  0x3f   :  { %8003 = vmatprep.subr.msk.bf16.mxu1 %vm8002_vm0, %v15549_v7  ;;  %vm8514_vm3 = vmpackc.low %vm2265_vm14, %vm2249_vm13  ;;  %vm2272_vm14 = vcmp.eq.s32.totalorder %v10080_v8, %v10037_v2  ;;  %vm2280_vm0 = vcmp.eq.s32.totalorder %v10080_v8, %v10041_v3  ;;  %v10161_v16 = vadd.s32 88, %v9929_v13  ;;  %v10184_v17 = vadd.s32 96, %v9929_v13 }
  0x40   :  { %8515 = vmatprep.subr.msk.bf16.mxu0 %vm8514_vm3, %v15549_v7  ;;  %vm8004_vm8 = vmpackc.low %vm2256_vm2, %vm2240_vm1  ;;  %vm2296_vm1 = vcmp.eq.s32.totalorder %v10083_v9, %v10041_v3  ;;  %vm2305_vm2 = vcmp.eq.s32.totalorder %v10106_v10, %v10030_v0  ;;  %vm2321_vm3 = vcmp.eq.s32.totalorder %v10109_v11, %v10030_v0  ;;  %v10187_v18 = vadd.s32 104, %v9929_v13 }
  0x41   :  { %vm8516_vm11 = vmpackc.low %vm2264_vm5, %vm2248_vm4  ;;  %vm2313_vm5 = vcmp.eq.s32.totalorder %v10106_v10, %v10045_v4  ;;  %v10210_v19 = vadd.s32 112, %v9929_v13  ;;  %v10213_v20 = vadd.s32 120, %v9929_v13  ;;  %v10236_v25 = vadd.s32 128, %v9929_v13 }
  0x42   :  { %vm8006_vm12 = vmpackc.low %vm2289_vm7, %vm2273_vm6  ;;  %vm2329_vm6 = vcmp.eq.s32.totalorder %v10109_v11, %v10045_v4  ;;  %v10239_v28 = vadd.s32 136, %v9929_v13  ;;  %v182_v33 = vrot.slane %v9940_v24, %v9935_v22  ;;  %v10264_v22 = vadd.s32 144, %v9929_v13 }
  0x43   :  { %vm8518_vm13 = vmpackc.low %vm2297_vm10, %vm2281_vm9  ;;  %vm2304_vm10 = vcmp.eq.s32.totalorder %v10106_v10, %v10037_v2  ;;  %v10267_v24 = vadd.s32 152, %v9929_v13  ;;  %v10306_v35 = vadd.s32 160, %v9929_v13  ;;  %v10309_v36 = vadd.s32 168, %v9929_v13 }
  0x44   :  { %vm8008_vm4 = vmpackc.low %vm2288_vm15, %vm2272_vm14  ;;  %vm2337_vm14 = vcmp.eq.s32.totalorder %v10132_v12, %v10030_v0  ;;  %vm2353_vm15 = vcmp.eq.s32.totalorder %v10135_v14, %v10030_v0  ;;  %v10270_v34 = vrot.slane %v182_v33, %v9932_v21  ;;  %v10335_v37 = vadd.s32 176, %v9929_v13 }
  0x45   :  { %8005 = vmatpush1.bf16.xpose.msk.msra.mxu1 %vm8004_vm8, %v15549_v7  ;;  %vm8520_vm7 = vmpackc.low %vm2296_vm1, %vm2280_vm0  ;;  %vm2345_vm1 = vcmp.eq.s32.totalorder %v10132_v12, %v10045_v4  ;;  %v10338_v38 = vadd.s32 184, %v9929_v13  ;;  %v10361_v39 = vadd.s32 192, %v9929_v13  ;;  %v10364_v40 = vadd.s32 200, %v9929_v13 }
  0x46   :  { %8517 = vmatpush1.bf16.xpose.msk.msra.mxu0 %vm8516_vm11, %v15549_v7  ;;  %8007 = vmatprep.subr.msk.bf16.mxu1 %vm8006_vm12, %v15549_v7  ;;  %vm8010_vm8 = vmpackc.low %vm2321_vm3, %vm2305_vm2  ;;  %vm2320_vm11 = vcmp.eq.s32.totalorder %v10109_v11, %v10037_v2  ;;  %vm2312_vm12 = vcmp.eq.s32.totalorder %v10106_v10, %v10041_v3  ;;  %vm2361_vm2 = vcmp.eq.s32.totalorder %v10135_v14, %v10045_v4  ;;  %v10387_v41 = vadd.s32 208, %v9929_v13 }
  0x47   :  { %8519 = vmatprep.subr.msk.bf16.mxu0 %vm8518_vm13, %v15549_v7  ;;  %vm8522_vm9 = vmpackc.low %vm2329_vm6, %vm2313_vm5  ;;  %vm2328_vm13 = vcmp.eq.s32.totalorder %v10109_v11, %v10041_v3  ;;  %vm2336_vm6 = vcmp.eq.s32.totalorder %v10132_v12, %v10037_v2  ;;  %v10390_v42 = vadd.s32 216, %v9929_v13  ;;  %v10413_v43 = vadd.s32 224, %v9929_v13 }
  0x48   :  { %vm8012_vm0 = vmpackc.low %vm2320_vm11, %vm2304_vm10  ;;  %vm2369_vm10 = vcmp.eq.s32.totalorder %v10158_v15, %v10030_v0  ;;  %vm2385_vm11 = vcmp.eq.s32.totalorder %v10161_v16, %v10030_v0  ;;  %v10416_v44 = vadd.s32 232, %v9929_v13  ;;  %v10439_v45 = vadd.s32 240, %v9929_v13 }
  0x49   :  { %vm8524_vm3 = vmpackc.low %vm2328_vm13, %vm2312_vm12  ;;  %vm2377_vm13 = vcmp.eq.s32.totalorder %v10158_v15, %v10045_v4  ;;  %v10442_v46 = vadd.s32 248, %v9929_v13  ;;  %v10466_v47 = vrot.slane %v9957_v32, %v9943_v26  ;;  %v10470_v33 = vrot.slane %v9981_v48, %v9943_v26 }
  0x4a   :  { %vm8526_vm5 = vmpackc.low %vm2361_vm2, %vm2345_vm1  ;;  %vm2368_vm2 = vcmp.eq.s32.totalorder %v10158_v15, %v10037_v2  ;;  %v10490_v26 = vrot.slane %v9957_v32, %v9938_v23  ;;  %v15749_v62 = vmov 1.0|1.0   ;;  %v15761_v21 = vmov 0 }
  0x4d   :  { %8009 = vmatpush1.bf16.xpose.msk.msra.mxu1 %vm8008_vm4, %v15549_v7  ;;  %vm8014_vm4 = vmpackc.low %vm2353_vm15, %vm2337_vm14  ;;  %vm2393_vm14 = vcmp.eq.s32.totalorder %v10161_v16, %v10045_v4 }
  0x4e   :  { %8521 = vmatpush1.bf16.xpose.msk.msra.mxu0 %vm8520_vm7, %v15549_v7  ;;  %8011 = vmatprep.subr.msk.bf16.mxu1 %vm8010_vm8, %v15549_v7  ;;  %vm2352_vm7 = vcmp.eq.s32.totalorder %v10135_v14, %v10037_v2  ;;  %vm2344_vm8 = vcmp.eq.s32.totalorder %v10132_v12, %v10041_v3  ;;  %vm8530_vm1 = vmpackc.low %vm2393_vm14, %vm2377_vm13  ;;  %vm2400_vm14 = vcmp.eq.s32.totalorder %v10184_v17, %v10037_v2 }
  0x4f   :  { %8523 = vmatprep.subr.msk.bf16.mxu0 %vm8522_vm9, %v15549_v7  ;;  %vm2360_vm9 = vcmp.eq.s32.totalorder %v10135_v14, %v10041_v3  ;;  %vm8016_vm12 = vmpackc.low %vm2352_vm7, %vm2336_vm6  ;;  %vm2401_vm6 = vcmp.eq.s32.totalorder %v10184_v17, %v10030_v0  ;;  %vm2417_vm7 = vcmp.eq.s32.totalorder %v10187_v18, %v10030_v0 }
  0x50   :  { %vm8528_vm15 = vmpackc.low %vm2360_vm9, %vm2344_vm8  ;;  %vm2409_vm9 = vcmp.eq.s32.totalorder %v10184_v17, %v10045_v4 }
  0x55   :  { %8013 = vmatpush1.bf16.xpose.msk.msra.mxu1 %vm8012_vm0, %v15549_v7  ;;  %vm8018_vm0 = vmpackc.low %vm2385_vm11, %vm2369_vm10  ;;  %vm2425_vm10 = vcmp.eq.s32.totalorder %v10187_v18, %v10045_v4 }
  0x56   :  { %8525 = vmatpush1.bf16.xpose.msk.msra.mxu0 %vm8524_vm3, %v15549_v7  ;;  %8015 = vmatprep.subr.msk.bf16.mxu1 %vm8014_vm4, %v15549_v7  ;;  %vm2384_vm3 = vcmp.eq.s32.totalorder %v10161_v16, %v10037_v2  ;;  %vm2376_vm4 = vcmp.eq.s32.totalorder %v10158_v15, %v10041_v3  ;;  %vm8534_vm13 = vmpackc.low %vm2425_vm10, %vm2409_vm9  ;;  %vm2432_vm10 = vcmp.eq.s32.totalorder %v10210_v19, %v10037_v2 }
  0x57   :  { %8527 = vmatprep.subr.msk.bf16.mxu0 %vm8526_vm5, %v15549_v7  ;;  %vm2392_vm5 = vcmp.eq.s32.totalorder %v10161_v16, %v10041_v3  ;;  %vm8020_vm8 = vmpackc.low %vm2384_vm3, %vm2368_vm2  ;;  %vm2433_vm2 = vcmp.eq.s32.totalorder %v10210_v19, %v10030_v0  ;;  %vm2449_vm3 = vcmp.eq.s32.totalorder %v10213_v20, %v10030_v0 }
  0x58   :  { %vm8532_vm11 = vmpackc.low %vm2392_vm5, %vm2376_vm4  ;;  %vm2441_vm5 = vcmp.eq.s32.totalorder %v10210_v19, %v10045_v4 }
  0x5d   :  { %8017 = vmatpush1.bf16.xpose.msk.msra.mxu1 %vm8016_vm12, %v15549_v7  ;;  %vm8022_vm12 = vmpackc.low %vm2417_vm7, %vm2401_vm6  ;;  %vm2457_vm6 = vcmp.eq.s32.totalorder %v10213_v20, %v10045_v4 }
  0x5e   :  { %8529 = vmatpush1.bf16.xpose.msk.msra.mxu0 %vm8528_vm15, %v15549_v7  ;;  %8019 = vmatprep.subr.msk.bf16.mxu1 %vm8018_vm0, %v15549_v7  ;;  %vm2416_vm15 = vcmp.eq.s32.totalorder %v10187_v18, %v10037_v2  ;;  %vm2408_vm0 = vcmp.eq.s32.totalorder %v10184_v17, %v10041_v3  ;;  %vm8538_vm9 = vmpackc.low %vm2457_vm6, %vm2441_vm5  ;;  %vm2464_vm6 = vcmp.eq.s32.totalorder %v10236_v25, %v10037_v2 }
  0x5f   :  { %8531 = vmatprep.subr.msk.bf16.mxu0 %vm8530_vm1, %v15549_v7  ;;  %vm2424_vm1 = vcmp.eq.s32.totalorder %v10187_v18, %v10041_v3  ;;  %vm8024_vm4 = vmpackc.low %vm2416_vm15, %vm2400_vm14  ;;  %vm2465_vm14 = vcmp.eq.s32.totalorder %v10236_v25, %v10030_v0  ;;  %vm2481_vm15 = vcmp.eq.s32.totalorder %v10239_v28, %v10030_v0 }
  0x60   :  { %vm8536_vm7 = vmpackc.low %vm2424_vm1, %vm2408_vm0  ;;  %vm2473_vm1 = vcmp.eq.s32.totalorder %v10236_v25, %v10045_v4 }
  0x65   :  { %8021 = vmatpush1.bf16.xpose.msk.msra.mxu1 %vm8020_vm8, %v15549_v7  ;;  %vm8026_vm8 = vmpackc.low %vm2449_vm3, %vm2433_vm2  ;;  %vm2489_vm2 = vcmp.eq.s32.totalorder %v10239_v28, %v10045_v4 }
  0x66   :  { %8533 = vmatpush1.bf16.xpose.msk.msra.mxu0 %vm8532_vm11, %v15549_v7  ;;  %8023 = vmatprep.subr.msk.bf16.mxu1 %vm8022_vm12, %v15549_v7  ;;  %vm2448_vm11 = vcmp.eq.s32.totalorder %v10213_v20, %v10037_v2  ;;  %vm2440_vm12 = vcmp.eq.s32.totalorder %v10210_v19, %v10041_v3  ;;  %vm8542_vm5 = vmpackc.low %vm2489_vm2, %vm2473_vm1  ;;  %vm377_vm1 = vcmp.eq.s32.totalorder %v10033_v1, %v10008_v57 }
  0x67   :  { %8535 = vmatprep.subr.msk.bf16.mxu0 %vm8534_vm13, %v15549_v7  ;;  %vm2456_vm13 = vcmp.eq.s32.totalorder %v10213_v20, %v10041_v3  ;;  %vm8028_vm0 = vmpackc.low %vm2448_vm11, %vm2432_vm10  ;;  %vm2497_vm10 = vcmp.eq.s32.totalorder %v10264_v22, %v10030_v0  ;;  %vm2513_vm11 = vcmp.eq.s32.totalorder %v10267_v24, %v10030_v0 }
  0x68   :  { %vm8540_vm3 = vmpackc.low %vm2456_vm13, %vm2440_vm12  ;;  %vm353_vm13 = vcmp.eq.s32.totalorder %v9929_v13, %v10270_v34 }
  0x69   :  { %vm8034_vm2 = vmpackc.low %vm2513_vm11, %vm2497_vm10  ;;  %vm2504_vm10 = vcmp.eq.s32.totalorder %v10264_v22, %v10041_v3  ;;  %vm2520_vm11 = vcmp.eq.s32.totalorder %v10267_v24, %v10041_v3 }
  0x6d   :  { %8025 = vmatpush1.bf16.xpose.msk.msra.mxu1 %vm8024_vm4, %v15549_v7  ;;  %vm8030_vm4 = vmpackc.low %vm2481_vm15, %vm2465_vm14  ;;  %vm369_vm14 = vcmp.eq.s32.totalorder %v10033_v1, %v10270_v34 }
  0x6e   :  { %8537 = vmatpush1.bf16.xpose.msk.msra.mxu0 %vm8536_vm7, %v15549_v7  ;;  %8027 = vmatprep.subr.msk.bf16.mxu1 %vm8026_vm8, %v15549_v7  ;;  %vm2480_vm7 = vcmp.eq.s32.totalorder %v10239_v28, %v10037_v2  ;;  %vm2472_vm8 = vcmp.eq.s32.totalorder %v10236_v25, %v10041_v3 }
  0x6f   :  { %8539 = vmatprep.subr.msk.bf16.mxu0 %vm8538_vm9, %v15549_v7  ;;  %vm2488_vm9 = vcmp.eq.s32.totalorder %v10239_v28, %v10041_v3  ;;  %vm10288_vm12 = vmpackc.low %vm2480_vm7, %vm2464_vm6 }
  0x70   :  { %vm8544_vm15 = vmpackc.low %vm2488_vm9, %vm2472_vm8  ;;  %vm2496_vm8 = vcmp.eq.s32.totalorder %v10264_v22, %v10037_v2  ;;  %vm2512_vm9 = vcmp.eq.s32.totalorder %v10267_v24, %v10037_v2 }
  0x75   :  { %8029 = vmatpush1.bf16.xpose.msk.msra.mxu1 %vm8028_vm0, %v15549_v7  ;;  %vm361_vm0 = vcmp.eq.s32.totalorder %v9929_v13, %v10008_v57 }
  0x76   :  { %8541 = vmatpush1.bf16.xpose.msk.msra.mxu0 %vm8540_vm3, %v15549_v7  ;;  %8031 = vmatprep.subr.msk.bf16.mxu1 %vm8030_vm4, %v15549_v7  ;;  %vm2505_vm3 = vcmp.eq.s32.totalorder %v10264_v22, %v10045_v4  ;;  %vm2521_vm4 = vcmp.eq.s32.totalorder %v10267_v24, %v10045_v4  ;;  %vm8574_vm6 = vmpackc.low %vm377_vm1, %vm361_vm0  ;;  %vm2553_vm0 = vcmp.eq.s32.totalorder %v10309_v36, %v10045_v4 }
  0x77   :  { %8543 = vmatprep.subr.msk.bf16.mxu0 %vm8542_vm5, %v15549_v7  ;;  %vm8062_vm5 = vmpackc.low %vm369_vm14, %vm353_vm13  ;;  %8575 = vmatprep.mubr.msk.bf16.mxu0 %vm8574_vm6, %v15549_v7  ;;  %vm2545_vm13 = vcmp.eq.s32.totalorder %v10309_v36, %v10030_v0  ;;  %vm2536_vm6 = vcmp.eq.s32.totalorder %v10306_v35, %v10041_v3 }
  0x78   :  { %8063 = vmatprep.mubr.msk.bf16.mxu1 %vm8062_vm5, %v15549_v7  ;;  %vm8546_vm7 = vmpackc.low %vm2521_vm4, %vm2505_vm3  ;;  %vm2528_vm4 = vcmp.eq.s32.totalorder %v10306_v35, %v10037_v2  ;;  %vm2544_vm5 = vcmp.eq.s32.totalorder %v10309_v36, %v10037_v2 }
  0x79   :  { %vm8036_vm14 = vmpackc.low %vm2512_vm9, %vm2496_vm8  ;;  %vm2561_vm8 = vcmp.eq.s32.totalorder %v10335_v37, %v10030_v0  ;;  %vm2577_vm9 = vcmp.eq.s32.totalorder %v10338_v38, %v10030_v0 }
  0x7a   :  { %vm8548_vm1 = vmpackc.low %vm2520_vm11, %vm2504_vm10  ;;  %vm2569_vm11 = vcmp.eq.s32.totalorder %v10335_v37, %v10045_v4 }
  0x7b   :  { %vm8040_vm10 = vmpackc.low %vm2544_vm5, %vm2528_vm4  ;;  %vm2593_vm4 = vcmp.eq.s32.totalorder %v10361_v39, %v10030_v0  ;;  %vm2609_vm5 = vcmp.eq.s32.totalorder %v10364_v40, %v10030_v0 }
  0x7d   :  { %8033 = vmatpush1.bf16.xpose.msk.msra.mxu1 %vm10288_vm12, %v15549_v7  ;;  %vm2529_vm12 = vcmp.eq.s32.totalorder %v10306_v35, %v10030_v0 }
  0x7e   :  { %8545 = vmatpush1.bf16.xpose.msk.msra.mxu0 %vm8544_vm15, %v15549_v7  ;;  %8035 = vmatprep.subr.msk.bf16.mxu1 %vm8034_vm2, %v15549_v7  ;;  %vm2537_vm15 = vcmp.eq.s32.totalorder %v10306_v35, %v10045_v4  ;;  %vm8038_vm2 = vmpackc.low %vm2545_vm13, %vm2529_vm12  ;;  %vm2585_vm12 = vcmp.eq.s32.totalorder %v10338_v38, %v10045_v4 }
  0x7f   :  { %8547 = vmatprep.subr.msk.bf16.mxu0 %vm8546_vm7, %v15549_v7  ;;  %vm8550_vm3 = vmpackc.low %vm2553_vm0, %vm2537_vm15  ;;  %vm2552_vm7 = vcmp.eq.s32.totalorder %v10309_v36, %v10041_v3  ;;  %vm2560_vm0 = vcmp.eq.s32.totalorder %v10335_v37, %v10037_v2 }
  0x80   :  { %vm8552_vm13 = vmpackc.low %vm2552_vm7, %vm2536_vm6  ;;  %vm2601_vm7 = vcmp.eq.s32.totalorder %v10361_v39, %v10045_v4 }
  0x81   :  { %vm8554_vm15 = vmpackc.low %vm2585_vm12, %vm2569_vm11  ;;  %vm2592_vm12 = vcmp.eq.s32.totalorder %v10361_v39, %v10037_v2 }
  0x85   :  { %8037 = vmatpush1.bf16.xpose.msk.msra.mxu1 %vm8036_vm14, %v15549_v7  ;;  %vm8042_vm14 = vmpackc.low %vm2577_vm9, %vm2561_vm8  ;;  %vm2617_vm8 = vcmp.eq.s32.totalorder %v10364_v40, %v10045_v4 }
  0x86   :  { %8549 = vmatpush1.bf16.xpose.msk.msra.mxu0 %vm8548_vm1, %v15549_v7  ;;  %8039 = vmatprep.subr.msk.bf16.mxu1 %vm8038_vm2, %v15549_v7  ;;  %vm2576_vm1 = vcmp.eq.s32.totalorder %v10338_v38, %v10037_v2  ;;  %vm2568_vm2 = vcmp.eq.s32.totalorder %v10335_v37, %v10041_v3  ;;  %vm8558_vm11 = vmpackc.low %vm2617_vm8, %vm2601_vm7  ;;  %vm2624_vm8 = vcmp.eq.s32.totalorder %v10387_v41, %v10037_v2 }
  0x87   :  { %8551 = vmatprep.subr.msk.bf16.mxu0 %vm8550_vm3, %v15549_v7  ;;  %vm2584_vm3 = vcmp.eq.s32.totalorder %v10338_v38, %v10041_v3  ;;  %vm8044_vm6 = vmpackc.low %vm2576_vm1, %vm2560_vm0  ;;  %vm2625_vm0 = vcmp.eq.s32.totalorder %v10387_v41, %v10030_v0  ;;  %vm2641_vm1 = vcmp.eq.s32.totalorder %v10390_v42, %v10030_v0 }
  0x88   :  { %vm8556_vm9 = vmpackc.low %vm2584_vm3, %vm2568_vm2  ;;  %vm2633_vm3 = vcmp.eq.s32.totalorder %v10387_v41, %v10045_v4 }
  0x8d   :  { %8041 = vmatpush1.bf16.xpose.msk.msra.mxu1 %vm8040_vm10, %v15549_v7  ;;  %vm8046_vm10 = vmpackc.low %vm2609_vm5, %vm2593_vm4  ;;  %vm2649_vm4 = vcmp.eq.s32.totalorder %v10390_v42, %v10045_v4 }
  0x8e   :  { %8553 = vmatpush1.bf16.xpose.msk.msra.mxu0 %vm8552_vm13, %v15549_v7  ;;  %8043 = vmatprep.subr.msk.bf16.mxu1 %vm8042_vm14, %v15549_v7  ;;  %vm2608_vm13 = vcmp.eq.s32.totalorder %v10364_v40, %v10037_v2  ;;  %vm2600_vm14 = vcmp.eq.s32.totalorder %v10361_v39, %v10041_v3  ;;  %vm8562_vm7 = vmpackc.low %vm2649_vm4, %vm2633_vm3  ;;  %vm2656_vm4 = vcmp.eq.s32.totalorder %v10413_v43, %v10037_v2 }
  0x8f   :  { %8555 = vmatprep.subr.msk.bf16.mxu0 %vm8554_vm15, %v15549_v7  ;;  %vm2616_vm15 = vcmp.eq.s32.totalorder %v10364_v40, %v10041_v3  ;;  %vm8048_vm2 = vmpackc.low %vm2608_vm13, %vm2592_vm12  ;;  %vm2657_vm12 = vcmp.eq.s32.totalorder %v10413_v43, %v10030_v0  ;;  %vm2673_vm13 = vcmp.eq.s32.totalorder %v10416_v44, %v10030_v0 }
  0x90   :  { %vm8560_vm5 = vmpackc.low %vm2616_vm15, %vm2600_vm14  ;;  %vm2665_vm15 = vcmp.eq.s32.totalorder %v10413_v43, %v10045_v4 }
  0x95   :  { %8045 = vmatpush1.bf16.xpose.msk.msra.mxu1 %vm8044_vm6, %v15549_v7  ;;  %vm8050_vm6 = vmpackc.low %vm2641_vm1, %vm2625_vm0  ;;  %vm2681_vm0 = vcmp.eq.s32.totalorder %v10416_v44, %v10045_v4 }
  0x96   :  { %8557 = vmatpush1.bf16.xpose.msk.msra.mxu0 %vm8556_vm9, %v15549_v7  ;;  %8047 = vmatprep.subr.msk.bf16.mxu1 %vm8046_vm10, %v15549_v7  ;;  %vm2640_vm9 = vcmp.eq.s32.totalorder %v10390_v42, %v10037_v2  ;;  %vm2632_vm10 = vcmp.eq.s32.totalorder %v10387_v41, %v10041_v3  ;;  %vm8566_vm3 = vmpackc.low %vm2681_vm0, %vm2665_vm15  ;;  %vm2688_vm0 = vcmp.eq.s32.totalorder %v10439_v45, %v10037_v2 }
  0x97   :  { %8559 = vmatprep.subr.msk.bf16.mxu0 %vm8558_vm11, %v15549_v7  ;;  %vm2648_vm11 = vcmp.eq.s32.totalorder %v10390_v42, %v10041_v3  ;;  %vm8052_vm14 = vmpackc.low %vm2640_vm9, %vm2624_vm8  ;;  %vm2689_vm8 = vcmp.eq.s32.totalorder %v10439_v45, %v10030_v0  ;;  %vm2705_vm9 = vcmp.eq.s32.totalorder %v10442_v46, %v10030_v0  ;;  %v10498_v0 = vrot.slane %v9981_v48, %v9938_v23 }
  0x98   :  { %vm8564_vm1 = vmpackc.low %vm2648_vm11, %vm2632_vm10  ;;  %vm2697_vm11 = vcmp.eq.s32.totalorder %v10439_v45, %v10045_v4  ;;  %v16166_v23 = vmov 0 }
  0x9d   :  { %8049 = vmatpush1.bf16.xpose.msk.msra.mxu1 %vm8048_vm2, %v15549_v7  ;;  %vm8054_vm2 = vmpackc.low %vm2673_vm13, %vm2657_vm12  ;;  %vm2713_vm12 = vcmp.eq.s32.totalorder %v10442_v46, %v10045_v4  ;;  %v11655_v4 = vrot.slane %v9981_v48, %v9949_v29 }
  0x9e   :  { %8561 = vmatpush1.bf16.xpose.msk.msra.mxu0 %vm8560_vm5, %v15549_v7  ;;  %8051 = vmatprep.subr.msk.bf16.mxu1 %vm8050_vm6, %v15549_v7  ;;  %vm2672_vm5 = vcmp.eq.s32.totalorder %v10416_v44, %v10037_v2  ;;  %vm2664_vm6 = vcmp.eq.s32.totalorder %v10413_v43, %v10041_v3  ;;  %vm8570_vm15 = vmpackc.low %vm2713_vm12, %vm2697_vm11  ;;  %vm368_vm11 = vcmp.eq.s32.totalorder %v10033_v1, %v9984_v49 }
  0x9f   :  { %8563 = vmatprep.subr.msk.bf16.mxu0 %vm8562_vm7, %v15549_v7  ;;  %vm2680_vm7 = vcmp.eq.s32.totalorder %v10416_v44, %v10041_v3  ;;  %vm8056_vm10 = vmpackc.low %vm2672_vm5, %vm2656_vm4  ;;  %vm2211_vm4 = vcmp.eq.s32.totalorder %v9929_v13, %v10466_v47  ;;  %vm2227_vm5 = vcmp.eq.s32.totalorder %v10033_v1, %v10466_v47 }
  0xa0   :  { %vm8568_vm13 = vmpackc.low %vm2680_vm7, %vm2664_vm6  ;;  %vm2219_vm7 = vcmp.eq.s32.totalorder %v9929_v13, %v10470_v33 }
  0xa1   :  { %vm8126_vm12 = vmpackc.low %vm2227_vm5, %vm2211_vm4  ;;  %vm2234_vm4 = vcmp.eq.s32.totalorder %v10033_v1, %v10498_v0 }
  0xa5   :  { %8053 = vmatpush1.bf16.xpose.msk.msra.mxu1 %vm8052_vm14, %v15549_v7  ;;  %vm8058_vm14 = vmpackc.low %vm2705_vm9, %vm2689_vm8  ;;  %vm2235_vm8 = vcmp.eq.s32.totalorder %v10033_v1, %v10470_v33 }
  0xa6   :  { %8565 = vmatpush1.bf16.xpose.msk.msra.mxu0 %vm8564_vm1, %v15549_v7  ;;  %8055 = vmatprep.subr.msk.bf16.mxu1 %vm8054_vm2, %v15549_v7  ;;  %vm2704_vm1 = vcmp.eq.s32.totalorder %v10442_v46, %v10037_v2  ;;  %vm2696_vm2 = vcmp.eq.s32.totalorder %v10439_v45, %v10041_v3  ;;  %v15944_v2 = vmov 0 }
  0xa7   :  { %8567 = vmatprep.subr.msk.bf16.mxu0 %vm8566_vm3, %v15549_v7  ;;  %vm2712_vm3 = vcmp.eq.s32.totalorder %v10442_v46, %v10041_v3  ;;  %vm8060_vm6 = vmpackc.low %vm2704_vm1, %vm2688_vm0  ;;  %vm2210_vm0 = vcmp.eq.s32.totalorder %v9929_v13, %v10490_v26  ;;  %vm2226_vm1 = vcmp.eq.s32.totalorder %v10033_v1, %v10490_v26 }
  0xa8   :  { %vm8572_vm9 = vmpackc.low %vm2712_vm3, %vm2696_vm2  ;;  %vm2218_vm3 = vcmp.eq.s32.totalorder %v9929_v13, %v10498_v0 }
  0xad   :  { %8057 = vmatpush1.bf16.xpose.msk.msra.mxu1 %vm8056_vm10, %v15549_v7  ;;  %vm352_vm10 = vcmp.eq.s32.totalorder %v9929_v13, %v9984_v49 }
  0xae   :  { %8569 = vmatpush1.bf16.xpose.msk.msra.mxu0 %vm8568_vm13, %v15549_v7  ;;  %8059 = vmatprep.subr.msk.bf16.mxu1 %vm8058_vm14, %v15549_v7  ;;  %vm360_vm13 = vcmp.eq.s32.totalorder %v9929_v13, %v10005_v56  ;;  %vm376_vm14 = vcmp.eq.s32.totalorder %v10033_v1, %v10005_v56  ;;  %vm10514_vm2 = vmpackc.low %vm368_vm11, %vm352_vm10  ;;  %vm409_vm10 = vcmp.eq.s32.totalorder %v10051_v6, %v10008_v57 }
  0xaf   :  { %8571 = vmatprep.subr.msk.bf16.mxu0 %vm8570_vm15, %v15549_v7  ;;  %vm8638_vm15 = vmpackc.low %vm2235_vm8, %vm2219_vm7  ;;  %vm401_vm7 = vcmp.eq.s32.totalorder %v10051_v6, %v10270_v34 }
  0xb0   :  { %vm10523_vm5 = vmpackc.low %vm376_vm14, %vm360_vm13  ;;  %vm2259_vm13 = vcmp.eq.s32.totalorder %v10051_v6, %v10466_v47 }
  0xb1   :  { %vm10532_vm8 = vmpackc.low %vm2226_vm1, %vm2210_vm0  ;;  %vm2267_vm0 = vcmp.eq.s32.totalorder %v10051_v6, %v10470_v33 }
  0xb2   :  { %vm10540_vm11 = vmpackc.low %vm2234_vm4, %vm2218_vm3  ;;  %vm384_vm3 = vcmp.eq.s32.totalorder %v10048_v5, %v9984_v49  ;;  %vm400_vm4 = vcmp.eq.s32.totalorder %v10051_v6, %v9984_v49 }
  0xb5   :  { %8061 = vmatpush1.bf16.xpose.msk.msra.mxu1 %vm8060_vm6, %v15549_v7  ;;  %vm385_vm6 = vcmp.eq.s32.totalorder %v10048_v5, %v10270_v34 }
  0xb6   :  { %8573 = vmatpush1.bf16.xpose.msk.msra.mxu0 %vm8572_vm9, %v15549_v7  ;;  %8127 = vmatprep.subr.msk.bf16.mxu1 %vm8126_vm12, %v15549_v7  ;;  %vm393_vm9 = vcmp.eq.s32.totalorder %v10048_v5, %v10008_v57  ;;  %vm2243_vm12 = vcmp.eq.s32.totalorder %v10048_v5, %v10466_v47  ;;  %vm10548_vm14 = vmpackc.low %vm401_vm7, %vm385_vm6  ;;  %vm392_vm7 = vcmp.eq.s32.totalorder %v10048_v5, %v10005_v56 }
  0xb7   :  { %8639 = vmatprep.subr.msk.bf16.mxu0 %vm8638_vm15, %v15549_v7  ;;  %vm2251_vm15 = vcmp.eq.s32.totalorder %v10048_v5, %v10470_v33  ;;  %vm10556_vm1 = vmpackc.low %vm409_vm10, %vm393_vm9  ;;  %v15747_v7 = vmov 0  ;;  %vm408_vm9 = vcmp.eq.s32.totalorder %v10051_v6, %v10005_v56 }
  0xb8   :  { %v15748_v7 = vsel %vm10556_vm1, 4294967295, %v15747_v7  ;;  %vm8130_vm6 = vmpackc.low %vm2259_vm13, %vm2243_vm12  ;;  %vm2242_vm1 = vcmp.eq.s32.totalorder %v10048_v5, %v10490_v26  ;;  %vm2266_vm12 = vcmp.eq.s32.totalorder %v10051_v6, %v10498_v0 }
  0xb9   :  { %vm8642_vm10 = vmpackc.low %vm2267_vm0, %vm2251_vm15  ;;  %vm15752_vm13 = vnez %v15748_v7  ;;  %vm433_vm15 = vcmp.eq.s32.totalorder %v10083_v9, %v10270_v34  ;;  %v16218_v7 = vmov 0 }
  0xbc   :  { %8065 = vmatmul.mubr.msk.bf16.vlgmr.msra.gmra.mrb[0].mxu1 %vm10514_vm2, %v15749_v62  ;;  %vm2258_vm2 = vcmp.eq.s32.totalorder %v10051_v6, %v10490_v26 }
  0xbd   :  { %8577 = vmatmul.mubr.msk.bf16.vlgmr.msra.gmra.mrb[0].mxu0 %vm10523_vm5, %v15749_v62  ;;  %8129 = vmatpush1.bf16.xpose.msk.msra.mxu1 %vm10532_vm8, %v15749_v62  ;;  %vm10587_vm5 = vmpackc.low %vm400_vm4, %vm384_vm3  ;;  %vm2250_vm8 = vcmp.eq.s32.totalorder %v10048_v5, %v10498_v0  ;;  %vm425_vm3 = vcmp.eq.s32.totalorder %v10080_v8, %v10008_v57  ;;  %vm441_vm4 = vcmp.eq.s32.totalorder %v10083_v9, %v10008_v57 }
  0xbe   :  { %8641 = vmatpush1.bf16.xpose.msk.msra.mxu0 %vm10540_vm11, %v15749_v62  ;;  %8067 = vmatprep.mubr.msk.bf16.mxu1 %vm10548_vm14, %v15749_v62  ;;  %vm10599_vm11 = vmpackc.low %vm408_vm9, %vm392_vm7  ;;  %vm417_vm14 = vcmp.eq.s32.totalorder %v10080_v8, %v10270_v34  ;;  %vm2275_vm7 = vcmp.eq.s32.totalorder %v10080_v8, %v10466_v47  ;;  %vm2291_vm9 = vcmp.eq.s32.totalorder %v10083_v9, %v10466_v47 }
  0xbf   :  { %8579 = vmatprep.mubr.msk.bf16.mxu0 %vm15752_vm13, %v15749_v62  ;;  %8131 = vmatprep.subr.msk.bf16.mxu1 %vm8130_vm6, %v15749_v62  ;;  %vm10608_vm0 = vmpackc.low %vm2258_vm2, %vm2242_vm1  ;;  %vm2299_vm2 = vcmp.eq.s32.totalorder %v10083_v9, %v10470_v33  ;;  %vm432_vm13 = vcmp.eq.s32.totalorder %v10083_v9, %v9984_v49 }
  0xc0   :  { %8643 = vmatprep.subr.msk.bf16.mxu0 %vm8642_vm10, %v15749_v62  ;;  %vm10616_vm6 = vmpackc.low %vm2266_vm12, %vm2250_vm8  ;;  %vm2283_vm10 = vcmp.eq.s32.totalorder %v10080_v8, %v10470_v33  ;;  %vm416_vm12 = vcmp.eq.s32.totalorder %v10080_v8, %v9984_v49 }
  0xc1   :  { %vm10624_vm1 = vmpackc.low %vm433_vm15, %vm417_vm14  ;;  %vm424_vm15 = vcmp.eq.s32.totalorder %v10080_v8, %v10005_v56 }
  0xc2   :  { %vm10632_vm8 = vmpackc.low %vm441_vm4, %vm425_vm3  ;;  %vm440_vm3 = vcmp.eq.s32.totalorder %v10083_v9, %v10005_v56 }
  0xc3   :  { %v15762_v21 = vsel %vm10632_vm8, 4294967295, %v15761_v21  ;;  %vm8134_vm14 = vmpackc.low %vm2291_vm9, %vm2275_vm7  ;;  %vm2274_vm8 = vcmp.eq.s32.totalorder %v10080_v8, %v10490_v26  ;;  %vm2298_vm7 = vcmp.eq.s32.totalorder %v10083_v9, %v10498_v0 }
  0xc4   :  { %8069 = vmatmul.mubr.msk.bf16.gmra.mrb[4].mxu1 %vm10587_vm5, %v15749_v62  ;;  %vm8646_vm4 = vmpackc.low %vm2299_vm2, %vm2283_vm10  ;;  %vm2290_vm5 = vcmp.eq.s32.totalorder %v10083_v9, %v10490_v26  ;;  %vm15765_vm9 = vnez %v15762_v21  ;;  %vm465_vm10 = vcmp.eq.s32.totalorder %v10109_v11, %v10270_v34  ;;  %v15774_v21 = vmov 0 }
  0xc5   :  { %8581 = vmatmul.mubr.msk.bf16.gmra.mrb[4].mxu0 %vm10599_vm11, %v15749_v62  ;;  %8133 = vmatpush1.bf16.xpose.msk.msra.mxu1 %vm10608_vm0, %v15749_v62  ;;  %vm10663_vm11 = vmpackc.low %vm432_vm13, %vm416_vm12  ;;  %vm2282_vm0 = vcmp.eq.s32.totalorder %v10080_v8, %v10498_v0  ;;  %vm457_vm12 = vcmp.eq.s32.totalorder %v10106_v10, %v10008_v57  ;;  %vm473_vm13 = vcmp.eq.s32.totalorder %v10109_v11, %v10008_v57 }
  0xc6   :  { %8645 = vmatpush1.bf16.xpose.msk.msra.mxu0 %vm10616_vm6, %v15749_v62  ;;  %8071 = vmatprep.mubr.msk.bf16.mxu1 %vm10624_vm1, %v15749_v62  ;;  %vm10675_vm6 = vmpackc.low %vm440_vm3, %vm424_vm15  ;;  %vm449_vm1 = vcmp.eq.s32.totalorder %v10106_v10, %v10270_v34  ;;  %vm2307_vm15 = vcmp.eq.s32.totalorder %v10106_v10, %v10466_v47  ;;  %vm2323_vm3 = vcmp.eq.s32.totalorder %v10109_v11, %v10466_v47 }
  0xc7   :  { %8583 = vmatprep.mubr.msk.bf16.mxu0 %vm15765_vm9, %v15749_v62  ;;  %8135 = vmatprep.subr.msk.bf16.mxu1 %vm8134_vm14, %v15749_v62  ;;  %vm10684_vm2 = vmpackc.low %vm2290_vm5, %vm2274_vm8  ;;  %vm2331_vm5 = vcmp.eq.s32.totalorder %v10109_v11, %v10470_v33  ;;  %vm464_vm9 = vcmp.eq.s32.totalorder %v10109_v11, %v9984_v49 }
  0xc8   :  { %8647 = vmatprep.subr.msk.bf16.mxu0 %vm8646_vm4, %v15749_v62  ;;  %vm10692_vm14 = vmpackc.low %vm2298_vm7, %vm2282_vm0  ;;  %vm2315_vm4 = vcmp.eq.s32.totalorder %v10106_v10, %v10470_v33  ;;  %vm448_vm7 = vcmp.eq.s32.totalorder %v10106_v10, %v9984_v49 }
  0xc9   :  { %vm10700_vm8 = vmpackc.low %vm465_vm10, %vm449_vm1  ;;  %vm456_vm10 = vcmp.eq.s32.totalorder %v10106_v10, %v10005_v56 }
  0xca   :  { %vm10708_vm0 = vmpackc.low %vm473_vm13, %vm457_vm12  ;;  %vm472_vm12 = vcmp.eq.s32.totalorder %v10109_v11, %v10005_v56 }
  0xcb   :  { %v15775_v21 = vsel %vm10708_vm0, 4294967295, %v15774_v21  ;;  %vm8138_vm1 = vmpackc.low %vm2323_vm3, %vm2307_vm15  ;;  %vm2306_vm0 = vcmp.eq.s32.totalorder %v10106_v10, %v10490_v26  ;;  %vm2330_vm15 = vcmp.eq.s32.totalorder %v10109_v11, %v10498_v0 }
  0xcc   :  { %8073 = vmatmul.mubr.msk.bf16.gmra.mrb[8].mxu1 %vm10663_vm11, %v15749_v62  ;;  %vm8650_vm13 = vmpackc.low %vm2331_vm5, %vm2315_vm4  ;;  %vm2322_vm11 = vcmp.eq.s32.totalorder %v10109_v11, %v10490_v26  ;;  %vm15778_vm3 = vnez %v15775_v21  ;;  %vm497_vm4 = vcmp.eq.s32.totalorder %v10135_v14, %v10270_v34  ;;  %v15787_v21 = vmov 0 }
  0xcd   :  { %8585 = vmatmul.mubr.msk.bf16.gmra.mrb[8].mxu0 %vm10675_vm6, %v15749_v62  ;;  %8137 = vmatpush1.bf16.xpose.msk.msra.mxu1 %vm10684_vm2, %v15749_v62  ;;  %vm10739_vm6 = vmpackc.low %vm464_vm9, %vm448_vm7  ;;  %vm2314_vm2 = vcmp.eq.s32.totalorder %v10106_v10, %v10498_v0  ;;  %vm489_vm7 = vcmp.eq.s32.totalorder %v10132_v12, %v10008_v57  ;;  %vm505_vm9 = vcmp.eq.s32.totalorder %v10135_v14, %v10008_v57 }
  0xce   :  { %8649 = vmatpush1.bf16.xpose.msk.msra.mxu0 %vm10692_vm14, %v15749_v62  ;;  %8075 = vmatprep.mubr.msk.bf16.mxu1 %vm10700_vm8, %v15749_v62  ;;  %vm10751_vm14 = vmpackc.low %vm472_vm12, %vm456_vm10  ;;  %vm481_vm8 = vcmp.eq.s32.totalorder %v10132_v12, %v10270_v34  ;;  %vm2339_vm10 = vcmp.eq.s32.totalorder %v10132_v12, %v10466_v47  ;;  %vm2355_vm12 = vcmp.eq.s32.totalorder %v10135_v14, %v10466_v47 }
  0xcf   :  { %8587 = vmatprep.mubr.msk.bf16.mxu0 %vm15778_vm3, %v15749_v62  ;;  %8139 = vmatprep.subr.msk.bf16.mxu1 %vm8138_vm1, %v15749_v62  ;;  %vm10760_vm5 = vmpackc.low %vm2322_vm11, %vm2306_vm0  ;;  %vm2363_vm11 = vcmp.eq.s32.totalorder %v10135_v14, %v10470_v33  ;;  %vm496_vm3 = vcmp.eq.s32.totalorder %v10135_v14, %v9984_v49 }
  0xd0   :  { %8651 = vmatprep.subr.msk.bf16.mxu0 %vm8650_vm13, %v15749_v62  ;;  %vm10768_vm1 = vmpackc.low %vm2330_vm15, %vm2314_vm2  ;;  %vm2347_vm13 = vcmp.eq.s32.totalorder %v10132_v12, %v10470_v33  ;;  %vm480_vm15 = vcmp.eq.s32.totalorder %v10132_v12, %v9984_v49 }
  0xd1   :  { %vm10776_vm0 = vmpackc.low %vm497_vm4, %vm481_vm8  ;;  %vm488_vm4 = vcmp.eq.s32.totalorder %v10132_v12, %v10005_v56 }
  0xd2   :  { %vm10784_vm2 = vmpackc.low %vm505_vm9, %vm489_vm7  ;;  %vm504_vm7 = vcmp.eq.s32.totalorder %v10135_v14, %v10005_v56 }
  0xd3   :  { %v15788_v21 = vsel %vm10784_vm2, 4294967295, %v15787_v21  ;;  %vm8142_vm8 = vmpackc.low %vm2355_vm12, %vm2339_vm10  ;;  %vm2338_vm2 = vcmp.eq.s32.totalorder %v10132_v12, %v10490_v26  ;;  %vm2362_vm10 = vcmp.eq.s32.totalorder %v10135_v14, %v10498_v0 }
  0xd4   :  { %8077 = vmatmul.mubr.msk.bf16.gmra.mrb[12].mxu1 %vm10739_vm6, %v15749_v62  ;;  %vm8654_vm9 = vmpackc.low %vm2363_vm11, %vm2347_vm13  ;;  %vm2354_vm6 = vcmp.eq.s32.totalorder %v10135_v14, %v10490_v26  ;;  %vm15791_vm12 = vnez %v15788_v21  ;;  %vm529_vm13 = vcmp.eq.s32.totalorder %v10161_v16, %v10270_v34  ;;  %v15800_v21 = vmov 0 }
  0xd5   :  { %8589 = vmatmul.mubr.msk.bf16.gmra.mrb[12].mxu0 %vm10751_vm14, %v15749_v62  ;;  %8141 = vmatpush1.bf16.xpose.msk.msra.mxu1 %vm10760_vm5, %v15749_v62  ;;  %vm10815_vm14 = vmpackc.low %vm496_vm3, %vm480_vm15  ;;  %vm2346_vm5 = vcmp.eq.s32.totalorder %v10132_v12, %v10498_v0  ;;  %vm521_vm15 = vcmp.eq.s32.totalorder %v10158_v15, %v10008_v57  ;;  %vm537_vm3 = vcmp.eq.s32.totalorder %v10161_v16, %v10008_v57 }
  0xd6   :  { %8653 = vmatpush1.bf16.xpose.msk.msra.mxu0 %vm10768_vm1, %v15749_v62  ;;  %8079 = vmatprep.mubr.msk.bf16.mxu1 %vm10776_vm0, %v15749_v62  ;;  %vm10827_vm1 = vmpackc.low %vm504_vm7, %vm488_vm4  ;;  %vm513_vm0 = vcmp.eq.s32.totalorder %v10158_v15, %v10270_v34  ;;  %vm2371_vm4 = vcmp.eq.s32.totalorder %v10158_v15, %v10466_v47  ;;  %vm2387_vm7 = vcmp.eq.s32.totalorder %v10161_v16, %v10466_v47 }
  0xd7   :  { %8591 = vmatprep.mubr.msk.bf16.mxu0 %vm15791_vm12, %v15749_v62  ;;  %8143 = vmatprep.subr.msk.bf16.mxu1 %vm8142_vm8, %v15749_v62  ;;  %vm10836_vm11 = vmpackc.low %vm2354_vm6, %vm2338_vm2  ;;  %vm2395_vm6 = vcmp.eq.s32.totalorder %v10161_v16, %v10470_v33  ;;  %vm528_vm12 = vcmp.eq.s32.totalorder %v10161_v16, %v9984_v49 }
  0xd8   :  { %8655 = vmatprep.subr.msk.bf16.mxu0 %vm8654_vm9, %v15749_v62  ;;  %vm10844_vm8 = vmpackc.low %vm2362_vm10, %vm2346_vm5  ;;  %vm2379_vm9 = vcmp.eq.s32.totalorder %v10158_v15, %v10470_v33  ;;  %vm512_vm10 = vcmp.eq.s32.totalorder %v10158_v15, %v9984_v49 }
  0xd9   :  { %vm10852_vm2 = vmpackc.low %vm529_vm13, %vm513_vm0  ;;  %vm520_vm13 = vcmp.eq.s32.totalorder %v10158_v15, %v10005_v56 }
  0xda   :  { %vm10860_vm5 = vmpackc.low %vm537_vm3, %vm521_vm15  ;;  %vm536_vm15 = vcmp.eq.s32.totalorder %v10161_v16, %v10005_v56 }
  0xdb   :  { %v15801_v21 = vsel %vm10860_vm5, 4294967295, %v15800_v21  ;;  %vm8146_vm0 = vmpackc.low %vm2387_vm7, %vm2371_vm4  ;;  %vm2370_vm5 = vcmp.eq.s32.totalorder %v10158_v15, %v10490_v26  ;;  %vm2394_vm4 = vcmp.eq.s32.totalorder %v10161_v16, %v10498_v0 }
  0xdc   :  { %8081 = vmatmul.mubr.msk.bf16.gmra.mrb[16].mxu1 %vm10815_vm14, %v15749_v62  ;;  %vm8658_vm3 = vmpackc.low %vm2395_vm6, %vm2379_vm9  ;;  %vm2386_vm14 = vcmp.eq.s32.totalorder %v10161_v16, %v10490_v26  ;;  %vm15804_vm7 = vnez %v15801_v21  ;;  %vm561_vm9 = vcmp.eq.s32.totalorder %v10187_v18, %v10270_v34  ;;  %v15813_v21 = vmov 0 }
  0xdd   :  { %8593 = vmatmul.mubr.msk.bf16.gmra.mrb[16].mxu0 %vm10827_vm1, %v15749_v62  ;;  %8145 = vmatpush1.bf16.xpose.msk.msra.mxu1 %vm10836_vm11, %v15749_v62  ;;  %vm10891_vm1 = vmpackc.low %vm528_vm12, %vm512_vm10  ;;  %vm2378_vm11 = vcmp.eq.s32.totalorder %v10158_v15, %v10498_v0  ;;  %vm553_vm10 = vcmp.eq.s32.totalorder %v10184_v17, %v10008_v57  ;;  %vm569_vm12 = vcmp.eq.s32.totalorder %v10187_v18, %v10008_v57 }
  0xde   :  { %8657 = vmatpush1.bf16.xpose.msk.msra.mxu0 %vm10844_vm8, %v15749_v62  ;;  %8083 = vmatprep.mubr.msk.bf16.mxu1 %vm10852_vm2, %v15749_v62  ;;  %vm10903_vm8 = vmpackc.low %vm536_vm15, %vm520_vm13  ;;  %vm545_vm2 = vcmp.eq.s32.totalorder %v10184_v17, %v10270_v34  ;;  %vm2403_vm13 = vcmp.eq.s32.totalorder %v10184_v17, %v10466_v47  ;;  %vm2419_vm15 = vcmp.eq.s32.totalorder %v10187_v18, %v10466_v47 }
  0xdf   :  { %8595 = vmatprep.mubr.msk.bf16.mxu0 %vm15804_vm7, %v15749_v62  ;;  %8147 = vmatprep.subr.msk.bf16.mxu1 %vm8146_vm0, %v15749_v62  ;;  %vm10912_vm6 = vmpackc.low %vm2386_vm14, %vm2370_vm5  ;;  %vm2427_vm14 = vcmp.eq.s32.totalorder %v10187_v18, %v10470_v33  ;;  %vm560_vm7 = vcmp.eq.s32.totalorder %v10187_v18, %v9984_v49 }
  0xe0   :  { %8659 = vmatprep.subr.msk.bf16.mxu0 %vm8658_vm3, %v15749_v62  ;;  %vm10920_vm0 = vmpackc.low %vm2394_vm4, %vm2378_vm11  ;;  %vm2411_vm3 = vcmp.eq.s32.totalorder %v10184_v17, %v10470_v33  ;;  %vm544_vm4 = vcmp.eq.s32.totalorder %v10184_v17, %v9984_v49 }
  0xe1   :  { %vm10928_vm5 = vmpackc.low %vm561_vm9, %vm545_vm2  ;;  %vm552_vm9 = vcmp.eq.s32.totalorder %v10184_v17, %v10005_v56 }
  0xe2   :  { %vm10936_vm11 = vmpackc.low %vm569_vm12, %vm553_vm10  ;;  %vm568_vm10 = vcmp.eq.s32.totalorder %v10187_v18, %v10005_v56 }
  0xe3   :  { %v15814_v21 = vsel %vm10936_vm11, 4294967295, %v15813_v21  ;;  %vm8150_vm2 = vmpackc.low %vm2419_vm15, %vm2403_vm13  ;;  %vm2402_vm11 = vcmp.eq.s32.totalorder %v10184_v17, %v10490_v26  ;;  %vm2426_vm13 = vcmp.eq.s32.totalorder %v10187_v18, %v10498_v0 }
  0xe4   :  { %8085 = vmatmul.mubr.msk.bf16.gmra.mrb[20].mxu1 %vm10891_vm1, %v15749_v62  ;;  %vm8662_vm12 = vmpackc.low %vm2427_vm14, %vm2411_vm3  ;;  %vm2418_vm1 = vcmp.eq.s32.totalorder %v10187_v18, %v10490_v26  ;;  %vm15817_vm15 = vnez %v15814_v21  ;;  %vm593_vm3 = vcmp.eq.s32.totalorder %v10213_v20, %v10270_v34  ;;  %v15826_v21 = vmov 0 }
  0xe5   :  { %8597 = vmatmul.mubr.msk.bf16.gmra.mrb[20].mxu0 %vm10903_vm8, %v15749_v62  ;;  %8149 = vmatpush1.bf16.xpose.msk.msra.mxu1 %vm10912_vm6, %v15749_v62  ;;  %vm10967_vm8 = vmpackc.low %vm560_vm7, %vm544_vm4  ;;  %vm2410_vm6 = vcmp.eq.s32.totalorder %v10184_v17, %v10498_v0  ;;  %vm585_vm4 = vcmp.eq.s32.totalorder %v10210_v19, %v10008_v57  ;;  %vm601_vm7 = vcmp.eq.s32.totalorder %v10213_v20, %v10008_v57 }
  0xe6   :  { %8661 = vmatpush1.bf16.xpose.msk.msra.mxu0 %vm10920_vm0, %v15749_v62  ;;  %8087 = vmatprep.mubr.msk.bf16.mxu1 %vm10928_vm5, %v15749_v62  ;;  %vm10979_vm0 = vmpackc.low %vm568_vm10, %vm552_vm9  ;;  %vm577_vm5 = vcmp.eq.s32.totalorder %v10210_v19, %v10270_v34  ;;  %vm2435_vm9 = vcmp.eq.s32.totalorder %v10210_v19, %v10466_v47  ;;  %vm2451_vm10 = vcmp.eq.s32.totalorder %v10213_v20, %v10466_v47 }
  0xe7   :  { %8599 = vmatprep.mubr.msk.bf16.mxu0 %vm15817_vm15, %v15749_v62  ;;  %8151 = vmatprep.subr.msk.bf16.mxu1 %vm8150_vm2, %v15749_v62  ;;  %vm10988_vm14 = vmpackc.low %vm2418_vm1, %vm2402_vm11  ;;  %vm2459_vm1 = vcmp.eq.s32.totalorder %v10213_v20, %v10470_v33  ;;  %vm592_vm15 = vcmp.eq.s32.totalorder %v10213_v20, %v9984_v49 }
  0xe8   :  { %8663 = vmatprep.subr.msk.bf16.mxu0 %vm8662_vm12, %v15749_v62  ;;  %vm10996_vm2 = vmpackc.low %vm2426_vm13, %vm2410_vm6  ;;  %vm2443_vm12 = vcmp.eq.s32.totalorder %v10210_v19, %v10470_v33  ;;  %vm576_vm13 = vcmp.eq.s32.totalorder %v10210_v19, %v9984_v49 }
  0xe9   :  { %vm11004_vm11 = vmpackc.low %vm593_vm3, %vm577_vm5  ;;  %vm584_vm3 = vcmp.eq.s32.totalorder %v10210_v19, %v10005_v56 }
  0xea   :  { %vm11012_vm6 = vmpackc.low %vm601_vm7, %vm585_vm4  ;;  %vm600_vm4 = vcmp.eq.s32.totalorder %v10213_v20, %v10005_v56 }
  0xeb   :  { %v15827_v21 = vsel %vm11012_vm6, 4294967295, %v15826_v21  ;;  %vm8154_vm5 = vmpackc.low %vm2451_vm10, %vm2435_vm9  ;;  %vm2434_vm6 = vcmp.eq.s32.totalorder %v10210_v19, %v10490_v26  ;;  %vm2458_vm9 = vcmp.eq.s32.totalorder %v10213_v20, %v10498_v0 }
  0xec   :  { %8089 = vmatmul.mubr.msk.bf16.gmra.mrb[24].mxu1 %vm10967_vm8, %v15749_v62  ;;  %vm8666_vm7 = vmpackc.low %vm2459_vm1, %vm2443_vm12  ;;  %vm2450_vm8 = vcmp.eq.s32.totalorder %v10213_v20, %v10490_v26  ;;  %vm15830_vm10 = vnez %v15827_v21  ;;  %vm625_vm12 = vcmp.eq.s32.totalorder %v10239_v28, %v10270_v34  ;;  %v15839_v21 = vmov 0 }
  0xed   :  { %8601 = vmatmul.mubr.msk.bf16.gmra.mrb[24].mxu0 %vm10979_vm0, %v15749_v62  ;;  %8153 = vmatpush1.bf16.xpose.msk.msra.mxu1 %vm10988_vm14, %v15749_v62  ;;  %vm11043_vm0 = vmpackc.low %vm592_vm15, %vm576_vm13  ;;  %vm2442_vm14 = vcmp.eq.s32.totalorder %v10210_v19, %v10498_v0  ;;  %vm617_vm13 = vcmp.eq.s32.totalorder %v10236_v25, %v10008_v57  ;;  %vm633_vm15 = vcmp.eq.s32.totalorder %v10239_v28, %v10008_v57 }
  0xee   :  { %8665 = vmatpush1.bf16.xpose.msk.msra.mxu0 %vm10996_vm2, %v15749_v62  ;;  %8091 = vmatprep.mubr.msk.bf16.mxu1 %vm11004_vm11, %v15749_v62  ;;  %vm11055_vm2 = vmpackc.low %vm600_vm4, %vm584_vm3  ;;  %vm609_vm11 = vcmp.eq.s32.totalorder %v10236_v25, %v10270_v34  ;;  %vm2467_vm3 = vcmp.eq.s32.totalorder %v10236_v25, %v10466_v47  ;;  %vm2483_vm4 = vcmp.eq.s32.totalorder %v10239_v28, %v10466_v47 }
  0xef   :  { %8603 = vmatprep.mubr.msk.bf16.mxu0 %vm15830_vm10, %v15749_v62  ;;  %8155 = vmatprep.subr.msk.bf16.mxu1 %vm8154_vm5, %v15749_v62  ;;  %vm11064_vm1 = vmpackc.low %vm2450_vm8, %vm2434_vm6  ;;  %vm2491_vm8 = vcmp.eq.s32.totalorder %v10239_v28, %v10470_v33  ;;  %vm624_vm10 = vcmp.eq.s32.totalorder %v10239_v28, %v9984_v49 }
  0xf0   :  { %8667 = vmatprep.subr.msk.bf16.mxu0 %vm8666_vm7, %v15749_v62  ;;  %vm11072_vm5 = vmpackc.low %vm2458_vm9, %vm2442_vm14  ;;  %vm2475_vm7 = vcmp.eq.s32.totalorder %v10236_v25, %v10470_v33  ;;  %vm608_vm9 = vcmp.eq.s32.totalorder %v10236_v25, %v9984_v49 }
  0xf1   :  { %vm11080_vm6 = vmpackc.low %vm625_vm12, %vm609_vm11  ;;  %vm616_vm12 = vcmp.eq.s32.totalorder %v10236_v25, %v10005_v56 }
  0xf2   :  { %vm11088_vm14 = vmpackc.low %vm633_vm15, %vm617_vm13  ;;  %vm632_vm13 = vcmp.eq.s32.totalorder %v10239_v28, %v10005_v56 }
  0xf3   :  { %v15840_v21 = vsel %vm11088_vm14, 4294967295, %v15839_v21  ;;  %vm8158_vm11 = vmpackc.low %vm2483_vm4, %vm2467_vm3  ;;  %vm2466_vm14 = vcmp.eq.s32.totalorder %v10236_v25, %v10490_v26  ;;  %vm2490_vm3 = vcmp.eq.s32.totalorder %v10239_v28, %v10498_v0 }
  0xf4   :  { %8093 = vmatmul.mubr.msk.bf16.gmra.mrb[28].mxu1 %vm11043_vm0, %v15749_v62  ;;  %vm8670_vm15 = vmpackc.low %vm2491_vm8, %vm2475_vm7  ;;  %vm2482_vm0 = vcmp.eq.s32.totalorder %v10239_v28, %v10490_v26  ;;  %vm15843_vm4 = vnez %v15840_v21  ;;  %vm657_vm7 = vcmp.eq.s32.totalorder %v10267_v24, %v10270_v34  ;;  %v15852_v21 = vmov 0 }
  0xf5   :  { %8605 = vmatmul.mubr.msk.bf16.gmra.mrb[28].mxu0 %vm11055_vm2, %v15749_v62  ;;  %8157 = vmatpush1.bf16.xpose.msk.msra.mxu1 %vm11064_vm1, %v15749_v62  ;;  %vm11119_vm2 = vmpackc.low %vm624_vm10, %vm608_vm9  ;;  %vm2474_vm1 = vcmp.eq.s32.totalorder %v10236_v25, %v10498_v0  ;;  %vm649_vm9 = vcmp.eq.s32.totalorder %v10264_v22, %v10008_v57  ;;  %vm665_vm10 = vcmp.eq.s32.totalorder %v10267_v24, %v10008_v57 }
  0xf6   :  { %8669 = vmatpush1.bf16.xpose.msk.msra.mxu0 %vm11072_vm5, %v15749_v62  ;;  %8095 = vmatprep.mubr.msk.bf16.mxu1 %vm11080_vm6, %v15749_v62  ;;  %vm11131_vm5 = vmpackc.low %vm632_vm13, %vm616_vm12  ;;  %vm641_vm6 = vcmp.eq.s32.totalorder %v10264_v22, %v10270_v34  ;;  %vm2499_vm12 = vcmp.eq.s32.totalorder %v10264_v22, %v10466_v47  ;;  %vm2515_vm13 = vcmp.eq.s32.totalorder %v10267_v24, %v10466_v47 }
  0xf7   :  { %8607 = vmatprep.mubr.msk.bf16.mxu0 %vm15843_vm4, %v15749_v62  ;;  %8159 = vmatprep.subr.msk.bf16.mxu1 %vm8158_vm11, %v15749_v62  ;;  %vm11140_vm8 = vmpackc.low %vm2482_vm0, %vm2466_vm14  ;;  %vm2523_vm0 = vcmp.eq.s32.totalorder %v10267_v24, %v10470_v33  ;;  %vm656_vm4 = vcmp.eq.s32.totalorder %v10267_v24, %v9984_v49 }
  0xf8   :  { %8671 = vmatprep.subr.msk.bf16.mxu0 %vm8670_vm15, %v15749_v62  ;;  %vm11148_vm11 = vmpackc.low %vm2490_vm3, %vm2474_vm1  ;;  %vm2507_vm15 = vcmp.eq.s32.totalorder %v10264_v22, %v10470_v33  ;;  %vm640_vm3 = vcmp.eq.s32.totalorder %v10264_v22, %v9984_v49 }
  0xf9   :  { %vm11156_vm14 = vmpackc.low %vm657_vm7, %vm641_vm6  ;;  %vm648_vm7 = vcmp.eq.s32.totalorder %v10264_v22, %v10005_v56 }
  0xfa   :  { %vm11164_vm1 = vmpackc.low %vm665_vm10, %vm649_vm9  ;;  %vm664_vm9 = vcmp.eq.s32.totalorder %v10267_v24, %v10005_v56 }
  0xfb   :  { %v15853_v21 = vsel %vm11164_vm1, 4294967295, %v15852_v21  ;;  %vm8162_vm6 = vmpackc.low %vm2515_vm13, %vm2499_vm12  ;;  %vm2498_vm1 = vcmp.eq.s32.totalorder %v10264_v22, %v10490_v26  ;;  %vm2522_vm12 = vcmp.eq.s32.totalorder %v10267_v24, %v10498_v0 }
  0xfc   :  { %8097 = vmatmul.mubr.msk.bf16.gmra.mrb[32].mxu1 %vm11119_vm2, %v15749_v62  ;;  %vm8674_vm10 = vmpackc.low %vm2523_vm0, %vm2507_vm15  ;;  %vm2514_vm2 = vcmp.eq.s32.totalorder %v10267_v24, %v10490_v26  ;;  %vm15856_vm13 = vnez %v15853_v21  ;;  %vm689_vm15 = vcmp.eq.s32.totalorder %v10309_v36, %v10270_v34  ;;  %v15865_v21 = vmov 0 }
  0xfd   :  { %8609 = vmatmul.mubr.msk.bf16.gmra.mrb[32].mxu0 %vm11131_vm5, %v15749_v62  ;;  %8161 = vmatpush1.bf16.xpose.msk.msra.mxu1 %vm11140_vm8, %v15749_v62  ;;  %vm11195_vm5 = vmpackc.low %vm656_vm4, %vm640_vm3  ;;  %vm2506_vm8 = vcmp.eq.s32.totalorder %v10264_v22, %v10498_v0  ;;  %vm681_vm3 = vcmp.eq.s32.totalorder %v10306_v35, %v10008_v57  ;;  %vm697_vm4 = vcmp.eq.s32.totalorder %v10309_v36, %v10008_v57 }
  0xfe   :  { %8673 = vmatpush1.bf16.xpose.msk.msra.mxu0 %vm11148_vm11, %v15749_v62  ;;  %8099 = vmatprep.mubr.msk.bf16.mxu1 %vm11156_vm14, %v15749_v62  ;;  %vm11207_vm11 = vmpackc.low %vm664_vm9, %vm648_vm7  ;;  %vm673_vm14 = vcmp.eq.s32.totalorder %v10306_v35, %v10270_v34  ;;  %vm2531_vm7 = vcmp.eq.s32.totalorder %v10306_v35, %v10466_v47  ;;  %vm2547_vm9 = vcmp.eq.s32.totalorder %v10309_v36, %v10466_v47 }
  0xff   :  { %8611 = vmatprep.mubr.msk.bf16.mxu0 %vm15856_vm13, %v15749_v62  ;;  %8163 = vmatprep.subr.msk.bf16.mxu1 %vm8162_vm6, %v15749_v62  ;;  %vm11216_vm0 = vmpackc.low %vm2514_vm2, %vm2498_vm1  ;;  %vm2555_vm2 = vcmp.eq.s32.totalorder %v10309_v36, %v10470_v33  ;;  %vm688_vm13 = vcmp.eq.s32.totalorder %v10309_v36, %v9984_v49 }
 0x100   :  { %8675 = vmatprep.subr.msk.bf16.mxu0 %vm8674_vm10, %v15749_v62  ;;  %vm11224_vm6 = vmpackc.low %vm2522_vm12, %vm2506_vm8  ;;  %vm2539_vm10 = vcmp.eq.s32.totalorder %v10306_v35, %v10470_v33  ;;  %vm672_vm12 = vcmp.eq.s32.totalorder %v10306_v35, %v9984_v49 }
 0x101   :  { %vm11232_vm1 = vmpackc.low %vm689_vm15, %vm673_vm14  ;;  %vm680_vm15 = vcmp.eq.s32.totalorder %v10306_v35, %v10005_v56 }
 0x102   :  { %vm11240_vm8 = vmpackc.low %vm697_vm4, %vm681_vm3  ;;  %vm696_vm3 = vcmp.eq.s32.totalorder %v10309_v36, %v10005_v56 }
 0x103   :  { %v15866_v21 = vsel %vm11240_vm8, 4294967295, %v15865_v21  ;;  %vm8166_vm14 = vmpackc.low %vm2547_vm9, %vm2531_vm7  ;;  %vm2530_vm8 = vcmp.eq.s32.totalorder %v10306_v35, %v10490_v26  ;;  %vm2554_vm7 = vcmp.eq.s32.totalorder %v10309_v36, %v10498_v0 }
 0x104   :  { %8101 = vmatmul.mubr.msk.bf16.gmra.mrb[36].mxu1 %vm11195_vm5, %v15749_v62  ;;  %vm8678_vm4 = vmpackc.low %vm2555_vm2, %vm2539_vm10  ;;  %vm2546_vm5 = vcmp.eq.s32.totalorder %v10309_v36, %v10490_v26  ;;  %vm15869_vm9 = vnez %v15866_v21  ;;  %vm721_vm10 = vcmp.eq.s32.totalorder %v10338_v38, %v10270_v34  ;;  %v15878_v21 = vmov 0 }
 0x105   :  { %8613 = vmatmul.mubr.msk.bf16.gmra.mrb[36].mxu0 %vm11207_vm11, %v15749_v62  ;;  %8165 = vmatpush1.bf16.xpose.msk.msra.mxu1 %vm11216_vm0, %v15749_v62  ;;  %vm11271_vm11 = vmpackc.low %vm688_vm13, %vm672_vm12  ;;  %vm2538_vm0 = vcmp.eq.s32.totalorder %v10306_v35, %v10498_v0  ;;  %vm713_vm12 = vcmp.eq.s32.totalorder %v10335_v37, %v10008_v57  ;;  %vm729_vm13 = vcmp.eq.s32.totalorder %v10338_v38, %v10008_v57 }
 0x106   :  { %8677 = vmatpush1.bf16.xpose.msk.msra.mxu0 %vm11224_vm6, %v15749_v62  ;;  %8103 = vmatprep.mubr.msk.bf16.mxu1 %vm11232_vm1, %v15749_v62  ;;  %vm11283_vm6 = vmpackc.low %vm696_vm3, %vm680_vm15  ;;  %vm705_vm1 = vcmp.eq.s32.totalorder %v10335_v37, %v10270_v34  ;;  %vm2563_vm15 = vcmp.eq.s32.totalorder %v10335_v37, %v10466_v47  ;;  %vm2579_vm3 = vcmp.eq.s32.totalorder %v10338_v38, %v10466_v47 }
 0x107   :  { %8615 = vmatprep.mubr.msk.bf16.mxu0 %vm15869_vm9, %v15749_v62  ;;  %8167 = vmatprep.subr.msk.bf16.mxu1 %vm8166_vm14, %v15749_v62  ;;  %vm11292_vm2 = vmpackc.low %vm2546_vm5, %vm2530_vm8  ;;  %vm2587_vm5 = vcmp.eq.s32.totalorder %v10338_v38, %v10470_v33  ;;  %vm720_vm9 = vcmp.eq.s32.totalorder %v10338_v38, %v9984_v49 }
 0x108   :  { %8679 = vmatprep.subr.msk.bf16.mxu0 %vm8678_vm4, %v15749_v62  ;;  %vm11300_vm14 = vmpackc.low %vm2554_vm7, %vm2538_vm0  ;;  %vm2571_vm4 = vcmp.eq.s32.totalorder %v10335_v37, %v10470_v33  ;;  %vm704_vm7 = vcmp.eq.s32.totalorder %v10335_v37, %v9984_v49 }
 0x109   :  { %vm11308_vm8 = vmpackc.low %vm721_vm10, %vm705_vm1  ;;  %vm712_vm10 = vcmp.eq.s32.totalorder %v10335_v37, %v10005_v56 }
 0x10a   :  { %vm11316_vm0 = vmpackc.low %vm729_vm13, %vm713_vm12  ;;  %vm728_vm12 = vcmp.eq.s32.totalorder %v10338_v38, %v10005_v56 }
 0x10b   :  { %v15879_v21 = vsel %vm11316_vm0, 4294967295, %v15878_v21  ;;  %vm8170_vm1 = vmpackc.low %vm2579_vm3, %vm2563_vm15  ;;  %vm2562_vm0 = vcmp.eq.s32.totalorder %v10335_v37, %v10490_v26  ;;  %vm2586_vm15 = vcmp.eq.s32.totalorder %v10338_v38, %v10498_v0 }
 0x10c   :  { %8105 = vmatmul.mubr.msk.bf16.gmra.mrb[40].mxu1 %vm11271_vm11, %v15749_v62  ;;  %vm8682_vm13 = vmpackc.low %vm2587_vm5, %vm2571_vm4  ;;  %vm2578_vm11 = vcmp.eq.s32.totalorder %v10338_v38, %v10490_v26  ;;  %vm15882_vm3 = vnez %v15879_v21  ;;  %vm753_vm4 = vcmp.eq.s32.totalorder %v10364_v40, %v10270_v34  ;;  %v15891_v21 = vmov 0 }
 0x10d   :  { %8617 = vmatmul.mubr.msk.bf16.gmra.mrb[40].mxu0 %vm11283_vm6, %v15749_v62  ;;  %8169 = vmatpush1.bf16.xpose.msk.msra.mxu1 %vm11292_vm2, %v15749_v62  ;;  %vm11347_vm6 = vmpackc.low %vm720_vm9, %vm704_vm7  ;;  %vm2570_vm2 = vcmp.eq.s32.totalorder %v10335_v37, %v10498_v0  ;;  %vm745_vm7 = vcmp.eq.s32.totalorder %v10361_v39, %v10008_v57  ;;  %vm761_vm9 = vcmp.eq.s32.totalorder %v10364_v40, %v10008_v57 }
 0x10e   :  { %8681 = vmatpush1.bf16.xpose.msk.msra.mxu0 %vm11300_vm14, %v15749_v62  ;;  %8107 = vmatprep.mubr.msk.bf16.mxu1 %vm11308_vm8, %v15749_v62  ;;  %vm11359_vm14 = vmpackc.low %vm728_vm12, %vm712_vm10  ;;  %vm737_vm8 = vcmp.eq.s32.totalorder %v10361_v39, %v10270_v34  ;;  %vm2595_vm10 = vcmp.eq.s32.totalorder %v10361_v39, %v10466_v47  ;;  %vm2611_vm12 = vcmp.eq.s32.totalorder %v10364_v40, %v10466_v47 }
 0x10f   :  { %8619 = vmatprep.mubr.msk.bf16.mxu0 %vm15882_vm3, %v15749_v62  ;;  %8171 = vmatprep.subr.msk.bf16.mxu1 %vm8170_vm1, %v15749_v62  ;;  %vm11368_vm5 = vmpackc.low %vm2578_vm11, %vm2562_vm0  ;;  %vm2619_vm11 = vcmp.eq.s32.totalorder %v10364_v40, %v10470_v33  ;;  %vm752_vm3 = vcmp.eq.s32.totalorder %v10364_v40, %v9984_v49 }
 0x110   :  { %8683 = vmatprep.subr.msk.bf16.mxu0 %vm8682_vm13, %v15749_v62  ;;  %vm11376_vm1 = vmpackc.low %vm2586_vm15, %vm2570_vm2  ;;  %vm2603_vm13 = vcmp.eq.s32.totalorder %v10361_v39, %v10470_v33  ;;  %vm736_vm15 = vcmp.eq.s32.totalorder %v10361_v39, %v9984_v49 }
 0x111   :  { %vm11384_vm0 = vmpackc.low %vm753_vm4, %vm737_vm8  ;;  %vm744_vm4 = vcmp.eq.s32.totalorder %v10361_v39, %v10005_v56 }
 0x112   :  { %vm11392_vm2 = vmpackc.low %vm761_vm9, %vm745_vm7  ;;  %vm760_vm7 = vcmp.eq.s32.totalorder %v10364_v40, %v10005_v56 }
 0x113   :  { %v15892_v21 = vsel %vm11392_vm2, 4294967295, %v15891_v21  ;;  %vm8174_vm8 = vmpackc.low %vm2611_vm12, %vm2595_vm10  ;;  %vm2594_vm2 = vcmp.eq.s32.totalorder %v10361_v39, %v10490_v26  ;;  %vm2618_vm10 = vcmp.eq.s32.totalorder %v10364_v40, %v10498_v0 }
 0x114   :  { %8109 = vmatmul.mubr.msk.bf16.gmra.mrb[44].mxu1 %vm11347_vm6, %v15749_v62  ;;  %vm8686_vm9 = vmpackc.low %vm2619_vm11, %vm2603_vm13  ;;  %vm2610_vm6 = vcmp.eq.s32.totalorder %v10364_v40, %v10490_v26  ;;  %vm15895_vm12 = vnez %v15892_v21  ;;  %vm785_vm13 = vcmp.eq.s32.totalorder %v10390_v42, %v10270_v34  ;;  %v15904_v21 = vmov 0 }
 0x115   :  { %8621 = vmatmul.mubr.msk.bf16.gmra.mrb[44].mxu0 %vm11359_vm14, %v15749_v62  ;;  %8173 = vmatpush1.bf16.xpose.msk.msra.mxu1 %vm11368_vm5, %v15749_v62  ;;  %vm11423_vm14 = vmpackc.low %vm752_vm3, %vm736_vm15  ;;  %vm2602_vm5 = vcmp.eq.s32.totalorder %v10361_v39, %v10498_v0  ;;  %vm777_vm15 = vcmp.eq.s32.totalorder %v10387_v41, %v10008_v57  ;;  %vm793_vm3 = vcmp.eq.s32.totalorder %v10390_v42, %v10008_v57 }
 0x116   :  { %8685 = vmatpush1.bf16.xpose.msk.msra.mxu0 %vm11376_vm1, %v15749_v62  ;;  %8111 = vmatprep.mubr.msk.bf16.mxu1 %vm11384_vm0, %v15749_v62  ;;  %vm11435_vm1 = vmpackc.low %vm760_vm7, %vm744_vm4  ;;  %vm769_vm0 = vcmp.eq.s32.totalorder %v10387_v41, %v10270_v34  ;;  %vm2627_vm4 = vcmp.eq.s32.totalorder %v10387_v41, %v10466_v47  ;;  %vm2643_vm7 = vcmp.eq.s32.totalorder %v10390_v42, %v10466_v47 }
 0x117   :  { %8623 = vmatprep.mubr.msk.bf16.mxu0 %vm15895_vm12, %v15749_v62  ;;  %8175 = vmatprep.subr.msk.bf16.mxu1 %vm8174_vm8, %v15749_v62  ;;  %vm11444_vm11 = vmpackc.low %vm2610_vm6, %vm2594_vm2  ;;  %vm2651_vm6 = vcmp.eq.s32.totalorder %v10390_v42, %v10470_v33  ;;  %vm784_vm12 = vcmp.eq.s32.totalorder %v10390_v42, %v9984_v49 }
 0x118   :  { %8687 = vmatprep.subr.msk.bf16.mxu0 %vm8686_vm9, %v15749_v62  ;;  %vm11452_vm8 = vmpackc.low %vm2618_vm10, %vm2602_vm5  ;;  %vm2635_vm9 = vcmp.eq.s32.totalorder %v10387_v41, %v10470_v33  ;;  %vm768_vm10 = vcmp.eq.s32.totalorder %v10387_v41, %v9984_v49 }
 0x119   :  { %vm11460_vm2 = vmpackc.low %vm785_vm13, %vm769_vm0  ;;  %vm776_vm13 = vcmp.eq.s32.totalorder %v10387_v41, %v10005_v56 }
 0x11a   :  { %vm11468_vm5 = vmpackc.low %vm793_vm3, %vm777_vm15  ;;  %vm792_vm15 = vcmp.eq.s32.totalorder %v10390_v42, %v10005_v56 }
 0x11b   :  { %v15905_v21 = vsel %vm11468_vm5, 4294967295, %v15904_v21  ;;  %vm8178_vm0 = vmpackc.low %vm2643_vm7, %vm2627_vm4  ;;  %vm2626_vm5 = vcmp.eq.s32.totalorder %v10387_v41, %v10490_v26  ;;  %vm2650_vm4 = vcmp.eq.s32.totalorder %v10390_v42, %v10498_v0 }
 0x11c   :  { %8113 = vmatmul.mubr.msk.bf16.gmra.mrb[48].mxu1 %vm11423_vm14, %v15749_v62  ;;  %vm8690_vm3 = vmpackc.low %vm2651_vm6, %vm2635_vm9  ;;  %vm2642_vm14 = vcmp.eq.s32.totalorder %v10390_v42, %v10490_v26  ;;  %vm15908_vm7 = vnez %v15905_v21  ;;  %vm817_vm9 = vcmp.eq.s32.totalorder %v10416_v44, %v10270_v34  ;;  %v15917_v21 = vmov 0 }
 0x11d   :  { %8625 = vmatmul.mubr.msk.bf16.gmra.mrb[48].mxu0 %vm11435_vm1, %v15749_v62  ;;  %8177 = vmatpush1.bf16.xpose.msk.msra.mxu1 %vm11444_vm11, %v15749_v62  ;;  %vm11499_vm1 = vmpackc.low %vm784_vm12, %vm768_vm10  ;;  %vm2634_vm11 = vcmp.eq.s32.totalorder %v10387_v41, %v10498_v0  ;;  %vm809_vm10 = vcmp.eq.s32.totalorder %v10413_v43, %v10008_v57  ;;  %vm825_vm12 = vcmp.eq.s32.totalorder %v10416_v44, %v10008_v57 }
 0x11e   :  { %8689 = vmatpush1.bf16.xpose.msk.msra.mxu0 %vm11452_vm8, %v15749_v62  ;;  %8115 = vmatprep.mubr.msk.bf16.mxu1 %vm11460_vm2, %v15749_v62  ;;  %vm11511_vm8 = vmpackc.low %vm792_vm15, %vm776_vm13  ;;  %vm801_vm2 = vcmp.eq.s32.totalorder %v10413_v43, %v10270_v34  ;;  %vm2659_vm13 = vcmp.eq.s32.totalorder %v10413_v43, %v10466_v47  ;;  %vm2675_vm15 = vcmp.eq.s32.totalorder %v10416_v44, %v10466_v47 }
 0x11f   :  { %8627 = vmatprep.mubr.msk.bf16.mxu0 %vm15908_vm7, %v15749_v62  ;;  %8179 = vmatprep.subr.msk.bf16.mxu1 %vm8178_vm0, %v15749_v62  ;;  %vm11520_vm6 = vmpackc.low %vm2642_vm14, %vm2626_vm5  ;;  %vm2683_vm14 = vcmp.eq.s32.totalorder %v10416_v44, %v10470_v33  ;;  %vm816_vm7 = vcmp.eq.s32.totalorder %v10416_v44, %v9984_v49 }
 0x120   :  { %8691 = vmatprep.subr.msk.bf16.mxu0 %vm8690_vm3, %v15749_v62  ;;  %vm11528_vm0 = vmpackc.low %vm2650_vm4, %vm2634_vm11  ;;  %vm2667_vm3 = vcmp.eq.s32.totalorder %v10413_v43, %v10470_v33  ;;  %vm800_vm4 = vcmp.eq.s32.totalorder %v10413_v43, %v9984_v49 }
 0x121   :  { %vm11536_vm5 = vmpackc.low %vm817_vm9, %vm801_vm2  ;;  %vm808_vm9 = vcmp.eq.s32.totalorder %v10413_v43, %v10005_v56 }
 0x122   :  { %vm11544_vm11 = vmpackc.low %vm825_vm12, %vm809_vm10  ;;  %vm824_vm10 = vcmp.eq.s32.totalorder %v10416_v44, %v10005_v56 }
 0x123   :  { %v15918_v21 = vsel %vm11544_vm11, 4294967295, %v15917_v21  ;;  %vm8182_vm2 = vmpackc.low %vm2675_vm15, %vm2659_vm13  ;;  %vm2658_vm11 = vcmp.eq.s32.totalorder %v10413_v43, %v10490_v26  ;;  %vm2682_vm13 = vcmp.eq.s32.totalorder %v10416_v44, %v10498_v0 }
 0x124   :  { %8117 = vmatmul.mubr.msk.bf16.gmra.mrb[52].mxu1 %vm11499_vm1, %v15749_v62  ;;  %vm8694_vm12 = vmpackc.low %vm2683_vm14, %vm2667_vm3  ;;  %vm2674_vm1 = vcmp.eq.s32.totalorder %v10416_v44, %v10490_v26  ;;  %vm15921_vm15 = vnez %v15918_v21  ;;  %vm849_vm3 = vcmp.eq.s32.totalorder %v10442_v46, %v10270_v34 }
 0x125   :  { %8629 = vmatmul.mubr.msk.bf16.gmra.mrb[52].mxu0 %vm11511_vm8, %v15749_v62  ;;  %8181 = vmatpush1.bf16.xpose.msk.msra.mxu1 %vm11520_vm6, %v15749_v62  ;;  %vm11575_vm8 = vmpackc.low %vm816_vm7, %vm800_vm4  ;;  %vm2666_vm6 = vcmp.eq.s32.totalorder %v10413_v43, %v10498_v0  ;;  %vm841_vm4 = vcmp.eq.s32.totalorder %v10439_v45, %v10008_v57  ;;  %vm857_vm7 = vcmp.eq.s32.totalorder %v10442_v46, %v10008_v57 }
 0x126   :  { %8693 = vmatpush1.bf16.xpose.msk.msra.mxu0 %vm11528_vm0, %v15749_v62  ;;  %8119 = vmatprep.mubr.msk.bf16.mxu1 %vm11536_vm5, %v15749_v62  ;;  %vm11587_vm0 = vmpackc.low %vm824_vm10, %vm808_vm9  ;;  %vm833_vm5 = vcmp.eq.s32.totalorder %v10439_v45, %v10270_v34  ;;  %vm2691_vm9 = vcmp.eq.s32.totalorder %v10439_v45, %v10466_v47  ;;  %vm2707_vm10 = vcmp.eq.s32.totalorder %v10442_v46, %v10466_v47  ;;  %v15957_v47 = vmov 0 }
 0x127   :  { %8631 = vmatprep.mubr.msk.bf16.mxu0 %vm15921_vm15, %v15749_v62  ;;  %8183 = vmatprep.subr.msk.bf16.mxu1 %vm8182_vm2, %v15749_v62  ;;  %vm11596_vm14 = vmpackc.low %vm2674_vm1, %vm2658_vm11  ;;  %vm2715_vm1 = vcmp.eq.s32.totalorder %v10442_v46, %v10470_v33  ;;  %vm848_vm15 = vcmp.eq.s32.totalorder %v10442_v46, %v9984_v49  ;;  %v12902_v57 = vrot.slane %v9981_v48, %v9955_v31 }
 0x128   :  { %8695 = vmatprep.subr.msk.bf16.mxu0 %vm8694_vm12, %v15749_v62  ;;  %vm11604_vm2 = vmpackc.low %vm2682_vm13, %vm2666_vm6  ;;  %vm2699_vm12 = vcmp.eq.s32.totalorder %v10439_v45, %v10470_v33  ;;  %vm832_vm13 = vcmp.eq.s32.totalorder %v10439_v45, %v9984_v49  ;;  %v11641_v33 = vrot.slane %v9957_v32, %v9949_v29  ;;  %v16205_v49 = vmov 0 }
 0x129   :  { %vm11612_vm11 = vmpackc.low %vm849_vm3, %vm833_vm5  ;;  %vm840_vm3 = vcmp.eq.s32.totalorder %v10439_v45, %v10005_v56 }
 0x12a   :  { %vm11620_vm6 = vmpackc.low %vm857_vm7, %vm841_vm4  ;;  %vm856_vm4 = vcmp.eq.s32.totalorder %v10442_v46, %v10005_v56  ;;  %vm2690_vm7 = vcmp.eq.s32.totalorder %v10439_v45, %v10490_v26  ;;  %v11705_v56 = vrot.slane %v9957_v32, %v9946_v27 }
 0x12b   :  { %vm11631_vm5 = vmpackc.low %vm2707_vm10, %vm2691_vm9  ;;  %vm2706_vm9 = vcmp.eq.s32.totalorder %v10442_v46, %v10490_v26  ;;  %vm2714_vm10 = vcmp.eq.s32.totalorder %v10442_v46, %v10498_v0 }
 0x12c   :  { %8121 = vmatmul.mubr.msk.bf16.gmra.mrb[56].mxu1 %vm11575_vm8, %v15749_v62  ;;  %vm8698_vm8 = vmpackc.low %vm2715_vm1, %vm2699_vm12  ;;  %vm371_vm12 = vcmp.eq.s32.totalorder %v10033_v1, %v9990_v51 }
 0x12d   :  { %8633 = vmatmul.mubr.msk.bf16.gmra.mrb[56].mxu0 %vm11587_vm0, %v15749_v62  ;;  %8185 = vmatpush1.bf16.xpose.msk.msra.mxu1 %vm11596_vm14, %v15749_v62  ;;  %vm11666_vm0 = vmpackc.low %vm848_vm15, %vm832_vm13  ;;  %vm2698_vm14 = vcmp.eq.s32.totalorder %v10439_v45, %v10498_v0  ;;  %vm379_vm13 = vcmp.eq.s32.totalorder %v10033_v1, %v10014_v59  ;;  %v11717_v0 = vrot.slane %v9981_v48, %v9946_v27  ;;  %v16257_v27 = vmov 0 }
 0x12e   :  { %8697 = vmatpush1.bf16.xpose.msk.msra.mxu0 %vm11604_vm2, %v15749_v62  ;;  %8123 = vmatprep.mubr.msk.bf16.mxu1 %vm11612_vm11, %v15749_v62  ;;  %vm11686_vm2 = vmpackc.low %vm856_vm4, %vm840_vm3  ;;  %vm355_vm11 = vcmp.eq.s32.totalorder %v9929_v13, %v9990_v51  ;;  %vm2229_vm3 = vcmp.eq.s32.totalorder %v10033_v1, %v11641_v33 }
 0x12f   :  { %8635 = vmatprep.mubr.msk.bf16.mxu0 %vm11620_vm6, %v15749_v62  ;;  %8187 = vmatprep.subr.msk.bf16.mxu1 %vm11631_vm5, %v15749_v62  ;;  %vm11695_vm1 = vmpackc.low %vm2706_vm9, %vm2690_vm7  ;;  %vm363_vm6 = vcmp.eq.s32.totalorder %v9929_v13, %v10014_v59  ;;  %vm2213_vm5 = vcmp.eq.s32.totalorder %v9929_v13, %v11641_v33  ;;  %vm2237_vm7 = vcmp.eq.s32.totalorder %v10033_v1, %v11655_v4 }
 0x130   :  { %8699 = vmatprep.subr.msk.bf16.mxu0 %vm8698_vm8, %v15749_v62  ;;  %vm11707_vm15 = vmpackc.low %vm2714_vm10, %vm2698_vm14  ;;  %vm2221_vm8 = vcmp.eq.s32.totalorder %v9929_v13, %v11655_v4  ;;  %vm354_vm14 = vcmp.eq.s32.totalorder %v9929_v13, %v9987_v50  ;;  %vm370_vm10 = vcmp.eq.s32.totalorder %v10033_v1, %v9987_v50 }
 0x131   :  { %vm11719_vm4 = vmpackc.low %vm371_vm12, %vm355_vm11  ;;  %vm362_vm12 = vcmp.eq.s32.totalorder %v9929_v13, %v10011_v58 }
 0x132   :  { %vm11727_vm9 = vmpackc.low %vm379_vm13, %vm363_vm6  ;;  %vm378_vm6 = vcmp.eq.s32.totalorder %v10033_v1, %v10011_v58 }
 0x133   :  { %v15945_v2 = vsel %vm11727_vm9, 4294967295, %v15944_v2  ;;  %vm8254_vm11 = vmpackc.low %vm2229_vm3, %vm2213_vm5  ;;  %vm2212_vm9 = vcmp.eq.s32.totalorder %v9929_v13, %v11705_v56  ;;  %vm2236_vm5 = vcmp.eq.s32.totalorder %v10033_v1, %v11717_v0 }
 0x134   :  { %8125 = vmatmul.mubr.msk.bf16.gmra.mrb[60].mxu1 %vm11666_vm0, %v15749_v62  ;;  %vm8766_vm13 = vmpackc.low %vm2237_vm7, %vm2221_vm8  ;;  %vm2228_vm0 = vcmp.eq.s32.totalorder %v10033_v1, %v11705_v56  ;;  %vm15948_vm3 = vnez %v15945_v2  ;;  %vm403_vm8 = vcmp.eq.s32.totalorder %v10051_v6, %v9990_v51  ;;  %v15970_v2 = vmov 0 }
 0x135   :  { %8637 = vmatmul.mubr.msk.bf16.gmra.mrb[60].mxu0 %vm11686_vm2, %v15749_v62  ;;  %8189 = vmatpush1.bf16.xpose.msk.msra.mxu1 %vm11695_vm1, %v15749_v62  ;;  %vm11758_vm2 = vmpackc.low %vm370_vm10, %vm354_vm14  ;;  %vm2220_vm1 = vcmp.eq.s32.totalorder %v9929_v13, %v11717_v0  ;;  %vm395_vm14 = vcmp.eq.s32.totalorder %v10048_v5, %v10014_v59  ;;  %vm411_vm10 = vcmp.eq.s32.totalorder %v10051_v6, %v10014_v59 }
 0x136   :  { %8701 = vmatpush1.bf16.xpose.msk.msra.mxu0 %vm11707_vm15, %v15749_v62  ;;  %8191 = vmatprep.mubr.msk.bf16.mxu1 %vm11719_vm4, %v15749_v62  ;;  %vm11770_vm15 = vmpackc.low %vm378_vm6, %vm362_vm12  ;;  %vm387_vm4 = vcmp.eq.s32.totalorder %v10048_v5, %v9990_v51  ;;  %vm2245_vm12 = vcmp.eq.s32.totalorder %v10048_v5, %v11641_v33  ;;  %vm2261_vm6 = vcmp.eq.s32.totalorder %v10051_v6, %v11641_v33 }
 0x137   :  { %8703 = vmatprep.mubr.msk.bf16.mxu0 %vm15948_vm3, %v15749_v62  ;;  %8255 = vmatprep.subr.msk.bf16.mxu1 %vm8254_vm11, %v15749_v62  ;;  %vm11779_vm7 = vmpackc.low %vm2228_vm0, %vm2212_vm9  ;;  %vm2269_vm0 = vcmp.eq.s32.totalorder %v10051_v6, %v11655_v4  ;;  %vm402_vm3 = vcmp.eq.s32.totalorder %v10051_v6, %v9987_v50 }
 0x138   :  { %8767 = vmatprep.subr.msk.bf16.mxu0 %vm8766_vm13, %v15749_v62  ;;  %vm11787_vm11 = vmpackc.low %vm2236_vm5, %vm2220_vm1  ;;  %vm2253_vm13 = vcmp.eq.s32.totalorder %v10048_v5, %v11655_v4  ;;  %vm386_vm5 = vcmp.eq.s32.totalorder %v10048_v5, %v9987_v50 }
 0x139   :  { %vm11795_vm9 = vmpackc.low %vm403_vm8, %vm387_vm4  ;;  %vm394_vm8 = vcmp.eq.s32.totalorder %v10048_v5, %v10011_v58 }
 0x13a   :  { %vm11803_vm1 = vmpackc.low %vm411_vm10, %vm395_vm14  ;;  %vm410_vm14 = vcmp.eq.s32.totalorder %v10051_v6, %v10011_v58 }
 0x13b   :  { %v15958_v47 = vsel %vm11803_vm1, 4294967295, %v15957_v47  ;;  %vm8258_vm4 = vmpackc.low %vm2261_vm6, %vm2245_vm12  ;;  %vm2244_vm1 = vcmp.eq.s32.totalorder %v10048_v5, %v11705_v56  ;;  %vm2268_vm12 = vcmp.eq.s32.totalorder %v10051_v6, %v11717_v0 }
 0x13c   :  { %8193 = vmatmul.mubr.msk.bf16.vlgmr.msra.gmra.mrb[0].mxu1 %vm11758_vm2, %v15749_v62  ;;  %vm8770_vm10 = vmpackc.low %vm2269_vm0, %vm2253_vm13  ;;  %vm2260_vm2 = vcmp.eq.s32.totalorder %v10051_v6, %v11705_v56  ;;  %vm15961_vm6 = vnez %v15958_v47  ;;  %vm435_vm13 = vcmp.eq.s32.totalorder %v10083_v9, %v9990_v51  ;;  %v15983_v47 = vmov 0 }
 0x13d   :  { %8705 = vmatmul.mubr.msk.bf16.vlgmr.msra.gmra.mrb[0].mxu0 %vm11770_vm15, %v15749_v62  ;;  %8257 = vmatpush1.bf16.xpose.msk.msra.mxu1 %vm11779_vm7, %v15749_v62  ;;  %vm11834_vm15 = vmpackc.low %vm402_vm3, %vm386_vm5  ;;  %vm2252_vm7 = vcmp.eq.s32.totalorder %v10048_v5, %v11717_v0  ;;  %vm427_vm5 = vcmp.eq.s32.totalorder %v10080_v8, %v10014_v59  ;;  %vm443_vm3 = vcmp.eq.s32.totalorder %v10083_v9, %v10014_v59 }
 0x13e   :  { %8769 = vmatpush1.bf16.xpose.msk.msra.mxu0 %vm11787_vm11, %v15749_v62  ;;  %8195 = vmatprep.mubr.msk.bf16.mxu1 %vm11795_vm9, %v15749_v62  ;;  %vm11846_vm11 = vmpackc.low %vm410_vm14, %vm394_vm8  ;;  %vm419_vm9 = vcmp.eq.s32.totalorder %v10080_v8, %v9990_v51  ;;  %vm2277_vm8 = vcmp.eq.s32.totalorder %v10080_v8, %v11641_v33  ;;  %vm2293_vm14 = vcmp.eq.s32.totalorder %v10083_v9, %v11641_v33 }
 0x13f   :  { %8707 = vmatprep.mubr.msk.bf16.mxu0 %vm15961_vm6, %v15749_v62  ;;  %8259 = vmatprep.subr.msk.bf16.mxu1 %vm8258_vm4, %v15749_v62  ;;  %vm11855_vm0 = vmpackc.low %vm2260_vm2, %vm2244_vm1  ;;  %vm2301_vm2 = vcmp.eq.s32.totalorder %v10083_v9, %v11655_v4  ;;  %vm434_vm6 = vcmp.eq.s32.totalorder %v10083_v9, %v9987_v50 }
 0x140   :  { %8771 = vmatprep.subr.msk.bf16.mxu0 %vm8770_vm10, %v15749_v62  ;;  %vm11863_vm4 = vmpackc.low %vm2268_vm12, %vm2252_vm7  ;;  %vm2285_vm10 = vcmp.eq.s32.totalorder %v10080_v8, %v11655_v4  ;;  %vm418_vm12 = vcmp.eq.s32.totalorder %v10080_v8, %v9987_v50 }
 0x141   :  { %vm11871_vm1 = vmpackc.low %vm435_vm13, %vm419_vm9  ;;  %vm426_vm13 = vcmp.eq.s32.totalorder %v10080_v8, %v10011_v58 }
 0x142   :  { %vm11879_vm7 = vmpackc.low %vm443_vm3, %vm427_vm5  ;;  %vm442_vm5 = vcmp.eq.s32.totalorder %v10083_v9, %v10011_v58 }
 0x143   :  { %v15971_v2 = vsel %vm11879_vm7, 4294967295, %v15970_v2  ;;  %vm8262_vm9 = vmpackc.low %vm2293_vm14, %vm2277_vm8  ;;  %vm2276_vm7 = vcmp.eq.s32.totalorder %v10080_v8, %v11705_v56  ;;  %vm2300_vm8 = vcmp.eq.s32.totalorder %v10083_v9, %v11717_v0 }
 0x144   :  { %8197 = vmatmul.mubr.msk.bf16.gmra.mrb[4].mxu1 %vm11834_vm15, %v15749_v62  ;;  %vm8774_vm3 = vmpackc.low %vm2301_vm2, %vm2285_vm10  ;;  %vm2292_vm15 = vcmp.eq.s32.totalorder %v10083_v9, %v11705_v56  ;;  %vm15974_vm14 = vnez %v15971_v2  ;;  %vm467_vm10 = vcmp.eq.s32.totalorder %v10109_v11, %v9990_v51  ;;  %v15996_v2 = vmov 0 }
 0x145   :  { %8709 = vmatmul.mubr.msk.bf16.gmra.mrb[4].mxu0 %vm11846_vm11, %v15749_v62  ;;  %8261 = vmatpush1.bf16.xpose.msk.msra.mxu1 %vm11855_vm0, %v15749_v62  ;;  %vm11910_vm11 = vmpackc.low %vm434_vm6, %vm418_vm12  ;;  %vm2284_vm0 = vcmp.eq.s32.totalorder %v10080_v8, %v11717_v0  ;;  %vm459_vm12 = vcmp.eq.s32.totalorder %v10106_v10, %v10014_v59  ;;  %vm475_vm6 = vcmp.eq.s32.totalorder %v10109_v11, %v10014_v59 }
 0x146   :  { %8773 = vmatpush1.bf16.xpose.msk.msra.mxu0 %vm11863_vm4, %v15749_v62  ;;  %8199 = vmatprep.mubr.msk.bf16.mxu1 %vm11871_vm1, %v15749_v62  ;;  %vm11922_vm4 = vmpackc.low %vm442_vm5, %vm426_vm13  ;;  %vm451_vm1 = vcmp.eq.s32.totalorder %v10106_v10, %v9990_v51  ;;  %vm2309_vm13 = vcmp.eq.s32.totalorder %v10106_v10, %v11641_v33  ;;  %vm2325_vm5 = vcmp.eq.s32.totalorder %v10109_v11, %v11641_v33 }
 0x147   :  { %8711 = vmatprep.mubr.msk.bf16.mxu0 %vm15974_vm14, %v15749_v62  ;;  %8263 = vmatprep.subr.msk.bf16.mxu1 %vm8262_vm9, %v15749_v62  ;;  %vm11931_vm2 = vmpackc.low %vm2292_vm15, %vm2276_vm7  ;;  %vm2333_vm15 = vcmp.eq.s32.totalorder %v10109_v11, %v11655_v4  ;;  %vm466_vm14 = vcmp.eq.s32.totalorder %v10109_v11, %v9987_v50 }
 0x148   :  { %8775 = vmatprep.subr.msk.bf16.mxu0 %vm8774_vm3, %v15749_v62  ;;  %vm11939_vm9 = vmpackc.low %vm2300_vm8, %vm2284_vm0  ;;  %vm2317_vm3 = vcmp.eq.s32.totalorder %v10106_v10, %v11655_v4  ;;  %vm450_vm8 = vcmp.eq.s32.totalorder %v10106_v10, %v9987_v50 }
 0x149   :  { %vm11947_vm7 = vmpackc.low %vm467_vm10, %vm451_vm1  ;;  %vm458_vm10 = vcmp.eq.s32.totalorder %v10106_v10, %v10011_v58 }
 0x14a   :  { %vm11955_vm0 = vmpackc.low %vm475_vm6, %vm459_vm12  ;;  %vm474_vm12 = vcmp.eq.s32.totalorder %v10109_v11, %v10011_v58 }
 0x14b   :  { %v15984_v47 = vsel %vm11955_vm0, 4294967295, %v15983_v47  ;;  %vm8266_vm1 = vmpackc.low %vm2325_vm5, %vm2309_vm13  ;;  %vm2308_vm0 = vcmp.eq.s32.totalorder %v10106_v10, %v11705_v56  ;;  %vm2332_vm13 = vcmp.eq.s32.totalorder %v10109_v11, %v11717_v0 }
 0x14c   :  { %8201 = vmatmul.mubr.msk.bf16.gmra.mrb[8].mxu1 %vm11910_vm11, %v15749_v62  ;;  %vm8778_vm6 = vmpackc.low %vm2333_vm15, %vm2317_vm3  ;;  %vm2324_vm11 = vcmp.eq.s32.totalorder %v10109_v11, %v11705_v56  ;;  %vm15987_vm5 = vnez %v15984_v47  ;;  %vm499_vm3 = vcmp.eq.s32.totalorder %v10135_v14, %v9990_v51  ;;  %v16009_v47 = vmov 0 }
 0x14d   :  { %8713 = vmatmul.mubr.msk.bf16.gmra.mrb[8].mxu0 %vm11922_vm4, %v15749_v62  ;;  %8265 = vmatpush1.bf16.xpose.msk.msra.mxu1 %vm11931_vm2, %v15749_v62  ;;  %vm11986_vm4 = vmpackc.low %vm466_vm14, %vm450_vm8  ;;  %vm2316_vm2 = vcmp.eq.s32.totalorder %v10106_v10, %v11717_v0  ;;  %vm491_vm8 = vcmp.eq.s32.totalorder %v10132_v12, %v10014_v59  ;;  %vm507_vm14 = vcmp.eq.s32.totalorder %v10135_v14, %v10014_v59 }
 0x14e   :  { %8777 = vmatpush1.bf16.xpose.msk.msra.mxu0 %vm11939_vm9, %v15749_v62  ;;  %8203 = vmatprep.mubr.msk.bf16.mxu1 %vm11947_vm7, %v15749_v62  ;;  %vm11998_vm9 = vmpackc.low %vm474_vm12, %vm458_vm10  ;;  %vm483_vm7 = vcmp.eq.s32.totalorder %v10132_v12, %v9990_v51  ;;  %vm2341_vm10 = vcmp.eq.s32.totalorder %v10132_v12, %v11641_v33  ;;  %vm2357_vm12 = vcmp.eq.s32.totalorder %v10135_v14, %v11641_v33 }
 0x14f   :  { %8715 = vmatprep.mubr.msk.bf16.mxu0 %vm15987_vm5, %v15749_v62  ;;  %8267 = vmatprep.subr.msk.bf16.mxu1 %vm8266_vm1, %v15749_v62  ;;  %vm12007_vm15 = vmpackc.low %vm2324_vm11, %vm2308_vm0  ;;  %vm2365_vm11 = vcmp.eq.s32.totalorder %v10135_v14, %v11655_v4  ;;  %vm498_vm5 = vcmp.eq.s32.totalorder %v10135_v14, %v9987_v50 }
 0x150   :  { %8779 = vmatprep.subr.msk.bf16.mxu0 %vm8778_vm6, %v15749_v62  ;;  %vm12015_vm1 = vmpackc.low %vm2332_vm13, %vm2316_vm2  ;;  %vm2349_vm6 = vcmp.eq.s32.totalorder %v10132_v12, %v11655_v4  ;;  %vm482_vm13 = vcmp.eq.s32.totalorder %v10132_v12, %v9987_v50 }
 0x151   :  { %vm12023_vm0 = vmpackc.low %vm499_vm3, %vm483_vm7  ;;  %vm490_vm3 = vcmp.eq.s32.totalorder %v10132_v12, %v10011_v58 }
 0x152   :  { %vm12031_vm2 = vmpackc.low %vm507_vm14, %vm491_vm8  ;;  %vm506_vm8 = vcmp.eq.s32.totalorder %v10135_v14, %v10011_v58 }
 0x153   :  { %v15997_v2 = vsel %vm12031_vm2, 4294967295, %v15996_v2  ;;  %vm8270_vm7 = vmpackc.low %vm2357_vm12, %vm2341_vm10  ;;  %vm2340_vm2 = vcmp.eq.s32.totalorder %v10132_v12, %v11705_v56  ;;  %vm2364_vm10 = vcmp.eq.s32.totalorder %v10135_v14, %v11717_v0 }
 0x154   :  { %8205 = vmatmul.mubr.msk.bf16.gmra.mrb[12].mxu1 %vm11986_vm4, %v15749_v62  ;;  %vm8782_vm14 = vmpackc.low %vm2365_vm11, %vm2349_vm6  ;;  %vm2356_vm4 = vcmp.eq.s32.totalorder %v10135_v14, %v11705_v56  ;;  %vm16000_vm12 = vnez %v15997_v2  ;;  %vm531_vm6 = vcmp.eq.s32.totalorder %v10161_v16, %v9990_v51  ;;  %v16022_v2 = vmov 0 }
 0x155   :  { %8717 = vmatmul.mubr.msk.bf16.gmra.mrb[12].mxu0 %vm11998_vm9, %v15749_v62  ;;  %8269 = vmatpush1.bf16.xpose.msk.msra.mxu1 %vm12007_vm15, %v15749_v62  ;;  %vm12062_vm9 = vmpackc.low %vm498_vm5, %vm482_vm13  ;;  %vm2348_vm15 = vcmp.eq.s32.totalorder %v10132_v12, %v11717_v0  ;;  %vm523_vm13 = vcmp.eq.s32.totalorder %v10158_v15, %v10014_v59  ;;  %vm539_vm5 = vcmp.eq.s32.totalorder %v10161_v16, %v10014_v59 }
 0x156   :  { %8781 = vmatpush1.bf16.xpose.msk.msra.mxu0 %vm12015_vm1, %v15749_v62  ;;  %8207 = vmatprep.mubr.msk.bf16.mxu1 %vm12023_vm0, %v15749_v62  ;;  %vm12074_vm1 = vmpackc.low %vm506_vm8, %vm490_vm3  ;;  %vm515_vm0 = vcmp.eq.s32.totalorder %v10158_v15, %v9990_v51  ;;  %vm2373_vm3 = vcmp.eq.s32.totalorder %v10158_v15, %v11641_v33  ;;  %vm2389_vm8 = vcmp.eq.s32.totalorder %v10161_v16, %v11641_v33 }
 0x157   :  { %8719 = vmatprep.mubr.msk.bf16.mxu0 %vm16000_vm12, %v15749_v62  ;;  %8271 = vmatprep.subr.msk.bf16.mxu1 %vm8270_vm7, %v15749_v62  ;;  %vm12083_vm11 = vmpackc.low %vm2356_vm4, %vm2340_vm2  ;;  %vm2397_vm4 = vcmp.eq.s32.totalorder %v10161_v16, %v11655_v4  ;;  %vm530_vm12 = vcmp.eq.s32.totalorder %v10161_v16, %v9987_v50 }
 0x158   :  { %8783 = vmatprep.subr.msk.bf16.mxu0 %vm8782_vm14, %v15749_v62  ;;  %vm12091_vm7 = vmpackc.low %vm2364_vm10, %vm2348_vm15  ;;  %vm2381_vm14 = vcmp.eq.s32.totalorder %v10158_v15, %v11655_v4  ;;  %vm514_vm10 = vcmp.eq.s32.totalorder %v10158_v15, %v9987_v50 }
 0x159   :  { %vm12099_vm2 = vmpackc.low %vm531_vm6, %vm515_vm0  ;;  %vm522_vm6 = vcmp.eq.s32.totalorder %v10158_v15, %v10011_v58 }
 0x15a   :  { %vm12107_vm15 = vmpackc.low %vm539_vm5, %vm523_vm13  ;;  %vm538_vm13 = vcmp.eq.s32.totalorder %v10161_v16, %v10011_v58 }
 0x15b   :  { %v16010_v47 = vsel %vm12107_vm15, 4294967295, %v16009_v47  ;;  %vm8274_vm0 = vmpackc.low %vm2389_vm8, %vm2373_vm3  ;;  %vm2372_vm15 = vcmp.eq.s32.totalorder %v10158_v15, %v11705_v56  ;;  %vm2396_vm3 = vcmp.eq.s32.totalorder %v10161_v16, %v11717_v0 }
 0x15c   :  { %8209 = vmatmul.mubr.msk.bf16.gmra.mrb[16].mxu1 %vm12062_vm9, %v15749_v62  ;;  %vm8786_vm5 = vmpackc.low %vm2397_vm4, %vm2381_vm14  ;;  %vm2388_vm9 = vcmp.eq.s32.totalorder %v10161_v16, %v11705_v56  ;;  %vm16013_vm8 = vnez %v16010_v47  ;;  %vm563_vm14 = vcmp.eq.s32.totalorder %v10187_v18, %v9990_v51  ;;  %v16035_v47 = vmov 0 }
 0x15d   :  { %8721 = vmatmul.mubr.msk.bf16.gmra.mrb[16].mxu0 %vm12074_vm1, %v15749_v62  ;;  %8273 = vmatpush1.bf16.xpose.msk.msra.mxu1 %vm12083_vm11, %v15749_v62  ;;  %vm12138_vm1 = vmpackc.low %vm530_vm12, %vm514_vm10  ;;  %vm2380_vm11 = vcmp.eq.s32.totalorder %v10158_v15, %v11717_v0  ;;  %vm555_vm10 = vcmp.eq.s32.totalorder %v10184_v17, %v10014_v59  ;;  %vm571_vm12 = vcmp.eq.s32.totalorder %v10187_v18, %v10014_v59 }
 0x15e   :  { %8785 = vmatpush1.bf16.xpose.msk.msra.mxu0 %vm12091_vm7, %v15749_v62  ;;  %8211 = vmatprep.mubr.msk.bf16.mxu1 %vm12099_vm2, %v15749_v62  ;;  %vm12150_vm7 = vmpackc.low %vm538_vm13, %vm522_vm6  ;;  %vm547_vm2 = vcmp.eq.s32.totalorder %v10184_v17, %v9990_v51  ;;  %vm2405_vm6 = vcmp.eq.s32.totalorder %v10184_v17, %v11641_v33  ;;  %vm2421_vm13 = vcmp.eq.s32.totalorder %v10187_v18, %v11641_v33 }
 0x15f   :  { %8723 = vmatprep.mubr.msk.bf16.mxu0 %vm16013_vm8, %v15749_v62  ;;  %8275 = vmatprep.subr.msk.bf16.mxu1 %vm8274_vm0, %v15749_v62  ;;  %vm12159_vm4 = vmpackc.low %vm2388_vm9, %vm2372_vm15  ;;  %vm2429_vm9 = vcmp.eq.s32.totalorder %v10187_v18, %v11655_v4  ;;  %vm562_vm8 = vcmp.eq.s32.totalorder %v10187_v18, %v9987_v50 }
 0x160   :  { %8787 = vmatprep.subr.msk.bf16.mxu0 %vm8786_vm5, %v15749_v62  ;;  %vm12167_vm0 = vmpackc.low %vm2396_vm3, %vm2380_vm11  ;;  %vm2413_vm5 = vcmp.eq.s32.totalorder %v10184_v17, %v11655_v4  ;;  %vm546_vm3 = vcmp.eq.s32.totalorder %v10184_v17, %v9987_v50 }
 0x161   :  { %vm12175_vm15 = vmpackc.low %vm563_vm14, %vm547_vm2  ;;  %vm554_vm14 = vcmp.eq.s32.totalorder %v10184_v17, %v10011_v58 }
 0x162   :  { %vm12183_vm11 = vmpackc.low %vm571_vm12, %vm555_vm10  ;;  %vm570_vm10 = vcmp.eq.s32.totalorder %v10187_v18, %v10011_v58 }
 0x163   :  { %v16023_v2 = vsel %vm12183_vm11, 4294967295, %v16022_v2  ;;  %vm8278_vm2 = vmpackc.low %vm2421_vm13, %vm2405_vm6  ;;  %vm2404_vm11 = vcmp.eq.s32.totalorder %v10184_v17, %v11705_v56  ;;  %vm2428_vm6 = vcmp.eq.s32.totalorder %v10187_v18, %v11717_v0 }
 0x164   :  { %8213 = vmatmul.mubr.msk.bf16.gmra.mrb[20].mxu1 %vm12138_vm1, %v15749_v62  ;;  %vm8790_vm12 = vmpackc.low %vm2429_vm9, %vm2413_vm5  ;;  %vm2420_vm1 = vcmp.eq.s32.totalorder %v10187_v18, %v11705_v56  ;;  %vm16026_vm13 = vnez %v16023_v2  ;;  %vm595_vm5 = vcmp.eq.s32.totalorder %v10213_v20, %v9990_v51  ;;  %v16048_v2 = vmov 0 }
 0x165   :  { %8725 = vmatmul.mubr.msk.bf16.gmra.mrb[20].mxu0 %vm12150_vm7, %v15749_v62  ;;  %8277 = vmatpush1.bf16.xpose.msk.msra.mxu1 %vm12159_vm4, %v15749_v62  ;;  %vm12214_vm7 = vmpackc.low %vm562_vm8, %vm546_vm3  ;;  %vm2412_vm4 = vcmp.eq.s32.totalorder %v10184_v17, %v11717_v0  ;;  %vm587_vm3 = vcmp.eq.s32.totalorder %v10210_v19, %v10014_v59  ;;  %vm603_vm8 = vcmp.eq.s32.totalorder %v10213_v20, %v10014_v59 }
 0x166   :  { %8789 = vmatpush1.bf16.xpose.msk.msra.mxu0 %vm12167_vm0, %v15749_v62  ;;  %8215 = vmatprep.mubr.msk.bf16.mxu1 %vm12175_vm15, %v15749_v62  ;;  %vm12226_vm0 = vmpackc.low %vm570_vm10, %vm554_vm14  ;;  %vm579_vm15 = vcmp.eq.s32.totalorder %v10210_v19, %v9990_v51  ;;  %vm2437_vm14 = vcmp.eq.s32.totalorder %v10210_v19, %v11641_v33  ;;  %vm2453_vm10 = vcmp.eq.s32.totalorder %v10213_v20, %v11641_v33 }
 0x167   :  { %8727 = vmatprep.mubr.msk.bf16.mxu0 %vm16026_vm13, %v15749_v62  ;;  %8279 = vmatprep.subr.msk.bf16.mxu1 %vm8278_vm2, %v15749_v62  ;;  %vm12235_vm9 = vmpackc.low %vm2420_vm1, %vm2404_vm11  ;;  %vm2461_vm1 = vcmp.eq.s32.totalorder %v10213_v20, %v11655_v4  ;;  %vm594_vm13 = vcmp.eq.s32.totalorder %v10213_v20, %v9987_v50 }
 0x168   :  { %8791 = vmatprep.subr.msk.bf16.mxu0 %vm8790_vm12, %v15749_v62  ;;  %vm12243_vm2 = vmpackc.low %vm2428_vm6, %vm2412_vm4  ;;  %vm2445_vm12 = vcmp.eq.s32.totalorder %v10210_v19, %v11655_v4  ;;  %vm578_vm6 = vcmp.eq.s32.totalorder %v10210_v19, %v9987_v50 }
 0x169   :  { %vm12251_vm11 = vmpackc.low %vm595_vm5, %vm579_vm15  ;;  %vm586_vm5 = vcmp.eq.s32.totalorder %v10210_v19, %v10011_v58 }
 0x16a   :  { %vm12259_vm4 = vmpackc.low %vm603_vm8, %vm587_vm3  ;;  %vm602_vm3 = vcmp.eq.s32.totalorder %v10213_v20, %v10011_v58 }
 0x16b   :  { %v16036_v47 = vsel %vm12259_vm4, 4294967295, %v16035_v47  ;;  %vm8282_vm15 = vmpackc.low %vm2453_vm10, %vm2437_vm14  ;;  %vm2436_vm4 = vcmp.eq.s32.totalorder %v10210_v19, %v11705_v56  ;;  %vm2460_vm14 = vcmp.eq.s32.totalorder %v10213_v20, %v11717_v0 }
 0x16c   :  { %8217 = vmatmul.mubr.msk.bf16.gmra.mrb[24].mxu1 %vm12214_vm7, %v15749_v62  ;;  %vm8794_vm8 = vmpackc.low %vm2461_vm1, %vm2445_vm12  ;;  %vm2452_vm7 = vcmp.eq.s32.totalorder %v10213_v20, %v11705_v56  ;;  %vm16039_vm10 = vnez %v16036_v47  ;;  %vm627_vm12 = vcmp.eq.s32.totalorder %v10239_v28, %v9990_v51  ;;  %v16061_v47 = vmov 0 }
 0x16d   :  { %8729 = vmatmul.mubr.msk.bf16.gmra.mrb[24].mxu0 %vm12226_vm0, %v15749_v62  ;;  %8281 = vmatpush1.bf16.xpose.msk.msra.mxu1 %vm12235_vm9, %v15749_v62  ;;  %vm12290_vm0 = vmpackc.low %vm594_vm13, %vm578_vm6  ;;  %vm2444_vm9 = vcmp.eq.s32.totalorder %v10210_v19, %v11717_v0  ;;  %vm619_vm6 = vcmp.eq.s32.totalorder %v10236_v25, %v10014_v59  ;;  %vm635_vm13 = vcmp.eq.s32.totalorder %v10239_v28, %v10014_v59 }
 0x16e   :  { %8793 = vmatpush1.bf16.xpose.msk.msra.mxu0 %vm12243_vm2, %v15749_v62  ;;  %8219 = vmatprep.mubr.msk.bf16.mxu1 %vm12251_vm11, %v15749_v62  ;;  %vm12302_vm2 = vmpackc.low %vm602_vm3, %vm586_vm5  ;;  %vm611_vm11 = vcmp.eq.s32.totalorder %v10236_v25, %v9990_v51  ;;  %vm2469_vm5 = vcmp.eq.s32.totalorder %v10236_v25, %v11641_v33  ;;  %vm2485_vm3 = vcmp.eq.s32.totalorder %v10239_v28, %v11641_v33 }
 0x16f   :  { %8731 = vmatprep.mubr.msk.bf16.mxu0 %vm16039_vm10, %v15749_v62  ;;  %8283 = vmatprep.subr.msk.bf16.mxu1 %vm8282_vm15, %v15749_v62  ;;  %vm12311_vm1 = vmpackc.low %vm2452_vm7, %vm2436_vm4  ;;  %vm2493_vm7 = vcmp.eq.s32.totalorder %v10239_v28, %v11655_v4  ;;  %vm626_vm10 = vcmp.eq.s32.totalorder %v10239_v28, %v9987_v50 }
 0x170   :  { %8795 = vmatprep.subr.msk.bf16.mxu0 %vm8794_vm8, %v15749_v62  ;;  %vm12319_vm15 = vmpackc.low %vm2460_vm14, %vm2444_vm9  ;;  %vm2477_vm8 = vcmp.eq.s32.totalorder %v10236_v25, %v11655_v4  ;;  %vm610_vm14 = vcmp.eq.s32.totalorder %v10236_v25, %v9987_v50 }
 0x171   :  { %vm12327_vm4 = vmpackc.low %vm627_vm12, %vm611_vm11  ;;  %vm618_vm12 = vcmp.eq.s32.totalorder %v10236_v25, %v10011_v58 }
 0x172   :  { %vm12335_vm9 = vmpackc.low %vm635_vm13, %vm619_vm6  ;;  %vm634_vm6 = vcmp.eq.s32.totalorder %v10239_v28, %v10011_v58 }
 0x173   :  { %v16049_v2 = vsel %vm12335_vm9, 4294967295, %v16048_v2  ;;  %vm8286_vm11 = vmpackc.low %vm2485_vm3, %vm2469_vm5  ;;  %vm2468_vm9 = vcmp.eq.s32.totalorder %v10236_v25, %v11705_v56  ;;  %vm2492_vm5 = vcmp.eq.s32.totalorder %v10239_v28, %v11717_v0 }
 0x174   :  { %8221 = vmatmul.mubr.msk.bf16.gmra.mrb[28].mxu1 %vm12290_vm0, %v15749_v62  ;;  %vm8798_vm13 = vmpackc.low %vm2493_vm7, %vm2477_vm8  ;;  %vm2484_vm0 = vcmp.eq.s32.totalorder %v10239_v28, %v11705_v56  ;;  %vm16052_vm3 = vnez %v16049_v2  ;;  %vm659_vm8 = vcmp.eq.s32.totalorder %v10267_v24, %v9990_v51  ;;  %v16074_v2 = vmov 0 }
 0x175   :  { %8733 = vmatmul.mubr.msk.bf16.gmra.mrb[28].mxu0 %vm12302_vm2, %v15749_v62  ;;  %8285 = vmatpush1.bf16.xpose.msk.msra.mxu1 %vm12311_vm1, %v15749_v62  ;;  %vm12366_vm2 = vmpackc.low %vm626_vm10, %vm610_vm14  ;;  %vm2476_vm1 = vcmp.eq.s32.totalorder %v10236_v25, %v11717_v0  ;;  %vm651_vm14 = vcmp.eq.s32.totalorder %v10264_v22, %v10014_v59  ;;  %vm667_vm10 = vcmp.eq.s32.totalorder %v10267_v24, %v10014_v59 }
 0x176   :  { %8797 = vmatpush1.bf16.xpose.msk.msra.mxu0 %vm12319_vm15, %v15749_v62  ;;  %8223 = vmatprep.mubr.msk.bf16.mxu1 %vm12327_vm4, %v15749_v62  ;;  %vm12378_vm15 = vmpackc.low %vm634_vm6, %vm618_vm12  ;;  %vm643_vm4 = vcmp.eq.s32.totalorder %v10264_v22, %v9990_v51  ;;  %vm2501_vm12 = vcmp.eq.s32.totalorder %v10264_v22, %v11641_v33  ;;  %vm2517_vm6 = vcmp.eq.s32.totalorder %v10267_v24, %v11641_v33 }
 0x177   :  { %8735 = vmatprep.mubr.msk.bf16.mxu0 %vm16052_vm3, %v15749_v62  ;;  %8287 = vmatprep.subr.msk.bf16.mxu1 %vm8286_vm11, %v15749_v62  ;;  %vm12387_vm7 = vmpackc.low %vm2484_vm0, %vm2468_vm9  ;;  %vm2525_vm0 = vcmp.eq.s32.totalorder %v10267_v24, %v11655_v4  ;;  %vm658_vm3 = vcmp.eq.s32.totalorder %v10267_v24, %v9987_v50 }
 0x178   :  { %8799 = vmatprep.subr.msk.bf16.mxu0 %vm8798_vm13, %v15749_v62  ;;  %vm12395_vm11 = vmpackc.low %vm2492_vm5, %vm2476_vm1  ;;  %vm2509_vm13 = vcmp.eq.s32.totalorder %v10264_v22, %v11655_v4  ;;  %vm642_vm5 = vcmp.eq.s32.totalorder %v10264_v22, %v9987_v50 }
 0x179   :  { %vm12403_vm9 = vmpackc.low %vm659_vm8, %vm643_vm4  ;;  %vm650_vm8 = vcmp.eq.s32.totalorder %v10264_v22, %v10011_v58 }
 0x17a   :  { %vm12411_vm1 = vmpackc.low %vm667_vm10, %vm651_vm14  ;;  %vm666_vm14 = vcmp.eq.s32.totalorder %v10267_v24, %v10011_v58 }
 0x17b   :  { %v16062_v47 = vsel %vm12411_vm1, 4294967295, %v16061_v47  ;;  %vm8290_vm4 = vmpackc.low %vm2517_vm6, %vm2501_vm12  ;;  %vm2500_vm1 = vcmp.eq.s32.totalorder %v10264_v22, %v11705_v56  ;;  %vm2524_vm12 = vcmp.eq.s32.totalorder %v10267_v24, %v11717_v0 }
 0x17c   :  { %8225 = vmatmul.mubr.msk.bf16.gmra.mrb[32].mxu1 %vm12366_vm2, %v15749_v62  ;;  %vm8802_vm10 = vmpackc.low %vm2525_vm0, %vm2509_vm13  ;;  %vm2516_vm2 = vcmp.eq.s32.totalorder %v10267_v24, %v11705_v56  ;;  %vm16065_vm6 = vnez %v16062_v47  ;;  %vm691_vm13 = vcmp.eq.s32.totalorder %v10309_v36, %v9990_v51  ;;  %v16087_v47 = vmov 0 }
 0x17d   :  { %8737 = vmatmul.mubr.msk.bf16.gmra.mrb[32].mxu0 %vm12378_vm15, %v15749_v62  ;;  %8289 = vmatpush1.bf16.xpose.msk.msra.mxu1 %vm12387_vm7, %v15749_v62  ;;  %vm12442_vm15 = vmpackc.low %vm658_vm3, %vm642_vm5  ;;  %vm2508_vm7 = vcmp.eq.s32.totalorder %v10264_v22, %v11717_v0  ;;  %vm683_vm5 = vcmp.eq.s32.totalorder %v10306_v35, %v10014_v59  ;;  %vm699_vm3 = vcmp.eq.s32.totalorder %v10309_v36, %v10014_v59 }
 0x17e   :  { %8801 = vmatpush1.bf16.xpose.msk.msra.mxu0 %vm12395_vm11, %v15749_v62  ;;  %8227 = vmatprep.mubr.msk.bf16.mxu1 %vm12403_vm9, %v15749_v62  ;;  %vm12454_vm11 = vmpackc.low %vm666_vm14, %vm650_vm8  ;;  %vm675_vm9 = vcmp.eq.s32.totalorder %v10306_v35, %v9990_v51  ;;  %vm2533_vm8 = vcmp.eq.s32.totalorder %v10306_v35, %v11641_v33  ;;  %vm2549_vm14 = vcmp.eq.s32.totalorder %v10309_v36, %v11641_v33 }
 0x17f   :  { %8739 = vmatprep.mubr.msk.bf16.mxu0 %vm16065_vm6, %v15749_v62  ;;  %8291 = vmatprep.subr.msk.bf16.mxu1 %vm8290_vm4, %v15749_v62  ;;  %vm12463_vm0 = vmpackc.low %vm2516_vm2, %vm2500_vm1  ;;  %vm2557_vm2 = vcmp.eq.s32.totalorder %v10309_v36, %v11655_v4  ;;  %vm690_vm6 = vcmp.eq.s32.totalorder %v10309_v36, %v9987_v50 }
 0x180   :  { %8803 = vmatprep.subr.msk.bf16.mxu0 %vm8802_vm10, %v15749_v62  ;;  %vm12471_vm4 = vmpackc.low %vm2524_vm12, %vm2508_vm7  ;;  %vm2541_vm10 = vcmp.eq.s32.totalorder %v10306_v35, %v11655_v4  ;;  %vm674_vm12 = vcmp.eq.s32.totalorder %v10306_v35, %v9987_v50 }
 0x181   :  { %vm12479_vm1 = vmpackc.low %vm691_vm13, %vm675_vm9  ;;  %vm682_vm13 = vcmp.eq.s32.totalorder %v10306_v35, %v10011_v58 }
 0x182   :  { %vm12487_vm7 = vmpackc.low %vm699_vm3, %vm683_vm5  ;;  %vm698_vm5 = vcmp.eq.s32.totalorder %v10309_v36, %v10011_v58 }
 0x183   :  { %v16075_v2 = vsel %vm12487_vm7, 4294967295, %v16074_v2  ;;  %vm8294_vm9 = vmpackc.low %vm2549_vm14, %vm2533_vm8  ;;  %vm2532_vm7 = vcmp.eq.s32.totalorder %v10306_v35, %v11705_v56  ;;  %vm2556_vm8 = vcmp.eq.s32.totalorder %v10309_v36, %v11717_v0 }
 0x184   :  { %8229 = vmatmul.mubr.msk.bf16.gmra.mrb[36].mxu1 %vm12442_vm15, %v15749_v62  ;;  %vm8806_vm3 = vmpackc.low %vm2557_vm2, %vm2541_vm10  ;;  %vm2548_vm15 = vcmp.eq.s32.totalorder %v10309_v36, %v11705_v56  ;;  %vm16078_vm14 = vnez %v16075_v2  ;;  %vm723_vm10 = vcmp.eq.s32.totalorder %v10338_v38, %v9990_v51  ;;  %v16100_v2 = vmov 0 }
 0x185   :  { %8741 = vmatmul.mubr.msk.bf16.gmra.mrb[36].mxu0 %vm12454_vm11, %v15749_v62  ;;  %8293 = vmatpush1.bf16.xpose.msk.msra.mxu1 %vm12463_vm0, %v15749_v62  ;;  %vm12518_vm11 = vmpackc.low %vm690_vm6, %vm674_vm12  ;;  %vm2540_vm0 = vcmp.eq.s32.totalorder %v10306_v35, %v11717_v0  ;;  %vm715_vm12 = vcmp.eq.s32.totalorder %v10335_v37, %v10014_v59  ;;  %vm731_vm6 = vcmp.eq.s32.totalorder %v10338_v38, %v10014_v59 }
 0x186   :  { %8805 = vmatpush1.bf16.xpose.msk.msra.mxu0 %vm12471_vm4, %v15749_v62  ;;  %8231 = vmatprep.mubr.msk.bf16.mxu1 %vm12479_vm1, %v15749_v62  ;;  %vm12530_vm4 = vmpackc.low %vm698_vm5, %vm682_vm13  ;;  %vm707_vm1 = vcmp.eq.s32.totalorder %v10335_v37, %v9990_v51  ;;  %vm2565_vm13 = vcmp.eq.s32.totalorder %v10335_v37, %v11641_v33  ;;  %vm2581_vm5 = vcmp.eq.s32.totalorder %v10338_v38, %v11641_v33 }
 0x187   :  { %8743 = vmatprep.mubr.msk.bf16.mxu0 %vm16078_vm14, %v15749_v62  ;;  %8295 = vmatprep.subr.msk.bf16.mxu1 %vm8294_vm9, %v15749_v62  ;;  %vm12539_vm2 = vmpackc.low %vm2548_vm15, %vm2532_vm7  ;;  %vm2589_vm15 = vcmp.eq.s32.totalorder %v10338_v38, %v11655_v4  ;;  %vm722_vm14 = vcmp.eq.s32.totalorder %v10338_v38, %v9987_v50 }
 0x188   :  { %8807 = vmatprep.subr.msk.bf16.mxu0 %vm8806_vm3, %v15749_v62  ;;  %vm12547_vm9 = vmpackc.low %vm2556_vm8, %vm2540_vm0  ;;  %vm2573_vm3 = vcmp.eq.s32.totalorder %v10335_v37, %v11655_v4  ;;  %vm706_vm8 = vcmp.eq.s32.totalorder %v10335_v37, %v9987_v50 }
 0x189   :  { %vm12555_vm7 = vmpackc.low %vm723_vm10, %vm707_vm1  ;;  %vm714_vm10 = vcmp.eq.s32.totalorder %v10335_v37, %v10011_v58 }
 0x18a   :  { %vm12563_vm0 = vmpackc.low %vm731_vm6, %vm715_vm12  ;;  %vm730_vm12 = vcmp.eq.s32.totalorder %v10338_v38, %v10011_v58 }
 0x18b   :  { %v16088_v47 = vsel %vm12563_vm0, 4294967295, %v16087_v47  ;;  %vm8298_vm1 = vmpackc.low %vm2581_vm5, %vm2565_vm13  ;;  %vm2564_vm0 = vcmp.eq.s32.totalorder %v10335_v37, %v11705_v56  ;;  %vm2588_vm13 = vcmp.eq.s32.totalorder %v10338_v38, %v11717_v0 }
 0x18c   :  { %8233 = vmatmul.mubr.msk.bf16.gmra.mrb[40].mxu1 %vm12518_vm11, %v15749_v62  ;;  %vm8810_vm6 = vmpackc.low %vm2589_vm15, %vm2573_vm3  ;;  %vm2580_vm11 = vcmp.eq.s32.totalorder %v10338_v38, %v11705_v56  ;;  %vm16091_vm5 = vnez %v16088_v47  ;;  %vm755_vm3 = vcmp.eq.s32.totalorder %v10364_v40, %v9990_v51  ;;  %v16113_v47 = vmov 0 }
 0x18d   :  { %8745 = vmatmul.mubr.msk.bf16.gmra.mrb[40].mxu0 %vm12530_vm4, %v15749_v62  ;;  %8297 = vmatpush1.bf16.xpose.msk.msra.mxu1 %vm12539_vm2, %v15749_v62  ;;  %vm12594_vm4 = vmpackc.low %vm722_vm14, %vm706_vm8  ;;  %vm2572_vm2 = vcmp.eq.s32.totalorder %v10335_v37, %v11717_v0  ;;  %vm747_vm8 = vcmp.eq.s32.totalorder %v10361_v39, %v10014_v59  ;;  %vm763_vm14 = vcmp.eq.s32.totalorder %v10364_v40, %v10014_v59 }
 0x18e   :  { %8809 = vmatpush1.bf16.xpose.msk.msra.mxu0 %vm12547_vm9, %v15749_v62  ;;  %8235 = vmatprep.mubr.msk.bf16.mxu1 %vm12555_vm7, %v15749_v62  ;;  %vm12606_vm9 = vmpackc.low %vm730_vm12, %vm714_vm10  ;;  %vm739_vm7 = vcmp.eq.s32.totalorder %v10361_v39, %v9990_v51  ;;  %vm2597_vm10 = vcmp.eq.s32.totalorder %v10361_v39, %v11641_v33  ;;  %vm2613_vm12 = vcmp.eq.s32.totalorder %v10364_v40, %v11641_v33 }
 0x18f   :  { %8747 = vmatprep.mubr.msk.bf16.mxu0 %vm16091_vm5, %v15749_v62  ;;  %8299 = vmatprep.subr.msk.bf16.mxu1 %vm8298_vm1, %v15749_v62  ;;  %vm12615_vm15 = vmpackc.low %vm2580_vm11, %vm2564_vm0  ;;  %vm2621_vm11 = vcmp.eq.s32.totalorder %v10364_v40, %v11655_v4  ;;  %vm754_vm5 = vcmp.eq.s32.totalorder %v10364_v40, %v9987_v50 }
 0x190   :  { %8811 = vmatprep.subr.msk.bf16.mxu0 %vm8810_vm6, %v15749_v62  ;;  %vm12623_vm1 = vmpackc.low %vm2588_vm13, %vm2572_vm2  ;;  %vm2605_vm6 = vcmp.eq.s32.totalorder %v10361_v39, %v11655_v4  ;;  %vm738_vm13 = vcmp.eq.s32.totalorder %v10361_v39, %v9987_v50 }
 0x191   :  { %vm12631_vm0 = vmpackc.low %vm755_vm3, %vm739_vm7  ;;  %vm746_vm3 = vcmp.eq.s32.totalorder %v10361_v39, %v10011_v58 }
 0x192   :  { %vm12639_vm2 = vmpackc.low %vm763_vm14, %vm747_vm8  ;;  %vm762_vm8 = vcmp.eq.s32.totalorder %v10364_v40, %v10011_v58 }
 0x193   :  { %v16101_v2 = vsel %vm12639_vm2, 4294967295, %v16100_v2  ;;  %vm8302_vm7 = vmpackc.low %vm2613_vm12, %vm2597_vm10  ;;  %vm2596_vm2 = vcmp.eq.s32.totalorder %v10361_v39, %v11705_v56  ;;  %vm2620_vm10 = vcmp.eq.s32.totalorder %v10364_v40, %v11717_v0 }
 0x194   :  { %8237 = vmatmul.mubr.msk.bf16.gmra.mrb[44].mxu1 %vm12594_vm4, %v15749_v62  ;;  %vm8814_vm14 = vmpackc.low %vm2621_vm11, %vm2605_vm6  ;;  %vm2612_vm4 = vcmp.eq.s32.totalorder %v10364_v40, %v11705_v56  ;;  %vm16104_vm12 = vnez %v16101_v2  ;;  %vm787_vm6 = vcmp.eq.s32.totalorder %v10390_v42, %v9990_v51  ;;  %v16126_v2 = vmov 0 }
 0x195   :  { %8749 = vmatmul.mubr.msk.bf16.gmra.mrb[44].mxu0 %vm12606_vm9, %v15749_v62  ;;  %8301 = vmatpush1.bf16.xpose.msk.msra.mxu1 %vm12615_vm15, %v15749_v62  ;;  %vm12670_vm9 = vmpackc.low %vm754_vm5, %vm738_vm13  ;;  %vm2604_vm15 = vcmp.eq.s32.totalorder %v10361_v39, %v11717_v0  ;;  %vm779_vm13 = vcmp.eq.s32.totalorder %v10387_v41, %v10014_v59  ;;  %vm795_vm5 = vcmp.eq.s32.totalorder %v10390_v42, %v10014_v59 }
 0x196   :  { %8813 = vmatpush1.bf16.xpose.msk.msra.mxu0 %vm12623_vm1, %v15749_v62  ;;  %8239 = vmatprep.mubr.msk.bf16.mxu1 %vm12631_vm0, %v15749_v62  ;;  %vm12682_vm1 = vmpackc.low %vm762_vm8, %vm746_vm3  ;;  %vm771_vm0 = vcmp.eq.s32.totalorder %v10387_v41, %v9990_v51  ;;  %vm2629_vm3 = vcmp.eq.s32.totalorder %v10387_v41, %v11641_v33  ;;  %vm2645_vm8 = vcmp.eq.s32.totalorder %v10390_v42, %v11641_v33 }
 0x197   :  { %8751 = vmatprep.mubr.msk.bf16.mxu0 %vm16104_vm12, %v15749_v62  ;;  %8303 = vmatprep.subr.msk.bf16.mxu1 %vm8302_vm7, %v15749_v62  ;;  %vm12691_vm11 = vmpackc.low %vm2612_vm4, %vm2596_vm2  ;;  %vm2653_vm4 = vcmp.eq.s32.totalorder %v10390_v42, %v11655_v4  ;;  %vm786_vm12 = vcmp.eq.s32.totalorder %v10390_v42, %v9987_v50 }
 0x198   :  { %8815 = vmatprep.subr.msk.bf16.mxu0 %vm8814_vm14, %v15749_v62  ;;  %vm12699_vm7 = vmpackc.low %vm2620_vm10, %vm2604_vm15  ;;  %vm2637_vm14 = vcmp.eq.s32.totalorder %v10387_v41, %v11655_v4  ;;  %vm770_vm10 = vcmp.eq.s32.totalorder %v10387_v41, %v9987_v50 }
 0x199   :  { %vm12707_vm2 = vmpackc.low %vm787_vm6, %vm771_vm0  ;;  %vm778_vm6 = vcmp.eq.s32.totalorder %v10387_v41, %v10011_v58 }
 0x19a   :  { %vm12715_vm15 = vmpackc.low %vm795_vm5, %vm779_vm13  ;;  %vm794_vm13 = vcmp.eq.s32.totalorder %v10390_v42, %v10011_v58 }
 0x19b   :  { %v16114_v47 = vsel %vm12715_vm15, 4294967295, %v16113_v47  ;;  %vm8306_vm0 = vmpackc.low %vm2645_vm8, %vm2629_vm3  ;;  %vm2628_vm15 = vcmp.eq.s32.totalorder %v10387_v41, %v11705_v56  ;;  %vm2652_vm3 = vcmp.eq.s32.totalorder %v10390_v42, %v11717_v0 }
 0x19c   :  { %8241 = vmatmul.mubr.msk.bf16.gmra.mrb[48].mxu1 %vm12670_vm9, %v15749_v62  ;;  %vm8818_vm5 = vmpackc.low %vm2653_vm4, %vm2637_vm14  ;;  %vm2644_vm9 = vcmp.eq.s32.totalorder %v10390_v42, %v11705_v56  ;;  %vm16117_vm8 = vnez %v16114_v47  ;;  %vm819_vm14 = vcmp.eq.s32.totalorder %v10416_v44, %v9990_v51 }
 0x19d   :  { %8753 = vmatmul.mubr.msk.bf16.gmra.mrb[48].mxu0 %vm12682_vm1, %v15749_v62  ;;  %8305 = vmatpush1.bf16.xpose.msk.msra.mxu1 %vm12691_vm11, %v15749_v62  ;;  %vm12746_vm1 = vmpackc.low %vm786_vm12, %vm770_vm10  ;;  %vm2636_vm11 = vcmp.eq.s32.totalorder %v10387_v41, %v11717_v0  ;;  %vm811_vm10 = vcmp.eq.s32.totalorder %v10413_v43, %v10014_v59  ;;  %vm827_vm12 = vcmp.eq.s32.totalorder %v10416_v44, %v10014_v59 }
 0x19e   :  { %8817 = vmatpush1.bf16.xpose.msk.msra.mxu0 %vm12699_vm7, %v15749_v62  ;;  %8243 = vmatprep.mubr.msk.bf16.mxu1 %vm12707_vm2, %v15749_v62  ;;  %vm12758_vm7 = vmpackc.low %vm794_vm13, %vm778_vm6  ;;  %vm803_vm2 = vcmp.eq.s32.totalorder %v10413_v43, %v9990_v51  ;;  %vm2661_vm6 = vcmp.eq.s32.totalorder %v10413_v43, %v11641_v33  ;;  %vm2677_vm13 = vcmp.eq.s32.totalorder %v10416_v44, %v11641_v33 }
 0x19f   :  { %8755 = vmatprep.mubr.msk.bf16.mxu0 %vm16117_vm8, %v15749_v62  ;;  %8307 = vmatprep.subr.msk.bf16.mxu1 %vm8306_vm0, %v15749_v62  ;;  %vm12767_vm4 = vmpackc.low %vm2644_vm9, %vm2628_vm15  ;;  %vm2685_vm9 = vcmp.eq.s32.totalorder %v10416_v44, %v11655_v4  ;;  %vm818_vm8 = vcmp.eq.s32.totalorder %v10416_v44, %v9987_v50 }
 0x1a0   :  { %8819 = vmatprep.subr.msk.bf16.mxu0 %vm8818_vm5, %v15749_v62  ;;  %vm12775_vm0 = vmpackc.low %vm2652_vm3, %vm2636_vm11  ;;  %vm2669_vm5 = vcmp.eq.s32.totalorder %v10413_v43, %v11655_v4  ;;  %vm802_vm3 = vcmp.eq.s32.totalorder %v10413_v43, %v9987_v50 }
 0x1a1   :  { %vm12783_vm15 = vmpackc.low %vm819_vm14, %vm803_vm2  ;;  %vm810_vm14 = vcmp.eq.s32.totalorder %v10413_v43, %v10011_v58 }
 0x1a2   :  { %vm12791_vm11 = vmpackc.low %vm827_vm12, %vm811_vm10  ;;  %vm826_vm10 = vcmp.eq.s32.totalorder %v10416_v44, %v10011_v58 }
 0x1a3   :  { %v16127_v2 = vsel %vm12791_vm11, 4294967295, %v16126_v2  ;;  %vm8310_vm2 = vmpackc.low %vm2677_vm13, %vm2661_vm6  ;;  %vm2660_vm11 = vcmp.eq.s32.totalorder %v10413_v43, %v11705_v56  ;;  %vm2684_vm6 = vcmp.eq.s32.totalorder %v10416_v44, %v11717_v0 }
 0x1a4   :  { %8245 = vmatmul.mubr.msk.bf16.gmra.mrb[52].mxu1 %vm12746_vm1, %v15749_v62  ;;  %vm8822_vm12 = vmpackc.low %vm2685_vm9, %vm2669_vm5  ;;  %vm2676_vm1 = vcmp.eq.s32.totalorder %v10416_v44, %v11705_v56  ;;  %vm16130_vm13 = vnez %v16127_v2  ;;  %vm851_vm5 = vcmp.eq.s32.totalorder %v10442_v46, %v9990_v51  ;;  %v16342_v2 = vmov 0 }
 0x1a5   :  { %8757 = vmatmul.mubr.msk.bf16.gmra.mrb[52].mxu0 %vm12758_vm7, %v15749_v62  ;;  %8309 = vmatpush1.bf16.xpose.msk.msra.mxu1 %vm12767_vm4, %v15749_v62  ;;  %vm12822_vm7 = vmpackc.low %vm818_vm8, %vm802_vm3  ;;  %vm2668_vm4 = vcmp.eq.s32.totalorder %v10413_v43, %v11717_v0  ;;  %vm843_vm3 = vcmp.eq.s32.totalorder %v10439_v45, %v10014_v59  ;;  %vm859_vm8 = vcmp.eq.s32.totalorder %v10442_v46, %v10014_v59 }
 0x1a6   :  { %8821 = vmatpush1.bf16.xpose.msk.msra.mxu0 %vm12775_vm0, %v15749_v62  ;;  %8247 = vmatprep.mubr.msk.bf16.mxu1 %vm12783_vm15, %v15749_v62  ;;  %vm12834_vm0 = vmpackc.low %vm826_vm10, %vm810_vm14  ;;  %vm835_vm15 = vcmp.eq.s32.totalorder %v10439_v45, %v9990_v51  ;;  %vm2693_vm14 = vcmp.eq.s32.totalorder %v10439_v45, %v11641_v33  ;;  %vm2709_vm10 = vcmp.eq.s32.totalorder %v10442_v46, %v11641_v33  ;;  %v16179_v51 = vmov 0 }
 0x1a7   :  { %8759 = vmatprep.mubr.msk.bf16.mxu0 %vm16130_vm13, %v15749_v62  ;;  %8311 = vmatprep.subr.msk.bf16.mxu1 %vm8310_vm2, %v15749_v62  ;;  %vm12843_vm9 = vmpackc.low %vm2676_vm1, %vm2660_vm11  ;;  %vm2717_vm1 = vcmp.eq.s32.totalorder %v10442_v46, %v11655_v4  ;;  %vm850_vm13 = vcmp.eq.s32.totalorder %v10442_v46, %v9987_v50  ;;  %v16270_v33 = vmov 0 }
 0x1a8   :  { %8823 = vmatprep.subr.msk.bf16.mxu0 %vm8822_vm12, %v15749_v62  ;;  %vm12851_vm2 = vmpackc.low %vm2684_vm6, %vm2668_vm4  ;;  %vm2701_vm12 = vcmp.eq.s32.totalorder %v10439_v45, %v11655_v4  ;;  %vm834_vm6 = vcmp.eq.s32.totalorder %v10439_v45, %v9987_v50  ;;  %v12888_v4 = vrot.slane %v9957_v32, %v9955_v31  ;;  %v16231_v31 = vmov 0 }
 0x1a9   :  { %vm12859_vm11 = vmpackc.low %vm851_vm5, %vm835_vm15  ;;  %vm842_vm5 = vcmp.eq.s32.totalorder %v10439_v45, %v10011_v58 }
 0x1aa   :  { %vm12867_vm4 = vmpackc.low %vm859_vm8, %vm843_vm3  ;;  %vm858_vm3 = vcmp.eq.s32.totalorder %v10442_v46, %v10011_v58  ;;  %vm2692_vm8 = vcmp.eq.s32.totalorder %v10439_v45, %v11705_v56  ;;  %v12952_v58 = vrot.slane %v9957_v32, %v9952_v30  ;;  %v16153_v32 = vmov 0 }
 0x1ab   :  { %vm12878_vm15 = vmpackc.low %vm2709_vm10, %vm2693_vm14  ;;  %vm2708_vm14 = vcmp.eq.s32.totalorder %v10442_v46, %v11705_v56  ;;  %vm2716_vm10 = vcmp.eq.s32.totalorder %v10442_v46, %v11717_v0  ;;  %v16192_v56 = vmov 0 }
 0x1ac   :  { %8249 = vmatmul.mubr.msk.bf16.gmra.mrb[56].mxu1 %vm12822_vm7, %v15749_v62  ;;  %vm8826_vm7 = vmpackc.low %vm2717_vm1, %vm2701_vm12  ;;  %vm373_vm12 = vcmp.eq.s32.totalorder %v10033_v1, %v9996_v53 }
 0x1ad   :  { %8761 = vmatmul.mubr.msk.bf16.gmra.mrb[56].mxu0 %vm12834_vm0, %v15749_v62  ;;  %8313 = vmatpush1.bf16.xpose.msk.msra.mxu1 %vm12843_vm9, %v15749_v62  ;;  %vm12913_vm0 = vmpackc.low %vm850_vm13, %vm834_vm6  ;;  %vm2700_vm9 = vcmp.eq.s32.totalorder %v10439_v45, %v11717_v0  ;;  %vm381_vm6 = vcmp.eq.s32.totalorder %v10033_v1, %v10020_v61  ;;  %v12964_v0 = vrot.slane %v9981_v48, %v9952_v30  ;;  %v16244_v48 = vmov 0 }
 0x1ae   :  { %8825 = vmatpush1.bf16.xpose.msk.msra.mxu0 %vm12851_vm2, %v15749_v62  ;;  %8251 = vmatprep.mubr.msk.bf16.mxu1 %vm12859_vm11, %v15749_v62  ;;  %vm12933_vm2 = vmpackc.low %vm858_vm3, %vm842_vm5  ;;  %vm357_vm11 = vcmp.eq.s32.totalorder %v9929_v13, %v9996_v53  ;;  %vm2231_vm5 = vcmp.eq.s32.totalorder %v10033_v1, %v12888_v4 }
 0x1af   :  { %8763 = vmatprep.mubr.msk.bf16.mxu0 %vm12867_vm4, %v15749_v62  ;;  %8315 = vmatprep.subr.msk.bf16.mxu1 %vm12878_vm15, %v15749_v62  ;;  %vm12942_vm1 = vmpackc.low %vm2708_vm14, %vm2692_vm8  ;;  %vm365_vm4 = vcmp.eq.s32.totalorder %v9929_v13, %v10020_v61  ;;  %vm2215_vm15 = vcmp.eq.s32.totalorder %v9929_v13, %v12888_v4  ;;  %vm2239_vm8 = vcmp.eq.s32.totalorder %v10033_v1, %v12902_v57 }
 0x1b0   :  { %8827 = vmatprep.subr.msk.bf16.mxu0 %vm8826_vm7, %v15749_v62  ;;  %vm12954_vm13 = vmpackc.low %vm2716_vm10, %vm2700_vm9  ;;  %vm2223_vm7 = vcmp.eq.s32.totalorder %v9929_v13, %v12902_v57  ;;  %vm356_vm9 = vcmp.eq.s32.totalorder %v9929_v13, %v9993_v52  ;;  %vm372_vm10 = vcmp.eq.s32.totalorder %v10033_v1, %v9993_v52 }
 0x1b1   :  { %vm12966_vm3 = vmpackc.low %vm373_vm12, %vm357_vm11  ;;  %vm364_vm12 = vcmp.eq.s32.totalorder %v9929_v13, %v10017_v60 }
 0x1b2   :  { %vm12974_vm14 = vmpackc.low %vm381_vm6, %vm365_vm4  ;;  %vm380_vm4 = vcmp.eq.s32.totalorder %v10033_v1, %v10017_v60 }
 0x1b3   :  { %v16154_v32 = vsel %vm12974_vm14, 4294967295, %v16153_v32  ;;  %vm8382_vm11 = vmpackc.low %vm2231_vm5, %vm2215_vm15  ;;  %vm2214_vm14 = vcmp.eq.s32.totalorder %v9929_v13, %v12952_v58  ;;  %vm2238_vm15 = vcmp.eq.s32.totalorder %v10033_v1, %v12964_v0 }
 0x1b4   :  { %8253 = vmatmul.mubr.msk.bf16.gmra.mrb[60].mxu1 %vm12913_vm0, %v15749_v62  ;;  %vm8894_vm6 = vmpackc.low %vm2239_vm8, %vm2223_vm7  ;;  %vm2230_vm0 = vcmp.eq.s32.totalorder %v10033_v1, %v12952_v58  ;;  %vm16157_vm5 = vnez %v16154_v32  ;;  %vm405_vm7 = vcmp.eq.s32.totalorder %v10051_v6, %v9996_v53  ;;  %v16283_v32 = vmov 0 }
 0x1b5   :  { %8765 = vmatmul.mubr.msk.bf16.gmra.mrb[60].mxu0 %vm12933_vm2, %v15749_v62  ;;  %8317 = vmatpush1.bf16.xpose.msk.msra.mxu1 %vm12942_vm1, %v15749_v62  ;;  %vm13005_vm2 = vmpackc.low %vm372_vm10, %vm356_vm9  ;;  %vm2222_vm1 = vcmp.eq.s32.totalorder %v9929_v13, %v12964_v0  ;;  %vm397_vm9 = vcmp.eq.s32.totalorder %v10048_v5, %v10020_v61  ;;  %vm413_vm10 = vcmp.eq.s32.totalorder %v10051_v6, %v10020_v61 }
 0x1b6   :  { %8829 = vmatpush1.bf16.xpose.msk.msra.mxu0 %vm12954_vm13, %v15749_v62  ;;  %8319 = vmatprep.mubr.msk.bf16.mxu1 %vm12966_vm3, %v15749_v62  ;;  %vm13017_vm13 = vmpackc.low %vm380_vm4, %vm364_vm12  ;;  %vm389_vm3 = vcmp.eq.s32.totalorder %v10048_v5, %v9996_v53  ;;  %vm2247_vm12 = vcmp.eq.s32.totalorder %v10048_v5, %v12888_v4  ;;  %vm2263_vm4 = vcmp.eq.s32.totalorder %v10051_v6, %v12888_v4 }
 0x1b7   :  { %8831 = vmatprep.mubr.msk.bf16.mxu0 %vm16157_vm5, %v15749_v62  ;;  %8383 = vmatprep.subr.msk.bf16.mxu1 %vm8382_vm11, %v15749_v62  ;;  %vm13026_vm8 = vmpackc.low %vm2230_vm0, %vm2214_vm14  ;;  %vm2271_vm0 = vcmp.eq.s32.totalorder %v10051_v6, %v12902_v57  ;;  %vm404_vm5 = vcmp.eq.s32.totalorder %v10051_v6, %v9993_v52 }
 0x1b8   :  { %8895 = vmatprep.subr.msk.bf16.mxu0 %vm8894_vm6, %v15749_v62  ;;  %vm13034_vm11 = vmpackc.low %vm2238_vm15, %vm2222_vm1  ;;  %vm2255_vm6 = vcmp.eq.s32.totalorder %v10048_v5, %v12902_v57  ;;  %vm388_vm15 = vcmp.eq.s32.totalorder %v10048_v5, %v9993_v52 }
 0x1b9   :  { %vm13042_vm14 = vmpackc.low %vm405_vm7, %vm389_vm3  ;;  %vm396_vm7 = vcmp.eq.s32.totalorder %v10048_v5, %v10017_v60 }
 0x1ba   :  { %vm13050_vm1 = vmpackc.low %vm413_vm10, %vm397_vm9  ;;  %vm412_vm9 = vcmp.eq.s32.totalorder %v10051_v6, %v10017_v60 }
 0x1bb   :  { %v16167_v23 = vsel %vm13050_vm1, 4294967295, %v16166_v23  ;;  %vm8386_vm3 = vmpackc.low %vm2263_vm4, %vm2247_vm12  ;;  %vm2246_vm1 = vcmp.eq.s32.totalorder %v10048_v5, %v12952_v58  ;;  %vm2270_vm12 = vcmp.eq.s32.totalorder %v10051_v6, %v12964_v0 }
 0x1bc   :  { %8321 = vmatmul.mubr.msk.bf16.vlgmr.msra.gmra.mrb[0].mxu1 %vm13005_vm2, %v15749_v62  ;;  %vm8898_vm10 = vmpackc.low %vm2271_vm0, %vm2255_vm6  ;;  %vm2262_vm2 = vcmp.eq.s32.totalorder %v10051_v6, %v12952_v58  ;;  %vm16170_vm4 = vnez %v16167_v23  ;;  %vm437_vm6 = vcmp.eq.s32.totalorder %v10083_v9, %v9996_v53  ;;  %v16296_v23 = vmov 0 }
 0x1bd   :  { %8833 = vmatmul.mubr.msk.bf16.vlgmr.msra.gmra.mrb[0].mxu0 %vm13017_vm13, %v15749_v62  ;;  %8385 = vmatpush1.bf16.xpose.msk.msra.mxu1 %vm13026_vm8, %v15749_v62  ;;  %vm13081_vm13 = vmpackc.low %vm404_vm5, %vm388_vm15  ;;  %vm2254_vm8 = vcmp.eq.s32.totalorder %v10048_v5, %v12964_v0  ;;  %vm429_vm15 = vcmp.eq.s32.totalorder %v10080_v8, %v10020_v61  ;;  %vm445_vm5 = vcmp.eq.s32.totalorder %v10083_v9, %v10020_v61 }
 0x1be   :  { %8897 = vmatpush1.bf16.xpose.msk.msra.mxu0 %vm13034_vm11, %v15749_v62  ;;  %8323 = vmatprep.mubr.msk.bf16.mxu1 %vm13042_vm14, %v15749_v62  ;;  %vm13093_vm11 = vmpackc.low %vm412_vm9, %vm396_vm7  ;;  %vm421_vm14 = vcmp.eq.s32.totalorder %v10080_v8, %v9996_v53  ;;  %vm2279_vm7 = vcmp.eq.s32.totalorder %v10080_v8, %v12888_v4  ;;  %vm2295_vm9 = vcmp.eq.s32.totalorder %v10083_v9, %v12888_v4 }
 0x1bf   :  { %8835 = vmatprep.mubr.msk.bf16.mxu0 %vm16170_vm4, %v15749_v62  ;;  %8387 = vmatprep.subr.msk.bf16.mxu1 %vm8386_vm3, %v15749_v62  ;;  %vm13102_vm0 = vmpackc.low %vm2262_vm2, %vm2246_vm1  ;;  %vm2303_vm2 = vcmp.eq.s32.totalorder %v10083_v9, %v12902_v57  ;;  %vm436_vm4 = vcmp.eq.s32.totalorder %v10083_v9, %v9993_v52 }
 0x1c0   :  { %8899 = vmatprep.subr.msk.bf16.mxu0 %vm8898_vm10, %v15749_v62  ;;  %vm13110_vm3 = vmpackc.low %vm2270_vm12, %vm2254_vm8  ;;  %vm2287_vm10 = vcmp.eq.s32.totalorder %v10080_v8, %v12902_v57  ;;  %vm420_vm12 = vcmp.eq.s32.totalorder %v10080_v8, %v9993_v52 }
 0x1c1   :  { %vm13118_vm1 = vmpackc.low %vm437_vm6, %vm421_vm14  ;;  %vm428_vm6 = vcmp.eq.s32.totalorder %v10080_v8, %v10017_v60 }
 0x1c2   :  { %vm13126_vm8 = vmpackc.low %vm445_vm5, %vm429_vm15  ;;  %vm444_vm15 = vcmp.eq.s32.totalorder %v10083_v9, %v10017_v60 }
 0x1c3   :  { %v16180_v51 = vsel %vm13126_vm8, 4294967295, %v16179_v51  ;;  %vm8390_vm14 = vmpackc.low %vm2295_vm9, %vm2279_vm7  ;;  %vm2278_vm8 = vcmp.eq.s32.totalorder %v10080_v8, %v12952_v58  ;;  %vm2302_vm7 = vcmp.eq.s32.totalorder %v10083_v9, %v12964_v0 }
 0x1c4   :  { %8325 = vmatmul.mubr.msk.bf16.gmra.mrb[4].mxu1 %vm13081_vm13, %v15749_v62  ;;  %vm8902_vm5 = vmpackc.low %vm2303_vm2, %vm2287_vm10  ;;  %vm2294_vm13 = vcmp.eq.s32.totalorder %v10083_v9, %v12952_v58  ;;  %vm16183_vm9 = vnez %v16180_v51  ;;  %vm469_vm10 = vcmp.eq.s32.totalorder %v10109_v11, %v9996_v53  ;;  %v16309_v51 = vmov 0 }
 0x1c5   :  { %8837 = vmatmul.mubr.msk.bf16.gmra.mrb[4].mxu0 %vm13093_vm11, %v15749_v62  ;;  %8389 = vmatpush1.bf16.xpose.msk.msra.mxu1 %vm13102_vm0, %v15749_v62  ;;  %vm13157_vm11 = vmpackc.low %vm436_vm4, %vm420_vm12  ;;  %vm2286_vm0 = vcmp.eq.s32.totalorder %v10080_v8, %v12964_v0  ;;  %vm461_vm12 = vcmp.eq.s32.totalorder %v10106_v10, %v10020_v61  ;;  %vm477_vm4 = vcmp.eq.s32.totalorder %v10109_v11, %v10020_v61 }
 0x1c6   :  { %8901 = vmatpush1.bf16.xpose.msk.msra.mxu0 %vm13110_vm3, %v15749_v62  ;;  %8327 = vmatprep.mubr.msk.bf16.mxu1 %vm13118_vm1, %v15749_v62  ;;  %vm13169_vm3 = vmpackc.low %vm444_vm15, %vm428_vm6  ;;  %vm453_vm1 = vcmp.eq.s32.totalorder %v10106_v10, %v9996_v53  ;;  %vm2311_vm6 = vcmp.eq.s32.totalorder %v10106_v10, %v12888_v4  ;;  %vm2327_vm15 = vcmp.eq.s32.totalorder %v10109_v11, %v12888_v4 }
 0x1c7   :  { %8839 = vmatprep.mubr.msk.bf16.mxu0 %vm16183_vm9, %v15749_v62  ;;  %8391 = vmatprep.subr.msk.bf16.mxu1 %vm8390_vm14, %v15749_v62  ;;  %vm13178_vm2 = vmpackc.low %vm2294_vm13, %vm2278_vm8  ;;  %vm2335_vm13 = vcmp.eq.s32.totalorder %v10109_v11, %v12902_v57  ;;  %vm468_vm9 = vcmp.eq.s32.totalorder %v10109_v11, %v9993_v52 }
 0x1c8   :  { %8903 = vmatprep.subr.msk.bf16.mxu0 %vm8902_vm5, %v15749_v62  ;;  %vm13186_vm14 = vmpackc.low %vm2302_vm7, %vm2286_vm0  ;;  %vm2319_vm5 = vcmp.eq.s32.totalorder %v10106_v10, %v12902_v57  ;;  %vm452_vm7 = vcmp.eq.s32.totalorder %v10106_v10, %v9993_v52 }
 0x1c9   :  { %vm13194_vm8 = vmpackc.low %vm469_vm10, %vm453_vm1  ;;  %vm460_vm10 = vcmp.eq.s32.totalorder %v10106_v10, %v10017_v60 }
 0x1ca   :  { %vm13202_vm0 = vmpackc.low %vm477_vm4, %vm461_vm12  ;;  %vm476_vm12 = vcmp.eq.s32.totalorder %v10109_v11, %v10017_v60 }
 0x1cb   :  { %v16193_v56 = vsel %vm13202_vm0, 4294967295, %v16192_v56  ;;  %vm8394_vm1 = vmpackc.low %vm2327_vm15, %vm2311_vm6  ;;  %vm2310_vm0 = vcmp.eq.s32.totalorder %v10106_v10, %v12952_v58  ;;  %vm2334_vm6 = vcmp.eq.s32.totalorder %v10109_v11, %v12964_v0 }
 0x1cc   :  { %8329 = vmatmul.mubr.msk.bf16.gmra.mrb[8].mxu1 %vm13157_vm11, %v15749_v62  ;;  %vm8906_vm4 = vmpackc.low %vm2335_vm13, %vm2319_vm5  ;;  %vm2326_vm11 = vcmp.eq.s32.totalorder %v10109_v11, %v12952_v58  ;;  %vm16196_vm15 = vnez %v16193_v56  ;;  %vm501_vm5 = vcmp.eq.s32.totalorder %v10135_v14, %v9996_v53  ;;  %v16322_v56 = vmov 0 }
 0x1cd   :  { %8841 = vmatmul.mubr.msk.bf16.gmra.mrb[8].mxu0 %vm13169_vm3, %v15749_v62  ;;  %8393 = vmatpush1.bf16.xpose.msk.msra.mxu1 %vm13178_vm2, %v15749_v62  ;;  %vm13233_vm3 = vmpackc.low %vm468_vm9, %vm452_vm7  ;;  %vm2318_vm2 = vcmp.eq.s32.totalorder %v10106_v10, %v12964_v0  ;;  %vm493_vm7 = vcmp.eq.s32.totalorder %v10132_v12, %v10020_v61  ;;  %vm509_vm9 = vcmp.eq.s32.totalorder %v10135_v14, %v10020_v61 }
 0x1ce   :  { %8905 = vmatpush1.bf16.xpose.msk.msra.mxu0 %vm13186_vm14, %v15749_v62  ;;  %8331 = vmatprep.mubr.msk.bf16.mxu1 %vm13194_vm8, %v15749_v62  ;;  %vm13245_vm14 = vmpackc.low %vm476_vm12, %vm460_vm10  ;;  %vm485_vm8 = vcmp.eq.s32.totalorder %v10132_v12, %v9996_v53  ;;  %vm2343_vm10 = vcmp.eq.s32.totalorder %v10132_v12, %v12888_v4  ;;  %vm2359_vm12 = vcmp.eq.s32.totalorder %v10135_v14, %v12888_v4 }
 0x1cf   :  { %8843 = vmatprep.mubr.msk.bf16.mxu0 %vm16196_vm15, %v15749_v62  ;;  %8395 = vmatprep.subr.msk.bf16.mxu1 %vm8394_vm1, %v15749_v62  ;;  %vm13254_vm13 = vmpackc.low %vm2326_vm11, %vm2310_vm0  ;;  %vm2367_vm11 = vcmp.eq.s32.totalorder %v10135_v14, %v12902_v57  ;;  %vm500_vm15 = vcmp.eq.s32.totalorder %v10135_v14, %v9993_v52 }
 0x1d0   :  { %8907 = vmatprep.subr.msk.bf16.mxu0 %vm8906_vm4, %v15749_v62  ;;  %vm13262_vm1 = vmpackc.low %vm2334_vm6, %vm2318_vm2  ;;  %vm2351_vm4 = vcmp.eq.s32.totalorder %v10132_v12, %v12902_v57  ;;  %vm484_vm6 = vcmp.eq.s32.totalorder %v10132_v12, %v9993_v52 }
 0x1d1   :  { %vm13270_vm0 = vmpackc.low %vm501_vm5, %vm485_vm8  ;;  %vm492_vm5 = vcmp.eq.s32.totalorder %v10132_v12, %v10017_v60 }
 0x1d2   :  { %vm13278_vm2 = vmpackc.low %vm509_vm9, %vm493_vm7  ;;  %vm508_vm7 = vcmp.eq.s32.totalorder %v10135_v14, %v10017_v60 }
 0x1d3   :  { %v16206_v49 = vsel %vm13278_vm2, 4294967295, %v16205_v49  ;;  %vm8398_vm8 = vmpackc.low %vm2359_vm12, %vm2343_vm10  ;;  %vm2342_vm2 = vcmp.eq.s32.totalorder %v10132_v12, %v12952_v58  ;;  %vm2366_vm10 = vcmp.eq.s32.totalorder %v10135_v14, %v12964_v0 }
 0x1d4   :  { %8333 = vmatmul.mubr.msk.bf16.gmra.mrb[12].mxu1 %vm13233_vm3, %v15749_v62  ;;  %vm8910_vm9 = vmpackc.low %vm2367_vm11, %vm2351_vm4  ;;  %vm2358_vm3 = vcmp.eq.s32.totalorder %v10135_v14, %v12952_v58  ;;  %vm16209_vm12 = vnez %v16206_v49  ;;  %vm533_vm4 = vcmp.eq.s32.totalorder %v10161_v16, %v9996_v53  ;;  %v16335_v49 = vmov 0 }
 0x1d5   :  { %8845 = vmatmul.mubr.msk.bf16.gmra.mrb[12].mxu0 %vm13245_vm14, %v15749_v62  ;;  %8397 = vmatpush1.bf16.xpose.msk.msra.mxu1 %vm13254_vm13, %v15749_v62  ;;  %vm13309_vm14 = vmpackc.low %vm500_vm15, %vm484_vm6  ;;  %vm2350_vm13 = vcmp.eq.s32.totalorder %v10132_v12, %v12964_v0  ;;  %vm525_vm6 = vcmp.eq.s32.totalorder %v10158_v15, %v10020_v61  ;;  %vm541_vm15 = vcmp.eq.s32.totalorder %v10161_v16, %v10020_v61 }
 0x1d6   :  { %8909 = vmatpush1.bf16.xpose.msk.msra.mxu0 %vm13262_vm1, %v15749_v62  ;;  %8335 = vmatprep.mubr.msk.bf16.mxu1 %vm13270_vm0, %v15749_v62  ;;  %vm13321_vm1 = vmpackc.low %vm508_vm7, %vm492_vm5  ;;  %vm517_vm0 = vcmp.eq.s32.totalorder %v10158_v15, %v9996_v53  ;;  %vm2375_vm5 = vcmp.eq.s32.totalorder %v10158_v15, %v12888_v4  ;;  %vm2391_vm7 = vcmp.eq.s32.totalorder %v10161_v16, %v12888_v4 }
 0x1d7   :  { %8847 = vmatprep.mubr.msk.bf16.mxu0 %vm16209_vm12, %v15749_v62  ;;  %8399 = vmatprep.subr.msk.bf16.mxu1 %vm8398_vm8, %v15749_v62  ;;  %vm13330_vm11 = vmpackc.low %vm2358_vm3, %vm2342_vm2  ;;  %vm2399_vm3 = vcmp.eq.s32.totalorder %v10161_v16, %v12902_v57  ;;  %vm532_vm12 = vcmp.eq.s32.totalorder %v10161_v16, %v9993_v52 }
 0x1d8   :  { %8911 = vmatprep.subr.msk.bf16.mxu0 %vm8910_vm9, %v15749_v62  ;;  %vm13338_vm8 = vmpackc.low %vm2366_vm10, %vm2350_vm13  ;;  %vm2383_vm9 = vcmp.eq.s32.totalorder %v10158_v15, %v12902_v57  ;;  %vm516_vm10 = vcmp.eq.s32.totalorder %v10158_v15, %v9993_v52 }
 0x1d9   :  { %vm13346_vm2 = vmpackc.low %vm533_vm4, %vm517_vm0  ;;  %vm524_vm4 = vcmp.eq.s32.totalorder %v10158_v15, %v10017_v60 }
 0x1da   :  { %vm13354_vm13 = vmpackc.low %vm541_vm15, %vm525_vm6  ;;  %vm540_vm6 = vcmp.eq.s32.totalorder %v10161_v16, %v10017_v60 }
 0x1db   :  { %v16219_v7 = vsel %vm13354_vm13, 4294967295, %v16218_v7  ;;  %vm8402_vm0 = vmpackc.low %vm2391_vm7, %vm2375_vm5  ;;  %vm2374_vm13 = vcmp.eq.s32.totalorder %v10158_v15, %v12952_v58  ;;  %vm2398_vm5 = vcmp.eq.s32.totalorder %v10161_v16, %v12964_v0 }
 0x1dc   :  { %8337 = vmatmul.mubr.msk.bf16.gmra.mrb[16].mxu1 %vm13309_vm14, %v15749_v62  ;;  %vm8914_vm15 = vmpackc.low %vm2399_vm3, %vm2383_vm9  ;;  %vm2390_vm14 = vcmp.eq.s32.totalorder %v10161_v16, %v12952_v58  ;;  %vm16222_vm7 = vnez %v16219_v7  ;;  %vm565_vm9 = vcmp.eq.s32.totalorder %v10187_v18, %v9996_v53 }
 0x1dd   :  { %8849 = vmatmul.mubr.msk.bf16.gmra.mrb[16].mxu0 %vm13321_vm1, %v15749_v62  ;;  %8401 = vmatpush1.bf16.xpose.msk.msra.mxu1 %vm13330_vm11, %v15749_v62  ;;  %vm13385_vm1 = vmpackc.low %vm532_vm12, %vm516_vm10  ;;  %vm2382_vm11 = vcmp.eq.s32.totalorder %v10158_v15, %v12964_v0  ;;  %vm557_vm10 = vcmp.eq.s32.totalorder %v10184_v17, %v10020_v61  ;;  %vm573_vm12 = vcmp.eq.s32.totalorder %v10187_v18, %v10020_v61 }
 0x1de   :  { %8913 = vmatpush1.bf16.xpose.msk.msra.mxu0 %vm13338_vm8, %v15749_v62  ;;  %8339 = vmatprep.mubr.msk.bf16.mxu1 %vm13346_vm2, %v15749_v62  ;;  %vm13397_vm8 = vmpackc.low %vm540_vm6, %vm524_vm4  ;;  %vm549_vm2 = vcmp.eq.s32.totalorder %v10184_v17, %v9996_v53  ;;  %vm2407_vm4 = vcmp.eq.s32.totalorder %v10184_v17, %v12888_v4  ;;  %vm2423_vm6 = vcmp.eq.s32.totalorder %v10187_v18, %v12888_v4 }
 0x1df   :  { %8851 = vmatprep.mubr.msk.bf16.mxu0 %vm16222_vm7, %v15749_v62  ;;  %8403 = vmatprep.subr.msk.bf16.mxu1 %vm8402_vm0, %v15749_v62  ;;  %vm13406_vm3 = vmpackc.low %vm2390_vm14, %vm2374_vm13  ;;  %vm2431_vm14 = vcmp.eq.s32.totalorder %v10187_v18, %v12902_v57  ;;  %vm564_vm7 = vcmp.eq.s32.totalorder %v10187_v18, %v9993_v52 }
 0x1e0   :  { %8915 = vmatprep.subr.msk.bf16.mxu0 %vm8914_vm15, %v15749_v62  ;;  %vm13414_vm0 = vmpackc.low %vm2398_vm5, %vm2382_vm11  ;;  %vm2415_vm15 = vcmp.eq.s32.totalorder %v10184_v17, %v12902_v57  ;;  %vm548_vm5 = vcmp.eq.s32.totalorder %v10184_v17, %v9993_v52 }
 0x1e1   :  { %vm13422_vm13 = vmpackc.low %vm565_vm9, %vm549_vm2  ;;  %vm556_vm9 = vcmp.eq.s32.totalorder %v10184_v17, %v10017_v60 }
 0x1e2   :  { %vm13430_vm11 = vmpackc.low %vm573_vm12, %vm557_vm10  ;;  %vm572_vm10 = vcmp.eq.s32.totalorder %v10187_v18, %v10017_v60 }
 0x1e3   :  { %v16232_v31 = vsel %vm13430_vm11, 4294967295, %v16231_v31  ;;  %vm8406_vm2 = vmpackc.low %vm2423_vm6, %vm2407_vm4  ;;  %vm2406_vm11 = vcmp.eq.s32.totalorder %v10184_v17, %v12952_v58  ;;  %vm2430_vm4 = vcmp.eq.s32.totalorder %v10187_v18, %v12964_v0 }
 0x1e4   :  { %8341 = vmatmul.mubr.msk.bf16.gmra.mrb[20].mxu1 %vm13385_vm1, %v15749_v62  ;;  %vm8918_vm12 = vmpackc.low %vm2431_vm14, %vm2415_vm15  ;;  %vm2422_vm1 = vcmp.eq.s32.totalorder %v10187_v18, %v12952_v58  ;;  %vm16235_vm6 = vnez %v16232_v31  ;;  %vm597_vm15 = vcmp.eq.s32.totalorder %v10213_v20, %v9996_v53 }
 0x1e5   :  { %8853 = vmatmul.mubr.msk.bf16.gmra.mrb[20].mxu0 %vm13397_vm8, %v15749_v62  ;;  %8405 = vmatpush1.bf16.xpose.msk.msra.mxu1 %vm13406_vm3, %v15749_v62  ;;  %vm13461_vm8 = vmpackc.low %vm564_vm7, %vm548_vm5  ;;  %vm2414_vm3 = vcmp.eq.s32.totalorder %v10184_v17, %v12964_v0  ;;  %vm589_vm5 = vcmp.eq.s32.totalorder %v10210_v19, %v10020_v61  ;;  %vm605_vm7 = vcmp.eq.s32.totalorder %v10213_v20, %v10020_v61 }
 0x1e6   :  { %8917 = vmatpush1.bf16.xpose.msk.msra.mxu0 %vm13414_vm0, %v15749_v62  ;;  %8343 = vmatprep.mubr.msk.bf16.mxu1 %vm13422_vm13, %v15749_v62  ;;  %vm13473_vm0 = vmpackc.low %vm572_vm10, %vm556_vm9  ;;  %vm581_vm13 = vcmp.eq.s32.totalorder %v10210_v19, %v9996_v53  ;;  %vm2439_vm9 = vcmp.eq.s32.totalorder %v10210_v19, %v12888_v4  ;;  %vm2455_vm10 = vcmp.eq.s32.totalorder %v10213_v20, %v12888_v4 }
 0x1e7   :  { %8855 = vmatprep.mubr.msk.bf16.mxu0 %vm16235_vm6, %v15749_v62  ;;  %8407 = vmatprep.subr.msk.bf16.mxu1 %vm8406_vm2, %v15749_v62  ;;  %vm13482_vm14 = vmpackc.low %vm2422_vm1, %vm2406_vm11  ;;  %vm2463_vm1 = vcmp.eq.s32.totalorder %v10213_v20, %v12902_v57  ;;  %vm596_vm6 = vcmp.eq.s32.totalorder %v10213_v20, %v9993_v52 }
 0x1e8   :  { %8919 = vmatprep.subr.msk.bf16.mxu0 %vm8918_vm12, %v15749_v62  ;;  %vm13490_vm2 = vmpackc.low %vm2430_vm4, %vm2414_vm3  ;;  %vm2447_vm12 = vcmp.eq.s32.totalorder %v10210_v19, %v12902_v57  ;;  %vm580_vm4 = vcmp.eq.s32.totalorder %v10210_v19, %v9993_v52 }
 0x1e9   :  { %vm13498_vm11 = vmpackc.low %vm597_vm15, %vm581_vm13  ;;  %vm588_vm15 = vcmp.eq.s32.totalorder %v10210_v19, %v10017_v60 }
 0x1ea   :  { %vm13506_vm3 = vmpackc.low %vm605_vm7, %vm589_vm5  ;;  %vm604_vm5 = vcmp.eq.s32.totalorder %v10213_v20, %v10017_v60 }
 0x1eb   :  { %v16245_v48 = vsel %vm13506_vm3, 4294967295, %v16244_v48  ;;  %vm8410_vm13 = vmpackc.low %vm2455_vm10, %vm2439_vm9  ;;  %vm2438_vm3 = vcmp.eq.s32.totalorder %v10210_v19, %v12952_v58  ;;  %vm2462_vm9 = vcmp.eq.s32.totalorder %v10213_v20, %v12964_v0 }
 0x1ec   :  { %8345 = vmatmul.mubr.msk.bf16.gmra.mrb[24].mxu1 %vm13461_vm8, %v15749_v62  ;;  %vm8922_vm7 = vmpackc.low %vm2463_vm1, %vm2447_vm12  ;;  %vm2454_vm8 = vcmp.eq.s32.totalorder %v10213_v20, %v12952_v58  ;;  %vm16248_vm10 = vnez %v16245_v48  ;;  %vm629_vm12 = vcmp.eq.s32.totalorder %v10239_v28, %v9996_v53 }
 0x1ed   :  { %8857 = vmatmul.mubr.msk.bf16.gmra.mrb[24].mxu0 %vm13473_vm0, %v15749_v62  ;;  %8409 = vmatpush1.bf16.xpose.msk.msra.mxu1 %vm13482_vm14, %v15749_v62  ;;  %vm13537_vm0 = vmpackc.low %vm596_vm6, %vm580_vm4  ;;  %vm2446_vm14 = vcmp.eq.s32.totalorder %v10210_v19, %v12964_v0  ;;  %vm621_vm4 = vcmp.eq.s32.totalorder %v10236_v25, %v10020_v61  ;;  %vm637_vm6 = vcmp.eq.s32.totalorder %v10239_v28, %v10020_v61 }
 0x1ee   :  { %8921 = vmatpush1.bf16.xpose.msk.msra.mxu0 %vm13490_vm2, %v15749_v62  ;;  %8347 = vmatprep.mubr.msk.bf16.mxu1 %vm13498_vm11, %v15749_v62  ;;  %vm13549_vm2 = vmpackc.low %vm604_vm5, %vm588_vm15  ;;  %vm613_vm11 = vcmp.eq.s32.totalorder %v10236_v25, %v9996_v53  ;;  %vm2471_vm15 = vcmp.eq.s32.totalorder %v10236_v25, %v12888_v4  ;;  %vm2487_vm5 = vcmp.eq.s32.totalorder %v10239_v28, %v12888_v4 }
 0x1ef   :  { %8859 = vmatprep.mubr.msk.bf16.mxu0 %vm16248_vm10, %v15749_v62  ;;  %8411 = vmatprep.subr.msk.bf16.mxu1 %vm8410_vm13, %v15749_v62  ;;  %vm13558_vm1 = vmpackc.low %vm2454_vm8, %vm2438_vm3  ;;  %vm2495_vm8 = vcmp.eq.s32.totalorder %v10239_v28, %v12902_v57  ;;  %vm628_vm10 = vcmp.eq.s32.totalorder %v10239_v28, %v9993_v52 }
 0x1f0   :  { %8923 = vmatprep.subr.msk.bf16.mxu0 %vm8922_vm7, %v15749_v62  ;;  %vm13566_vm13 = vmpackc.low %vm2462_vm9, %vm2446_vm14  ;;  %vm2479_vm7 = vcmp.eq.s32.totalorder %v10236_v25, %v12902_v57  ;;  %vm612_vm9 = vcmp.eq.s32.totalorder %v10236_v25, %v9993_v52 }
 0x1f1   :  { %vm13574_vm3 = vmpackc.low %vm629_vm12, %vm613_vm11  ;;  %vm620_vm12 = vcmp.eq.s32.totalorder %v10236_v25, %v10017_v60 }
 0x1f2   :  { %vm13582_vm14 = vmpackc.low %vm637_vm6, %vm621_vm4  ;;  %vm636_vm4 = vcmp.eq.s32.totalorder %v10239_v28, %v10017_v60 }
 0x1f3   :  { %v16258_v27 = vsel %vm13582_vm14, 4294967295, %v16257_v27  ;;  %vm8414_vm11 = vmpackc.low %vm2487_vm5, %vm2471_vm15  ;;  %vm2470_vm14 = vcmp.eq.s32.totalorder %v10236_v25, %v12952_v58  ;;  %vm2494_vm15 = vcmp.eq.s32.totalorder %v10239_v28, %v12964_v0 }
 0x1f4   :  { %8349 = vmatmul.mubr.msk.bf16.gmra.mrb[28].mxu1 %vm13537_vm0, %v15749_v62  ;;  %vm8926_vm6 = vmpackc.low %vm2495_vm8, %vm2479_vm7  ;;  %vm2486_vm0 = vcmp.eq.s32.totalorder %v10239_v28, %v12952_v58  ;;  %vm16261_vm5 = vnez %v16258_v27  ;;  %vm661_vm7 = vcmp.eq.s32.totalorder %v10267_v24, %v9996_v53 }
 0x1f5   :  { %8861 = vmatmul.mubr.msk.bf16.gmra.mrb[28].mxu0 %vm13549_vm2, %v15749_v62  ;;  %8413 = vmatpush1.bf16.xpose.msk.msra.mxu1 %vm13558_vm1, %v15749_v62  ;;  %vm13613_vm2 = vmpackc.low %vm628_vm10, %vm612_vm9  ;;  %vm2478_vm1 = vcmp.eq.s32.totalorder %v10236_v25, %v12964_v0  ;;  %vm653_vm9 = vcmp.eq.s32.totalorder %v10264_v22, %v10020_v61  ;;  %vm669_vm10 = vcmp.eq.s32.totalorder %v10267_v24, %v10020_v61 }
 0x1f6   :  { %8925 = vmatpush1.bf16.xpose.msk.msra.mxu0 %vm13566_vm13, %v15749_v62  ;;  %8351 = vmatprep.mubr.msk.bf16.mxu1 %vm13574_vm3, %v15749_v62  ;;  %vm13625_vm13 = vmpackc.low %vm636_vm4, %vm620_vm12  ;;  %vm645_vm3 = vcmp.eq.s32.totalorder %v10264_v22, %v9996_v53  ;;  %vm2503_vm12 = vcmp.eq.s32.totalorder %v10264_v22, %v12888_v4  ;;  %vm2519_vm4 = vcmp.eq.s32.totalorder %v10267_v24, %v12888_v4 }
 0x1f7   :  { %8863 = vmatprep.mubr.msk.bf16.mxu0 %vm16261_vm5, %v15749_v62  ;;  %8415 = vmatprep.subr.msk.bf16.mxu1 %vm8414_vm11, %v15749_v62  ;;  %vm13634_vm8 = vmpackc.low %vm2486_vm0, %vm2470_vm14  ;;  %vm2527_vm0 = vcmp.eq.s32.totalorder %v10267_v24, %v12902_v57  ;;  %vm660_vm5 = vcmp.eq.s32.totalorder %v10267_v24, %v9993_v52 }
 0x1f8   :  { %8927 = vmatprep.subr.msk.bf16.mxu0 %vm8926_vm6, %v15749_v62  ;;  %vm13642_vm11 = vmpackc.low %vm2494_vm15, %vm2478_vm1  ;;  %vm2511_vm6 = vcmp.eq.s32.totalorder %v10264_v22, %v12902_v57  ;;  %vm644_vm15 = vcmp.eq.s32.totalorder %v10264_v22, %v9993_v52 }
 0x1f9   :  { %vm13650_vm14 = vmpackc.low %vm661_vm7, %vm645_vm3  ;;  %vm652_vm7 = vcmp.eq.s32.totalorder %v10264_v22, %v10017_v60 }
 0x1fa   :  { %vm13658_vm1 = vmpackc.low %vm669_vm10, %vm653_vm9  ;;  %vm668_vm9 = vcmp.eq.s32.totalorder %v10267_v24, %v10017_v60 }
 0x1fb   :  { %v16271_v33 = vsel %vm13658_vm1, 4294967295, %v16270_v33  ;;  %vm8418_vm3 = vmpackc.low %vm2519_vm4, %vm2503_vm12  ;;  %vm2502_vm1 = vcmp.eq.s32.totalorder %v10264_v22, %v12952_v58  ;;  %vm2526_vm12 = vcmp.eq.s32.totalorder %v10267_v24, %v12964_v0 }
 0x1fc   :  { %8353 = vmatmul.mubr.msk.bf16.gmra.mrb[32].mxu1 %vm13613_vm2, %v15749_v62  ;;  %vm8930_vm10 = vmpackc.low %vm2527_vm0, %vm2511_vm6  ;;  %vm2518_vm2 = vcmp.eq.s32.totalorder %v10267_v24, %v12952_v58  ;;  %vm16274_vm4 = vnez %v16271_v33  ;;  %vm693_vm6 = vcmp.eq.s32.totalorder %v10309_v36, %v9996_v53 }
 0x1fd   :  { %8865 = vmatmul.mubr.msk.bf16.gmra.mrb[32].mxu0 %vm13625_vm13, %v15749_v62  ;;  %8417 = vmatpush1.bf16.xpose.msk.msra.mxu1 %vm13634_vm8, %v15749_v62  ;;  %vm13689_vm13 = vmpackc.low %vm660_vm5, %vm644_vm15  ;;  %vm2510_vm8 = vcmp.eq.s32.totalorder %v10264_v22, %v12964_v0  ;;  %vm685_vm15 = vcmp.eq.s32.totalorder %v10306_v35, %v10020_v61  ;;  %vm701_vm5 = vcmp.eq.s32.totalorder %v10309_v36, %v10020_v61 }
 0x1fe   :  { %8929 = vmatpush1.bf16.xpose.msk.msra.mxu0 %vm13642_vm11, %v15749_v62  ;;  %8355 = vmatprep.mubr.msk.bf16.mxu1 %vm13650_vm14, %v15749_v62  ;;  %vm13701_vm11 = vmpackc.low %vm668_vm9, %vm652_vm7  ;;  %vm677_vm14 = vcmp.eq.s32.totalorder %v10306_v35, %v9996_v53  ;;  %vm2535_vm7 = vcmp.eq.s32.totalorder %v10306_v35, %v12888_v4  ;;  %vm2551_vm9 = vcmp.eq.s32.totalorder %v10309_v36, %v12888_v4 }
 0x1ff   :  { %8867 = vmatprep.mubr.msk.bf16.mxu0 %vm16274_vm4, %v15749_v62  ;;  %8419 = vmatprep.subr.msk.bf16.mxu1 %vm8418_vm3, %v15749_v62  ;;  %vm13710_vm0 = vmpackc.low %vm2518_vm2, %vm2502_vm1  ;;  %vm2559_vm2 = vcmp.eq.s32.totalorder %v10309_v36, %v12902_v57  ;;  %vm692_vm4 = vcmp.eq.s32.totalorder %v10309_v36, %v9993_v52 }
 0x200   :  { %8931 = vmatprep.subr.msk.bf16.mxu0 %vm8930_vm10, %v15749_v62  ;;  %vm13718_vm3 = vmpackc.low %vm2526_vm12, %vm2510_vm8  ;;  %vm2543_vm10 = vcmp.eq.s32.totalorder %v10306_v35, %v12902_v57  ;;  %vm676_vm12 = vcmp.eq.s32.totalorder %v10306_v35, %v9993_v52 }
 0x201   :  { %vm13726_vm1 = vmpackc.low %vm693_vm6, %vm677_vm14  ;;  %vm684_vm6 = vcmp.eq.s32.totalorder %v10306_v35, %v10017_v60 }
 0x202   :  { %vm13734_vm8 = vmpackc.low %vm701_vm5, %vm685_vm15  ;;  %vm700_vm15 = vcmp.eq.s32.totalorder %v10309_v36, %v10017_v60 }
 0x203   :  { %v16284_v32 = vsel %vm13734_vm8, 4294967295, %v16283_v32  ;;  %vm8422_vm14 = vmpackc.low %vm2551_vm9, %vm2535_vm7  ;;  %vm2534_vm8 = vcmp.eq.s32.totalorder %v10306_v35, %v12952_v58  ;;  %vm2558_vm7 = vcmp.eq.s32.totalorder %v10309_v36, %v12964_v0 }
 0x204   :  { %8357 = vmatmul.mubr.msk.bf16.gmra.mrb[36].mxu1 %vm13689_vm13, %v15749_v62  ;;  %vm8934_vm5 = vmpackc.low %vm2559_vm2, %vm2543_vm10  ;;  %vm2550_vm13 = vcmp.eq.s32.totalorder %v10309_v36, %v12952_v58  ;;  %vm16287_vm9 = vnez %v16284_v32  ;;  %vm725_vm10 = vcmp.eq.s32.totalorder %v10338_v38, %v9996_v53 }
 0x205   :  { %8869 = vmatmul.mubr.msk.bf16.gmra.mrb[36].mxu0 %vm13701_vm11, %v15749_v62  ;;  %8421 = vmatpush1.bf16.xpose.msk.msra.mxu1 %vm13710_vm0, %v15749_v62  ;;  %vm13765_vm11 = vmpackc.low %vm692_vm4, %vm676_vm12  ;;  %vm2542_vm0 = vcmp.eq.s32.totalorder %v10306_v35, %v12964_v0  ;;  %vm717_vm12 = vcmp.eq.s32.totalorder %v10335_v37, %v10020_v61  ;;  %vm733_vm4 = vcmp.eq.s32.totalorder %v10338_v38, %v10020_v61 }
 0x206   :  { %8933 = vmatpush1.bf16.xpose.msk.msra.mxu0 %vm13718_vm3, %v15749_v62  ;;  %8359 = vmatprep.mubr.msk.bf16.mxu1 %vm13726_vm1, %v15749_v62  ;;  %vm13777_vm3 = vmpackc.low %vm700_vm15, %vm684_vm6  ;;  %vm709_vm1 = vcmp.eq.s32.totalorder %v10335_v37, %v9996_v53  ;;  %vm2567_vm6 = vcmp.eq.s32.totalorder %v10335_v37, %v12888_v4  ;;  %vm2583_vm15 = vcmp.eq.s32.totalorder %v10338_v38, %v12888_v4 }
 0x207   :  { %8871 = vmatprep.mubr.msk.bf16.mxu0 %vm16287_vm9, %v15749_v62  ;;  %8423 = vmatprep.subr.msk.bf16.mxu1 %vm8422_vm14, %v15749_v62  ;;  %vm13786_vm2 = vmpackc.low %vm2550_vm13, %vm2534_vm8  ;;  %vm2591_vm13 = vcmp.eq.s32.totalorder %v10338_v38, %v12902_v57  ;;  %vm724_vm9 = vcmp.eq.s32.totalorder %v10338_v38, %v9993_v52 }
 0x208   :  { %8935 = vmatprep.subr.msk.bf16.mxu0 %vm8934_vm5, %v15749_v62  ;;  %vm13794_vm14 = vmpackc.low %vm2558_vm7, %vm2542_vm0  ;;  %vm2575_vm5 = vcmp.eq.s32.totalorder %v10335_v37, %v12902_v57  ;;  %vm708_vm7 = vcmp.eq.s32.totalorder %v10335_v37, %v9993_v52 }
 0x209   :  { %vm13802_vm8 = vmpackc.low %vm725_vm10, %vm709_vm1  ;;  %vm716_vm10 = vcmp.eq.s32.totalorder %v10335_v37, %v10017_v60 }
 0x20a   :  { %vm13810_vm0 = vmpackc.low %vm733_vm4, %vm717_vm12  ;;  %vm732_vm12 = vcmp.eq.s32.totalorder %v10338_v38, %v10017_v60 }
 0x20b   :  { %v16297_v23 = vsel %vm13810_vm0, 4294967295, %v16296_v23  ;;  %vm8426_vm1 = vmpackc.low %vm2583_vm15, %vm2567_vm6  ;;  %vm2566_vm0 = vcmp.eq.s32.totalorder %v10335_v37, %v12952_v58  ;;  %vm2590_vm6 = vcmp.eq.s32.totalorder %v10338_v38, %v12964_v0 }
 0x20c   :  { %8361 = vmatmul.mubr.msk.bf16.gmra.mrb[40].mxu1 %vm13765_vm11, %v15749_v62  ;;  %vm8938_vm4 = vmpackc.low %vm2591_vm13, %vm2575_vm5  ;;  %vm2582_vm11 = vcmp.eq.s32.totalorder %v10338_v38, %v12952_v58  ;;  %vm16300_vm15 = vnez %v16297_v23  ;;  %vm757_vm5 = vcmp.eq.s32.totalorder %v10364_v40, %v9996_v53 }
 0x20d   :  { %8873 = vmatmul.mubr.msk.bf16.gmra.mrb[40].mxu0 %vm13777_vm3, %v15749_v62  ;;  %8425 = vmatpush1.bf16.xpose.msk.msra.mxu1 %vm13786_vm2, %v15749_v62  ;;  %vm13841_vm3 = vmpackc.low %vm724_vm9, %vm708_vm7  ;;  %vm2574_vm2 = vcmp.eq.s32.totalorder %v10335_v37, %v12964_v0  ;;  %vm749_vm7 = vcmp.eq.s32.totalorder %v10361_v39, %v10020_v61  ;;  %vm765_vm9 = vcmp.eq.s32.totalorder %v10364_v40, %v10020_v61 }
 0x20e   :  { %8937 = vmatpush1.bf16.xpose.msk.msra.mxu0 %vm13794_vm14, %v15749_v62  ;;  %8363 = vmatprep.mubr.msk.bf16.mxu1 %vm13802_vm8, %v15749_v62  ;;  %vm13853_vm14 = vmpackc.low %vm732_vm12, %vm716_vm10  ;;  %vm741_vm8 = vcmp.eq.s32.totalorder %v10361_v39, %v9996_v53  ;;  %vm2599_vm10 = vcmp.eq.s32.totalorder %v10361_v39, %v12888_v4  ;;  %vm2615_vm12 = vcmp.eq.s32.totalorder %v10364_v40, %v12888_v4 }
 0x20f   :  { %8875 = vmatprep.mubr.msk.bf16.mxu0 %vm16300_vm15, %v15749_v62  ;;  %8427 = vmatprep.subr.msk.bf16.mxu1 %vm8426_vm1, %v15749_v62  ;;  %vm13862_vm13 = vmpackc.low %vm2582_vm11, %vm2566_vm0  ;;  %vm2623_vm11 = vcmp.eq.s32.totalorder %v10364_v40, %v12902_v57  ;;  %vm756_vm15 = vcmp.eq.s32.totalorder %v10364_v40, %v9993_v52 }
 0x210   :  { %8939 = vmatprep.subr.msk.bf16.mxu0 %vm8938_vm4, %v15749_v62  ;;  %vm13870_vm1 = vmpackc.low %vm2590_vm6, %vm2574_vm2  ;;  %vm2607_vm4 = vcmp.eq.s32.totalorder %v10361_v39, %v12902_v57  ;;  %vm740_vm6 = vcmp.eq.s32.totalorder %v10361_v39, %v9993_v52 }
 0x211   :  { %vm13878_vm0 = vmpackc.low %vm757_vm5, %vm741_vm8  ;;  %vm748_vm5 = vcmp.eq.s32.totalorder %v10361_v39, %v10017_v60 }
 0x212   :  { %vm13886_vm2 = vmpackc.low %vm765_vm9, %vm749_vm7  ;;  %vm764_vm7 = vcmp.eq.s32.totalorder %v10364_v40, %v10017_v60 }
 0x213   :  { %v16310_v51 = vsel %vm13886_vm2, 4294967295, %v16309_v51  ;;  %vm8430_vm8 = vmpackc.low %vm2615_vm12, %vm2599_vm10  ;;  %vm2598_vm2 = vcmp.eq.s32.totalorder %v10361_v39, %v12952_v58  ;;  %vm2622_vm10 = vcmp.eq.s32.totalorder %v10364_v40, %v12964_v0 }
 0x214   :  { %8365 = vmatmul.mubr.msk.bf16.gmra.mrb[44].mxu1 %vm13841_vm3, %v15749_v62  ;;  %vm8942_vm9 = vmpackc.low %vm2623_vm11, %vm2607_vm4  ;;  %vm2614_vm3 = vcmp.eq.s32.totalorder %v10364_v40, %v12952_v58  ;;  %vm16313_vm12 = vnez %v16310_v51  ;;  %vm789_vm4 = vcmp.eq.s32.totalorder %v10390_v42, %v9996_v53 }
 0x215   :  { %8877 = vmatmul.mubr.msk.bf16.gmra.mrb[44].mxu0 %vm13853_vm14, %v15749_v62  ;;  %8429 = vmatpush1.bf16.xpose.msk.msra.mxu1 %vm13862_vm13, %v15749_v62  ;;  %vm13917_vm14 = vmpackc.low %vm756_vm15, %vm740_vm6  ;;  %vm2606_vm13 = vcmp.eq.s32.totalorder %v10361_v39, %v12964_v0  ;;  %vm781_vm6 = vcmp.eq.s32.totalorder %v10387_v41, %v10020_v61  ;;  %vm797_vm15 = vcmp.eq.s32.totalorder %v10390_v42, %v10020_v61 }
 0x216   :  { %8941 = vmatpush1.bf16.xpose.msk.msra.mxu0 %vm13870_vm1, %v15749_v62  ;;  %8367 = vmatprep.mubr.msk.bf16.mxu1 %vm13878_vm0, %v15749_v62  ;;  %vm13929_vm1 = vmpackc.low %vm764_vm7, %vm748_vm5  ;;  %vm773_vm0 = vcmp.eq.s32.totalorder %v10387_v41, %v9996_v53  ;;  %vm2631_vm5 = vcmp.eq.s32.totalorder %v10387_v41, %v12888_v4  ;;  %vm2647_vm7 = vcmp.eq.s32.totalorder %v10390_v42, %v12888_v4 }
 0x217   :  { %8879 = vmatprep.mubr.msk.bf16.mxu0 %vm16313_vm12, %v15749_v62  ;;  %8431 = vmatprep.subr.msk.bf16.mxu1 %vm8430_vm8, %v15749_v62  ;;  %vm13938_vm11 = vmpackc.low %vm2614_vm3, %vm2598_vm2  ;;  %vm2655_vm3 = vcmp.eq.s32.totalorder %v10390_v42, %v12902_v57  ;;  %vm788_vm12 = vcmp.eq.s32.totalorder %v10390_v42, %v9993_v52 }
 0x218   :  { %8943 = vmatprep.subr.msk.bf16.mxu0 %vm8942_vm9, %v15749_v62  ;;  %vm13946_vm8 = vmpackc.low %vm2622_vm10, %vm2606_vm13  ;;  %vm2639_vm9 = vcmp.eq.s32.totalorder %v10387_v41, %v12902_v57  ;;  %vm772_vm10 = vcmp.eq.s32.totalorder %v10387_v41, %v9993_v52 }
 0x219   :  { %vm13954_vm2 = vmpackc.low %vm789_vm4, %vm773_vm0  ;;  %vm780_vm4 = vcmp.eq.s32.totalorder %v10387_v41, %v10017_v60 }
 0x21a   :  { %vm13962_vm13 = vmpackc.low %vm797_vm15, %vm781_vm6  ;;  %vm796_vm6 = vcmp.eq.s32.totalorder %v10390_v42, %v10017_v60 }
 0x21b   :  { %v16323_v56 = vsel %vm13962_vm13, 4294967295, %v16322_v56  ;;  %vm8434_vm0 = vmpackc.low %vm2647_vm7, %vm2631_vm5  ;;  %vm2630_vm13 = vcmp.eq.s32.totalorder %v10387_v41, %v12952_v58  ;;  %vm2654_vm5 = vcmp.eq.s32.totalorder %v10390_v42, %v12964_v0 }
 0x21c   :  { %8369 = vmatmul.mubr.msk.bf16.gmra.mrb[48].mxu1 %vm13917_vm14, %v15749_v62  ;;  %vm8946_vm15 = vmpackc.low %vm2655_vm3, %vm2639_vm9  ;;  %vm2646_vm14 = vcmp.eq.s32.totalorder %v10390_v42, %v12952_v58  ;;  %vm16326_vm7 = vnez %v16323_v56  ;;  %vm821_vm9 = vcmp.eq.s32.totalorder %v10416_v44, %v9996_v53 }
 0x21d   :  { %8881 = vmatmul.mubr.msk.bf16.gmra.mrb[48].mxu0 %vm13929_vm1, %v15749_v62  ;;  %8433 = vmatpush1.bf16.xpose.msk.msra.mxu1 %vm13938_vm11, %v15749_v62  ;;  %vm13993_vm1 = vmpackc.low %vm788_vm12, %vm772_vm10  ;;  %vm2638_vm11 = vcmp.eq.s32.totalorder %v10387_v41, %v12964_v0  ;;  %vm813_vm10 = vcmp.eq.s32.totalorder %v10413_v43, %v10020_v61  ;;  %vm829_vm12 = vcmp.eq.s32.totalorder %v10416_v44, %v10020_v61 }
 0x21e   :  { %8945 = vmatpush1.bf16.xpose.msk.msra.mxu0 %vm13946_vm8, %v15749_v62  ;;  %8371 = vmatprep.mubr.msk.bf16.mxu1 %vm13954_vm2, %v15749_v62  ;;  %vm14005_vm8 = vmpackc.low %vm796_vm6, %vm780_vm4  ;;  %vm805_vm2 = vcmp.eq.s32.totalorder %v10413_v43, %v9996_v53  ;;  %vm2663_vm4 = vcmp.eq.s32.totalorder %v10413_v43, %v12888_v4  ;;  %vm2679_vm6 = vcmp.eq.s32.totalorder %v10416_v44, %v12888_v4 }
 0x21f   :  { %8883 = vmatprep.mubr.msk.bf16.mxu0 %vm16326_vm7, %v15749_v62  ;;  %8435 = vmatprep.subr.msk.bf16.mxu1 %vm8434_vm0, %v15749_v62  ;;  %vm14014_vm3 = vmpackc.low %vm2646_vm14, %vm2630_vm13  ;;  %vm2687_vm14 = vcmp.eq.s32.totalorder %v10416_v44, %v12902_v57  ;;  %vm820_vm7 = vcmp.eq.s32.totalorder %v10416_v44, %v9993_v52 }
 0x220   :  { %8947 = vmatprep.subr.msk.bf16.mxu0 %vm8946_vm15, %v15749_v62  ;;  %vm14022_vm0 = vmpackc.low %vm2654_vm5, %vm2638_vm11  ;;  %vm2671_vm15 = vcmp.eq.s32.totalorder %v10413_v43, %v12902_v57  ;;  %vm804_vm5 = vcmp.eq.s32.totalorder %v10413_v43, %v9993_v52 }
 0x221   :  { %vm14030_vm13 = vmpackc.low %vm821_vm9, %vm805_vm2  ;;  %vm812_vm9 = vcmp.eq.s32.totalorder %v10413_v43, %v10017_v60 }
 0x222   :  { %vm14038_vm11 = vmpackc.low %vm829_vm12, %vm813_vm10  ;;  %vm828_vm10 = vcmp.eq.s32.totalorder %v10416_v44, %v10017_v60 }
 0x223   :  { %v16336_v49 = vsel %vm14038_vm11, 4294967295, %v16335_v49  ;;  %vm8438_vm2 = vmpackc.low %vm2679_vm6, %vm2663_vm4  ;;  %vm2662_vm11 = vcmp.eq.s32.totalorder %v10413_v43, %v12952_v58  ;;  %vm2686_vm4 = vcmp.eq.s32.totalorder %v10416_v44, %v12964_v0 }
 0x224   :  { %8373 = vmatmul.mubr.msk.bf16.gmra.mrb[52].mxu1 %vm13993_vm1, %v15749_v62  ;;  %vm8950_vm12 = vmpackc.low %vm2687_vm14, %vm2671_vm15  ;;  %vm2678_vm1 = vcmp.eq.s32.totalorder %v10416_v44, %v12952_v58  ;;  %vm16339_vm6 = vnez %v16336_v49  ;;  %vm853_vm15 = vcmp.eq.s32.totalorder %v10442_v46, %v9996_v53 }
 0x225   :  { %8885 = vmatmul.mubr.msk.bf16.gmra.mrb[52].mxu0 %vm14005_vm8, %v15749_v62  ;;  %8437 = vmatpush1.bf16.xpose.msk.msra.mxu1 %vm14014_vm3, %v15749_v62  ;;  %vm14069_vm8 = vmpackc.low %vm820_vm7, %vm804_vm5  ;;  %vm2670_vm3 = vcmp.eq.s32.totalorder %v10413_v43, %v12964_v0  ;;  %vm845_vm5 = vcmp.eq.s32.totalorder %v10439_v45, %v10020_v61  ;;  %vm861_vm7 = vcmp.eq.s32.totalorder %v10442_v46, %v10020_v61 }
 0x226   :  { %8949 = vmatpush1.bf16.xpose.msk.msra.mxu0 %vm14022_vm0, %v15749_v62  ;;  %8375 = vmatprep.mubr.msk.bf16.mxu1 %vm14030_vm13, %v15749_v62  ;;  %vm14081_vm0 = vmpackc.low %vm828_vm10, %vm812_vm9  ;;  %vm837_vm13 = vcmp.eq.s32.totalorder %v10439_v45, %v9996_v53  ;;  %vm2695_vm9 = vcmp.eq.s32.totalorder %v10439_v45, %v12888_v4  ;;  %vm2711_vm10 = vcmp.eq.s32.totalorder %v10442_v46, %v12888_v4 }
 0x227   :  { %8887 = vmatprep.mubr.msk.bf16.mxu0 %vm16339_vm6, %v15749_v62  ;;  %8439 = vmatprep.subr.msk.bf16.mxu1 %vm8438_vm2, %v15749_v62  ;;  %vm8440_vm14 = vmpackc.low %vm2678_vm1, %vm2662_vm11  ;;  %vm2703_vm11 = vcmp.eq.s32.totalorder %v10439_v45, %v12902_v57 }
 0x228   :  { %8951 = vmatprep.subr.msk.bf16.mxu0 %vm8950_vm12, %v15749_v62  ;;  %vm14094_vm2 = vmpackc.low %vm2686_vm4, %vm2670_vm3  ;;  %vm2719_vm12 = vcmp.eq.s32.totalorder %v10442_v46, %v12902_v57  ;;  %vm836_vm3 = vcmp.eq.s32.totalorder %v10439_v45, %v9993_v52  ;;  %vm852_vm4 = vcmp.eq.s32.totalorder %v10442_v46, %v9993_v52  ;;  %v16345_v52 = vld [vmem:[#allocation12_spill] sm:$0xff] }
 0x229   :  { %v16343_v2 = vsel %vm14094_vm2, 4294967295, %v16342_v2  ;;  %vm8378_vm6 = vmpackc.low %vm853_vm15, %vm837_vm13  ;;  %vm844_vm13 = vcmp.eq.s32.totalorder %v10439_v45, %v10017_v60  ;;  %vm860_vm15 = vcmp.eq.s32.totalorder %v10442_v46, %v10017_v60 }
 0x22a   :  { %vm8890_vm1 = vmpackc.low %vm861_vm7, %vm845_vm5  ;;  %vm16344_vm5 = vnez %v16343_v2  ;;  %vm2694_vm7 = vcmp.eq.s32.totalorder %v10439_v45, %v12952_v58 }
 0x22b   :  { %vm8442_vm2 = vmpackc.low %vm2711_vm10, %vm2695_vm9  ;;  %vm2702_vm9 = vcmp.eq.s32.totalorder %v10439_v45, %v12964_v0  ;;  %vm2718_vm10 = vcmp.eq.s32.totalorder %v10442_v46, %v12964_v0 }
 0x22c   :  { %8377 = vmatmul.mubr.msk.bf16.gmra.mrb[56].mxu1 %vm14069_vm8, %v15749_v62  ;;  %vm8954_vm8 = vmpackc.low %vm2719_vm12, %vm2703_vm11  ;;  %vm375_vm12 = vcmp.eq.s32.totalorder %v10033_v1, %v10002_v55 }
 0x22d   :  { %8889 = vmatmul.mubr.msk.bf16.gmra.mrb[56].mxu0 %vm14081_vm0, %v15749_v62  ;;  %8441 = vmatpush1.bf16.xpose.msk.msra.mxu1 %vm8440_vm14, %v15749_v62  ;;  %vm2710_vm0 = vcmp.eq.s32.totalorder %v10442_v46, %v12952_v58  ;;  %vm8380_vm14 = vmpackc.low %vm852_vm4, %vm836_vm3 }
 0x22e   :  { %8953 = vmatpush1.bf16.xpose.msk.msra.mxu0 %vm16344_vm5, %v15749_v62  ;;  %8379 = vmatprep.mubr.msk.bf16.mxu1 %vm8378_vm6, %v15749_v62  ;;  %vm8892_vm11 = vmpackc.low %vm860_vm15, %vm844_vm13  ;;  %vm359_vm6 = vcmp.eq.s32.totalorder %v9929_v13, %v10002_v55  ;;  %vm358_vm15 = vcmp.eq.s32.totalorder %v9929_v13, %v9999_v54 }
 0x22f   :  { %8891 = vmatprep.mubr.msk.bf16.mxu0 %vm8890_vm1, %v15749_v62  ;;  %8443 = vmatprep.subr.msk.bf16.mxu1 %vm8442_vm2, %v15749_v62  ;;  %vm8444_vm5 = vmpackc.low %vm2710_vm0, %vm2694_vm7  ;;  %vm367_vm1 = vcmp.eq.s32.totalorder %v9929_v13, %v10026_v63  ;;  %vm383_vm2 = vcmp.eq.s32.totalorder %v10033_v1, %v10026_v63  ;;  %vm366_vm7 = vcmp.eq.s32.totalorder %v9929_v13, %v16345_v52 }
 0x230   :  { %8955 = vmatprep.subr.msk.bf16.mxu0 %vm8954_vm8, %v15749_v62  ;;  %vm8956_vm3 = vmpackc.low %vm2718_vm10, %vm2702_vm9  ;;  %vm374_vm8 = vcmp.eq.s32.totalorder %v10033_v1, %v9999_v54  ;;  %vm382_vm0 = vcmp.eq.s32.totalorder %v10033_v1, %v16345_v52  ;;  %vm407_vm9 = vcmp.eq.s32.totalorder %v10051_v6, %v10002_v55 }
 0x231   :  { %vm8446_vm4 = vmpackc.low %vm375_vm12, %vm359_vm6  ;;  %vm415_vm6 = vcmp.eq.s32.totalorder %v10051_v6, %v10026_v63 }
 0x232   :  { %vm8958_vm13 = vmpackc.low %vm383_vm2, %vm367_vm1  ;;  %vm390_vm2 = vcmp.eq.s32.totalorder %v10048_v5, %v9999_v54 }
 0x233   :  { %vm8448_vm10 = vmpackc.low %vm374_vm8, %vm358_vm15  ;;  %vm423_vm15 = vcmp.eq.s32.totalorder %v10080_v8, %v10002_v55  ;;  %vm439_vm8 = vcmp.eq.s32.totalorder %v10083_v9, %v10002_v55 }
 0x234   :  { %8381 = vmatmul.mubr.msk.bf16.gmra.mrb[60].mxu1 %vm8380_vm14, %v15749_v62  ;;  %vm391_vm14 = vcmp.eq.s32.totalorder %v10048_v5, %v10002_v55  ;;  %vm8960_vm12 = vmpackc.low %vm382_vm0, %vm366_vm7  ;;  %vm431_vm0 = vcmp.eq.s32.totalorder %v10080_v8, %v10026_v63 }
 0x235   :  { %8893 = vmatmul.mubr.msk.bf16.gmra.mrb[60].mxu0 %vm8892_vm11, %v15749_v62  ;;  %8445 = vmatpush1.bf16.xpose.msk.msra.mxu1 %vm8444_vm5, %v15749_v62  ;;  %vm399_vm11 = vcmp.eq.s32.totalorder %v10048_v5, %v10026_v63  ;;  %vm8450_vm5 = vmpackc.low %vm407_vm9, %vm391_vm14  ;;  %vm447_vm14 = vcmp.eq.s32.totalorder %v10083_v9, %v10026_v63 }
 0x236   :  { %8957 = vmatpush1.bf16.xpose.msk.msra.mxu0 %vm8956_vm3, %v15749_v62  ;;  %8447 = vmatprep.mubr.msk.bf16.mxu1 %vm8446_vm4, %v15749_v62  ;;  %vm8962_vm1 = vmpackc.low %vm415_vm6, %vm399_vm11  ;;  %vm406_vm3 = vcmp.eq.s32.totalorder %v10051_v6, %v9999_v54  ;;  %vm398_vm4 = vcmp.eq.s32.totalorder %v10048_v5, %v16345_v52  ;;  %vm422_vm6 = vcmp.eq.s32.totalorder %v10080_v8, %v9999_v54 }
 0x237   :  { %8959 = vmatprep.mubr.msk.bf16.mxu0 %vm8958_vm13, %v15749_v62  ;;  %vm414_vm13 = vcmp.eq.s32.totalorder %v10051_v6, %v16345_v52  ;;  %vm8452_vm7 = vmpackc.low %vm406_vm3, %vm390_vm2  ;;  %vm455_vm2 = vcmp.eq.s32.totalorder %v10106_v10, %v10002_v55  ;;  %vm471_vm3 = vcmp.eq.s32.totalorder %v10109_v11, %v10002_v55 }
 0x238   :  { %vm8964_vm9 = vmpackc.low %vm414_vm13, %vm398_vm4  ;;  %vm463_vm13 = vcmp.eq.s32.totalorder %v10106_v10, %v10026_v63 }
 0x239   :  { %vm8966_vm11 = vmpackc.low %vm447_vm14, %vm431_vm0  ;;  %vm454_vm14 = vcmp.eq.s32.totalorder %v10106_v10, %v9999_v54 }
 0x23c   :  { %8449 = vmatmul.mubr.msk.bf16.vlgmr.msra.gmra.mrb[0].mxu1 %vm8448_vm10, %v15749_v62  ;;  %vm8454_vm10 = vmpackc.low %vm439_vm8, %vm423_vm15  ;;  %vm479_vm15 = vcmp.eq.s32.totalorder %v10109_v11, %v10026_v63 }
 0x23d   :  { %8961 = vmatmul.mubr.msk.bf16.vlgmr.msra.gmra.mrb[0].mxu0 %vm8960_vm12, %v15749_v62  ;;  %8451 = vmatprep.mubr.msk.bf16.mxu1 %vm8450_vm5, %v15749_v62  ;;  %vm438_vm12 = vcmp.eq.s32.totalorder %v10083_v9, %v9999_v54  ;;  %vm430_vm5 = vcmp.eq.s32.totalorder %v10080_v8, %v16345_v52  ;;  %vm8970_vm0 = vmpackc.low %vm479_vm15, %vm463_vm13  ;;  %vm486_vm15 = vcmp.eq.s32.totalorder %v10132_v12, %v9999_v54 }
 0x23e   :  { %8963 = vmatprep.mubr.msk.bf16.mxu0 %vm8962_vm1, %v15749_v62  ;;  %vm446_vm1 = vcmp.eq.s32.totalorder %v10083_v9, %v16345_v52  ;;  %vm8456_vm4 = vmpackc.low %vm438_vm12, %vm422_vm6  ;;  %vm487_vm6 = vcmp.eq.s32.totalorder %v10132_v12, %v10002_v55  ;;  %vm503_vm12 = vcmp.eq.s32.totalorder %v10135_v14, %v10002_v55  ;;  %v9888_v9 = vmov 0.0  }
 0x23f   :  { %vm8968_vm8 = vmpackc.low %vm446_vm1, %vm430_vm5  ;;  %vm495_vm1 = vcmp.eq.s32.totalorder %v10132_v12, %v10026_v63 }
 0x244   :  { %8453 = vmatmul.mubr.msk.bf16.gmra.mrb[4].mxu1 %vm8452_vm7, %v15749_v62  ;;  %vm8458_vm7 = vmpackc.low %vm471_vm3, %vm455_vm2  ;;  %vm511_vm2 = vcmp.eq.s32.totalorder %v10135_v14, %v10026_v63 }
 0x245   :  { %8965 = vmatmul.mubr.msk.bf16.gmra.mrb[4].mxu0 %vm8964_vm9, %v15749_v62  ;;  %8455 = vmatprep.mubr.msk.bf16.mxu1 %vm8454_vm10, %v15749_v62  ;;  %vm470_vm9 = vcmp.eq.s32.totalorder %v10109_v11, %v9999_v54  ;;  %vm462_vm10 = vcmp.eq.s32.totalorder %v10106_v10, %v16345_v52  ;;  %vm8974_vm13 = vmpackc.low %vm511_vm2, %vm495_vm1  ;;  %vm518_vm2 = vcmp.eq.s32.totalorder %v10158_v15, %v9999_v54 }
 0x246   :  { %8967 = vmatprep.mubr.msk.bf16.mxu0 %vm8966_vm11, %v15749_v62  ;;  %vm478_vm11 = vcmp.eq.s32.totalorder %v10109_v11, %v16345_v52  ;;  %vm8460_vm5 = vmpackc.low %vm470_vm9, %vm454_vm14  ;;  %vm519_vm14 = vcmp.eq.s32.totalorder %v10158_v15, %v10002_v55  ;;  %vm535_vm9 = vcmp.eq.s32.totalorder %v10161_v16, %v10002_v55 }
 0x247   :  { %vm8972_vm3 = vmpackc.low %vm478_vm11, %vm462_vm10  ;;  %vm527_vm11 = vcmp.eq.s32.totalorder %v10158_v15, %v10026_v63 }
 0x24c   :  { %8457 = vmatmul.mubr.msk.bf16.gmra.mrb[8].mxu1 %vm8456_vm4, %v15749_v62  ;;  %vm8462_vm4 = vmpackc.low %vm503_vm12, %vm487_vm6  ;;  %vm543_vm6 = vcmp.eq.s32.totalorder %v10161_v16, %v10026_v63 }
 0x24d   :  { %8969 = vmatmul.mubr.msk.bf16.gmra.mrb[8].mxu0 %vm8968_vm8, %v15749_v62  ;;  %8459 = vmatprep.mubr.msk.bf16.mxu1 %vm8458_vm7, %v15749_v62  ;;  %vm502_vm8 = vcmp.eq.s32.totalorder %v10135_v14, %v9999_v54  ;;  %vm494_vm7 = vcmp.eq.s32.totalorder %v10132_v12, %v16345_v52  ;;  %vm8978_vm1 = vmpackc.low %vm543_vm6, %vm527_vm11  ;;  %vm550_vm6 = vcmp.eq.s32.totalorder %v10184_v17, %v9999_v54 }
 0x24e   :  { %8971 = vmatprep.mubr.msk.bf16.mxu0 %vm8970_vm0, %v15749_v62  ;;  %vm510_vm0 = vcmp.eq.s32.totalorder %v10135_v14, %v16345_v52  ;;  %vm8464_vm10 = vmpackc.low %vm502_vm8, %vm486_vm15  ;;  %vm551_vm15 = vcmp.eq.s32.totalorder %v10184_v17, %v10002_v55  ;;  %vm567_vm8 = vcmp.eq.s32.totalorder %v10187_v18, %v10002_v55 }
 0x24f   :  { %vm8976_vm12 = vmpackc.low %vm510_vm0, %vm494_vm7  ;;  %vm559_vm0 = vcmp.eq.s32.totalorder %v10184_v17, %v10026_v63 }
 0x254   :  { %8461 = vmatmul.mubr.msk.bf16.gmra.mrb[12].mxu1 %vm8460_vm5, %v15749_v62  ;;  %vm8466_vm5 = vmpackc.low %vm535_vm9, %vm519_vm14  ;;  %vm575_vm14 = vcmp.eq.s32.totalorder %v10187_v18, %v10026_v63 }
 0x255   :  { %8973 = vmatmul.mubr.msk.bf16.gmra.mrb[12].mxu0 %vm8972_vm3, %v15749_v62  ;;  %8463 = vmatprep.mubr.msk.bf16.mxu1 %vm8462_vm4, %v15749_v62  ;;  %vm534_vm3 = vcmp.eq.s32.totalorder %v10161_v16, %v9999_v54  ;;  %vm526_vm4 = vcmp.eq.s32.totalorder %v10158_v15, %v16345_v52  ;;  %vm8982_vm11 = vmpackc.low %vm575_vm14, %vm559_vm0  ;;  %vm582_vm14 = vcmp.eq.s32.totalorder %v10210_v19, %v9999_v54 }
 0x256   :  { %8975 = vmatprep.mubr.msk.bf16.mxu0 %vm8974_vm13, %v15749_v62  ;;  %vm542_vm13 = vcmp.eq.s32.totalorder %v10161_v16, %v16345_v52  ;;  %vm8468_vm7 = vmpackc.low %vm534_vm3, %vm518_vm2  ;;  %vm583_vm2 = vcmp.eq.s32.totalorder %v10210_v19, %v10002_v55  ;;  %vm599_vm3 = vcmp.eq.s32.totalorder %v10213_v20, %v10002_v55 }
 0x257   :  { %vm8980_vm9 = vmpackc.low %vm542_vm13, %vm526_vm4  ;;  %vm591_vm13 = vcmp.eq.s32.totalorder %v10210_v19, %v10026_v63 }
 0x25c   :  { %8465 = vmatmul.mubr.msk.bf16.gmra.mrb[16].mxu1 %vm8464_vm10, %v15749_v62  ;;  %vm8470_vm10 = vmpackc.low %vm567_vm8, %vm551_vm15  ;;  %vm607_vm15 = vcmp.eq.s32.totalorder %v10213_v20, %v10026_v63 }
 0x25d   :  { %8977 = vmatmul.mubr.msk.bf16.gmra.mrb[16].mxu0 %vm8976_vm12, %v15749_v62  ;;  %8467 = vmatprep.mubr.msk.bf16.mxu1 %vm8466_vm5, %v15749_v62  ;;  %vm566_vm12 = vcmp.eq.s32.totalorder %v10187_v18, %v9999_v54  ;;  %vm558_vm5 = vcmp.eq.s32.totalorder %v10184_v17, %v16345_v52  ;;  %vm8986_vm0 = vmpackc.low %vm607_vm15, %vm591_vm13  ;;  %vm614_vm15 = vcmp.eq.s32.totalorder %v10236_v25, %v9999_v54 }
 0x25e   :  { %8979 = vmatprep.mubr.msk.bf16.mxu0 %vm8978_vm1, %v15749_v62  ;;  %vm574_vm1 = vcmp.eq.s32.totalorder %v10187_v18, %v16345_v52  ;;  %vm8472_vm4 = vmpackc.low %vm566_vm12, %vm550_vm6  ;;  %vm615_vm6 = vcmp.eq.s32.totalorder %v10236_v25, %v10002_v55  ;;  %vm631_vm12 = vcmp.eq.s32.totalorder %v10239_v28, %v10002_v55 }
 0x25f   :  { %vm8984_vm8 = vmpackc.low %vm574_vm1, %vm558_vm5  ;;  %vm623_vm1 = vcmp.eq.s32.totalorder %v10236_v25, %v10026_v63 }
 0x264   :  { %8469 = vmatmul.mubr.msk.bf16.gmra.mrb[20].mxu1 %vm8468_vm7, %v15749_v62  ;;  %vm8474_vm7 = vmpackc.low %vm599_vm3, %vm583_vm2  ;;  %vm639_vm2 = vcmp.eq.s32.totalorder %v10239_v28, %v10026_v63 }
 0x265   :  { %8981 = vmatmul.mubr.msk.bf16.gmra.mrb[20].mxu0 %vm8980_vm9, %v15749_v62  ;;  %8471 = vmatprep.mubr.msk.bf16.mxu1 %vm8470_vm10, %v15749_v62  ;;  %vm598_vm9 = vcmp.eq.s32.totalorder %v10213_v20, %v9999_v54  ;;  %vm590_vm10 = vcmp.eq.s32.totalorder %v10210_v19, %v16345_v52  ;;  %vm8990_vm13 = vmpackc.low %vm639_vm2, %vm623_vm1  ;;  %vm646_vm2 = vcmp.eq.s32.totalorder %v10264_v22, %v9999_v54 }
 0x266   :  { %8983 = vmatprep.mubr.msk.bf16.mxu0 %vm8982_vm11, %v15749_v62  ;;  %vm606_vm11 = vcmp.eq.s32.totalorder %v10213_v20, %v16345_v52  ;;  %vm8476_vm5 = vmpackc.low %vm598_vm9, %vm582_vm14  ;;  %vm647_vm14 = vcmp.eq.s32.totalorder %v10264_v22, %v10002_v55  ;;  %vm663_vm9 = vcmp.eq.s32.totalorder %v10267_v24, %v10002_v55 }
 0x267   :  { %vm8988_vm3 = vmpackc.low %vm606_vm11, %vm590_vm10  ;;  %vm655_vm11 = vcmp.eq.s32.totalorder %v10264_v22, %v10026_v63 }
 0x26c   :  { %8473 = vmatmul.mubr.msk.bf16.gmra.mrb[24].mxu1 %vm8472_vm4, %v15749_v62  ;;  %vm8478_vm4 = vmpackc.low %vm631_vm12, %vm615_vm6  ;;  %vm671_vm6 = vcmp.eq.s32.totalorder %v10267_v24, %v10026_v63 }
 0x26d   :  { %8985 = vmatmul.mubr.msk.bf16.gmra.mrb[24].mxu0 %vm8984_vm8, %v15749_v62  ;;  %8475 = vmatprep.mubr.msk.bf16.mxu1 %vm8474_vm7, %v15749_v62  ;;  %vm630_vm8 = vcmp.eq.s32.totalorder %v10239_v28, %v9999_v54  ;;  %vm622_vm7 = vcmp.eq.s32.totalorder %v10236_v25, %v16345_v52  ;;  %vm8994_vm1 = vmpackc.low %vm671_vm6, %vm655_vm11  ;;  %vm678_vm6 = vcmp.eq.s32.totalorder %v10306_v35, %v9999_v54 }
 0x26e   :  { %8987 = vmatprep.mubr.msk.bf16.mxu0 %vm8986_vm0, %v15749_v62  ;;  %vm638_vm0 = vcmp.eq.s32.totalorder %v10239_v28, %v16345_v52  ;;  %vm8480_vm10 = vmpackc.low %vm630_vm8, %vm614_vm15  ;;  %vm679_vm15 = vcmp.eq.s32.totalorder %v10306_v35, %v10002_v55  ;;  %vm695_vm8 = vcmp.eq.s32.totalorder %v10309_v36, %v10002_v55 }
 0x26f   :  { %vm8992_vm12 = vmpackc.low %vm638_vm0, %vm622_vm7  ;;  %vm687_vm0 = vcmp.eq.s32.totalorder %v10306_v35, %v10026_v63 }
 0x274   :  { %8477 = vmatmul.mubr.msk.bf16.gmra.mrb[28].mxu1 %vm8476_vm5, %v15749_v62  ;;  %vm8482_vm5 = vmpackc.low %vm663_vm9, %vm647_vm14  ;;  %vm703_vm14 = vcmp.eq.s32.totalorder %v10309_v36, %v10026_v63 }
 0x275   :  { %8989 = vmatmul.mubr.msk.bf16.gmra.mrb[28].mxu0 %vm8988_vm3, %v15749_v62  ;;  %8479 = vmatprep.mubr.msk.bf16.mxu1 %vm8478_vm4, %v15749_v62  ;;  %vm662_vm3 = vcmp.eq.s32.totalorder %v10267_v24, %v9999_v54  ;;  %vm654_vm4 = vcmp.eq.s32.totalorder %v10264_v22, %v16345_v52  ;;  %vm8998_vm11 = vmpackc.low %vm703_vm14, %vm687_vm0  ;;  %vm710_vm14 = vcmp.eq.s32.totalorder %v10335_v37, %v9999_v54 }
 0x276   :  { %8991 = vmatprep.mubr.msk.bf16.mxu0 %vm8990_vm13, %v15749_v62  ;;  %vm670_vm13 = vcmp.eq.s32.totalorder %v10267_v24, %v16345_v52  ;;  %vm8484_vm7 = vmpackc.low %vm662_vm3, %vm646_vm2  ;;  %vm711_vm2 = vcmp.eq.s32.totalorder %v10335_v37, %v10002_v55  ;;  %vm727_vm3 = vcmp.eq.s32.totalorder %v10338_v38, %v10002_v55 }
 0x277   :  { %vm8996_vm9 = vmpackc.low %vm670_vm13, %vm654_vm4  ;;  %vm719_vm13 = vcmp.eq.s32.totalorder %v10335_v37, %v10026_v63 }
 0x27c   :  { %8481 = vmatmul.mubr.msk.bf16.gmra.mrb[32].mxu1 %vm8480_vm10, %v15749_v62  ;;  %vm8486_vm10 = vmpackc.low %vm695_vm8, %vm679_vm15  ;;  %vm735_vm15 = vcmp.eq.s32.totalorder %v10338_v38, %v10026_v63 }
 0x27d   :  { %8993 = vmatmul.mubr.msk.bf16.gmra.mrb[32].mxu0 %vm8992_vm12, %v15749_v62  ;;  %8483 = vmatprep.mubr.msk.bf16.mxu1 %vm8482_vm5, %v15749_v62  ;;  %vm694_vm12 = vcmp.eq.s32.totalorder %v10309_v36, %v9999_v54  ;;  %vm686_vm5 = vcmp.eq.s32.totalorder %v10306_v35, %v16345_v52  ;;  %vm9002_vm0 = vmpackc.low %vm735_vm15, %vm719_vm13  ;;  %vm742_vm15 = vcmp.eq.s32.totalorder %v10361_v39, %v9999_v54 }
 0x27e   :  { %8995 = vmatprep.mubr.msk.bf16.mxu0 %vm8994_vm1, %v15749_v62  ;;  %vm702_vm1 = vcmp.eq.s32.totalorder %v10309_v36, %v16345_v52  ;;  %vm8488_vm4 = vmpackc.low %vm694_vm12, %vm678_vm6  ;;  %vm743_vm6 = vcmp.eq.s32.totalorder %v10361_v39, %v10002_v55  ;;  %vm759_vm12 = vcmp.eq.s32.totalorder %v10364_v40, %v10002_v55 }
 0x27f   :  { %vm9000_vm8 = vmpackc.low %vm702_vm1, %vm686_vm5  ;;  %vm751_vm1 = vcmp.eq.s32.totalorder %v10361_v39, %v10026_v63 }
 0x284   :  { %8485 = vmatmul.mubr.msk.bf16.gmra.mrb[36].mxu1 %vm8484_vm7, %v15749_v62  ;;  %vm8490_vm7 = vmpackc.low %vm727_vm3, %vm711_vm2  ;;  %vm767_vm2 = vcmp.eq.s32.totalorder %v10364_v40, %v10026_v63 }
 0x285   :  { %8997 = vmatmul.mubr.msk.bf16.gmra.mrb[36].mxu0 %vm8996_vm9, %v15749_v62  ;;  %8487 = vmatprep.mubr.msk.bf16.mxu1 %vm8486_vm10, %v15749_v62  ;;  %vm726_vm9 = vcmp.eq.s32.totalorder %v10338_v38, %v9999_v54  ;;  %vm718_vm10 = vcmp.eq.s32.totalorder %v10335_v37, %v16345_v52  ;;  %vm9006_vm13 = vmpackc.low %vm767_vm2, %vm751_vm1  ;;  %vm774_vm2 = vcmp.eq.s32.totalorder %v10387_v41, %v9999_v54 }
 0x286   :  { %8999 = vmatprep.mubr.msk.bf16.mxu0 %vm8998_vm11, %v15749_v62  ;;  %vm734_vm11 = vcmp.eq.s32.totalorder %v10338_v38, %v16345_v52  ;;  %vm8492_vm5 = vmpackc.low %vm726_vm9, %vm710_vm14  ;;  %vm775_vm14 = vcmp.eq.s32.totalorder %v10387_v41, %v10002_v55  ;;  %vm791_vm9 = vcmp.eq.s32.totalorder %v10390_v42, %v10002_v55 }
 0x287   :  { %vm9004_vm3 = vmpackc.low %vm734_vm11, %vm718_vm10  ;;  %vm783_vm11 = vcmp.eq.s32.totalorder %v10387_v41, %v10026_v63 }
 0x28c   :  { %8489 = vmatmul.mubr.msk.bf16.gmra.mrb[40].mxu1 %vm8488_vm4, %v15749_v62  ;;  %vm8494_vm4 = vmpackc.low %vm759_vm12, %vm743_vm6  ;;  %vm799_vm6 = vcmp.eq.s32.totalorder %v10390_v42, %v10026_v63 }
 0x28d   :  { %9001 = vmatmul.mubr.msk.bf16.gmra.mrb[40].mxu0 %vm9000_vm8, %v15749_v62  ;;  %8491 = vmatprep.mubr.msk.bf16.mxu1 %vm8490_vm7, %v15749_v62  ;;  %vm758_vm8 = vcmp.eq.s32.totalorder %v10364_v40, %v9999_v54  ;;  %vm750_vm7 = vcmp.eq.s32.totalorder %v10361_v39, %v16345_v52  ;;  %vm9010_vm1 = vmpackc.low %vm799_vm6, %vm783_vm11  ;;  %vm806_vm6 = vcmp.eq.s32.totalorder %v10413_v43, %v9999_v54 }
 0x28e   :  { %9003 = vmatprep.mubr.msk.bf16.mxu0 %vm9002_vm0, %v15749_v62  ;;  %vm766_vm0 = vcmp.eq.s32.totalorder %v10364_v40, %v16345_v52  ;;  %vm8496_vm10 = vmpackc.low %vm758_vm8, %vm742_vm15  ;;  %vm807_vm15 = vcmp.eq.s32.totalorder %v10413_v43, %v10002_v55  ;;  %vm823_vm8 = vcmp.eq.s32.totalorder %v10416_v44, %v10002_v55 }
 0x28f   :  { %vm9008_vm12 = vmpackc.low %vm766_vm0, %vm750_vm7  ;;  %vm815_vm0 = vcmp.eq.s32.totalorder %v10413_v43, %v10026_v63 }
 0x294   :  { %8493 = vmatmul.mubr.msk.bf16.gmra.mrb[44].mxu1 %vm8492_vm5, %v15749_v62  ;;  %vm8498_vm5 = vmpackc.low %vm791_vm9, %vm775_vm14  ;;  %vm831_vm14 = vcmp.eq.s32.totalorder %v10416_v44, %v10026_v63 }
 0x295   :  { %9005 = vmatmul.mubr.msk.bf16.gmra.mrb[44].mxu0 %vm9004_vm3, %v15749_v62  ;;  %8495 = vmatprep.mubr.msk.bf16.mxu1 %vm8494_vm4, %v15749_v62  ;;  %vm790_vm3 = vcmp.eq.s32.totalorder %v10390_v42, %v9999_v54  ;;  %vm782_vm4 = vcmp.eq.s32.totalorder %v10387_v41, %v16345_v52  ;;  %vm9014_vm11 = vmpackc.low %vm831_vm14, %vm815_vm0  ;;  %vm838_vm14 = vcmp.eq.s32.totalorder %v10439_v45, %v9999_v54 }
 0x296   :  { %9007 = vmatprep.mubr.msk.bf16.mxu0 %vm9006_vm13, %v15749_v62  ;;  %vm798_vm13 = vcmp.eq.s32.totalorder %v10390_v42, %v16345_v52  ;;  %vm8500_vm7 = vmpackc.low %vm790_vm3, %vm774_vm2  ;;  %vm839_vm2 = vcmp.eq.s32.totalorder %v10439_v45, %v10002_v55  ;;  %vm855_vm3 = vcmp.eq.s32.totalorder %v10442_v46, %v10002_v55 }
 0x297   :  { %vm9012_vm9 = vmpackc.low %vm798_vm13, %vm782_vm4  ;;  %vm847_vm13 = vcmp.eq.s32.totalorder %v10439_v45, %v10026_v63 }
 0x29c   :  { %8497 = vmatmul.mubr.msk.bf16.gmra.mrb[48].mxu1 %vm8496_vm10, %v15749_v62  ;;  %vm8502_vm10 = vmpackc.low %vm823_vm8, %vm807_vm15  ;;  %vm863_vm15 = vcmp.eq.s32.totalorder %v10442_v46, %v10026_v63 }
 0x29d   :  { %9009 = vmatmul.mubr.msk.bf16.gmra.mrb[48].mxu0 %vm9008_vm12, %v15749_v62  ;;  %8499 = vmatprep.mubr.msk.bf16.mxu1 %vm8498_vm5, %v15749_v62  ;;  %vm822_vm12 = vcmp.eq.s32.totalorder %v10416_v44, %v9999_v54  ;;  %vm814_vm5 = vcmp.eq.s32.totalorder %v10413_v43, %v16345_v52  ;;  %vm9018_vm0 = vmpackc.low %vm863_vm15, %vm847_vm13 }
 0x29e   :  { %9011 = vmatprep.mubr.msk.bf16.mxu0 %vm9010_vm1, %v15749_v62  ;;  %vm830_vm1 = vcmp.eq.s32.totalorder %v10416_v44, %v16345_v52  ;;  %vm8504_vm4 = vmpackc.low %vm822_vm12, %vm806_vm6 }
 0x29f   :  { %vm9016_vm8 = vmpackc.low %vm830_vm1, %vm814_vm5 }
 0x2a4   :  { %8501 = vmatmul.mubr.msk.bf16.gmra.mrb[52].mxu1 %vm8500_vm7, %v15749_v62  ;;  %vm8506_vm7 = vmpackc.low %vm855_vm3, %vm839_vm2 }
 0x2a5   :  { %9013 = vmatmul.mubr.msk.bf16.gmra.mrb[52].mxu0 %vm9012_vm9, %v15749_v62  ;;  %8503 = vmatprep.mubr.msk.bf16.mxu1 %vm8502_vm10, %v15749_v62  ;;  %vm854_vm9 = vcmp.eq.s32.totalorder %v10442_v46, %v9999_v54  ;;  %vm846_vm10 = vcmp.eq.s32.totalorder %v10439_v45, %v16345_v52 }
 0x2a6   :  { %9015 = vmatprep.mubr.msk.bf16.mxu0 %vm9014_vm11, %v15749_v62  ;;  %vm862_vm11 = vcmp.eq.s32.totalorder %v10442_v46, %v16345_v52  ;;  %vm8508_vm6 = vmpackc.low %vm854_vm9, %vm838_vm14 }
 0x2a7   :  { %vm9020_vm12 = vmpackc.low %vm862_vm11, %vm846_vm10 }
 0x2ac   :  { %8505 = vmatmul.mubr.msk.bf16.gmra.mrb[56].mxu1 %vm8504_vm4, %v15749_v62 }
 0x2ad   :  { %9017 = vmatmul.mubr.msk.bf16.gmra.mrb[56].mxu0 %vm9016_vm8, %v15749_v62  ;;  %8507 = vmatprep.mubr.msk.bf16.mxu1 %vm8506_vm7, %v15749_v62 }
 0x2ae   :  { %9019 = vmatprep.mubr.msk.bf16.mxu0 %vm9018_vm0, %v15749_v62 }
 0x2b4   :  { %8509 = vmatmul.mubr.msk.bf16.gmra.mrb[60].mxu1 %vm8508_vm6, %v15749_v62 }
 0x2b5   :  { %9021 = vmatmul.mubr.msk.bf16.gmra.mrb[60].mxu0 %vm9020_vm12, %v15749_v62 }
 0x30f   :  { %v4677_v13 = vpop.f32.mrb[0].mxu1 }
 0x310   :  { %v5449_v53 = vpop.f32.mrb[0].mxu0  ;;  %v4679_v55 = vpop.f32.mrb[1].mxu1 }
 0x311   :  { %v9086_v60 = vadd.f32 %v5449_v53, %v4677_v13  ;;  %v5451_v61 = vpop.f32.mrb[1].mxu0  ;;  %v4681_v63 = vpop.f32.mrb[2].mxu1 }
 0x312   :  { %v9087_v1 = vadd.f32 %v5451_v61, %v4679_v55  ;;  %v5453_v54 = vpop.f32.mrb[2].mxu0  ;;  %v4683_v5 = vpop.f32.mrb[3].mxu1 }
 0x313   :  { %vm5803_vm5 = vcmp.gt.f32.partialorder %v9086_v60, 0.0  ;;  %v9088_v6 = vadd.f32 %v5453_v54, %v4681_v63  ;;  %v5455_v8 = vpop.f32.mrb[3].mxu0 }
 0x314   :  { %v14461_v10 = vsel %vm5803_vm5, 1.0, %v9888_v9  ;;  %vm5804_vm1 = vcmp.gt.f32.partialorder %v9087_v1, 0.0  ;;  %v9089_v11 = vadd.f32 %v5455_v8, %v4683_v5 }
 0x315   :  { %v14464_v62 = vsel %vm5804_vm1, 1.0, %v9888_v9  ;;  %vm5805_vm2 = vcmp.gt.f32.partialorder %v9088_v6, 0.0 }
 0x316   :  { %v5995_v12 = vadd.f32 %v14464_v62, %v14461_v10  ;;  %v14469_v14 = vsel %vm5805_vm2, 1.0, %v9888_v9  ;;  %vm5806_vm3 = vcmp.gt.f32.partialorder %v9089_v11, 0.0 }
 0x317   :  { %v4687_v15 = vpop.f32.mrb[4].mxu1  ;;  %v14473_v19 = vsel %vm5806_vm3, 1.0, %v9888_v9 }
 0x318   :  { %v5996_v16 = vadd.f32 %v14469_v14, %v5995_v12  ;;  %v5459_v17 = vpop.f32.mrb[4].mxu0  ;;  %v4689_v18 = vpop.f32.mrb[5].mxu1 }
 0x319   :  { %v9090_v20 = vadd.f32 %v5459_v17, %v4687_v15  ;;  %v5461_v25 = vpop.f32.mrb[5].mxu0  ;;  %v4691_v28 = vpop.f32.mrb[6].mxu1 }
 0x31a   :  { %v5997_v22 = vadd.f32 %v14473_v19, %v5996_v16  ;;  %v9091_v24 = vadd.f32 %v5461_v25, %v4689_v18  ;;  %v5463_v35 = vpop.f32.mrb[6].mxu0  ;;  %v4693_v36 = vpop.f32.mrb[7].mxu1 }
 0x31b   :  { %vm5807_vm4 = vcmp.gt.f32.partialorder %v9090_v20, 0.0  ;;  %v9092_v37 = vadd.f32 %v5463_v35, %v4691_v28  ;;  %v5465_v38 = vpop.f32.mrb[7].mxu0 }
 0x31c   :  { %v14477_v39 = vsel %vm5807_vm4, 1.0, %v9888_v9  ;;  %vm5808_vm13 = vcmp.gt.f32.partialorder %v9091_v24, 0.0  ;;  %v9093_v40 = vadd.f32 %v5465_v38, %v4693_v36 }
 0x31d   :  { %16346 = vst [vmem:[#allocation12_spill] sm:$0xff] %v14477_v39  ;;  %v5998_v41 = vadd.f32 %v14477_v39, %v5997_v22  ;;  %v14481_v42 = vsel %vm5808_vm13, 1.0, %v9888_v9  ;;  %vm5809_vm15 = vcmp.gt.f32.partialorder %v9092_v37, 0.0 }
 0x31e   :  { %16347 = vst [vmem:[#allocation13_spill] sm:$0xff] %v14481_v42  ;;  %vm5810_vm8 = vcmp.gt.f32.partialorder %v9093_v40, 0.0  ;;  %v14485_v45 = vsel %vm5809_vm15, 1.0, %v9888_v9 }
 0x31f   :  { %v5999_v43 = vadd.f32 %v14481_v42, %v5998_v41  ;;  %v4697_v44 = vpop.f32.mrb[8].mxu1  ;;  %16348 = vst [vmem:[#allocation14_spill] sm:$0xff] %v14485_v45  ;;  %v14489_v3 = vsel %vm5810_vm8, 1.0, %v9888_v9 }
 0x320   :  { %v5469_v46 = vpop.f32.mrb[8].mxu0  ;;  %v4699_v4 = vpop.f32.mrb[9].mxu1  ;;  %16349 = vst [vmem:[#allocation15_spill] sm:$0xff] %v14489_v3 }
 0x321   :  { %v6000_v57 = vadd.f32 %v14485_v45, %v5999_v43  ;;  %v9094_v58 = vadd.f32 %v5469_v46, %v4697_v44  ;;  %v5471_v0 = vpop.f32.mrb[9].mxu0  ;;  %v4701_v27 = vpop.f32.mrb[10].mxu1 }
 0x322   :  { %v9095_v7 = vadd.f32 %v5471_v0, %v4699_v4  ;;  %v5473_v34 = vpop.f32.mrb[10].mxu0  ;;  %v4703_v51 = vpop.f32.mrb[11].mxu1 }
 0x323   :  { %v6001_v59 = vadd.f32 %v14489_v3, %v6000_v57  ;;  %vm5811_vm7 = vcmp.gt.f32.partialorder %v9094_v58, 0.0  ;;  %v9096_v33 = vadd.f32 %v5473_v34, %v4701_v27  ;;  %v5475_v47 = vpop.f32.mrb[11].mxu0 }
 0x324   :  { %v14493_v31 = vsel %vm5811_vm7, 1.0, %v9888_v9  ;;  %vm5812_vm0 = vcmp.gt.f32.partialorder %v9095_v7, 0.0  ;;  %v9097_v50 = vadd.f32 %v5475_v47, %v4703_v51 }
 0x325   :  { %v6002_v56 = vadd.f32 %v14493_v31, %v6001_v59  ;;  %v14497_v21 = vsel %vm5812_vm0, 1.0, %v9888_v9  ;;  %vm5813_vm14 = vcmp.gt.f32.partialorder %v9096_v33, 0.0 }
 0x326   :  { %vm5814_vm9 = vcmp.gt.f32.partialorder %v9097_v50, 0.0  ;;  %v14501_v48 = vsel %vm5813_vm14, 1.0, %v9888_v9 }
 0x327   :  { %v6003_v32 = vadd.f32 %v14497_v21, %v6002_v56  ;;  %v4707_v30 = vpop.f32.mrb[12].mxu1  ;;  %16350 = vst [vmem:[#allocation16_spill] sm:$0xff] %v14501_v48  ;;  %v14505_v13 = vsel %vm5814_vm9, 1.0, %v9888_v9 }
 0x328   :  { %v5479_v29 = vpop.f32.mrb[12].mxu0  ;;  %v4709_v49 = vpop.f32.mrb[13].mxu1  ;;  %16351 = vst [vmem:[#allocation17_spill] sm:$0xff] %v14505_v13 }
 0x329   :  { %v6004_v26 = vadd.f32 %v14501_v48, %v6003_v32  ;;  %v9098_v23 = vadd.f32 %v5479_v29, %v4707_v30  ;;  %v5481_v2 = vpop.f32.mrb[13].mxu0  ;;  %v4711_v52 = vpop.f32.mrb[14].mxu1 }
 0x32a   :  { %v9099_v53 = vadd.f32 %v5481_v2, %v4709_v49  ;;  %v5483_v55 = vpop.f32.mrb[14].mxu0  ;;  %v4713_v60 = vpop.f32.mrb[15].mxu1 }
 0x32b   :  { %v6005_v61 = vadd.f32 %v14505_v13, %v6004_v26  ;;  %vm5815_vm10 = vcmp.gt.f32.partialorder %v9098_v23, 0.0  ;;  %v9100_v63 = vadd.f32 %v5483_v55, %v4711_v52  ;;  %v5485_v1 = vpop.f32.mrb[15].mxu0 }
 0x32c   :  { %v14509_v54 = vsel %vm5815_vm10, 1.0, %v9888_v9  ;;  %vm5816_vm11 = vcmp.gt.f32.partialorder %v9099_v53, 0.0  ;;  %v9101_v5 = vadd.f32 %v5485_v1, %v4713_v60 }
 0x32d   :  { %v6006_v6 = vadd.f32 %v14509_v54, %v6005_v61  ;;  %v14513_v8 = vsel %vm5816_vm11, 1.0, %v9888_v9  ;;  %vm5817_vm6 = vcmp.gt.f32.partialorder %v9100_v63, 0.0 }
 0x32e   :  { %16352 = vst [vmem:[#allocation18_spill] sm:$0xff] %v14513_v8  ;;  %vm5818_vm12 = vcmp.gt.f32.partialorder %v9101_v5, 0.0  ;;  %v14517_v15 = vsel %vm5817_vm6, 1.0, %v9888_v9 }
 0x32f   :  { %v6007_v11 = vadd.f32 %v14513_v8, %v6006_v6  ;;  %v4717_v12 = vpop.f32.mrb[16].mxu1  ;;  %16353 = vst [vmem:[#allocation19_spill] sm:$0xff] %v14517_v15  ;;  %v14521_v22 = vsel %vm5818_vm12, 1.0, %v9888_v9 }
 0x330   :  { %v5489_v16 = vpop.f32.mrb[16].mxu0  ;;  %v4719_v17 = vpop.f32.mrb[17].mxu1  ;;  %16354 = vst [vmem:[#allocation20_spill] sm:$0xff] %v14521_v22 }
 0x331   :  { %v6008_v18 = vadd.f32 %v14517_v15, %v6007_v11  ;;  %v9102_v20 = vadd.f32 %v5489_v16, %v4717_v12  ;;  %v5491_v25 = vpop.f32.mrb[17].mxu0  ;;  %v4721_v28 = vpop.f32.mrb[18].mxu1 }
 0x332   :  { %v9103_v24 = vadd.f32 %v5491_v25, %v4719_v17  ;;  %v5493_v35 = vpop.f32.mrb[18].mxu0  ;;  %v4723_v36 = vpop.f32.mrb[19].mxu1 }
 0x333   :  { %v6009_v37 = vadd.f32 %v14521_v22, %v6008_v18  ;;  %vm5819_vm5 = vcmp.gt.f32.partialorder %v9102_v20, 0.0  ;;  %v9104_v38 = vadd.f32 %v5493_v35, %v4721_v28  ;;  %v5495_v40 = vpop.f32.mrb[19].mxu0 }
 0x334   :  { %v14525_v41 = vsel %vm5819_vm5, 1.0, %v9888_v9  ;;  %vm5820_vm1 = vcmp.gt.f32.partialorder %v9103_v24, 0.0  ;;  %v9105_v43 = vadd.f32 %v5495_v40, %v4723_v36 }
 0x335   :  { %16355 = vst [vmem:[#allocation21_spill] sm:$0xff] %v14525_v41  ;;  %v6010_v44 = vadd.f32 %v14525_v41, %v6009_v37  ;;  %v14529_v46 = vsel %vm5820_vm1, 1.0, %v9888_v9  ;;  %vm5821_vm2 = vcmp.gt.f32.partialorder %v9104_v38, 0.0 }
 0x336   :  { %16356 = vst [vmem:[#allocation22_spill] sm:$0xff] %v14529_v46  ;;  %vm5822_vm3 = vcmp.gt.f32.partialorder %v9105_v43, 0.0  ;;  %v14533_v58 = vsel %vm5821_vm2, 1.0, %v9888_v9 }
 0x337   :  { %v6011_v4 = vadd.f32 %v14529_v46, %v6010_v44  ;;  %v4727_v57 = vpop.f32.mrb[20].mxu1  ;;  %16357 = vst [vmem:[#allocation23_spill] sm:$0xff] %v14533_v58  ;;  %v14537_v33 = vsel %vm5822_vm3, 1.0, %v9888_v9 }
 0x338   :  { %v5499_v0 = vpop.f32.mrb[20].mxu0  ;;  %v4729_v27 = vpop.f32.mrb[21].mxu1  ;;  %16358 = vst [vmem:[#allocation24_spill] sm:$0xff] %v14537_v33 }
 0x339   :  { %v6012_v7 = vadd.f32 %v14533_v58, %v6011_v4  ;;  %v9106_v34 = vadd.f32 %v5499_v0, %v4727_v57  ;;  %v5501_v51 = vpop.f32.mrb[21].mxu0  ;;  %v4731_v59 = vpop.f32.mrb[22].mxu1 }
 0x33a   :  { %v9107_v47 = vadd.f32 %v5501_v51, %v4729_v27  ;;  %v5503_v50 = vpop.f32.mrb[22].mxu0  ;;  %v4733_v56 = vpop.f32.mrb[23].mxu1 }
 0x33b   :  { %v6013_v32 = vadd.f32 %v14537_v33, %v6012_v7  ;;  %vm5823_vm4 = vcmp.gt.f32.partialorder %v9106_v34, 0.0  ;;  %v9108_v30 = vadd.f32 %v5503_v50, %v4731_v59  ;;  %v5505_v29 = vpop.f32.mrb[23].mxu0 }
 0x33c   :  { %v14541_v49 = vsel %vm5823_vm4, 1.0, %v9888_v9  ;;  %vm5824_vm13 = vcmp.gt.f32.partialorder %v9107_v47, 0.0  ;;  %v9109_v26 = vadd.f32 %v5505_v29, %v4733_v56 }
 0x33d   :  { %16359 = vst [vmem:[#allocation25_spill] sm:$0xff] %v14541_v49  ;;  %v6014_v23 = vadd.f32 %v14541_v49, %v6013_v32  ;;  %v14545_v2 = vsel %vm5824_vm13, 1.0, %v9888_v9  ;;  %vm5825_vm15 = vcmp.gt.f32.partialorder %v9108_v30, 0.0 }
 0x33e   :  { %16360 = vst [vmem:[#allocation26_spill] sm:$0xff] %v14545_v2  ;;  %vm5826_vm8 = vcmp.gt.f32.partialorder %v9109_v26, 0.0  ;;  %v14549_v55 = vsel %vm5825_vm15, 1.0, %v9888_v9 }
 0x33f   :  { %v6015_v52 = vadd.f32 %v14545_v2, %v6014_v23  ;;  %v4737_v53 = vpop.f32.mrb[24].mxu1  ;;  %16361 = vst [vmem:[#allocation27_spill] sm:$0xff] %v14549_v55  ;;  %v14553_v11 = vsel %vm5826_vm8, 1.0, %v9888_v9 }
 0x340   :  { %v5509_v60 = vpop.f32.mrb[24].mxu0  ;;  %v4739_v61 = vpop.f32.mrb[25].mxu1  ;;  %16362 = vst [vmem:[#allocation28_spill] sm:$0xff] %v14553_v11 }
 0x341   :  { %v6016_v63 = vadd.f32 %v14549_v55, %v6015_v52  ;;  %v9110_v1 = vadd.f32 %v5509_v60, %v4737_v53  ;;  %v5511_v5 = vpop.f32.mrb[25].mxu0  ;;  %v4741_v6 = vpop.f32.mrb[26].mxu1 }
 0x342   :  { %v9111_v12 = vadd.f32 %v5511_v5, %v4739_v61  ;;  %v5513_v16 = vpop.f32.mrb[26].mxu0  ;;  %v4743_v17 = vpop.f32.mrb[27].mxu1 }
 0x343   :  { %v6017_v18 = vadd.f32 %v14553_v11, %v6016_v63  ;;  %vm5827_vm7 = vcmp.gt.f32.partialorder %v9110_v1, 0.0  ;;  %v9112_v20 = vadd.f32 %v5513_v16, %v4741_v6  ;;  %v5515_v25 = vpop.f32.mrb[27].mxu0 }
 0x344   :  { %v14557_v28 = vsel %vm5827_vm7, 1.0, %v9888_v9  ;;  %vm5828_vm0 = vcmp.gt.f32.partialorder %v9111_v12, 0.0  ;;  %v9113_v24 = vadd.f32 %v5515_v25, %v4743_v17 }
 0x345   :  { %16363 = vst [vmem:[#allocation29_spill] sm:$0xff] %v14557_v28  ;;  %v6018_v35 = vadd.f32 %v14557_v28, %v6017_v18  ;;  %v14561_v36 = vsel %vm5828_vm0, 1.0, %v9888_v9  ;;  %vm5829_vm14 = vcmp.gt.f32.partialorder %v9112_v20, 0.0 }
 0x346   :  { %16364 = vst [vmem:[#allocation30_spill] sm:$0xff] %v14561_v36  ;;  %vm5830_vm9 = vcmp.gt.f32.partialorder %v9113_v24, 0.0  ;;  %v14565_v40 = vsel %vm5829_vm14, 1.0, %v9888_v9 }
 0x347   :  { %v6019_v37 = vadd.f32 %v14561_v36, %v6018_v35  ;;  %v4747_v38 = vpop.f32.mrb[28].mxu1  ;;  %16365 = vst [vmem:[#allocation31_spill] sm:$0xff] %v14565_v40  ;;  %v14569_v7 = vsel %vm5830_vm9, 1.0, %v9888_v9 }
 0x348   :  { %v5519_v43 = vpop.f32.mrb[28].mxu0  ;;  %v4749_v44 = vpop.f32.mrb[29].mxu1  ;;  %16366 = vst [vmem:[#allocation32_spill] sm:$0xff] %v14569_v7 }
 0x349   :  { %v6020_v4 = vadd.f32 %v14565_v40, %v6019_v37  ;;  %v9114_v57 = vadd.f32 %v5519_v43, %v4747_v38  ;;  %v5521_v0 = vpop.f32.mrb[29].mxu0  ;;  %v4751_v27 = vpop.f32.mrb[30].mxu1 }
 0x34a   :  { %v9115_v34 = vadd.f32 %v5521_v0, %v4749_v44  ;;  %v5523_v51 = vpop.f32.mrb[30].mxu0  ;;  %v4753_v59 = vpop.f32.mrb[31].mxu1 }
 0x34b   :  { %v6021_v47 = vadd.f32 %v14569_v7, %v6020_v4  ;;  %vm5831_vm10 = vcmp.gt.f32.partialorder %v9114_v57, 0.0  ;;  %v9116_v50 = vadd.f32 %v5523_v51, %v4751_v27  ;;  %v5525_v56 = vpop.f32.mrb[31].mxu0 }
 0x34c   :  { %v14573_v32 = vsel %vm5831_vm10, 1.0, %v9888_v9  ;;  %vm5832_vm11 = vcmp.gt.f32.partialorder %v9115_v34, 0.0  ;;  %v9117_v30 = vadd.f32 %v5525_v56, %v4753_v59 }
 0x34d   :  { %16367 = vst [vmem:[#allocation33_spill] sm:$0xff] %v14573_v32  ;;  %v6022_v29 = vadd.f32 %v14573_v32, %v6021_v47  ;;  %v14577_v26 = vsel %vm5832_vm11, 1.0, %v9888_v9  ;;  %vm5833_vm6 = vcmp.gt.f32.partialorder %v9116_v50, 0.0 }
 0x34e   :  { %16368 = vst [vmem:[#allocation34_spill] sm:$0xff] %v14577_v26  ;;  %vm5834_vm12 = vcmp.gt.f32.partialorder %v9117_v30, 0.0  ;;  %v14581_v53 = vsel %vm5833_vm6, 1.0, %v9888_v9 }
 0x34f   :  { %v6023_v23 = vadd.f32 %v14577_v26, %v6022_v29  ;;  %v4757_v52 = vpop.f32.mrb[32].mxu1  ;;  %16369 = vst [vmem:[#allocation35_spill] sm:$0xff] %v14581_v53  ;;  %v14585_v12 = vsel %vm5834_vm12, 1.0, %v9888_v9 }
 0x350   :  { %v5529_v60 = vpop.f32.mrb[32].mxu0  ;;  %v4759_v61 = vpop.f32.mrb[33].mxu1  ;;  %16370 = vst [vmem:[#allocation36_spill] sm:$0xff] %v14585_v12 }
 0x351   :  { %v6024_v63 = vadd.f32 %v14581_v53, %v6023_v23  ;;  %v9118_v1 = vadd.f32 %v5529_v60, %v4757_v52  ;;  %v5531_v5 = vpop.f32.mrb[33].mxu0  ;;  %v4761_v6 = vpop.f32.mrb[34].mxu1 }
 0x352   :  { %v9119_v16 = vadd.f32 %v5531_v5, %v4759_v61  ;;  %v5533_v17 = vpop.f32.mrb[34].mxu0  ;;  %v4763_v18 = vpop.f32.mrb[35].mxu1 }
 0x353   :  { %v6025_v20 = vadd.f32 %v14585_v12, %v6024_v63  ;;  %vm5835_vm5 = vcmp.gt.f32.partialorder %v9118_v1, 0.0  ;;  %v9120_v25 = vadd.f32 %v5533_v17, %v4761_v6  ;;  %v5535_v24 = vpop.f32.mrb[35].mxu0 }
 0x354   :  { %v14589_v35 = vsel %vm5835_vm5, 1.0, %v9888_v9  ;;  %vm5836_vm1 = vcmp.gt.f32.partialorder %v9119_v16, 0.0  ;;  %v9121_v37 = vadd.f32 %v5535_v24, %v4763_v18 }
 0x355   :  { %16371 = vst [vmem:[#allocation37_spill] sm:$0xff] %v14589_v35  ;;  %v6026_v38 = vadd.f32 %v14589_v35, %v6025_v20  ;;  %v14593_v43 = vsel %vm5836_vm1, 1.0, %v9888_v9  ;;  %vm5837_vm2 = vcmp.gt.f32.partialorder %v9120_v25, 0.0 }
 0x356   :  { %16372 = vst [vmem:[#allocation38_spill] sm:$0xff] %v14593_v43  ;;  %vm5838_vm3 = vcmp.gt.f32.partialorder %v9121_v37, 0.0  ;;  %v14597_v57 = vsel %vm5837_vm2, 1.0, %v9888_v9 }
 0x357   :  { %v6027_v44 = vadd.f32 %v14593_v43, %v6026_v38  ;;  %v4767_v4 = vpop.f32.mrb[36].mxu1  ;;  %16373 = vst [vmem:[#allocation39_spill] sm:$0xff] %v14597_v57  ;;  %v14601_v50 = vsel %vm5838_vm3, 1.0, %v9888_v9 }
 0x358   :  { %v5539_v0 = vpop.f32.mrb[36].mxu0  ;;  %v4769_v27 = vpop.f32.mrb[37].mxu1  ;;  %16374 = vst [vmem:[#allocation40_spill] sm:$0xff] %v14601_v50 }
 0x359   :  { %v6028_v34 = vadd.f32 %v14597_v57, %v6027_v44  ;;  %v9122_v51 = vadd.f32 %v5539_v0, %v4767_v4  ;;  %v5541_v59 = vpop.f32.mrb[37].mxu0  ;;  %v4771_v47 = vpop.f32.mrb[38].mxu1 }
 0x35a   :  { %v9123_v56 = vadd.f32 %v5541_v59, %v4769_v27  ;;  %v5543_v30 = vpop.f32.mrb[38].mxu0  ;;  %v4773_v29 = vpop.f32.mrb[39].mxu1 }
 0x35b   :  { %v6029_v23 = vadd.f32 %v14601_v50, %v6028_v34  ;;  %vm5839_vm4 = vcmp.gt.f32.partialorder %v9122_v51, 0.0  ;;  %v9124_v52 = vadd.f32 %v5543_v30, %v4771_v47  ;;  %v5545_v60 = vpop.f32.mrb[39].mxu0 }
 0x35c   :  { %v14605_v61 = vsel %vm5839_vm4, 1.0, %v9888_v9  ;;  %vm5840_vm13 = vcmp.gt.f32.partialorder %v9123_v56, 0.0  ;;  %v9125_v63 = vadd.f32 %v5545_v60, %v4773_v29 }
 0x35d   :  { %16375 = vst [vmem:[#allocation41_spill] sm:$0xff] %v14605_v61  ;;  %v6030_v1 = vadd.f32 %v14605_v61, %v6029_v23  ;;  %v14609_v5 = vsel %vm5840_vm13, 1.0, %v9888_v9  ;;  %vm5841_vm15 = vcmp.gt.f32.partialorder %v9124_v52, 0.0 }
 0x35e   :  { %16376 = vst [vmem:[#allocation42_spill] sm:$0xff] %v14609_v5  ;;  %vm5842_vm8 = vcmp.gt.f32.partialorder %v9125_v63, 0.0  ;;  %v14613_v17 = vsel %vm5841_vm15, 1.0, %v9888_v9 }
 0x35f   :  { %v6031_v6 = vadd.f32 %v14609_v5, %v6030_v1  ;;  %v4777_v16 = vpop.f32.mrb[40].mxu1  ;;  %16377 = vst [vmem:[#allocation43_spill] sm:$0xff] %v14613_v17  ;;  %v14617_v44 = vsel %vm5842_vm8, 1.0, %v9888_v9 }
 0x360   :  { %v5549_v18 = vpop.f32.mrb[40].mxu0  ;;  %v4779_v20 = vpop.f32.mrb[41].mxu1  ;;  %16378 = vst [vmem:[#allocation44_spill] sm:$0xff] %v14617_v44 }
 0x361   :  { %v6032_v25 = vadd.f32 %v14613_v17, %v6031_v6  ;;  %v9126_v24 = vadd.f32 %v5549_v18, %v4777_v16  ;;  %v5551_v37 = vpop.f32.mrb[41].mxu0  ;;  %v4781_v38 = vpop.f32.mrb[42].mxu1 }
 0x362   :  { %v9127_v4 = vadd.f32 %v5551_v37, %v4779_v20  ;;  %v5553_v0 = vpop.f32.mrb[42].mxu0  ;;  %v4783_v27 = vpop.f32.mrb[43].mxu1 }
 0x363   :  { %v6033_v34 = vadd.f32 %v14617_v44, %v6032_v25  ;;  %vm5843_vm7 = vcmp.gt.f32.partialorder %v9126_v24, 0.0  ;;  %v9128_v51 = vadd.f32 %v5553_v0, %v4781_v38  ;;  %v5555_v59 = vpop.f32.mrb[43].mxu0 }
 0x364   :  { %v14621_v47 = vsel %vm5843_vm7, 1.0, %v9888_v9  ;;  %vm5844_vm0 = vcmp.gt.f32.partialorder %v9127_v4, 0.0  ;;  %v9129_v56 = vadd.f32 %v5555_v59, %v4783_v27 }
 0x365   :  { %16379 = vst [vmem:[#allocation45_spill] sm:$0xff] %v14621_v47  ;;  %v6034_v30 = vadd.f32 %v14621_v47, %v6033_v34  ;;  %v14625_v29 = vsel %vm5844_vm0, 1.0, %v9888_v9  ;;  %vm5845_vm14 = vcmp.gt.f32.partialorder %v9128_v51, 0.0 }
 0x366   :  { %16380 = vst [vmem:[#allocation46_spill] sm:$0xff] %v14625_v29  ;;  %vm5846_vm9 = vcmp.gt.f32.partialorder %v9129_v56, 0.0  ;;  %v14629_v60 = vsel %vm5845_vm14, 1.0, %v9888_v9 }
 0x367   :  { %v6035_v23 = vadd.f32 %v14625_v29, %v6034_v30  ;;  %v4787_v52 = vpop.f32.mrb[44].mxu1  ;;  %16381 = vst [vmem:[#allocation47_spill] sm:$0xff] %v14629_v60  ;;  %v14633_v25 = vsel %vm5846_vm9, 1.0, %v9888_v9 }
 0x368   :  { %v5559_v63 = vpop.f32.mrb[44].mxu0  ;;  %v4789_v1 = vpop.f32.mrb[45].mxu1  ;;  %16382 = vst [vmem:[#allocation48_spill] sm:$0xff] %v14633_v25 }
 0x369   :  { %v6036_v6 = vadd.f32 %v14629_v60, %v6035_v23  ;;  %v9130_v16 = vadd.f32 %v5559_v63, %v4787_v52  ;;  %v5561_v18 = vpop.f32.mrb[45].mxu0  ;;  %v4791_v20 = vpop.f32.mrb[46].mxu1 }
 0x36a   :  { %v9131_v24 = vadd.f32 %v5561_v18, %v4789_v1  ;;  %v5563_v37 = vpop.f32.mrb[46].mxu0  ;;  %v4793_v38 = vpop.f32.mrb[47].mxu1 }
 0x36b   :  { %v6037_v4 = vadd.f32 %v14633_v25, %v6036_v6  ;;  %vm5847_vm10 = vcmp.gt.f32.partialorder %v9130_v16, 0.0  ;;  %v9132_v0 = vadd.f32 %v5563_v37, %v4791_v20  ;;  %v5565_v27 = vpop.f32.mrb[47].mxu0 }
 0x36c   :  { %v14637_v34 = vsel %vm5847_vm10, 1.0, %v9888_v9  ;;  %vm5848_vm11 = vcmp.gt.f32.partialorder %v9131_v24, 0.0  ;;  %v9133_v51 = vadd.f32 %v5565_v27, %v4793_v38 }
 0x36d   :  { %16383 = vst [vmem:[#allocation49_spill] sm:$0xff] %v14637_v34  ;;  %v6038_v59 = vadd.f32 %v14637_v34, %v6037_v4  ;;  %v14641_v56 = vsel %vm5848_vm11, 1.0, %v9888_v9  ;;  %vm5849_vm6 = vcmp.gt.f32.partialorder %v9132_v0, 0.0 }
 0x36e   :  { %16384 = vst [vmem:[#allocation50_spill] sm:$0xff] %v14641_v56  ;;  %vm5850_vm12 = vcmp.gt.f32.partialorder %v9133_v51, 0.0  ;;  %v14645_v52 = vsel %vm5849_vm6, 1.0, %v9888_v9 }
 0x36f   :  { %v6039_v30 = vadd.f32 %v14641_v56, %v6038_v59  ;;  %v4797_v23 = vpop.f32.mrb[48].mxu1  ;;  %16385 = vst [vmem:[#allocation51_spill] sm:$0xff] %v14645_v52  ;;  %v14649_v24 = vsel %vm5850_vm12, 1.0, %v9888_v9 }
 0x370   :  { %v5569_v63 = vpop.f32.mrb[48].mxu0  ;;  %v4799_v1 = vpop.f32.mrb[49].mxu1  ;;  %16386 = vst [vmem:[#allocation52_spill] sm:$0xff] %v14649_v24 }
 0x371   :  { %v6040_v6 = vadd.f32 %v14645_v52, %v6039_v30  ;;  %v9134_v16 = vadd.f32 %v5569_v63, %v4797_v23  ;;  %v5571_v18 = vpop.f32.mrb[49].mxu0  ;;  %v4801_v20 = vpop.f32.mrb[50].mxu1 }
 0x372   :  { %v9135_v37 = vadd.f32 %v5571_v18, %v4799_v1  ;;  %v5573_v38 = vpop.f32.mrb[50].mxu0  ;;  %v4803_v4 = vpop.f32.mrb[51].mxu1 }
 0x373   :  { %v6041_v0 = vadd.f32 %v14649_v24, %v6040_v6  ;;  %vm5851_vm5 = vcmp.gt.f32.partialorder %v9134_v16, 0.0  ;;  %v9136_v27 = vadd.f32 %v5573_v38, %v4801_v20  ;;  %v5575_v51 = vpop.f32.mrb[51].mxu0 }
 0x374   :  { %v14653_v59 = vsel %vm5851_vm5, 1.0, %v9888_v9  ;;  %vm5852_vm1 = vcmp.gt.f32.partialorder %v9135_v37, 0.0  ;;  %v9137_v56 = vadd.f32 %v5575_v51, %v4803_v4  ;;  %vm6431_vm5 = vcmp.gt.f32.partialorder %v14461_v10, 0.0 }
 0x375   :  { %16387 = vst [vmem:[#allocation53_spill] sm:$0xff] %v14653_v59  ;;  %v6042_v30 = vadd.f32 %v14653_v59, %v6041_v0  ;;  %v14657_v23 = vsel %vm5852_vm1, 1.0, %v9888_v9  ;;  %vm5853_vm2 = vcmp.gt.f32.partialorder %v9136_v27, 0.0  ;;  %vm6432_vm1 = vcmp.gt.f32.partialorder %v14464_v62, 0.0 }
 0x376   :  { %16388 = vst [vmem:[#allocation54_spill] sm:$0xff] %v14657_v23  ;;  %vm5854_vm3 = vcmp.gt.f32.partialorder %v9137_v56, 0.0  ;;  %v14661_v6 = vsel %vm5853_vm2, 1.0, %v9888_v9  ;;  %vm6433_vm2 = vcmp.gt.f32.partialorder %v14469_v14, 0.0 }
 0x377   :  { %v6043_v63 = vadd.f32 %v14657_v23, %v6042_v30  ;;  %v4807_v1 = vpop.f32.mrb[52].mxu1  ;;  %16389 = vst [vmem:[#allocation55_spill] sm:$0xff] %v14661_v6  ;;  %v14665_v0 = vsel %vm5854_vm3, 1.0, %v9888_v9  ;;  %vm6434_vm3 = vcmp.gt.f32.partialorder %v14473_v19, 0.0 }
 0x378   :  { %v5579_v16 = vpop.f32.mrb[52].mxu0  ;;  %v4809_v18 = vpop.f32.mrb[53].mxu1  ;;  %16390 = vst [vmem:[#allocation56_spill] sm:$0xff] %v14665_v0 }
 0x379   :  { %v6044_v20 = vadd.f32 %v14661_v6, %v6043_v63  ;;  %v9138_v38 = vadd.f32 %v5579_v16, %v4807_v1  ;;  %v5581_v37 = vpop.f32.mrb[53].mxu0  ;;  %v4811_v4 = vpop.f32.mrb[54].mxu1 }
 0x37a   :  { %v9139_v51 = vadd.f32 %v5581_v37, %v4809_v18  ;;  %v5583_v59 = vpop.f32.mrb[54].mxu0  ;;  %v4813_v27 = vpop.f32.mrb[55].mxu1 }
 0x37b   :  { %v6045_v30 = vadd.f32 %v14665_v0, %v6044_v20  ;;  %vm5855_vm4 = vcmp.gt.f32.partialorder %v9138_v38, 0.0  ;;  %v9140_v56 = vadd.f32 %v5583_v59, %v4811_v4  ;;  %v5585_v23 = vpop.f32.mrb[55].mxu0 }
 0x37c   :  { %v14669_v24 = vsel %vm5855_vm4, 1.0, %v9888_v9  ;;  %vm5856_vm13 = vcmp.gt.f32.partialorder %v9139_v51, 0.0  ;;  %v9141_v52 = vadd.f32 %v5585_v23, %v4813_v27 }
 0x37d   :  { %16391 = vst [vmem:[#allocation57_spill] sm:$0xff] %v14669_v24  ;;  %v6046_v63 = vadd.f32 %v14669_v24, %v6045_v30  ;;  %v14673_v1 = vsel %vm5856_vm13, 1.0, %v9888_v9  ;;  %vm5857_vm15 = vcmp.gt.f32.partialorder %v9140_v56, 0.0 }
 0x37e   :  { %16392 = vst [vmem:[#allocation58_spill] sm:$0xff] %v14673_v1  ;;  %vm5858_vm8 = vcmp.gt.f32.partialorder %v9141_v52, 0.0  ;;  %v14677_v20 = vsel %vm5857_vm15, 1.0, %v9888_v9 }
 0x37f   :  { %v6047_v16 = vadd.f32 %v14673_v1, %v6046_v63  ;;  %v4817_v18 = vpop.f32.mrb[56].mxu1  ;;  %16393 = vst [vmem:[#allocation59_spill] sm:$0xff] %v14677_v20  ;;  %v14681_v27 = vsel %vm5858_vm8, 1.0, %v9888_v9 }
 0x380   :  { %v5589_v59 = vpop.f32.mrb[56].mxu0  ;;  %v4819_v38 = vpop.f32.mrb[57].mxu1  ;;  %16394 = vst [vmem:[#allocation60_spill] sm:$0xff] %v14681_v27 }
 0x381   :  { %v6048_v37 = vadd.f32 %v14677_v20, %v6047_v16  ;;  %v9142_v4 = vadd.f32 %v5589_v59, %v4817_v18  ;;  %v5591_v51 = vpop.f32.mrb[57].mxu0  ;;  %v4821_v23 = vpop.f32.mrb[58].mxu1 }
 0x382   :  { %v9143_v30 = vadd.f32 %v5591_v51, %v4819_v38  ;;  %v5593_v24 = vpop.f32.mrb[58].mxu0  ;;  %v4823_v56 = vpop.f32.mrb[59].mxu1 }
 0x383   :  { %v6049_v63 = vadd.f32 %v14681_v27, %v6048_v37  ;;  %vm5859_vm7 = vcmp.gt.f32.partialorder %v9142_v4, 0.0  ;;  %v9144_v52 = vadd.f32 %v5593_v24, %v4821_v23  ;;  %v5595_v1 = vpop.f32.mrb[59].mxu0 }
 0x384   :  { %v14685_v0 = vsel %vm5859_vm7, 1.0, %v9888_v9  ;;  %vm5860_vm0 = vcmp.gt.f32.partialorder %v9143_v30, 0.0  ;;  %v9145_v6 = vadd.f32 %v5595_v1, %v4823_v56  ;;  %vm6439_vm7 = vcmp.gt.f32.partialorder %v14493_v31, 0.0 }
 0x385   :  { %16395 = vst [vmem:[#allocation61_spill] sm:$0xff] %v14685_v0  ;;  %v6050_v16 = vadd.f32 %v14685_v0, %v6049_v63  ;;  %v14689_v18 = vsel %vm5860_vm0, 1.0, %v9888_v9  ;;  %vm5861_vm14 = vcmp.gt.f32.partialorder %v9144_v52, 0.0  ;;  %vm6440_vm0 = vcmp.gt.f32.partialorder %v14497_v21, 0.0 }
 0x386   :  { %16396 = vst [vmem:[#allocation62_spill] sm:$0xff] %v14689_v18  ;;  %vm5862_vm9 = vcmp.gt.f32.partialorder %v9145_v6, 0.0  ;;  %v14693_v37 = vsel %vm5861_vm14, 1.0, %v9888_v9 }
 0x387   :  { %v6051_v59 = vadd.f32 %v14689_v18, %v6050_v16  ;;  %v4827_v38 = vpop.f32.mrb[60].mxu1  ;;  %16397 = vst [vmem:[#allocation63_spill] sm:$0xff] %v14693_v37  ;;  %v14697_v56 = vsel %vm5862_vm9, 1.0, %v9888_v9 }
 0x388   :  { %v5599_v24 = vpop.f32.mrb[60].mxu0  ;;  %v4829_v4 = vpop.f32.mrb[61].mxu1  ;;  %16398 = vst [vmem:[#allocation64_spill] sm:$0xff] %v14697_v56 }
 0x389   :  { %v6052_v51 = vadd.f32 %v14693_v37, %v6051_v59  ;;  %v9146_v23 = vadd.f32 %v5599_v24, %v4827_v38  ;;  %v5601_v30 = vpop.f32.mrb[61].mxu0  ;;  %v4831_v1 = vpop.f32.mrb[62].mxu1 }
 0x38a   :  { %v9147_v63 = vadd.f32 %v5601_v30, %v4829_v4  ;;  %v5603_v0 = vpop.f32.mrb[62].mxu0  ;;  %v4833_v52 = vpop.f32.mrb[63].mxu1 }
 0x38b   :  { %v6053_v16 = vadd.f32 %v14697_v56, %v6052_v51  ;;  %vm5863_vm10 = vcmp.gt.f32.partialorder %v9146_v23, 0.0  ;;  %v9148_v6 = vadd.f32 %v5603_v0, %v4831_v1  ;;  %v5605_v18 = vpop.f32.mrb[63].mxu0 }
 0x38c   :  { %v14701_v27 = vsel %vm5863_vm10, 1.0, %v9888_v9  ;;  %vm5864_vm11 = vcmp.gt.f32.partialorder %v9147_v63, 0.0  ;;  %v9149_v20 = vadd.f32 %v5605_v18, %v4833_v52  ;;  %vm6443_vm10 = vcmp.gt.f32.partialorder %v14509_v54, 0.0 }
 0x38d   :  { %16399 = vst [vmem:[#allocation65_spill] sm:$0xff] %v14701_v27  ;;  %v6054_v59 = vadd.f32 %v14701_v27, %v6053_v16  ;;  %v14705_v38 = vsel %vm5864_vm11, 1.0, %v9888_v9  ;;  %vm5865_vm6 = vcmp.gt.f32.partialorder %v9148_v6, 0.0 }
 0x38e   :  { %16400 = vst [vmem:[#allocation66_spill] sm:$0xff] %v14705_v38  ;;  %vm5866_vm12 = vcmp.gt.f32.partialorder %v9149_v20, 0.0  ;;  %v14709_v4 = vsel %vm5865_vm6, 1.0, %v9888_v9 }
 0x38f   :  { %v6055_v24 = vadd.f32 %v14705_v38, %v6054_v59  ;;  %16401 = vst [vmem:[#allocation67_spill] sm:$0xff] %v14709_v4  ;;  %v14713_v51 = vsel %vm5866_vm12, 1.0, %v9888_v9 }
 0x390   :  { %16402 = vst [vmem:[#allocation68_spill] sm:$0xff] %v14713_v51 }
 0x391   :  { %v6056_v0 = vadd.f32 %v14709_v4, %v6055_v24 }
 0x393   :  { %v6057_v23 = vadd.f32 %v14713_v51, %v6056_v0 }
 0x395   :  { %6058 = vadd.xlane.f32.xlu0 %v6057_v23 }
 0x422   :  { %v6059_v18 = vpop.xlane.xlu0 %6058 }
 0x423   :  { %v6060_v30 = vrot.slane %v6059_v18, 4 }
 0x425   :  { %v6061_v1 = vadd.f32 %v6060_v30, %v6059_v18 }
 0x427   :  { %v6062_v63 = vrot.slane %v6061_v1, 2 }
 0x429   :  { %v6063_v52 = vadd.f32 %v6062_v63, %v6061_v1 }
 0x42b   :  { %v6064_v16 = vrot.slane %v6063_v52, 1 }
 0x42d   :  { %v6065_v20 = vadd.f32 %v6064_v16, %v6063_v52 }
 0x42f   :  { %9542 = vpush %v6065_v20 }
 0x460   :  { %s9543_s1 = spop %9542 }
 0x461   :  { %v6067_v6 = vstv %s9543_s1 }
 0x462   :  { %9553 = vrcp.f32 %v6067_v6 }
 0x46c   :  { %v14716_v59 = vpop.eup %9553 }
 0x46d   :  { %v14720_v9 = vmul.f32 %v14716_v59, %v14461_v10  ;;  %v14724_v24 = vmul.f32 %v14716_v59, %v14464_v62  ;;  %v14728_v0 = vmul.f32 %v14716_v59, %v14469_v14  ;;  %v14732_v23 = vmul.f32 %v14716_v59, %v14473_v19 }
 0x46e   :  { %v14736_v18 = vmul.f32 %v14716_v59, %v14477_v39  ;;  %v14740_v30 = vmul.f32 %v14716_v59, %v14481_v42  ;;  %v14744_v1 = vmul.f32 %v14716_v59, %v14485_v45  ;;  %v14748_v63 = vmul.f32 %v14716_v59, %v14489_v3 }
 0x46f   :  { %16403 = vst [vmem:[#allocation69_spill] sm:$0xff] %v14724_v24  ;;  %16404 = vst [vmem:[#allocation70_spill] sm:$0xff] %v14732_v23  ;;  %v6136_v52 = vadd.f32 %v14732_v23, %v14728_v0  ;;  %v6229_v16 = vadd.f32 %v14728_v0, %v14720_v9  ;;  %v6266_v20 = vadd.f32 %v14732_v23, %v14724_v24 }
 0x470   :  { %16405 = vst [vmem:[#allocation71_spill] sm:$0xff] %v14740_v30  ;;  %16406 = vst [vmem:[#allocation72_spill] sm:$0xff] %v14744_v1  ;;  %v6133_v6 = vadd.f32 %v14724_v24, %v14720_v9  ;;  %v14762_v3 = vmul.f32 %v14716_v59, %v14493_v31  ;;  %v14766_v39 = vmul.f32 %v14716_v59, %v14497_v21 }
 0x471   :  { %16407 = vst [vmem:[#allocation73_spill] sm:$0xff] %v14748_v63  ;;  %6137 = vadd.xlane.f32.xlu1 %v6136_v52  ;;  %v6230_v45 = vadd.f32 %v6229_v16, %v14736_v18  ;;  %v6267_v42 = vadd.f32 %v6266_v20, %v14740_v30  ;;  %v14770_v23 = vmul.f32 %v14716_v59, %v14501_v48 }
 0x472   :  { %6134 = vadd.xlane.f32.xlu0 %v6133_v6  ;;  %v14774_v52 = vmul.f32 %v14716_v59, %v14505_v13  ;;  %v6139_v16 = vadd.f32 %v14740_v30, %v14736_v18  ;;  %v6142_v20 = vadd.f32 %v14748_v63, %v14744_v1  ;;  %v14784_v48 = vmul.f32 %v14716_v59, %v14509_v54 }
 0x473   :  { %v6231_v6 = vadd.f32 %v6230_v45, %v14744_v1  ;;  %v6268_v24 = vadd.f32 %v6267_v42, %v14748_v63  ;;  %v14788_v13 = vmul.f32 %v14716_v59, %v14513_v8  ;;  %v14792_v30 = vmul.f32 %v14716_v59, %v14517_v15 }
 0x474   :  { %v6145_v42 = vadd.f32 %v14766_v39, %v14762_v3  ;;  %v6148_v45 = vadd.f32 %v14774_v52, %v14770_v23  ;;  %v14806_v15 = vmul.f32 %v14716_v59, %v14525_v41  ;;  %v14814_v1 = vmul.f32 %v14716_v59, %v14533_v58 }
 0x475   :  { %6140 = vadd.xlane.f32.xlu1 %v6139_v16  ;;  %v14796_v16 = vmul.f32 %v14716_v59, %v14521_v22  ;;  %v6269_v63 = vadd.f32 %v6268_v24, %v14766_v39  ;;  %v14810_v22 = vmul.f32 %v14716_v59, %v14529_v46  ;;  %v14818_v8 = vmul.f32 %v14716_v59, %v14537_v33 }
 0x476   :  { %6143 = vadd.xlane.f32.xlu0 %v6142_v20  ;;  %v6232_v20 = vadd.f32 %v6231_v6, %v14762_v3  ;;  %16409 = vst [vmem:[#allocation75_spill] sm:$0xff] %v14806_v15  ;;  %16411 = vst [vmem:[#allocation77_spill] sm:$0xff] %v14814_v1  ;;  %v6151_v24 = vadd.f32 %v14788_v13, %v14784_v48  ;;  %v14828_v58 = vmul.f32 %v14716_v59, %v14541_v49 }
 0x477   :  { %16408 = vst [vmem:[#allocation74_spill] sm:$0xff] %v14796_v16  ;;  %16410 = vst [vmem:[#allocation76_spill] sm:$0xff] %v14810_v22  ;;  %v6154_v6 = vadd.f32 %v14796_v16, %v14792_v30  ;;  %v14832_v33 = vmul.f32 %v14716_v59, %v14545_v2  ;;  %v14836_v46 = vmul.f32 %v14716_v59, %v14549_v55 }
 0x478   :  { %16412 = vst [vmem:[#allocation78_spill] sm:$0xff] %v14818_v8  ;;  %16413 = vst [vmem:[#allocation79_spill] sm:$0xff] %v14828_v58  ;;  %v14840_v41 = vmul.f32 %v14716_v59, %v14553_v11  ;;  %v14850_v55 = vmul.f32 %v14716_v59, %v14557_v28  ;;  %v14854_v11 = vmul.f32 %v14716_v59, %v14561_v36 }
 0x479   :  { %6146 = vadd.xlane.f32.xlu1 %v6145_v42  ;;  %v6233_v42 = vadd.f32 %v6232_v20, %v14770_v23  ;;  %16414 = vst [vmem:[#allocation80_spill] sm:$0xff] %v14832_v33  ;;  %16415 = vst [vmem:[#allocation81_spill] sm:$0xff] %v14836_v46  ;;  %v6160_v20 = vadd.f32 %v14818_v8, %v14814_v1  ;;  %v14858_v2 = vmul.f32 %v14716_v59, %v14565_v40 }
 0x47a   :  { %6149 = vadd.xlane.f32.xlu0 %v6148_v45  ;;  %v6270_v45 = vadd.f32 %v6269_v63, %v14774_v52  ;;  %16416 = vst [vmem:[#allocation82_spill] sm:$0xff] %v14840_v41  ;;  %v6157_v63 = vadd.f32 %v14810_v22, %v14806_v15  ;;  %16417 = vst [vmem:[#allocation83_spill] sm:$0xff] %v14850_v55  ;;  %v14862_v49 = vmul.f32 %v14716_v59, %v14569_v7 }
 0x47b   :  { %16418 = vst [vmem:[#allocation84_spill] sm:$0xff] %v14854_v11  ;;  %16419 = vst [vmem:[#allocation85_spill] sm:$0xff] %v14858_v2  ;;  %v14872_v40 = vmul.f32 %v14716_v59, %v14573_v32  ;;  %v14876_v7 = vmul.f32 %v14716_v59, %v14577_v26  ;;  %v14880_v36 = vmul.f32 %v14716_v59, %v14581_v53 }
 0x47c   :  { %16420 = vst [vmem:[#allocation86_spill] sm:$0xff] %v14862_v49  ;;  %v14884_v28 = vmul.f32 %v14716_v59, %v14585_v12  ;;  %v14894_v53 = vmul.f32 %v14716_v59, %v14589_v35  ;;  %v14898_v12 = vmul.f32 %v14716_v59, %v14593_v43  ;;  %v14902_v26 = vmul.f32 %v14716_v59, %v14597_v57 }
 0x47d   :  { %6152 = vadd.xlane.f32.xlu1 %v6151_v24  ;;  %v6234_v24 = vadd.f32 %v6233_v42, %v14784_v48  ;;  %v6163_v42 = vadd.f32 %v14832_v33, %v14828_v58  ;;  %v14906_v32 = vmul.f32 %v14716_v59, %v14601_v50  ;;  %v14916_v57 = vmul.f32 %v14716_v59, %v14605_v61 }
 0x47e   :  { %6155 = vadd.xlane.f32.xlu0 %v6154_v6  ;;  %v6271_v6 = vadd.f32 %v6270_v45, %v14788_v13  ;;  %v6166_v45 = vadd.f32 %v14840_v41, %v14836_v46  ;;  %16421 = vst [vmem:[#allocation87_spill] sm:$0xff] %v14894_v53  ;;  %16422 = vst [vmem:[#allocation88_spill] sm:$0xff] %v14898_v12  ;;  %v14920_v50 = vmul.f32 %v14716_v59, %v14609_v5 }
 0x47f   :  { %v14924_v43 = vmul.f32 %v14716_v59, %v14613_v17  ;;  %v14928_v35 = vmul.f32 %v14716_v59, %v14617_v44  ;;  %v14938_v17 = vmul.f32 %v14716_v59, %v14621_v47  ;;  %v14942_v44 = vmul.f32 %v14716_v59, %v14625_v29  ;;  %v16423_v29 = vld [vmem:[#allocation50_spill] sm:$0xff]  ;;  %v16424_v47 = vld [vmem:[#allocation51_spill] sm:$0xff] }
 0x480   :  { %v14946_v5 = vmul.f32 %v14716_v59, %v14629_v60  ;;  %v14950_v61 = vmul.f32 %v14716_v59, %v14633_v25  ;;  %v14960_v60 = vmul.f32 %v14716_v59, %v14637_v34  ;;  %v14964_v25 = vmul.f32 %v14716_v59, %v16423_v29  ;;  %v16427_v29 = vld [vmem:[#allocation53_spill] sm:$0xff]  ;;  %v16429_v34 = vld [vmem:[#allocation54_spill] sm:$0xff] }
 0x481   :  { %6158 = vadd.xlane.f32.xlu1 %v6157_v63  ;;  %v6235_v63 = vadd.f32 %v6234_v24, %v14792_v30  ;;  %v6169_v24 = vadd.f32 %v14854_v11, %v14850_v55 }
 0x482   :  { %6161 = vadd.xlane.f32.xlu0 %v6160_v20  ;;  %v6272_v20 = vadd.f32 %v6271_v6, %v14796_v16  ;;  %v6172_v6 = vadd.f32 %v14862_v49, %v14858_v2 }
 0x485   :  { %6164 = vadd.xlane.f32.xlu1 %v6163_v42  ;;  %v6236_v42 = vadd.f32 %v6235_v63, %v14806_v15  ;;  %v6175_v63 = vadd.f32 %v14876_v7, %v14872_v40  ;;  %v16441_v15 = vld [vmem:[#allocation60_spill] sm:$0xff] }
 0x486   :  { %6167 = vadd.xlane.f32.xlu0 %v6166_v45  ;;  %v6273_v45 = vadd.f32 %v6272_v20, %v14810_v22  ;;  %v6178_v20 = vadd.f32 %v14884_v28, %v14880_v36  ;;  %v15016_v16 = vmul.f32 %v14716_v59, %v16441_v15 }
 0x488   :  { %16442 = vst [vmem:[#allocation97_spill] sm:$0xff] %v15016_v16 }
 0x489   :  { %6170 = vadd.xlane.f32.xlu1 %v6169_v24  ;;  %v6237_v24 = vadd.f32 %v6236_v42, %v14814_v1  ;;  %v6181_v42 = vadd.f32 %v14898_v12, %v14894_v53  ;;  %v16433_v1 = vld [vmem:[#allocation56_spill] sm:$0xff] }
 0x48a   :  { %6173 = vadd.xlane.f32.xlu0 %v6172_v6  ;;  %v6274_v6 = vadd.f32 %v6273_v45, %v14818_v8  ;;  %v6184_v45 = vadd.f32 %v14906_v32, %v14902_v26  ;;  %v14994_v22 = vmul.f32 %v14716_v59, %v16433_v1 }
 0x48c   :  { %16434 = vst [vmem:[#allocation93_spill] sm:$0xff] %v14994_v22 }
 0x48d   :  { %6176 = vadd.xlane.f32.xlu1 %v6175_v63  ;;  %v6238_v63 = vadd.f32 %v6237_v24, %v14828_v58  ;;  %v6187_v24 = vadd.f32 %v14920_v50, %v14916_v57  ;;  %v16425_v58 = vld [vmem:[#allocation52_spill] sm:$0xff] }
 0x48e   :  { %6179 = vadd.xlane.f32.xlu0 %v6178_v20  ;;  %v6275_v20 = vadd.f32 %v6274_v6, %v14832_v33  ;;  %v6190_v6 = vadd.f32 %v14928_v35, %v14924_v43  ;;  %v14968_v33 = vmul.f32 %v14716_v59, %v16424_v47  ;;  %v14972_v8 = vmul.f32 %v14716_v59, %v16425_v58 }
 0x48f   :  { %v14982_v47 = vmul.f32 %v14716_v59, %v16427_v29  ;;  %v14986_v58 = vmul.f32 %v14716_v59, %v16429_v34  ;;  %v16435_v34 = vld [vmem:[#allocation57_spill] sm:$0xff]  ;;  %v16437_v29 = vld [vmem:[#allocation58_spill] sm:$0xff] }
 0x490   :  { %16426 = vst [vmem:[#allocation89_spill] sm:$0xff] %v14972_v8  ;;  %v15008_v1 = vmul.f32 %v14716_v59, %v16437_v29  ;;  %v16443_v29 = vld [vmem:[#allocation61_spill] sm:$0xff] }
 0x491   :  { %6182 = vadd.xlane.f32.xlu1 %v6181_v42  ;;  %v6239_v42 = vadd.f32 %v6238_v63, %v14836_v46  ;;  %v6193_v63 = vadd.f32 %v14942_v44, %v14938_v17  ;;  %16428 = vst [vmem:[#allocation90_spill] sm:$0xff] %v14982_v47  ;;  %16430 = vst [vmem:[#allocation91_spill] sm:$0xff] %v14986_v58 }
 0x492   :  { %6185 = vadd.xlane.f32.xlu0 %v6184_v45  ;;  %v6276_v45 = vadd.f32 %v6275_v20, %v14840_v41  ;;  %v6196_v20 = vadd.f32 %v14950_v61, %v14946_v5  ;;  %v16431_v41 = vld [vmem:[#allocation55_spill] sm:$0xff]  ;;  %16438 = vst [vmem:[#allocation95_spill] sm:$0xff] %v15008_v1 }
 0x493   :  { %v14990_v46 = vmul.f32 %v14716_v59, %v16431_v41  ;;  %v15004_v41 = vmul.f32 %v14716_v59, %v16435_v34  ;;  %v16445_v34 = vld [vmem:[#allocation62_spill] sm:$0xff] }
 0x494   :  { %v15030_v15 = vmul.f32 %v14716_v59, %v16445_v34  ;;  %v15056_v34 = vmul.f32 %v14716_v59, %v14709_v4 }
 0x495   :  { %6188 = vadd.xlane.f32.xlu1 %v6187_v24  ;;  %v6240_v24 = vadd.f32 %v6239_v42, %v14850_v55  ;;  %16432 = vst [vmem:[#allocation92_spill] sm:$0xff] %v14990_v46  ;;  %v6199_v42 = vadd.f32 %v14964_v25, %v14960_v60  ;;  %16436 = vst [vmem:[#allocation94_spill] sm:$0xff] %v15004_v41 }
 0x496   :  { %6191 = vadd.xlane.f32.xlu0 %v6190_v6  ;;  %v6277_v6 = vadd.f32 %v6276_v45, %v14854_v11  ;;  %v6202_v45 = vadd.f32 %v14972_v8, %v14968_v33  ;;  %v16439_v11 = vld [vmem:[#allocation59_spill] sm:$0xff]  ;;  %16446 = vst [vmem:[#allocation99_spill] sm:$0xff] %v15030_v15  ;;  %16451 = vst [vmem:[#allocation104_spill] sm:$0xff] %v15056_v34 }
 0x497   :  { %v15012_v55 = vmul.f32 %v14716_v59, %v16439_v11  ;;  %v15026_v11 = vmul.f32 %v14716_v59, %v16443_v29  ;;  %v15060_v29 = vmul.f32 %v14716_v59, %v14713_v51 }
 0x499   :  { %6194 = vadd.xlane.f32.xlu1 %v6193_v63  ;;  %v6241_v63 = vadd.f32 %v6240_v24, %v14858_v2  ;;  %16440 = vst [vmem:[#allocation96_spill] sm:$0xff] %v15012_v55  ;;  %v6205_v24 = vadd.f32 %v14986_v58, %v14982_v47  ;;  %16444 = vst [vmem:[#allocation98_spill] sm:$0xff] %v15026_v11  ;;  %v15038_v2 = vmul.f32 %v14716_v59, %v14697_v56 }
 0x49a   :  { %6197 = vadd.xlane.f32.xlu0 %v6196_v20  ;;  %v6278_v20 = vadd.f32 %v6277_v6, %v14862_v49  ;;  %v6208_v6 = vadd.f32 %v14994_v22, %v14990_v46  ;;  %v15034_v49 = vmul.f32 %v14716_v59, %v14693_v37  ;;  %v15048_v37 = vmul.f32 %v14716_v59, %v14701_v27 }
 0x49b   :  { %16448 = vst [vmem:[#allocation101_spill] sm:$0xff] %v15038_v2  ;;  %v15052_v56 = vmul.f32 %v14716_v59, %v14705_v38  ;;  %16452 = vst [vmem:[#allocation105_spill] sm:$0xff] %v15060_v29  ;;  %v6226_v38 = vadd.f32 %v15060_v29, %v15056_v34 }
 0x49c   :  { %16447 = vst [vmem:[#allocation100_spill] sm:$0xff] %v15034_v49  ;;  %16449 = vst [vmem:[#allocation102_spill] sm:$0xff] %v15048_v37 }
 0x49d   :  { %6200 = vadd.xlane.f32.xlu1 %v6199_v42  ;;  %v6242_v42 = vadd.f32 %v6241_v63, %v14872_v40  ;;  %v6211_v63 = vadd.f32 %v15008_v1, %v15004_v41  ;;  %16450 = vst [vmem:[#allocation103_spill] sm:$0xff] %v15052_v56  ;;  %v6223_v4 = vadd.f32 %v15052_v56, %v15048_v37 }
 0x49e   :  { %6203 = vadd.xlane.f32.xlu0 %v6202_v45  ;;  %v6279_v45 = vadd.f32 %v6278_v20, %v14876_v7  ;;  %v6214_v20 = vadd.f32 %v15016_v16, %v15012_v55 }
 0x4a1   :  { %6206 = vadd.xlane.f32.xlu1 %v6205_v24  ;;  %v6243_v24 = vadd.f32 %v6242_v42, %v14880_v36  ;;  %v6217_v42 = vadd.f32 %v15030_v15, %v15026_v11 }
 0x4a2   :  { %6209 = vadd.xlane.f32.xlu0 %v6208_v6  ;;  %v6280_v6 = vadd.f32 %v6279_v45, %v14884_v28  ;;  %v6220_v45 = vadd.f32 %v15038_v2, %v15034_v49 }
 0x4a5   :  { %6212 = vadd.xlane.f32.xlu1 %v6211_v63  ;;  %v6244_v63 = vadd.f32 %v6243_v24, %v14894_v53 }
 0x4a6   :  { %6215 = vadd.xlane.f32.xlu0 %v6214_v20  ;;  %v6281_v20 = vadd.f32 %v6280_v6, %v14898_v12 }
 0x4a7   :  { %v6245_v59 = vadd.f32 %v6244_v63, %v14902_v26 }
 0x4a8   :  { %v6282_v51 = vadd.f32 %v6281_v20, %v14906_v32 }
 0x4a9   :  { %6218 = vadd.xlane.f32.xlu1 %v6217_v42  ;;  %v6246_v27 = vadd.f32 %v6245_v59, %v14916_v57 }
 0x4aa   :  { %6221 = vadd.xlane.f32.xlu0 %v6220_v45  ;;  %v6283_v24 = vadd.f32 %v6282_v51, %v14920_v50 }
 0x4ab   :  { %v6247_v6 = vadd.f32 %v6246_v27, %v14924_v43 }
 0x4ac   :  { %v6284_v42 = vadd.f32 %v6283_v24, %v14928_v35 }
 0x4ad   :  { %6224 = vadd.xlane.f32.xlu1 %v6223_v4  ;;  %v6248_v45 = vadd.f32 %v6247_v6, %v14938_v17 }
 0x4ae   :  { %6227 = vadd.xlane.f32.xlu0 %v6226_v38  ;;  %v6285_v12 = vadd.f32 %v6284_v42, %v14942_v44 }
 0x4af   :  { %v6249_v53 = vadd.f32 %v6248_v45, %v14946_v5 }
 0x4b0   :  { %v6286_v63 = vadd.f32 %v6285_v12, %v14950_v61 }
 0x4b1   :  { %v6250_v20 = vadd.f32 %v6249_v53, %v14960_v60 }
 0x4b2   :  { %v6287_v38 = vadd.f32 %v6286_v63, %v14964_v25 }
 0x4b3   :  { %v6251_v4 = vadd.f32 %v6250_v20, %v14968_v33 }
 0x4b4   :  { %v6288_v51 = vadd.f32 %v6287_v38, %v14972_v8 }
 0x4b5   :  { %v6252_v27 = vadd.f32 %v6251_v4, %v14982_v47  ;;  %v16462_v47 = vld [vmem:[#allocation18_spill] sm:$0xff] }
 0x4b6   :  { %v6289_v59 = vadd.f32 %v6288_v51, %v14986_v58  ;;  %v16460_v58 = vld [vmem:[#allocation17_spill] sm:$0xff]  ;;  %vm6444_vm11 = vcmp.gt.f32.partialorder %v16462_v47, 0.0 }
 0x4b7   :  { %v6253_v24 = vadd.f32 %v6252_v27, %v14990_v46  ;;  %vm6442_vm9 = vcmp.gt.f32.partialorder %v16460_v58, 0.0 }
 0x4b8   :  { %v6290_v6 = vadd.f32 %v6289_v59, %v14994_v22 }
 0x4b9   :  { %v6254_v42 = vadd.f32 %v6253_v24, %v15004_v41  ;;  %v16458_v41 = vld [vmem:[#allocation16_spill] sm:$0xff] }
 0x4ba   :  { %v6291_v12 = vadd.f32 %v6290_v6, %v15008_v1  ;;  %vm6441_vm14 = vcmp.gt.f32.partialorder %v16458_v41, 0.0 }
 0x4bb   :  { %v6255_v53 = vadd.f32 %v6254_v42, %v15012_v55 }
 0x4bc   :  { %v6292_v45 = vadd.f32 %v6291_v12, %v15016_v16 }
 0x4bd   :  { %v6256_v63 = vadd.f32 %v6255_v53, %v15026_v11 }
 0x4be   :  { %v6293_v20 = vadd.f32 %v6292_v45, %v15030_v15 }
 0x4bf   :  { %v6257_v38 = vadd.f32 %v6256_v63, %v15034_v49 }
 0x4c0   :  { %v6294_v4 = vadd.f32 %v6293_v20, %v15038_v2 }
 0x4c1   :  { %v6258_v51 = vadd.f32 %v6257_v38, %v15048_v37 }
 0x4c2   :  { %v6295_v27 = vadd.f32 %v6294_v4, %v15052_v56 }
 0x4c3   :  { %v6259_v59 = vadd.f32 %v6258_v51, %v15056_v34 }
 0x4c4   :  { %v6296_v24 = vadd.f32 %v6295_v27, %v15060_v29 }
 0x4c5   :  { %v6260_v6 = vrot.slane %v6259_v59, 4 }
 0x4c6   :  { %v6297_v42 = vrot.slane %v6296_v24, 4 }
 0x4c7   :  { %v6261_v55 = vadd.f32 %v6260_v6, %v6259_v59 }
 0x4c8   :  { %v6298_v12 = vadd.f32 %v6297_v42, %v6296_v24 }
 0x4c9   :  { %v6262_v16 = vrot.slane %v6261_v55, 2 }
 0x4ca   :  { %v6299_v53 = vrot.slane %v6298_v12, 2 }
 0x4cb   :  { %v6263_v11 = vadd.f32 %v6262_v16, %v6261_v55 }
 0x4cc   :  { %v6300_v45 = vadd.f32 %v6299_v53, %v6298_v12 }
 0x4cd   :  { %v6264_v15 = vrot.slane %v6263_v11, 1 }
 0x4ce   :  { %v6301_v63 = vrot.slane %v6300_v45, 1 }
 0x4cf   :  { %v15102_v49 = vadd.f32 %v6264_v15, %v6263_v11 }
 0x4d0   :  { %v15104_v20 = vadd.f32 %v6301_v63, %v6300_v45 }
 0x4fe   :  { %v6138_v38 = vpop.xlane.xlu1 %6137 }
 0x4ff   :  { %v6135_v4 = vpop.xlane.xlu0 %6134  ;;  %v6305_v51 = vmul.f32 %v15102_v49, %v6138_v38  ;;  %v6306_v27 = vmul.f32 %v15104_v20, %v6138_v38 }
 0x500   :  { %v6303_v29 = vmul.f32 %v15102_v49, %v6135_v4  ;;  %v6304_v59 = vmul.f32 %v15104_v20, %v6135_v4 }
 0x501   :  { %v6369_v24 = vadd.f32 1e-10, %v6305_v51  ;;  %v6370_v6 = vadd.f32 1e-10, %v6306_v27 }
 0x502   :  { %v6367_v55 = vadd.f32 1e-10, %v6303_v29  ;;  %v6368_v16 = vadd.f32 1e-10, %v6304_v59  ;;  %v6141_v42 = vpop.xlane.xlu1 %6140 }
 0x503   :  { %v6144_v12 = vpop.xlane.xlu0 %6143  ;;  %9555 = vrcp.f32 %v6369_v24  ;;  %v6307_v15 = vmul.f32 %v15102_v49, %v6141_v42  ;;  %v6308_v11 = vmul.f32 %v15104_v20, %v6141_v42 }
 0x504   :  { %v6309_v53 = vmul.f32 %v15102_v49, %v6144_v12  ;;  %9557 = vrcp.f32 %v6370_v6  ;;  %v6310_v45 = vmul.f32 %v15104_v20, %v6144_v12 }
 0x505   :  { %9559 = vrcp.f32 %v6367_v55  ;;  %v6371_v63 = vadd.f32 1e-10, %v6307_v15  ;;  %v6372_v38 = vadd.f32 1e-10, %v6308_v11 }
 0x506   :  { %v6373_v4 = vadd.f32 1e-10, %v6309_v53  ;;  %9561 = vrcp.f32 %v6368_v16  ;;  %v6374_v51 = vadd.f32 1e-10, %v6310_v45  ;;  %v6147_v29 = vpop.xlane.xlu1 %6146 }
 0x507   :  { %v6150_v27 = vpop.xlane.xlu0 %6149  ;;  %9563 = vrcp.f32 %v6371_v63  ;;  %v6311_v59 = vmul.f32 %v15102_v49, %v6147_v29  ;;  %v6312_v24 = vmul.f32 %v15104_v20, %v6147_v29  ;;  %v16454_v29 = vld [vmem:[#allocation13_spill] sm:$0xff] }
 0x508   :  { %v6313_v42 = vmul.f32 %v15102_v49, %v6150_v27  ;;  %9565 = vrcp.f32 %v6372_v38  ;;  %v6314_v6 = vmul.f32 %v15104_v20, %v6150_v27  ;;  %vm6436_vm13 = vcmp.gt.f32.partialorder %v16454_v29, 0.0 }
 0x509   :  { %9567 = vrcp.f32 %v6373_v4  ;;  %v6375_v55 = vadd.f32 1e-10, %v6311_v59  ;;  %v6376_v12 = vadd.f32 1e-10, %v6312_v24  ;;  %v16453_v4 = vld [vmem:[#allocation12_spill] sm:$0xff]  ;;  %v16455_v24 = vld [vmem:[#allocation14_spill] sm:$0xff] }
 0x50a   :  { %v6377_v15 = vadd.f32 1e-10, %v6313_v42  ;;  %9569 = vrcp.f32 %v6374_v51  ;;  %v6378_v16 = vadd.f32 1e-10, %v6314_v6  ;;  %v6153_v11 = vpop.xlane.xlu1 %6152  ;;  %vm6435_vm4 = vcmp.gt.f32.partialorder %v16453_v4, 0.0 }
 0x50b   :  { %v6156_v53 = vpop.xlane.xlu0 %6155  ;;  %9571 = vrcp.f32 %v6375_v55  ;;  %v6315_v45 = vmul.f32 %v15102_v49, %v6153_v11  ;;  %v6316_v63 = vmul.f32 %v15104_v20, %v6153_v11  ;;  %vm6437_vm15 = vcmp.gt.f32.partialorder %v16455_v24, 0.0  ;;  %v16456_v55 = vld [vmem:[#allocation15_spill] sm:$0xff] }
 0x50c   :  { %v6317_v38 = vmul.f32 %v15102_v49, %v6156_v53  ;;  %9573 = vrcp.f32 %v6376_v12  ;;  %v6318_v27 = vmul.f32 %v15104_v20, %v6156_v53  ;;  %vm6438_vm8 = vcmp.gt.f32.partialorder %v16456_v55, 0.0  ;;  %v16457_v53 = vld [vmem:[#allocation70_spill] sm:$0xff] }
 0x50d   :  { %v9556_v59 = vpop.eup %9555  ;;  %9575 = vrcp.f32 %v6377_v15  ;;  %v6379_v51 = vadd.f32 1e-10, %v6315_v45  ;;  %v6380_v42 = vadd.f32 1e-10, %v6316_v63 }
 0x50e   :  { %v9558_v6 = vpop.eup %9557  ;;  %v6500_v11 = vmul.f32 %v9556_v59, %v14728_v0  ;;  %9577 = vrcp.f32 %v6378_v16  ;;  %v15131_v34 = vadd.f32 1e-10, %v6317_v38  ;;  %v15133_v56 = vadd.f32 1e-10, %v6318_v27  ;;  %v6159_v37 = vpop.xlane.xlu1 %6158 }
 0x50f   :  { %v6162_v12 = vpop.xlane.xlu0 %6161  ;;  %v9560_v2 = vpop.eup %9559  ;;  %v6502_v1 = vmul.f32 %v9558_v6, %v16457_v53  ;;  %9579 = vrcp.f32 %v6379_v51  ;;  %v6319_v15 = vmul.f32 %v15102_v49, %v6159_v37  ;;  %v6320_v45 = vmul.f32 %v15104_v20, %v6159_v37  ;;  %v16459_v6 = vld [vmem:[#allocation69_spill] sm:$0xff] }
 0x510   :  { %v9562_v63 = vpop.eup %9561  ;;  %v6625_v16 = vsel %vm6433_vm2, %v6500_v11, 1.0  ;;  %v6496_v38 = vmul.f32 %v9560_v2, %v14720_v9  ;;  %9581 = vrcp.f32 %v6380_v42  ;;  %v6321_v27 = vmul.f32 %v15102_v49, %v6162_v12 }
 0x511   :  { %v9564_v59 = vpop.eup %9563  ;;  %v6626_v51 = vsel %vm6434_vm3, %v6502_v1, 1.0  ;;  %9583 = vlog2.f32 %v6625_v16  ;;  %v6498_v37 = vmul.f32 %v9562_v63, %v16459_v6  ;;  %v15148_v22 = vadd.f32 1e-10, %v6319_v15  ;;  %v16461_v1 = vld [vmem:[#allocation71_spill] sm:$0xff] }
 0x512   :  { %v9566_v46 = vpop.eup %9565  ;;  %9585 = vlog2.f32 %v6626_v51  ;;  %v6623_v14 = vsel %vm6431_vm5, %v6496_v38, 1.0  ;;  %v6504_v2 = vmul.f32 %v9564_v59, %v14736_v18  ;;  %v15154_v42 = vadd.f32 1e-10, %v6320_v45  ;;  %v6165_v16 = vpop.xlane.xlu1 %6164  ;;  %v16463_v45 = vld [vmem:[#allocation72_spill] sm:$0xff] }
 0x513   :  { %v9568_v11 = vpop.eup %9567  ;;  %v6624_v19 = vsel %vm6432_vm1, %v6498_v37, 1.0  ;;  %9587 = vlog2.f32 %v6623_v14  ;;  %v6506_v15 = vmul.f32 %v9566_v46, %v16461_v1  ;;  %v6322_v63 = vmul.f32 %v15104_v20, %v6162_v12  ;;  %v16464_v46 = vld [vmem:[#allocation73_spill] sm:$0xff] }
 0x514   :  { %v9570_v51 = vpop.eup %9569  ;;  %9589 = vlog2.f32 %v6624_v19  ;;  %v6627_v10 = vsel %vm6435_vm4, %v6504_v2, 1.0  ;;  %v6508_v38 = vmul.f32 %v9568_v11, %v16463_v45  ;;  %v15165_v59 = vadd.f32 1e-10, %v6321_v27 }
 0x515   :  { %v9572_v8 = vpop.eup %9571  ;;  %v6628_v62 = vsel %vm6436_vm13, %v6506_v15, 1.0  ;;  %9591 = vlog2.f32 %v6627_v10  ;;  %v6510_v37 = vmul.f32 %v9570_v51, %v16464_v46  ;;  %v15170_v12 = vadd.f32 1e-10, %v6322_v63  ;;  %v6168_v63 = vpop.xlane.xlu0 %6167 }
 0x516   :  { %v9574_v14 = vpop.eup %9573  ;;  %9593 = vlog2.f32 %v6628_v62  ;;  %v6629_v19 = vsel %vm6437_vm15, %v6508_v38, 1.0  ;;  %v6512_v4 = vmul.f32 %v9572_v8, %v14762_v3  ;;  %v6323_v2 = vmul.f32 %v15102_v49, %v6165_v16 }
 0x517   :  { %v9576_v27 = vpop.eup %9575  ;;  %v6630_v11 = vsel %vm6438_vm8, %v6510_v37, 1.0  ;;  %9595 = vlog2.f32 %v6629_v19  ;;  %v6514_v29 = vmul.f32 %v9574_v14, %v14766_v39  ;;  %v6324_v15 = vmul.f32 %v15104_v20, %v6165_v16 }
 0x518   :  { %v9578_v51 = vpop.eup %9577  ;;  %9597 = vlog2.f32 %v6630_v11  ;;  %v6631_v24 = vsel %vm6439_vm7, %v6512_v4, 1.0  ;;  %v6516_v10 = vmul.f32 %v9576_v27, %v14770_v23  ;;  %v15183_v8 = vadd.f32 1e-10, %v6323_v2  ;;  %v6171_v11 = vpop.xlane.xlu1 %6170 }
 0x519   :  { %v9580_v38 = vpop.eup %9579  ;;  %v6632_v55 = vsel %vm6440_vm0, %v6514_v29, 1.0  ;;  %9599 = vlog2.f32 %v6631_v24  ;;  %v6518_v62 = vmul.f32 %v9578_v51, %v14774_v52  ;;  %v15188_v37 = vadd.f32 1e-10, %v6324_v15 }
 0x51a   :  { %v9582_v16 = vpop.eup %9581  ;;  %9601 = vlog2.f32 %v6632_v55  ;;  %v6633_v14 = vsel %vm6441_vm14, %v6516_v10, 1.0  ;;  %v6520_v31 = vmul.f32 %v9580_v38, %v14784_v48  ;;  %v6325_v19 = vmul.f32 %v15102_v49, %v6168_v63 }
 0x51b   :  { %v9584_v4 = vpop.eup %9583  ;;  %v6634_v2 = vsel %vm6442_vm9, %v6518_v62, 1.0  ;;  %9603 = vlog2.f32 %v6633_v14  ;;  %v6522_v21 = vmul.f32 %v9582_v16, %v14788_v13  ;;  %v6326_v27 = vmul.f32 %v15104_v20, %v6168_v63 }
 0x51c   :  { %v9586_v29 = vpop.eup %9585  ;;  %v6692_v15 = vmul.f32 0.6931472, %v9584_v4  ;;  %9605 = vlog2.f32 %v6634_v2  ;;  %v6635_v41 = vsel %vm6443_vm10, %v6520_v31, 1.0  ;;  %v6389_v51 = vadd.f32 1e-10, %v6325_v19  ;;  %v6174_v19 = vpop.xlane.xlu0 %6173 }
 0x51d   :  { %v9588_v24 = vpop.eup %9587  ;;  %v6694_v10 = vmul.f32 0.6931472, %v9586_v29  ;;  %v6636_v38 = vsel %vm6444_vm11, %v6522_v21, 1.0  ;;  %9607 = vlog2.f32 %v6635_v41  ;;  %v6390_v58 = vadd.f32 1e-10, %v6326_v27 }
 0x51e   :  { %v9590_v55 = vpop.eup %9589  ;;  %v6817_v62 = vmul.f32 %v6692_v15, %v14728_v0  ;;  %v6688_v16 = vmul.f32 0.6931472, %v9588_v24  ;;  %9609 = vlog2.f32 %v6636_v38  ;;  %v6327_v63 = vmul.f32 %v15102_v49, %v6171_v11 }
 0x51f   :  { %v9592_v14 = vpop.eup %9591  ;;  %v6818_v4 = vmul.f32 %v6694_v10, %v16457_v53  ;;  %v6690_v54 = vmul.f32 0.6931472, %v9590_v55  ;;  %9611 = vrcp.f32 %v15131_v34  ;;  %v6328_v31 = vmul.f32 %v15104_v20, %v6171_v11  ;;  %v16465_v10 = vld [vmem:[#allocation19_spill] sm:$0xff] }
 0x520   :  { %v9594_v47 = vpop.eup %9593  ;;  %v6815_v2 = vmul.f32 %v6688_v16, %v14720_v9  ;;  %v6696_v21 = vmul.f32 0.6931472, %v9592_v14  ;;  %9613 = vrcp.f32 %v15133_v56  ;;  %v6391_v0 = vadd.f32 1e-10, %v6327_v63  ;;  %v16467_v14 = vld [vmem:[#allocation21_spill] sm:$0xff] }
 0x521   :  { %v9596_v27 = vpop.eup %9595  ;;  %v6816_v29 = vmul.f32 %v6690_v54, %v16459_v6  ;;  %v6698_v15 = vmul.f32 0.6931472, %v9594_v47  ;;  %9615 = vrcp.f32 %v15148_v22  ;;  %v6392_v53 = vadd.f32 1e-10, %v6328_v31  ;;  %v16466_v22 = vld [vmem:[#allocation20_spill] sm:$0xff]  ;;  %v16468_v47 = vld [vmem:[#allocation22_spill] sm:$0xff] }
 0x522   :  { %v9598_v41 = vpop.eup %9597  ;;  %v6819_v34 = vmul.f32 %v6696_v21, %v14736_v18  ;;  %v6700_v24 = vmul.f32 0.6931472, %v9596_v27  ;;  %9617 = vrcp.f32 %v15154_v42  ;;  %v6329_v11 = vmul.f32 %v15102_v49, %v6174_v19  ;;  %v16469_v21 = vld [vmem:[#allocation23_spill] sm:$0xff] }
 0x523   :  { %v9600_v9 = vpop.eup %9599  ;;  %vm6445_vm6 = vcmp.gt.f32.partialorder %v16465_v10, 0.0  ;;  %v6879_v56 = vadd.f32 %v6816_v29, %v6815_v2  ;;  %v6820_v38 = vmul.f32 %v6698_v15, %v16461_v1  ;;  %v6702_v55 = vmul.f32 0.6931472, %v9598_v41  ;;  %v16470_v15 = vld [vmem:[#allocation24_spill] sm:$0xff] }
 0x524   :  { %9619 = vrcp.f32 %v15165_v59  ;;  %v9602_v6 = vpop.eup %9601  ;;  %vm6446_vm12 = vcmp.gt.f32.partialorder %v16466_v22, 0.0  ;;  %v6821_v16 = vmul.f32 %v6700_v24, %v16463_v45  ;;  %v6704_v18 = vmul.f32 0.6931472, %v9600_v9 }
 0x525   :  { %9621 = vrcp.f32 %v15170_v12  ;;  %v6330_v42 = vmul.f32 %v15104_v20, %v6174_v19  ;;  %v9604_v63 = vpop.eup %9603  ;;  %vm6447_vm5 = vcmp.gt.f32.partialorder %v16467_v14, 0.0  ;;  %v6880_v54 = vadd.f32 %v6879_v56, %v6817_v62  ;;  %v16472_v56 = vld [vmem:[#allocation26_spill] sm:$0xff] }
 0x526   :  { %v6822_v31 = vmul.f32 %v6702_v55, %v16464_v46  ;;  %v6706_v1 = vmul.f32 0.6931472, %v9602_v6  ;;  %9623 = vrcp.f32 %v15183_v8  ;;  %v9606_v59 = vpop.eup %9605  ;;  %vm6448_vm1 = vcmp.gt.f32.partialorder %v16468_v47, 0.0  ;;  %v6177_v8 = vpop.xlane.xlu1 %6176 }
 0x527   :  { %v15226_v2 = vmul.f32 %v6704_v18, %v14762_v3  ;;  %v6708_v45 = vmul.f32 0.6931472, %v9604_v63  ;;  %9625 = vrcp.f32 %v15188_v37  ;;  %v6393_v12 = vadd.f32 1e-10, %v6329_v11  ;;  %v9608_v19 = vpop.eup %9607  ;;  %v16471_v11 = vld [vmem:[#allocation25_spill] sm:$0xff]  ;;  %v16473_v18 = vld [vmem:[#allocation27_spill] sm:$0xff] }
 0x528   :  { %vm6449_vm2 = vcmp.gt.f32.partialorder %v16469_v21, 0.0  ;;  %v6881_v27 = vadd.f32 %v6880_v54, %v6818_v4  ;;  %v15231_v62 = vmul.f32 %v6706_v1, %v14766_v39  ;;  %v6710_v46 = vmul.f32 0.6931472, %v9606_v59  ;;  %v9610_v29 = vpop.eup %9609  ;;  %v16475_v54 = vld [vmem:[#allocation28_spill] sm:$0xff]  ;;  %v16476_v1 = vld [vmem:[#allocation75_spill] sm:$0xff] }
 0x529   :  { %9627 = vrcp.f32 %v6389_v51  ;;  %vm6450_vm3 = vcmp.gt.f32.partialorder %v16470_v15, 0.0  ;;  %v15235_v3 = vmul.f32 %v6708_v45, %v14770_v23  ;;  %v6712_v41 = vmul.f32 0.6931472, %v9608_v19  ;;  %v9612_v24 = vpop.eup %9611  ;;  %v16477_v19 = vld [vmem:[#allocation29_spill] sm:$0xff]  ;;  %v16487_v15 = vld [vmem:[#allocation82_spill] sm:$0xff] }
 0x52a   :  { %9629 = vrcp.f32 %v6390_v58  ;;  %v6394_v37 = vadd.f32 1e-10, %v6330_v42  ;;  %vm6451_vm4 = vcmp.gt.f32.partialorder %v16471_v11, 0.0  ;;  %v6882_v9 = vadd.f32 %v6881_v27, %v6819_v34  ;;  %v9614_v51 = vpop.eup %9613  ;;  %v16474_v42 = vld [vmem:[#allocation74_spill] sm:$0xff]  ;;  %v16488_v11 = vld [vmem:[#allocation83_spill] sm:$0xff] }
 0x52b   :  { %v15239_v4 = vmul.f32 %v6710_v46, %v14774_v52  ;;  %v6714_v39 = vmul.f32 0.6931472, %v9610_v29  ;;  %9631 = vrcp.f32 %v6391_v0  ;;  %vm6452_vm13 = vcmp.gt.f32.partialorder %v16472_v56, 0.0  ;;  %v9616_v6 = vpop.eup %9615  ;;  %v16479_v29 = vld [vmem:[#allocation30_spill] sm:$0xff]  ;;  %v16489_v56 = vld [vmem:[#allocation84_spill] sm:$0xff] }
 0x52c   :  { %v15243_v55 = vmul.f32 %v6712_v41, %v14784_v48  ;;  %v6524_v23 = vmul.f32 %v9612_v24, %v14792_v30  ;;  %9633 = vrcp.f32 %v6392_v53  ;;  %v6331_v58 = vmul.f32 %v15102_v49, %v6177_v8  ;;  %v9618_v63 = vpop.eup %9617  ;;  %v16480_v41 = vld [vmem:[#allocation77_spill] sm:$0xff] }
 0x52d   :  { %vm6453_vm15 = vcmp.gt.f32.partialorder %v16473_v18, 0.0  ;;  %v6883_v34 = vadd.f32 %v6882_v9, %v6820_v38  ;;  %v15249_v52 = vmul.f32 %v6714_v39, %v14788_v13  ;;  %v6526_v0 = vmul.f32 %v9614_v51, %v16474_v42  ;;  %v16481_v9 = vld [vmem:[#allocation31_spill] sm:$0xff]  ;;  %v16482_v39 = vld [vmem:[#allocation78_spill] sm:$0xff]  ;;  %v16490_v18 = vld [vmem:[#allocation85_spill] sm:$0xff] }
 0x52e   :  { %9635 = vrcp.f32 %v6393_v12  ;;  %vm6454_vm8 = vcmp.gt.f32.partialorder %v16475_v54, 0.0  ;;  %v6637_v48 = vsel %vm6445_vm6, %v6524_v23, 1.0  ;;  %v6528_v53 = vmul.f32 %v9616_v6, %v16476_v1  ;;  %v9620_v45 = vpop.eup %9619  ;;  %v16478_v12 = vld [vmem:[#allocation76_spill] sm:$0xff]  ;;  %v6180_v23 = vpop.xlane.xlu0 %6179  ;;  %v16491_v54 = vld [vmem:[#allocation86_spill] sm:$0xff] }
 0x52f   :  { %9637 = vrcp.f32 %v6394_v37  ;;  %v6332_v59 = vmul.f32 %v15104_v20, %v6177_v8  ;;  %vm6455_vm7 = vcmp.gt.f32.partialorder %v16477_v19, 0.0  ;;  %v6884_v38 = vadd.f32 %v6883_v34, %v6821_v16  ;;  %v9622_v46 = vpop.eup %9621  ;;  %v16483_v34 = vld [vmem:[#allocation32_spill] sm:$0xff] }
 0x530   :  { %v6638_v13 = vsel %vm6446_vm12, %v6526_v0, 1.0  ;;  %9639 = vlog2.f32 %v6637_v48  ;;  %v6530_v27 = vmul.f32 %v9618_v63, %v16478_v12  ;;  %vm6456_vm0 = vcmp.gt.f32.partialorder %v16479_v29, 0.0  ;;  %v9624_v24 = vpop.eup %9623 }
 0x531   :  { %9641 = vlog2.f32 %v6638_v13  ;;  %v6639_v10 = vsel %vm6447_vm5, %v6528_v53, 1.0  ;;  %v6532_v37 = vmul.f32 %v9620_v45, %v16480_v41  ;;  %v15265_v8 = vadd.f32 1e-10, %v6331_v58  ;;  %v9626_v6 = vpop.eup %9625  ;;  %v16484_v58 = vld [vmem:[#allocation79_spill] sm:$0xff]  ;;  %v16485_v53 = vld [vmem:[#allocation80_spill] sm:$0xff] }
 0x532   :  { %vm6457_vm14 = vcmp.gt.f32.partialorder %v16481_v9, 0.0  ;;  %v6885_v16 = vadd.f32 %v6884_v38, %v6822_v31  ;;  %v6640_v22 = vsel %vm6448_vm1, %v6530_v27, 1.0  ;;  %9643 = vlog2.f32 %v6639_v10  ;;  %v16486_v27 = vld [vmem:[#allocation81_spill] sm:$0xff] }
 0x533   :  { %v6534_v51 = vmul.f32 %v9622_v46, %v16482_v39  ;;  %vm6458_vm9 = vcmp.gt.f32.partialorder %v16483_v34, 0.0  ;;  %9645 = vlog2.f32 %v6640_v22  ;;  %v6641_v14 = vsel %vm6449_vm2, %v6532_v37, 1.0  ;;  %v9628_v48 = vpop.eup %9627 }
 0x534   :  { %v6536_v0 = vmul.f32 %v9624_v24, %v16484_v58  ;;  %v6396_v63 = vadd.f32 1e-10, %v6332_v59  ;;  %v6886_v31 = vadd.f32 %v6885_v16, %v15226_v2  ;;  %9647 = vlog2.f32 %v6641_v14  ;;  %v9630_v38 = vpop.eup %9629 }
 0x535   :  { %v6642_v47 = vsel %vm6450_vm3, %v6534_v51, 1.0  ;;  %v6538_v45 = vmul.f32 %v9626_v6, %v16485_v53  ;;  %v6540_v21 = vmul.f32 %v9628_v48, %v16486_v27  ;;  %v6333_v46 = vmul.f32 %v15102_v49, %v6180_v23  ;;  %v9632_v10 = vpop.eup %9631 }
 0x536   :  { %9649 = vlog2.f32 %v6642_v47  ;;  %v6643_v13 = vsel %vm6451_vm4, %v6536_v0, 1.0  ;;  %v6887_v59 = vadd.f32 %v6886_v31, %v15231_v62  ;;  %v6542_v37 = vmul.f32 %v9630_v38, %v16487_v15  ;;  %v9634_v24 = vpop.eup %9633 }
 0x537   :  { %v6644_v2 = vsel %vm6452_vm13, %v6538_v45, 1.0  ;;  %9651 = vlog2.f32 %v6643_v13  ;;  %v6645_v16 = vsel %vm6453_vm15, %v6540_v21, 1.0  ;;  %v6544_v22 = vmul.f32 %v9632_v10, %v16488_v11  ;;  %v6183_v21 = vpop.xlane.xlu1 %6182 }
 0x538   :  { %9653 = vlog2.f32 %v6644_v2  ;;  %v6334_v51 = vmul.f32 %v15104_v20, %v6180_v23  ;;  %v9636_v6 = vpop.eup %9635  ;;  %v6888_v14 = vadd.f32 %v6887_v59, %v15235_v3  ;;  %v6646_v62 = vsel %vm6454_vm8, %v6542_v37, 1.0 }
 0x539   :  { %9655 = vlog2.f32 %v6645_v16  ;;  %v6546_v0 = vmul.f32 %v9634_v24, %v16489_v56  ;;  %v9638_v48 = vpop.eup %9637  ;;  %v6647_v31 = vsel %vm6455_vm7, %v6544_v22, 1.0  ;;  %v6548_v47 = vmul.f32 %v9636_v6, %v16490_v18 }
 0x53a   :  { %9657 = vlog2.f32 %v6646_v62  ;;  %v6397_v45 = vadd.f32 1e-10, %v6333_v46  ;;  %v9640_v38 = vpop.eup %9639  ;;  %v6889_v23 = vadd.f32 %v6888_v14, %v15239_v4  ;;  %v6550_v13 = vmul.f32 %v9638_v48, %v16491_v54 }
 0x53b   :  { %v6648_v3 = vsel %vm6456_vm0, %v6546_v0, 1.0  ;;  %9659 = vlog2.f32 %v6647_v31  ;;  %v9642_v10 = vpop.eup %9641  ;;  %v6716_v59 = vmul.f32 0.6931472, %v9640_v38  ;;  %v6649_v19 = vsel %vm6457_vm14, %v6548_v47, 1.0 }
 0x53c   :  { %9661 = vlog2.f32 %v6648_v3  ;;  %v6398_v2 = vadd.f32 1e-10, %v6334_v51  ;;  %v9644_v37 = vpop.eup %9643  ;;  %v6890_v46 = vadd.f32 %v6889_v23, %v15243_v55  ;;  %v6718_v24 = vmul.f32 0.6931472, %v9642_v10  ;;  %v6186_v23 = vpop.xlane.xlu0 %6185  ;;  %v16492_v10 = vld [vmem:[#allocation33_spill] sm:$0xff] }
 0x53d   :  { %v6650_v4 = vsel %vm6458_vm9, %v6550_v13, 1.0  ;;  %9663 = vlog2.f32 %v6649_v19  ;;  %v9646_v29 = vpop.eup %9645  ;;  %v6829_v16 = vmul.f32 %v6716_v59, %v14792_v30  ;;  %v6720_v22 = vmul.f32 0.6931472, %v9644_v37  ;;  %v16493_v37 = vld [vmem:[#allocation34_spill] sm:$0xff] }
 0x53e   :  { %9665 = vlog2.f32 %v6650_v4  ;;  %v6335_v6 = vmul.f32 %v15102_v49, %v6183_v21  ;;  %v9648_v14 = vpop.eup %9647  ;;  %v6891_v9 = vadd.f32 %v6890_v46, %v15249_v52  ;;  %v6830_v51 = vmul.f32 %v6718_v24, %v16474_v42  ;;  %v6189_v46 = vpop.xlane.xlu1 %6188  ;;  %v16494_v24 = vld [vmem:[#allocation35_spill] sm:$0xff] }
 0x53f   :  { %v6722_v62 = vmul.f32 0.6931472, %v9646_v29  ;;  %9667 = vrcp.f32 %v15265_v8  ;;  %v6831_v34 = vmul.f32 %v6720_v22, %v16476_v1  ;;  %v6724_v0 = vmul.f32 0.6931472, %v9648_v14  ;;  %v16495_v22 = vld [vmem:[#allocation36_spill] sm:$0xff] }
 0x540   :  { %v9650_v55 = vpop.eup %9649  ;;  %9669 = vrcp.f32 %v6396_v63  ;;  %v6336_v48 = vmul.f32 %v15104_v20, %v6183_v21  ;;  %v6892_v31 = vadd.f32 %v6891_v9, %v6829_v16  ;;  %v6399_v8 = vadd.f32 1e-10, %v6335_v6 }
 0x541   :  { %v9652_v30 = vpop.eup %9651  ;;  %v6832_v47 = vmul.f32 %v6722_v62, %v16478_v12  ;;  %v6726_v38 = vmul.f32 0.6931472, %v9650_v55  ;;  %9671 = vrcp.f32 %v6397_v45  ;;  %v6833_v42 = vmul.f32 %v6724_v0, %v16480_v41 }
 0x542   :  { %v9654_v52 = vpop.eup %9653  ;;  %v6728_v3 = vmul.f32 0.6931472, %v9652_v30  ;;  %9673 = vrcp.f32 %v6398_v2  ;;  %vm6459_vm10 = vcmp.gt.f32.partialorder %v16492_v10, 0.0  ;;  %v6893_v1 = vadd.f32 %v6892_v31, %v6830_v51 }
 0x543   :  { %v9656_v13 = vpop.eup %9655  ;;  %v6834_v63 = vmul.f32 %v6726_v38, %v16482_v39  ;;  %v6730_v21 = vmul.f32 0.6931472, %v9654_v52  ;;  %v6400_v59 = vadd.f32 1e-10, %v6336_v48  ;;  %vm6460_vm11 = vcmp.gt.f32.partialorder %v16493_v37, 0.0  ;;  %v16496_v48 = vld [vmem:[#allocation37_spill] sm:$0xff] }
 0x544   :  { %v9658_v19 = vpop.eup %9657  ;;  %v6835_v12 = vmul.f32 %v6728_v3, %v16484_v58  ;;  %v6732_v45 = vmul.f32 0.6931472, %v9656_v13  ;;  %9675 = vrcp.f32 %v6399_v8  ;;  %v6337_v41 = vmul.f32 %v15102_v49, %v6186_v23  ;;  %v6192_v8 = vpop.xlane.xlu0 %6191  ;;  %v16500_v37 = vld [vmem:[#allocation87_spill] sm:$0xff] }
 0x545   :  { %v9660_v2 = vpop.eup %9659  ;;  %vm6461_vm6 = vcmp.gt.f32.partialorder %v16494_v24, 0.0  ;;  %v6894_v4 = vadd.f32 %v6893_v1, %v6831_v34  ;;  %v6836_v29 = vmul.f32 %v6730_v21, %v16485_v53  ;;  %v6734_v16 = vmul.f32 0.6931472, %v9658_v19 }
 0x546   :  { %9677 = vrcp.f32 %v6400_v59  ;;  %v9662_v39 = vpop.eup %9661  ;;  %vm6462_vm12 = vcmp.gt.f32.partialorder %v16495_v22, 0.0  ;;  %v6837_v6 = vmul.f32 %v6732_v45, %v16486_v27  ;;  %v6736_v14 = vmul.f32 0.6931472, %v9660_v2 }
 0x547   :  { %v6338_v58 = vmul.f32 %v15104_v20, %v6186_v23  ;;  %v6401_v9 = vadd.f32 1e-10, %v6337_v41  ;;  %v9664_v51 = vpop.eup %9663  ;;  %v6895_v62 = vadd.f32 %v6894_v4, %v6832_v47  ;;  %v15327_v55 = vmul.f32 %v6734_v16, %v16487_v15  ;;  %v16497_v23 = vld [vmem:[#allocation38_spill] sm:$0xff]  ;;  %v6195_v41 = vpop.xlane.xlu1 %6194 }
 0x548   :  { %v6738_v0 = vmul.f32 0.6931472, %v9662_v39  ;;  %v6339_v34 = vmul.f32 %v15102_v49, %v6189_v46  ;;  %v9666_v53 = vpop.eup %9665  ;;  %vm6463_vm5 = vcmp.gt.f32.partialorder %v16496_v48, 0.0  ;;  %v15332_v30 = vmul.f32 %v6736_v14, %v16488_v11 }
 0x549   :  { %v6740_v31 = vmul.f32 0.6931472, %v9664_v51  ;;  %v6402_v27 = vadd.f32 1e-10, %v6338_v58  ;;  %9679 = vrcp.f32 %v6401_v9  ;;  %v9668_v38 = vpop.eup %9667  ;;  %vm6464_vm1 = vcmp.gt.f32.partialorder %v16497_v23, 0.0  ;;  %v16499_v58 = vld [vmem:[#allocation40_spill] sm:$0xff] }
 0x54a   :  { %v6896_v52 = vadd.f32 %v6895_v62, %v6833_v42  ;;  %v15336_v47 = vmul.f32 %v6738_v0, %v16489_v56  ;;  %v6742_v15 = vmul.f32 0.6931472, %v9666_v53  ;;  %v6340_v3 = vmul.f32 %v15104_v20, %v6189_v46  ;;  %v9670_v13 = vpop.eup %9669  ;;  %v16498_v46 = vld [vmem:[#allocation39_spill] sm:$0xff]  ;;  %v6198_v53 = vpop.xlane.xlu0 %6197 }
 0x54b   :  { %v15340_v1 = vmul.f32 %v6740_v31, %v16490_v18  ;;  %v6552_v11 = vmul.f32 %v9668_v38, %v14872_v40  ;;  %9681 = vrcp.f32 %v6402_v27  ;;  %v6403_v21 = vadd.f32 1e-10, %v6339_v34  ;;  %v9672_v59 = vpop.eup %9671  ;;  %v16501_v31 = vld [vmem:[#allocation41_spill] sm:$0xff]  ;;  %v16502_v27 = vld [vmem:[#allocation88_spill] sm:$0xff]  ;;  %v6201_v22 = vpop.xlane.xlu1 %6200 }
 0x54c   :  { %v6897_v19 = vadd.f32 %v6896_v52, %v6834_v63  ;;  %v15344_v45 = vmul.f32 %v6742_v15, %v16491_v54  ;;  %v6554_v56 = vmul.f32 %v9670_v13, %v14876_v7  ;;  %v6404_v42 = vadd.f32 1e-10, %v6340_v3  ;;  %v9674_v2 = vpop.eup %9673 }
 0x54d   :  { %vm6465_vm2 = vcmp.gt.f32.partialorder %v16498_v46, 0.0  ;;  %v6651_v18 = vsel %vm6459_vm10, %v6552_v11, 1.0  ;;  %v6556_v4 = vmul.f32 %v9672_v59, %v14880_v36  ;;  %9683 = vrcp.f32 %v6403_v21  ;;  %v16504_v46 = vld [vmem:[#allocation43_spill] sm:$0xff] }
 0x54e   :  { %v6341_v16 = vmul.f32 %v15102_v49, %v6192_v8  ;;  %v6898_v39 = vadd.f32 %v6897_v19, %v6835_v12  ;;  %v6652_v54 = vsel %vm6460_vm11, %v6554_v56, 1.0  ;;  %9685 = vlog2.f32 %v6651_v18  ;;  %v9676_v14 = vpop.eup %9675 }
 0x54f   :  { %v6558_v63 = vmul.f32 %v9674_v2, %v14884_v28  ;;  %vm6466_vm3 = vcmp.gt.f32.partialorder %v16499_v58, 0.0  ;;  %9687 = vlog2.f32 %v6652_v54  ;;  %v6653_v10 = vsel %vm6461_vm6, %v6556_v4, 1.0  ;;  %v16503_v2 = vld [vmem:[#allocation42_spill] sm:$0xff]  ;;  %v6204_v4 = vpop.xlane.xlu0 %6203 }
 0x550   :  { %v6342_v9 = vmul.f32 %v15104_v20, %v6192_v8  ;;  %v6405_v51 = vadd.f32 1e-10, %v6341_v16  ;;  %v9678_v62 = vpop.eup %9677  ;;  %v6899_v0 = vadd.f32 %v6898_v39, %v6836_v29  ;;  %9689 = vlog2.f32 %v6653_v10 }
 0x551   :  { %v6654_v12 = vsel %vm6462_vm12, %v6558_v63, 1.0  ;;  %v6560_v34 = vmul.f32 %v9676_v14, %v16500_v37  ;;  %vm6467_vm4 = vcmp.gt.f32.partialorder %v16501_v31, 0.0  ;;  %v6562_v38 = vmul.f32 %v9678_v62, %v16502_v27 }
 0x552   :  { %9691 = vlog2.f32 %v6654_v12  ;;  %v6406_v52 = vadd.f32 1e-10, %v6342_v9  ;;  %v6343_v24 = vmul.f32 %v15102_v49, %v6195_v41  ;;  %v6900_v15 = vadd.f32 %v6899_v0, %v6837_v6 }
 0x553   :  { %v6655_v3 = vsel %vm6463_vm5, %v6560_v34, 1.0  ;;  %9693 = vrcp.f32 %v6404_v42  ;;  %v6344_v29 = vmul.f32 %v15104_v20, %v6195_v41  ;;  %v9680_v8 = vpop.eup %9679  ;;  %v6656_v13 = vsel %vm6464_vm1, %v6562_v38, 1.0 }
 0x554   :  { %9695 = vlog2.f32 %v6655_v3  ;;  %v6407_v11 = vadd.f32 1e-10, %v6343_v24  ;;  %v6345_v21 = vmul.f32 %v15102_v49, %v6198_v53  ;;  %v6901_v59 = vadd.f32 %v6900_v15, %v15327_v55 }
 0x555   :  { %9697 = vlog2.f32 %v6656_v13  ;;  %v6564_v6 = vmul.f32 %v9680_v8, %v14902_v26  ;;  %v6408_v19 = vadd.f32 1e-10, %v6344_v29  ;;  %v9682_v48 = vpop.eup %9681  ;;  %v6346_v56 = vmul.f32 %v15104_v20, %v6198_v53  ;;  %v16505_v53 = vld [vmem:[#allocation44_spill] sm:$0xff] }
 0x556   :  { %9699 = vrcp.f32 %v6405_v51  ;;  %v6409_v42 = vadd.f32 1e-10, %v6345_v21  ;;  %v6347_v41 = vmul.f32 %v15102_v49, %v6201_v22  ;;  %vm6468_vm13 = vcmp.gt.f32.partialorder %v16503_v2, 0.0 }
 0x557   :  { %v6902_v23 = vadd.f32 %v6901_v59, %v15332_v30  ;;  %v6566_v18 = vmul.f32 %v9682_v48, %v14906_v32  ;;  %v6657_v55 = vsel %vm6465_vm2, %v6564_v6, 1.0  ;;  %9701 = vrcp.f32 %v6406_v52  ;;  %v9684_v16 = vpop.eup %9683  ;;  %v16507_v6 = vld [vmem:[#allocation46_spill] sm:$0xff] }
 0x558   :  { %9703 = vlog2.f32 %v6657_v55  ;;  %v6410_v39 = vadd.f32 1e-10, %v6346_v56  ;;  %v6348_v54 = vmul.f32 %v15104_v20, %v6201_v22  ;;  %v6411_v63 = vadd.f32 1e-10, %v6347_v41  ;;  %v9686_v14 = vpop.eup %9685  ;;  %v16506_v22 = vld [vmem:[#allocation45_spill] sm:$0xff] }
 0x559   :  { %v6903_v10 = vadd.f32 %v6902_v23, %v15336_v47  ;;  %v6658_v9 = vsel %vm6466_vm3, %v6566_v18, 1.0  ;;  %v6568_v30 = vmul.f32 %v9684_v16, %v14916_v57  ;;  %9705 = vrcp.f32 %v6407_v11  ;;  %v9688_v51 = vpop.eup %9687  ;;  %v16508_v18 = vld [vmem:[#allocation47_spill] sm:$0xff] }
 0x55a   :  { %vm6469_vm15 = vcmp.gt.f32.partialorder %v16504_v46, 0.0  ;;  %v6744_v62 = vmul.f32 0.6931472, %v9686_v14  ;;  %9707 = vlog2.f32 %v6658_v9  ;;  %v6412_v0 = vadd.f32 1e-10, %v6348_v54  ;;  %v9690_v34 = vpop.eup %9689  ;;  %v6210_v46 = vpop.xlane.xlu0 %6209 }
 0x55b   :  { %v6349_v12 = vmul.f32 %v15102_v49, %v6204_v4  ;;  %vm6470_vm8 = vcmp.gt.f32.partialorder %v16505_v53, 0.0  ;;  %v6904_v38 = vadd.f32 %v6903_v10, %v15340_v1  ;;  %v6746_v47 = vmul.f32 0.6931472, %v9688_v51  ;;  %v16510_v10 = vld [vmem:[#allocation49_spill] sm:$0xff] }
 0x55c   :  { %v6659_v58 = vsel %vm6467_vm4, %v6568_v30, 1.0  ;;  %9709 = vrcp.f32 %v6408_v19  ;;  %v9692_v52 = vpop.eup %9691  ;;  %v6843_v24 = vmul.f32 %v6744_v62, %v14872_v40  ;;  %v6748_v15 = vmul.f32 0.6931472, %v9690_v34  ;;  %v16511_v62 = vld [vmem:[#allocation50_spill] sm:$0xff] }
 0x55d   :  { %9711 = vlog2.f32 %v6659_v58  ;;  %v6350_v3 = vmul.f32 %v15104_v20, %v6204_v4  ;;  %v9694_v29 = vpop.eup %9693  ;;  %vm6471_vm7 = vcmp.gt.f32.partialorder %v16506_v22, 0.0  ;;  %v6905_v8 = vadd.f32 %v6904_v38, %v15344_v45  ;;  %v6207_v45 = vpop.xlane.xlu1 %6206 }
 0x55e   :  { %v6844_v13 = vmul.f32 %v6746_v47, %v14876_v7  ;;  %v6750_v1 = vmul.f32 0.6931472, %v9692_v52  ;;  %9713 = vrcp.f32 %v6409_v42  ;;  %v9696_v11 = vpop.eup %9695  ;;  %v6845_v31 = vmul.f32 %v6748_v15, %v14880_v36 }
 0x55f   :  { %v6570_v21 = vmul.f32 %v9694_v29, %v14920_v50  ;;  %9715 = vrcp.f32 %v6410_v39  ;;  %v6413_v40 = vadd.f32 1e-10, %v6349_v12  ;;  %v9698_v59 = vpop.eup %9697  ;;  %vm6472_vm0 = vcmp.gt.f32.partialorder %v16507_v6, 0.0  ;;  %v16509_v39 = vld [vmem:[#allocation48_spill] sm:$0xff] }
 0x560   :  { %v6906_v19 = vadd.f32 %v6905_v8, %v6843_v24  ;;  %v6846_v48 = vmul.f32 %v6750_v1, %v14884_v28  ;;  %v6752_v56 = vmul.f32 0.6931472, %v9696_v11  ;;  %9717 = vrcp.f32 %v6411_v63  ;;  %v9700_v41 = vpop.eup %9699  ;;  %v16512_v24 = vld [vmem:[#allocation51_spill] sm:$0xff] }
 0x561   :  { %v6754_v7 = vmul.f32 0.6931472, %v9698_v59  ;;  %v6660_v42 = vsel %vm6468_vm13, %v6570_v21, 1.0  ;;  %9719 = vrcp.f32 %v6412_v0  ;;  %v6414_v36 = vadd.f32 1e-10, %v6350_v3  ;;  %v9702_v23 = vpop.eup %9701 }
 0x562   :  { %vm6473_vm14 = vcmp.gt.f32.partialorder %v16508_v18, 0.0  ;;  %v6907_v55 = vadd.f32 %v6906_v19, %v6844_v13  ;;  %v6847_v4 = vmul.f32 %v6752_v56, %v16500_v37  ;;  %9721 = vlog2.f32 %v6660_v42  ;;  %v9704_v28 = vpop.eup %9703  ;;  %v16513_v13 = vld [vmem:[#allocation52_spill] sm:$0xff] }
 0x563   :  { %v6572_v16 = vmul.f32 %v9700_v41, %v14924_v43  ;;  %vm6474_vm9 = vcmp.gt.f32.partialorder %v16509_v39, 0.0  ;;  %v6848_v54 = vmul.f32 %v6754_v7, %v16502_v27  ;;  %v6574_v63 = vmul.f32 %v9702_v23, %v14928_v35  ;;  %v9706_v14 = vpop.eup %9705 }
 0x564   :  { %9723 = vrcp.f32 %v6413_v40  ;;  %v6351_v2 = vmul.f32 %v15102_v49, %v6207_v45  ;;  %vm6475_vm10 = vcmp.gt.f32.partialorder %v16510_v10, 0.0  ;;  %v6908_v9 = vadd.f32 %v6907_v55, %v6845_v31  ;;  %v9708_v51 = vpop.eup %9707  ;;  %v16514_v55 = vld [vmem:[#allocation53_spill] sm:$0xff] }
 0x565   :  { %v6756_v30 = vmul.f32 0.6931472, %v9704_v28  ;;  %v6661_v37 = vsel %vm6469_vm15, %v6572_v16, 1.0  ;;  %9725 = vrcp.f32 %v6414_v36  ;;  %vm6476_vm11 = vcmp.gt.f32.partialorder %v16511_v62, 0.0 }
 0x566   :  { %v6662_v27 = vsel %vm6470_vm8, %v6574_v63, 1.0  ;;  %9727 = vlog2.f32 %v6661_v37  ;;  %v6576_v0 = vmul.f32 %v9706_v14, %v14938_v17  ;;  %v6352_v12 = vmul.f32 %v15104_v20, %v6207_v45  ;;  %v9710_v34 = vpop.eup %9709  ;;  %v16516_v37 = vld [vmem:[#allocation89_spill] sm:$0xff] }
 0x567   :  { %v6909_v38 = vadd.f32 %v6908_v9, %v6846_v48  ;;  %v6758_v47 = vmul.f32 0.6931472, %v9708_v51  ;;  %v6849_v58 = vmul.f32 %v6756_v30, %v14902_v26  ;;  %9729 = vlog2.f32 %v6662_v27  ;;  %v9712_v52 = vpop.eup %9711  ;;  %v16515_v9 = vld [vmem:[#allocation54_spill] sm:$0xff] }
 0x568   :  { %vm6477_vm6 = vcmp.gt.f32.partialorder %v16512_v24, 0.0  ;;  %v6578_v15 = vmul.f32 %v9710_v34, %v14942_v44  ;;  %v6663_v53 = vsel %vm6471_vm7, %v6576_v0, 1.0  ;;  %v6415_v3 = vadd.f32 1e-10, %v6351_v2  ;;  %v9714_v8 = vpop.eup %9713  ;;  %v6213_v2 = vpop.xlane.xlu1 %6212 }
 0x569   :  { %v6416_v29 = vadd.f32 1e-10, %v6352_v12  ;;  %vm6478_vm12 = vcmp.gt.f32.partialorder %v16513_v13, 0.0  ;;  %v6910_v1 = vadd.f32 %v6909_v38, %v6847_v4  ;;  %v6850_v11 = vmul.f32 %v6758_v47, %v14906_v32  ;;  %v9716_v26 = vpop.eup %9715  ;;  %v16517_v13 = vld [vmem:[#allocation55_spill] sm:$0xff] }
 0x56a   :  { %v6760_v31 = vmul.f32 0.6931472, %v9712_v52  ;;  %9731 = vlog2.f32 %v6663_v53  ;;  %v6664_v21 = vsel %vm6472_vm0, %v6578_v15, 1.0  ;;  %v6580_v40 = vmul.f32 %v9714_v8, %v14946_v5  ;;  %v9718_v59 = vpop.eup %9717 }
 0x56b   :  { %9733 = vrcp.f32 %v6415_v3  ;;  %v6353_v22 = vmul.f32 %v15102_v49, %v6210_v46  ;;  %v6911_v19 = vadd.f32 %v6910_v1, %v6848_v54  ;;  %v6582_v56 = vmul.f32 %v9716_v26, %v14950_v61  ;;  %v9720_v45 = vpop.eup %9719 }
 0x56c   :  { %v6851_v48 = vmul.f32 %v6760_v31, %v14916_v57  ;;  %9735 = vlog2.f32 %v6664_v21  ;;  %v6665_v32 = vsel %vm6473_vm14, %v6580_v40, 1.0  ;;  %v6584_v41 = vmul.f32 %v9718_v59, %v14960_v60  ;;  %v9722_v7 = vpop.eup %9721 }
 0x56d   :  { %9737 = vrcp.f32 %v6416_v29  ;;  %v6354_v6 = vmul.f32 %v15104_v20, %v6210_v46  ;;  %v6912_v42 = vadd.f32 %v6911_v19, %v6849_v58  ;;  %v6666_v36 = vsel %vm6474_vm9, %v6582_v56, 1.0  ;;  %v6216_v58 = vpop.xlane.xlu0 %6215 }
 0x56e   :  { %9739 = vlog2.f32 %v6665_v32  ;;  %v6586_v57 = vmul.f32 %v9720_v45, %v14964_v25  ;;  %v9724_v23 = vpop.eup %9723  ;;  %vm6479_vm5 = vcmp.gt.f32.partialorder %v16514_v55, 0.0  ;;  %v6762_v4 = vmul.f32 0.6931472, %v9722_v7  ;;  %v6219_v32 = vpop.xlane.xlu1 %6218  ;;  %v16521_v55 = vld [vmem:[#allocation57_spill] sm:$0xff] }
 0x56f   :  { %9741 = vlog2.f32 %v6666_v36  ;;  %v6667_v18 = vsel %vm6475_vm10, %v6584_v41, 1.0  ;;  %v6417_v16 = vadd.f32 1e-10, %v6353_v22  ;;  %v9726_v28 = vpop.eup %9725  ;;  %v6913_v54 = vadd.f32 %v6912_v42, %v6850_v11  ;;  %v16518_v11 = vld [vmem:[#allocation90_spill] sm:$0xff] }
 0x570   :  { %v6668_v63 = vsel %vm6476_vm11, %v6586_v57, 1.0  ;;  %9743 = vlog2.f32 %v6667_v18  ;;  %v6588_v39 = vmul.f32 %v9724_v23, %v14968_v33  ;;  %v9728_v14 = vpop.eup %9727  ;;  %vm6480_vm1 = vcmp.gt.f32.partialorder %v16515_v9, 0.0 }
 0x571   :  { %v6852_v30 = vmul.f32 %v6762_v4, %v14920_v50  ;;  %9745 = vlog2.f32 %v6668_v63  ;;  %v6590_v51 = vmul.f32 %v9726_v28, %v16516_v37  ;;  %v6418_v10 = vadd.f32 1e-10, %v6354_v6  ;;  %v9730_v27 = vpop.eup %9729  ;;  %v16520_v6 = vld [vmem:[#allocation56_spill] sm:$0xff] }
 0x572   :  { %v6914_v0 = vadd.f32 %v6913_v54, %v6851_v48  ;;  %v6764_v12 = vmul.f32 0.6931472, %v9728_v14  ;;  %v6669_v62 = vsel %vm6477_vm6, %v6588_v39, 1.0  ;;  %9747 = vrcp.f32 %v6417_v16  ;;  %v16519_v48 = vld [vmem:[#allocation91_spill] sm:$0xff]  ;;  %v16522_v39 = vld [vmem:[#allocation58_spill] sm:$0xff] }
 0x573   :  { %v6766_v34 = vmul.f32 0.6931472, %v9730_v27  ;;  %v6670_v38 = vsel %vm6478_vm12, %v6590_v51, 1.0  ;;  %9749 = vlog2.f32 %v6669_v62  ;;  %v6355_v47 = vmul.f32 %v15102_v49, %v6213_v2 }
 0x574   :  { %v9732_v50 = vpop.eup %9731  ;;  %v6915_v46 = vadd.f32 %v6914_v0, %v6852_v30  ;;  %v6853_v52 = vmul.f32 %v6764_v12, %v14924_v43  ;;  %9751 = vlog2.f32 %v6670_v38  ;;  %v6356_v15 = vmul.f32 %v15104_v20, %v6213_v2  ;;  %v6222_v30 = vpop.xlane.xlu0 %6221 }
 0x575   :  { %v9734_v53 = vpop.eup %9733  ;;  %v6854_v24 = vmul.f32 %v6766_v34, %v14928_v35  ;;  %v6768_v3 = vmul.f32 0.6931472, %v9732_v50  ;;  %9753 = vrcp.f32 %v6418_v10  ;;  %v6419_v29 = vadd.f32 1e-10, %v6355_v47  ;;  %v16523_v10 = vld [vmem:[#allocation92_spill] sm:$0xff] }
 0x576   :  { %v9736_v8 = vpop.eup %9735  ;;  %vm6481_vm2 = vcmp.gt.f32.partialorder %v16517_v13, 0.0  ;;  %v6916_v1 = vadd.f32 %v6915_v46, %v6853_v52  ;;  %v6592_v31 = vmul.f32 %v9734_v53, %v16518_v11  ;;  %v6420_v26 = vadd.f32 1e-10, %v6356_v15  ;;  %v16524_v52 = vld [vmem:[#allocation59_spill] sm:$0xff] }
 0x577   :  { %v6357_v21 = vmul.f32 %v15102_v49, %v6216_v58  ;;  %v9738_v40 = vpop.eup %9737  ;;  %v6770_v43 = vmul.f32 0.6931472, %v9736_v8  ;;  %v6855_v22 = vmul.f32 %v6768_v3, %v14938_v17  ;;  %9755 = vrcp.f32 %v6419_v29  ;;  %v6225_v29 = vpop.xlane.xlu1 %6224  ;;  %v16526_v8 = vld [vmem:[#allocation60_spill] sm:$0xff] }
 0x578   :  { %v6358_v59 = vmul.f32 %v15104_v20, %v6216_v58  ;;  %v9740_v35 = vpop.eup %9739  ;;  %v6917_v19 = vadd.f32 %v6916_v1, %v6854_v24  ;;  %v6594_v56 = vmul.f32 %v9738_v40, %v16519_v48  ;;  %v6671_v45 = vsel %vm6479_vm5, %v6592_v31, 1.0  ;;  %v16525_v24 = vld [vmem:[#allocation93_spill] sm:$0xff]  ;;  %v16527_v40 = vld [vmem:[#allocation94_spill] sm:$0xff] }
 0x579   :  { %9757 = vrcp.f32 %v6420_v26  ;;  %v9742_v41 = vpop.eup %9741  ;;  %vm6482_vm3 = vcmp.gt.f32.partialorder %v16520_v6, 0.0  ;;  %v6856_v7 = vmul.f32 %v6770_v43, %v14942_v44  ;;  %v6772_v42 = vmul.f32 0.6931472, %v9740_v35 }
 0x57a   :  { %9759 = vlog2.f32 %v6671_v45  ;;  %v6421_v17 = vadd.f32 1e-10, %v6357_v21  ;;  %v9744_v36 = vpop.eup %9743  ;;  %v6918_v57 = vadd.f32 %v6917_v19, %v6855_v22  ;;  %v6774_v23 = vmul.f32 0.6931472, %v9742_v41  ;;  %v6228_v41 = vpop.xlane.xlu0 %6227 }
 0x57b   :  { %v6672_v4 = vsel %vm6480_vm1, %v6594_v56, 1.0  ;;  %v6422_v18 = vadd.f32 1e-10, %v6358_v59  ;;  %v9746_v16 = vpop.eup %9745  ;;  %vm6483_vm4 = vcmp.gt.f32.partialorder %v16521_v55, 0.0  ;;  %v6776_v28 = vmul.f32 0.6931472, %v9744_v36 }
 0x57c   :  { %9761 = vlog2.f32 %v6672_v4  ;;  %v6359_v54 = vmul.f32 %v15102_v49, %v6219_v32  ;;  %v9748_v63 = vpop.eup %9747  ;;  %vm6484_vm13 = vcmp.gt.f32.partialorder %v16522_v39, 0.0  ;;  %v6919_v44 = vadd.f32 %v6918_v57, %v6856_v7  ;;  %v16528_v59 = vld [vmem:[#allocation95_spill] sm:$0xff] }
 0x57d   :  { %v6857_v2 = vmul.f32 %v6772_v42, %v14946_v5  ;;  %v6778_v14 = vmul.f32 0.6931472, %v9746_v16  ;;  %9763 = vrcp.f32 %v6421_v17  ;;  %v9750_v51 = vpop.eup %9749  ;;  %v6858_v9 = vmul.f32 %v6774_v23, %v14950_v61  ;;  %v16529_v16 = vld [vmem:[#allocation96_spill] sm:$0xff] }
 0x57e   :  { %v6596_v27 = vmul.f32 %v9748_v63, %v16523_v10  ;;  %9765 = vrcp.f32 %v6422_v18  ;;  %v6360_v0 = vmul.f32 %v15104_v20, %v6219_v32  ;;  %v9752_v12 = vpop.eup %9751  ;;  %v6859_v34 = vmul.f32 %v6776_v28, %v14960_v60 }
 0x57f   :  { %v6920_v62 = vadd.f32 %v6919_v44, %v6857_v2  ;;  %v6780_v38 = vmul.f32 0.6931472, %v9750_v51  ;;  %v6423_v47 = vadd.f32 1e-10, %v6359_v54  ;;  %v9754_v58 = vpop.eup %9753  ;;  %v6860_v5 = vmul.f32 %v6778_v14, %v14964_v25  ;;  %v16530_v44 = vld [vmem:[#allocation97_spill] sm:$0xff] }
 0x580   :  { %v6673_v50 = vsel %vm6481_vm2, %v6596_v27, 1.0  ;;  %v6424_v46 = vadd.f32 1e-10, %v6360_v0  ;;  %v6361_v61 = vmul.f32 %v15102_v49, %v6222_v30  ;;  %vm6485_vm15 = vcmp.gt.f32.partialorder %v16524_v52, 0.0 }
 0x581   :  { %v6921_v15 = vadd.f32 %v6920_v62, %v6858_v9  ;;  %v6782_v53 = vmul.f32 0.6931472, %v9752_v12  ;;  %v6598_v3 = vmul.f32 %v9754_v58, %v16525_v24  ;;  %9767 = vlog2.f32 %v6673_v50  ;;  %v9756_v60 = vpop.eup %9755 }
 0x582   :  { %vm6486_vm8 = vcmp.gt.f32.partialorder %v16526_v8, 0.0  ;;  %v6861_v1 = vmul.f32 %v6780_v38, %v14968_v33  ;;  %9769 = vrcp.f32 %v6423_v47  ;;  %v6362_v25 = vmul.f32 %v15104_v20, %v6222_v30  ;;  %v16531_v38 = vld [vmem:[#allocation98_spill] sm:$0xff] }
 0x583   :  { %v6425_v13 = vadd.f32 1e-10, %v6361_v61  ;;  %v9758_v31 = vpop.eup %9757  ;;  %v6922_v26 = vadd.f32 %v6921_v15, %v6859_v34  ;;  %v6674_v21 = vsel %vm6482_vm3, %v6598_v3, 1.0  ;;  %v6600_v43 = vmul.f32 %v9756_v60, %v16527_v40  ;;  %v16534_v61 = vld [vmem:[#allocation62_spill] sm:$0xff]  ;;  %v16535_v60 = vld [vmem:[#allocation100_spill] sm:$0xff] }
 0x584   :  { %9771 = vrcp.f32 %v6424_v46  ;;  %v9760_v22 = vpop.eup %9759  ;;  %v6602_v35 = vmul.f32 %v9758_v31, %v16528_v59  ;;  %v6426_v19 = vadd.f32 1e-10, %v6362_v25  ;;  %v6363_v56 = vmul.f32 %v15102_v49, %v6225_v29  ;;  %v16536_v25 = vld [vmem:[#allocation63_spill] sm:$0xff] }
 0x585   :  { %9773 = vlog2.f32 %v6674_v21  ;;  %v6923_v33 = vadd.f32 %v6922_v26, %v6860_v5  ;;  %v6784_v45 = vmul.f32 0.6931472, %v9760_v22  ;;  %v6675_v32 = vsel %vm6483_vm4, %v6600_v43, 1.0 }
 0x586   :  { %9775 = vrcp.f32 %v6425_v13  ;;  %v9762_v7 = vpop.eup %9761  ;;  %v6676_v6 = vsel %vm6484_vm13, %v6602_v35, 1.0  ;;  %v6364_v42 = vmul.f32 %v15104_v20, %v6225_v29  ;;  %v6427_v17 = vadd.f32 1e-10, %v6363_v56 }
 0x587   :  { %9777 = vlog2.f32 %v6675_v32  ;;  %v9764_v36 = vpop.eup %9763  ;;  %v6862_v57 = vmul.f32 %v6782_v53, %v16516_v37  ;;  %v6924_v23 = vadd.f32 %v6923_v33, %v6861_v1  ;;  %v6786_v4 = vmul.f32 0.6931472, %v9762_v7  ;;  %v16539_v32 = vld [vmem:[#allocation65_spill] sm:$0xff] }
 0x588   :  { %9779 = vlog2.f32 %v6676_v6  ;;  %v9766_v18 = vpop.eup %9765  ;;  %v6604_v55 = vmul.f32 %v9764_v36, %v16529_v16  ;;  %v6428_v28 = vadd.f32 1e-10, %v6364_v42  ;;  %v6365_v54 = vmul.f32 %v15102_v49, %v6228_v41  ;;  %v16541_v36 = vld [vmem:[#allocation103_spill] sm:$0xff] }
 0x589   :  { %9781 = vrcp.f32 %v6426_v19  ;;  %v6925_v63 = vadd.f32 %v6924_v23, %v6862_v57  ;;  %v6863_v39 = vmul.f32 %v6784_v45, %v16518_v11  ;;  %v6606_v2 = vmul.f32 %v9766_v18, %v16530_v44  ;;  %v16537_v19 = vld [vmem:[#allocation101_spill] sm:$0xff]  ;;  %v16538_v45 = vld [vmem:[#allocation64_spill] sm:$0xff] }
 0x58a   :  { %9783 = vrcp.f32 %v6427_v17  ;;  %v6677_v14 = vsel %vm6485_vm15, %v6604_v55, 1.0  ;;  %v6366_v37 = vmul.f32 %v15104_v20, %v6228_v41  ;;  %v6429_v30 = vadd.f32 1e-10, %v6365_v54  ;;  %v16532_v20 = vld [vmem:[#allocation61_spill] sm:$0xff]  ;;  %v16540_v41 = vld [vmem:[#allocation102_spill] sm:$0xff] }
 0x58b   :  { %9785 = vrcp.f32 %v6428_v28  ;;  %v9768_v51 = vpop.eup %9767  ;;  %v6864_v9 = vmul.f32 %v6786_v4, %v16519_v48  ;;  %v6926_v27 = vadd.f32 %v6925_v63, %v6863_v39  ;;  %v6678_v49 = vsel %vm6486_vm8, %v6606_v2, 1.0  ;;  %v16533_v48 = vld [vmem:[#allocation99_spill] sm:$0xff]  ;;  %v16542_v4 = vld [vmem:[#allocation66_spill] sm:$0xff] }
 0x58c   :  { %9787 = vlog2.f32 %v6677_v14  ;;  %v9770_v0 = vpop.eup %9769  ;;  %v6788_v11 = vmul.f32 0.6931472, %v9768_v51  ;;  %v6430_v12 = vadd.f32 1e-10, %v6366_v37  ;;  %vm6487_vm7 = vcmp.gt.f32.partialorder %v16532_v20, 0.0  ;;  %v16543_v14 = vld [vmem:[#allocation104_spill] sm:$0xff] }
 0x58d   :  { %9789 = vlog2.f32 %v6678_v49  ;;  %v6927_v34 = vadd.f32 %v6926_v27, %v6864_v9  ;;  %v6608_v47 = vmul.f32 %v9770_v0, %v16531_v38  ;;  %vm6488_vm0 = vcmp.gt.f32.partialorder %v16534_v61, 0.0  ;;  %v16544_v37 = vld [vmem:[#allocation67_spill] sm:$0xff]  ;;  %v16546_v27 = vld [vmem:[#allocation68_spill] sm:$0xff] }
 0x58e   :  { %v9772_v62 = vpop.eup %9771  ;;  %9791 = vrcp.f32 %v6429_v30  ;;  %v6865_v5 = vmul.f32 %v6788_v11, %v16523_v10  ;;  %vm6489_vm14 = vcmp.gt.f32.partialorder %v16536_v25, 0.0  ;;  %vm6490_vm9 = vcmp.gt.f32.partialorder %v16538_v45, 0.0  ;;  %v16545_v30 = vld [vmem:[#allocation105_spill] sm:$0xff] }
 0x58f   :  { %v9774_v58 = vpop.eup %9773  ;;  %v6610_v50 = vmul.f32 %v9772_v62, %v16533_v48  ;;  %9793 = vrcp.f32 %v6430_v12  ;;  %v6679_v15 = vsel %vm6487_vm7, %v6608_v47, 1.0  ;;  %vm6491_vm10 = vcmp.gt.f32.partialorder %v16539_v32, 0.0 }
 0x590   :  { %v9776_v46 = vpop.eup %9775  ;;  %v6790_v52 = vmul.f32 0.6931472, %v9774_v58  ;;  %v6928_v3 = vadd.f32 %v6927_v34, %v6865_v5  ;;  %9795 = vlog2.f32 %v6679_v15  ;;  %vm6492_vm11 = vcmp.gt.f32.partialorder %v16542_v4, 0.0 }
 0x591   :  { %v9778_v53 = vpop.eup %9777  ;;  %v6680_v29 = vsel %vm6488_vm0, %v6610_v50, 1.0  ;;  %v6612_v8 = vmul.f32 %v9776_v46, %v16535_v60  ;;  %vm6493_vm6 = vcmp.gt.f32.partialorder %v16544_v37, 0.0  ;;  %vm6494_vm12 = vcmp.gt.f32.partialorder %v16546_v27, 0.0 }
 0x592   :  { %v9780_v1 = vpop.eup %9779  ;;  %v6866_v13 = vmul.f32 %v6790_v52, %v16525_v24  ;;  %v6792_v10 = vmul.f32 0.6931472, %v9778_v53  ;;  %9797 = vlog2.f32 %v6680_v29  ;;  %vm6956_vm5 = vcmask 0  }
 0x593   :  { %v9782_v31 = vpop.eup %9781  ;;  %v6794_v26 = vmul.f32 0.6931472, %v9780_v1  ;;  %v6681_v21 = vsel %vm6489_vm14, %v6612_v8, 1.0 }
 0x594   :  { %v9784_v43 = vpop.eup %9783  ;;  %v6929_v22 = vadd.f32 %v6928_v3, %v6866_v13  ;;  %v6867_v35 = vmul.f32 %v6792_v10, %v16527_v40  ;;  %v6614_v56 = vmul.f32 %v9782_v31, %v16537_v19  ;;  %9799 = vlog2.f32 %v6681_v21 }
 0x595   :  { %v9786_v33 = vpop.eup %9785  ;;  %v6616_v7 = vmul.f32 %v9784_v43, %v16540_v41  ;;  %v6868_v6 = vmul.f32 %v6794_v26, %v16528_v59 }
 0x596   :  { %v9788_v24 = vpop.eup %9787  ;;  %v6930_v42 = vadd.f32 %v6929_v22, %v6867_v35  ;;  %v6682_v17 = vsel %vm6490_vm9, %v6614_v56, 1.0  ;;  %v6618_v57 = vmul.f32 %v9786_v33, %v16541_v36 }
 0x597   :  { %v9790_v23 = vpop.eup %9789  ;;  %v6796_v40 = vmul.f32 0.6931472, %v9788_v24  ;;  %9801 = vlog2.f32 %v6682_v17  ;;  %v6683_v18 = vsel %vm6491_vm10, %v6616_v7, 1.0 }
 0x598   :  { %v9792_v55 = vpop.eup %9791  ;;  %v6798_v28 = vmul.f32 0.6931472, %v9790_v23  ;;  %v6684_v54 = vsel %vm6492_vm11, %v6618_v57, 1.0  ;;  %9803 = vlog2.f32 %v6683_v18  ;;  %v6931_v63 = vadd.f32 %v6930_v42, %v6868_v6 }
 0x599   :  { %v9794_v39 = vpop.eup %9793  ;;  %v6869_v2 = vmul.f32 %v6796_v40, %v16529_v16  ;;  %v6620_v59 = vmul.f32 %v9792_v55, %v16543_v14  ;;  %9805 = vlog2.f32 %v6684_v54 }
 0x59a   :  { %v6622_v51 = vmul.f32 %v9794_v39, %v16545_v30  ;;  %v9796_v9 = vpop.eup %9795  ;;  %v6870_v0 = vmul.f32 %v6798_v28, %v16530_v44 }
 0x59b   :  { %v6685_v49 = vsel %vm6493_vm6, %v6620_v59, 1.0  ;;  %v6932_v11 = vadd.f32 %v6931_v63, %v6869_v2  ;;  %v6800_v62 = vmul.f32 0.6931472, %v9796_v9 }
 0x59c   :  { %v9798_v12 = vpop.eup %9797  ;;  %v6686_v34 = vsel %vm6494_vm12, %v6622_v51, 1.0  ;;  %9807 = vlog2.f32 %v6685_v49 }
 0x59d   :  { %v6802_v47 = vmul.f32 0.6931472, %v9798_v12  ;;  %9809 = vlog2.f32 %v6686_v34  ;;  %v6933_v16 = vadd.f32 %v6932_v11, %v6870_v0  ;;  %v6871_v20 = vmul.f32 %v6800_v62, %v16531_v38 }
 0x59e   :  { %v9800_v58 = vpop.eup %9799 }
 0x59f   :  { %v6804_v5 = vmul.f32 0.6931472, %v9800_v58  ;;  %v6872_v50 = vmul.f32 %v6802_v47, %v16533_v48  ;;  %v6934_v46 = vadd.f32 %v6933_v16, %v6871_v20 }
 0x5a1   :  { %v9802_v61 = vpop.eup %9801  ;;  %v6873_v44 = vmul.f32 %v6804_v5, %v16535_v60  ;;  %v6935_v53 = vadd.f32 %v6934_v46, %v6872_v50 }
 0x5a2   :  { %v9804_v52 = vpop.eup %9803  ;;  %v6806_v15 = vmul.f32 0.6931472, %v9802_v61 }
 0x5a3   :  { %v9806_v3 = vpop.eup %9805  ;;  %v6808_v29 = vmul.f32 0.6931472, %v9804_v52  ;;  %v6936_v25 = vadd.f32 %v6935_v53, %v6873_v44 }
 0x5a4   :  { %v6810_v8 = vmul.f32 0.6931472, %v9806_v3  ;;  %v6874_v1 = vmul.f32 %v6806_v15, %v16537_v19 }
 0x5a5   :  { %v6875_v10 = vmul.f32 %v6808_v29, %v16540_v41 }
 0x5a6   :  { %v9808_v13 = vpop.eup %9807  ;;  %v6937_v38 = vadd.f32 %v6936_v25, %v6874_v1  ;;  %v6876_v21 = vmul.f32 %v6810_v8, %v16541_v36 }
 0x5a7   :  { %v9810_v31 = vpop.eup %9809  ;;  %v6812_v26 = vmul.f32 0.6931472, %v9808_v13 }
 0x5a8   :  { %v6814_v48 = vmul.f32 0.6931472, %v9810_v31  ;;  %v6938_v43 = vadd.f32 %v6937_v38, %v6875_v10 }
 0x5a9   :  { %v6877_v22 = vmul.f32 %v6812_v26, %v16543_v14 }
 0x5aa   :  { %v6939_v60 = vadd.f32 %v6938_v43, %v6876_v21  ;;  %v6878_v35 = vmul.f32 %v6814_v48, %v16545_v30 }
 0x5ac   :  { %v6940_v56 = vadd.f32 %v6939_v60, %v6877_v22 }
 0x5ae   :  { %v6941_v33 = vadd.f32 %v6940_v56, %v6878_v35 }
 0x5b0   :  { %6942 = vadd.xlane.f32.xlu1 %v6941_v33 }
 0x63d   :  { %v6943_v19 = vpop.xlane.xlu1 %6942 }
 0x63e   :  { %v6944_v45 = vrot.slane %v6943_v19, 4 }
 0x640   :  { %v6945_v32 = vadd.f32 %v6944_v45, %v6943_v19 }
 0x642   :  { %v6946_v7 = vrot.slane %v6945_v32, 2 }
 0x644   :  { %v6947_v41 = vadd.f32 %v6946_v7, %v6945_v32 }
 0x646   :  { %v6948_v24 = vrot.slane %v6947_v41, 1 }
 0x648   :  { %v6949_v6 = vadd.f32 %v6948_v24, %v6947_v41 }
 0x64a   :  { %9544 = vpush %v6949_v6 }
 0x67b   :  { %s9545_s4 = spop %9544 }
 0x67c   :  { %v6951_v42 = vstv %s9545_s4 }
 0x67d   :  { %9811 = vtanh.f32 %v6951_v42 }
 0x687   :  { %v9812_v17 = vpop.eup %9811 }
 0x688   :  { %9546 = vpush %v9812_v17 }
 0x6b9   :  { %s9547_s7 = spop %9546 }
 0x6ba   :  { %s6954_s8 = ssub.f32 1.0, %s9547_s7 }
 0x6bc   :  { %v6955_v36 = vstv %s6954_s8 }
 0x6bd   :  { %6957 = vst.msk [vmem:[#allocation8] sm:$0x1] %vm6956_vm5, %v6955_v36 }
 0x6be   :  { %9868 = shalt.err (!%p9865_p6)
}
 0x6bf   :  { %s9869_s13 = scalar_lea.hbm %s15548_s2, 16 }
 0x6c0   :  { %p9870_p7 = scmp.ne.s32.totalorder %s15548_s2, %s9869_s13  ;;  %p9873_p8 = scmp.lt.u32.totalorder %s9869_s13, %s15548_s2 }
 0x6c2   :  { %p9875_p9 = pnand %p9873_p8, %p9870_p7 }
 0x6c4   :  { %9878 = shalt.err (!%p9875_p9)
}
 0x6c5   :  { %6967 = dma.vmem_to_hbm [thread:$0]  %s6965_s6, 16, %s15548_s2, [#allocation5]  }
 0x6c6   :  { %9883 = dma.done.wait [#allocation5], 16  }
 0x6c7   :  { %9884 = vsyncadd [#allocation5], 4294967280 }
 0x6c8   :  { %6971 = vsyncpa [#allocation4], 1 }
 0x6c9   :  { %6972 = vsyncpa [#allocation7], 1 }
 0x6ca   :  { %6973 = vsyncpa [#allocation5], 1 }

</bundles_post_ra>
